<compile_context>
chip_gen: v7x
topology: tpu7x:2x2x1
jax: 0.10.0
libtpu: 0.0.40
codegen_flags: <defaults>
</compile_context>

<pallas_src>
import functools
import math

import jax
import jax.numpy as jnp
from jax.experimental import pallas as pl
from jax.experimental.pallas import tpu as pltpu


def _round_up(x, m):
    return (x + m - 1) // m * m


def _reflect_pad_2d(x, h, w, p):
    """ReflectionPad2d(p) of an (h, w) value, built from static slices."""
    if p == 0:
        return x
    # rows: padded row i (i<p) = original row p-i; padded row p+h+i = row h-2-i
    top = [x[p - i:p - i + 1, :] for i in range(p)]
    bot = [x[h - 2 - i:h - 1 - i, :] for i in range(p)]
    x = jnp.concatenate(top + [x] + bot, axis=0)              # (h+2p, w)
    # cols (taken from the row-padded array -> corners reflect both ways)
    left = [x[:, p - j:p - j + 1] for j in range(p)]
    right = [x[:, w - 2 - j:w - 1 - j] for j in range(p)]
    return jnp.concatenate(left + [x] + right, axis=1)        # (h+2p, w+2p)


def _make_fused_kernel(*, c_img, c_in, c_out, k, d, p, H, W,
                       has_code, has_shift, out_dtype):
    """out = shift(code + conv_enc(data - conv_dec(code))), fully fused."""
    f32 = jnp.float32

    def _conv_accumulate(src_plane, n_dst, w_ref, widx, acc_ref):
        # acc_ref[o] += sum_{kh,kw} w[o, src, kh, kw] * tap(kh, kw)  for all o
        padded = _reflect_pad_2d(src_plane, H, W, p)
        # hoist the lane-dim (kw) shift: one cross-lane slice per kw, reused
        # by every kh and every output channel.
        shifted = [padded[:, kw * d: kw * d + W] for kw in range(k)]
        for o in range(n_dst):
            acc = acc_ref[o]
            for kw in range(k):
                for kh in range(k):
                    tap = shifted[kw][kh * d: kh * d + H, :]
                    acc = acc + w_ref[widx(o, kh, kw)] * tap
            acc_ref[o] = acc

    def kernel(*refs):
        it = iter(refs)
        data_ref = next(it)
        code_ref = next(it) if has_code else None
        wdec_ref = next(it) if has_code else None   # pre-negated in wrapper
        wenc_ref = next(it)                         # 1x1 shift already folded in
        wshift_ref = next(it) if has_shift else None
        bias_ref = next(it) if has_shift else None
        out_ref = next(it)
        res_ref = next(it)      # VMEM scratch (c_img, H, W) f32
        oacc_ref = next(it)     # VMEM scratch (c_out, H, W) f32

        # ---- residual: res = data - conv_dec(code)  (w_dec pre-negated) ----
        for o in range(c_img):
            res_ref[o] = data_ref[0, o].astype(f32)
        if has_code:
            for ci in range(c_in):
                _conv_accumulate(
                    code_ref[0, ci].astype(f32), c_img, wdec_ref,
                    lambda o, kh, kw, ci=ci: ((o * c_in + ci) * k + kh) * k + kw,
                    res_ref)

        # ---- output init: folded 1x1 shift of `code` + bias (or plain code) ----
        if has_code:
            code_planes = [code_ref[0, ci].astype(f32) for ci in range(c_in)]
        for o in range(c_out):
            if has_shift:
                if has_code:
                    a = wshift_ref[o * c_in] * code_planes[0]
                    for ci in range(1, c_in):
                        a = a + wshift_ref[o * c_in + ci] * code_planes[ci]
                    a = a + bias_ref[o]
                else:
                    a = jnp.zeros((H, W), f32) + bias_ref[o]
            else:
                a = code_planes[o] if has_code else jnp.zeros((H, W), f32)
            oacc_ref[o] = a

        # ---- out += conv_enc_folded(res)  (residual padded in-kernel) ----
        for cm in range(c_img):
            _conv_accumulate(
                res_ref[cm], c_out, wenc_ref,
                lambda o, kh, kw, cm=cm: ((o * c_img + cm) * k + kh) * k + kw,
                oacc_ref)

        # ---- final store ----
        for o in range(c_out):
            out_ref[0, o] = oacc_ref[o].astype(out_dtype)

    return kernel


@functools.partial(jax.jit,
                   static_argnames=("kernel_size", "dilation", "storage_dtype"))
def dict_conv2d_forward(data, code, w_dec, w_enc, w_shift=None, b_shift=None,
                        *, kernel_size=3, dilation=1,
                        storage_dtype=jnp.float32):
    """DictConv2d.forward.  data/code/output are NCHW (PyTorch convention)."""
    B, c_img, H, W = data.shape
    c_in = w_dec.shape[1]                 # w_dec: (c_img, c_in, k, k)  [OIHW]
    k, d = kernel_size, dilation
    eff = 1 + d * (k - 1)
    if eff % 2 == 0:
        raise NotImplementedError(
            "even effective kernel size -> PyTorch F.interpolate branch is "
            "not implemented")
    p = eff // 2                          # 'same' padding

    has_code = code is not None
    has_shift = w_shift is not None
    sdt = jnp.dtype(storage_dtype)

    data = data.astype(sdt)
    w_dec = w_dec.astype(jnp.float32)
    w_enc = w_enc.astype(jnp.float32)

    if has_shift:
        w_shift = w_shift.astype(jnp.float32)
        c_out = w_shift.shape[0]
        if b_shift is None:
            b_shift = jnp.zeros((c_out,), jnp.float32)
        b_shift = b_shift.astype(jnp.float32)
        # Fold the 1x1 channel-shift conv into the encoder conv weights:
        #   wencf[o, cm, kh, kw] = sum_ci w_shift[o, ci] * w_enc[ci, cm, kh, kw]
        w_encf = jnp.einsum("oc,cmxy->omxy", w_shift, w_enc)
    else:
        c_out = c_in
        w_encf = w_enc

    kernel = _make_fused_kernel(c_img=c_img, c_in=c_in, c_out=c_out, k=k, d=d,
                                p=p, H=H, W=W, has_code=has_code,
                                has_shift=has_shift, out_dtype=sdt)

    operands = [data]
    in_specs = [pl.BlockSpec((1, c_img, H, W), lambda b: (b, 0, 0, 0))]
    if has_code:
        operands.append(code.astype(sdt))
        in_specs.append(pl.BlockSpec((1, c_in, H, W), lambda b: (b, 0, 0, 0)))
        # decoder weights pre-negated so the kernel only accumulates adds
        operands.append((-w_dec).reshape(-1))
        in_specs.append(pl.BlockSpec(memory_space=pltpu.MemorySpace.SMEM))
    operands.append(w_encf.reshape(-1))
    in_specs.append(pl.BlockSpec(memory_space=pltpu.MemorySpace.SMEM))
    if has_shift:
        operands.append(w_shift.reshape(-1))
        in_specs.append(pl.BlockSpec(memory_space=pltpu.MemorySpace.SMEM))
        operands.append(b_shift.reshape(-1))
        in_specs.append(pl.BlockSpec(memory_space=pltpu.MemorySpace.SMEM))

    # VMEM budget: double-buffered I/O blocks + f32 accumulation scratch,
    # plus headroom for in-kernel padded / shifted temporaries.
    plane_io = _round_up(H, 16) * _round_up(W, 128) * sdt.itemsize
    plane_f32 = _round_up(H, 8) * _round_up(W, 128) * 4
    n_io_planes = c_img + (c_in if has_code else 0) + c_out
    vmem_need = (2 * n_io_planes * max(plane_io, plane_f32)
                 + (c_img + c_out) * plane_f32
                 + 8 * 1024 * 1024)
    vmem_limit = int(min(max(vmem_need, 32 * 1024 * 1024), 112 * 1024 * 1024))

    grid_spec = pltpu.PrefetchScalarGridSpec(
        num_scalar_prefetch=0,
        grid=(B,),
        in_specs=in_specs,
        out_specs=pl.BlockSpec((1, c_out, H, W), lambda b: (b, 0, 0, 0)),
        scratch_shapes=[pltpu.VMEM((c_img, H, W), jnp.float32),
                        pltpu.VMEM((c_out, H, W), jnp.float32)],
    )
    return pl.pallas_call(
        kernel,
        out_shape=jax.ShapeDtypeStruct((B, c_out, H, W), sdt),
        grid_spec=grid_spec,
        compiler_params=pltpu.CompilerParams(
            dimension_semantics=("parallel",),
            vmem_limit_bytes=vmem_limit),
    )(*operands)


# ------------------------- pure-JAX reference -----------------------------

def _reference_forward(data, code, w_dec, w_enc, w_shift, b_shift, k, d):
    p = int((1 + d * (k - 1)) // 2)

    def conv(x, w):
        xp = jnp.pad(x, ((0, 0), (0, 0), (p, p), (p, p)), mode="reflect")
        return jax.lax.conv_general_dilated(
            xp, w, (1, 1), "VALID", rhs_dilation=(d, d),
            dimension_numbers=("NCHW", "OIHW", "NCHW"))

    res = data - conv(code, w_dec)
    new_code = code + conv(res, w_enc)
    if w_shift is None:
        return new_code
    out = jnp.einsum("oc,bchw->bohw", w_shift, new_code)
    return out + b_shift[None, :, None, None]


# --------------------------------- main ------------------------------------

if __name__ == "__main__":
    B, Cimg, Cin, Cout, H, W, k, d = 2, 3, 4, 6, 16, 16, 3, 1

    key = jax.random.PRNGKey(0)
    kd_, ke_, ks_, kb_, kdat, kcod = jax.random.split(key, 6)

    # deterministic "synthetic checkpoint" (uniform, ~kaiming scale)
    w_dec = jax.random.uniform(kd_, (Cimg, Cin, k, k), jnp.float32, -1.0, 1.0) \
        / math.sqrt(Cin * k * k)
    w_enc = jax.random.uniform(ke_, (Cin, Cimg, k, k), jnp.float32, -1.0, 1.0) \
        / math.sqrt(Cimg * k * k)
    w_shift = jax.random.uniform(ks_, (Cout, Cin), jnp.float32, -1.0, 1.0) \
        / math.sqrt(Cin)
    b_shift = jax.random.uniform(kb_, (Cout,), jnp.float32, -1.0, 1.0) \
        / math.sqrt(Cin)

    data = jax.random.normal(kdat, (B, Cimg, H, W), jnp.float32)
    code = jax.random.normal(kcod, (B, Cin, H, W), jnp.float32)

    # 1) shift_flag == True path (out_channels != in_channels)
    out = jax.block_until_ready(
        dict_conv2d_forward(data, code, w_dec, w_enc, w_shift, b_shift,
                            kernel_size=k, dilation=d))
    ref = _reference_forward(data, code, w_dec, w_enc, w_shift, b_shift, k, d)
    assert out.shape == (B, Cout, H, W), out.shape
    assert jnp.allclose(out, ref, atol=1e-4, rtol=1e-4), \
        float(jnp.max(jnp.abs(out - ref)))

    # 2) shift_flag == False path (out_channels == in_channels)
    out2 = jax.block_until_ready(
        dict_conv2d_forward(data, code, w_dec, w_enc, None, None,
                            kernel_size=k, dilation=d))
    ref2 = _reference_forward(data, code, w_dec, w_enc, None, None, k, d)
    assert out2.shape == (B, Cin, H, W), out2.shape
    assert jnp.allclose(out2, ref2, atol=1e-4, rtol=1e-4), \
        float(jnp.max(jnp.abs(out2 - ref2)))

    # 3) code is None cold-start fast path (decoder conv + code read skipped)
    out3 = jax.block_until_ready(
        dict_conv2d_forward(data, None, w_dec, w_enc, w_shift, b_shift,
                            kernel_size=k, dilation=d))
    ref3 = _reference_forward(data, jnp.zeros((B, Cin, H, W), jnp.float32),
                              w_dec, w_enc, w_shift, b_shift, k, d)
    assert out3.shape == (B, Cout, H, W), out3.shape
    assert jnp.allclose(out3, ref3, atol=1e-4, rtol=1e-4), \
        float(jnp.max(jnp.abs(out3 - ref3)))

    print("KERNEL_OK")
</pallas_src>

<mosaic_0001>
module attributes {stable_mosaic.version = 11 : i64} {
  func.func @kernel(%arg0: i32, %arg1: memref<1x3x16x16xf32, #tpu.memory_space<vmem>>, %arg2: memref<1x4x16x16xf32, #tpu.memory_space<vmem>>, %arg3: memref<108xf32, #tpu.memory_space<smem>>, %arg4: memref<162xf32, #tpu.memory_space<smem>>, %arg5: memref<24xf32, #tpu.memory_space<smem>>, %arg6: memref<6xf32, #tpu.memory_space<smem>>, %arg7: memref<1x6x16x16xf32, #tpu.memory_space<vmem>>, %arg8: memref<3x16x16xf32, #tpu.memory_space<vmem>>, %arg9: memref<6x16x16xf32, #tpu.memory_space<vmem>>) attributes {dimension_semantics = [#tpu.dimension_semantics<parallel>], iteration_bounds = array<i64: 2>, scalar_prefetch = 0 : i64, scratch_operands = 2 : i64, tpu.core_type = #tpu.core_type<tc>, window_params = [{transform_indices = @transform_0, window_bounds = array<i64: 1, 3, 16, 16>}, {transform_indices = @transform_1, window_bounds = array<i64: 1, 4, 16, 16>}, {transform_indices = @transform_2, window_bounds = array<i64: 108>}, {transform_indices = @transform_3, window_bounds = array<i64: 162>}, {transform_indices = @transform_4, window_bounds = array<i64: 24>}, {transform_indices = @transform_5, window_bounds = array<i64: 6>}, {transform_indices = @transform_6, window_bounds = array<i64: 1, 6, 16, 16>}]} {
    %c0 = arith.constant 0 : index
    %c0_0 = arith.constant 0 : index
    %c0_1 = arith.constant 0 : index
    %c0_2 = arith.constant 0 : index
    %0 = vector.load %arg1[%c0, %c0_0, %c0_1, %c0_2] : memref<1x3x16x16xf32, #tpu.memory_space<vmem>>, vector<1x1x16x16xf32>
    %1 = vector.shape_cast %0 : vector<1x1x16x16xf32> to vector<16x16xf32>
    %c0_3 = arith.constant 0 : index
    %c0_4 = arith.constant 0 : index
    %c0_5 = arith.constant 0 : index
    %2 = vector.load %arg8[%c0_3, %c0_4, %c0_5] : memref<3x16x16xf32, #tpu.memory_space<vmem>>, vector<1x16x16xf32>
    %3 = vector.shape_cast %2 : vector<1x16x16xf32> to vector<16x16xf32>
    %4 = vector.shape_cast %1 : vector<16x16xf32> to vector<1x16x16xf32>
    tpu.vector_store %arg8[%c0_3, %c0_4, %c0_5], %4 {strides = array<i32>} : memref<3x16x16xf32, #tpu.memory_space<vmem>>, vector<1x16x16xf32>,
    %c0_6 = arith.constant 0 : index
    %c1 = arith.constant 1 : index
    %c0_7 = arith.constant 0 : index
    %c0_8 = arith.constant 0 : index
    %5 = vector.load %arg1[%c0_6, %c1, %c0_7, %c0_8] : memref<1x3x16x16xf32, #tpu.memory_space<vmem>>, vector<1x1x16x16xf32>
    %6 = vector.shape_cast %5 : vector<1x1x16x16xf32> to vector<16x16xf32>
    %c1_9 = arith.constant 1 : index
    %c0_10 = arith.constant 0 : index
    %c0_11 = arith.constant 0 : index
    %7 = vector.load %arg8[%c1_9, %c0_10, %c0_11] : memref<3x16x16xf32, #tpu.memory_space<vmem>>, vector<1x16x16xf32>
    %8 = vector.shape_cast %7 : vector<1x16x16xf32> to vector<16x16xf32>
    %9 = vector.shape_cast %6 : vector<16x16xf32> to vector<1x16x16xf32>
    tpu.vector_store %arg8[%c1_9, %c0_10, %c0_11], %9 {strides = array<i32>} : memref<3x16x16xf32, #tpu.memory_space<vmem>>, vector<1x16x16xf32>,
    %c0_12 = arith.constant 0 : index
    %c2 = arith.constant 2 : index
    %c0_13 = arith.constant 0 : index
    %c0_14 = arith.constant 0 : index
    %10 = vector.load %arg1[%c0_12, %c2, %c0_13, %c0_14] : memref<1x3x16x16xf32, #tpu.memory_space<vmem>>, vector<1x1x16x16xf32>
    %11 = vector.shape_cast %10 : vector<1x1x16x16xf32> to vector<16x16xf32>
    %c2_15 = arith.constant 2 : index
    %c0_16 = arith.constant 0 : index
    %c0_17 = arith.constant 0 : index
    %12 = vector.load %arg8[%c2_15, %c0_16, %c0_17] : memref<3x16x16xf32, #tpu.memory_space<vmem>>, vector<1x16x16xf32>
    %13 = vector.shape_cast %12 : vector<1x16x16xf32> to vector<16x16xf32>
    %14 = vector.shape_cast %11 : vector<16x16xf32> to vector<1x16x16xf32>
    tpu.vector_store %arg8[%c2_15, %c0_16, %c0_17], %14 {strides = array<i32>} : memref<3x16x16xf32, #tpu.memory_space<vmem>>, vector<1x16x16xf32>,
    %c0_18 = arith.constant 0 : index
    %c0_19 = arith.constant 0 : index
    %c0_20 = arith.constant 0 : index
    %c0_21 = arith.constant 0 : index
    %15 = vector.load %arg2[%c0_18, %c0_19, %c0_20, %c0_21] : memref<1x4x16x16xf32, #tpu.memory_space<vmem>>, vector<1x1x16x16xf32>
    %16 = vector.shape_cast %15 : vector<1x1x16x16xf32> to vector<16x16xf32>
    %17 = vector.extract_strided_slice %16 {offsets = [1, 0], sizes = [1, 16], strides = [1, 1]} : vector<16x16xf32> to vector<1x16xf32>
    %18 = vector.extract_strided_slice %16 {offsets = [14, 0], sizes = [1, 16], strides = [1, 1]} : vector<16x16xf32> to vector<1x16xf32>
    %19 = tpu.concatenate %17, %16, %18 in 0 : vector<1x16xf32>, vector<16x16xf32>, vector<1x16xf32> -> vector<18x16xf32>
    %20 = vector.extract_strided_slice %19 {offsets = [0, 1], sizes = [18, 1], strides = [1, 1]} : vector<18x16xf32> to vector<18x1xf32>
    %21 = vector.extract_strided_slice %19 {offsets = [0, 14], sizes = [18, 1], strides = [1, 1]} : vector<18x16xf32> to vector<18x1xf32>
    %22 = tpu.concatenate %20, %19, %21 in 1 : vector<18x1xf32>, vector<18x16xf32>, vector<18x1xf32> -> vector<18x18xf32>
    %23 = vector.extract_strided_slice %22 {offsets = [0, 0], sizes = [18, 16], strides = [1, 1]} : vector<18x18xf32> to vector<18x16xf32>
    %24 = vector.extract_strided_slice %22 {offsets = [0, 1], sizes = [18, 16], strides = [1, 1]} : vector<18x18xf32> to vector<18x16xf32>
    %25 = vector.extract_strided_slice %22 {offsets = [0, 2], sizes = [18, 16], strides = [1, 1]} : vector<18x18xf32> to vector<18x16xf32>
    %c0_22 = arith.constant 0 : index
    %c0_23 = arith.constant 0 : index
    %c0_24 = arith.constant 0 : index
    %26 = vector.load %arg8[%c0_22, %c0_23, %c0_24] : memref<3x16x16xf32, #tpu.memory_space<vmem>>, vector<1x16x16xf32>
    %27 = vector.shape_cast %26 : vector<1x16x16xf32> to vector<16x16xf32>
    %28 = vector.extract_strided_slice %23 {offsets = [0, 0], sizes = [16, 16], strides = [1, 1]} : vector<18x16xf32> to vector<16x16xf32>
    %c0_25 = arith.constant 0 : index
    %29 = memref.load %arg3[%c0_25] : memref<108xf32, #tpu.memory_space<smem>>
    %30 = vector.broadcast %29 : f32 to vector<16x16xf32>
    %31 = arith.mulf %30, %28 : vector<16x16xf32>
    %32 = arith.addf %27, %31 : vector<16x16xf32>
    %33 = vector.extract_strided_slice %23 {offsets = [1, 0], sizes = [16, 16], strides = [1, 1]} : vector<18x16xf32> to vector<16x16xf32>
    %c3 = arith.constant 3 : index
    %34 = memref.load %arg3[%c3] : memref<108xf32, #tpu.memory_space<smem>>
    %35 = vector.broadcast %34 : f32 to vector<16x16xf32>
    %36 = arith.mulf %35, %33 : vector<16x16xf32>
    %37 = arith.addf %32, %36 : vector<16x16xf32>
    %38 = vector.extract_strided_slice %23 {offsets = [2, 0], sizes = [16, 16], strides = [1, 1]} : vector<18x16xf32> to vector<16x16xf32>
    %c6 = arith.constant 6 : index
    %39 = memref.load %arg3[%c6] : memref<108xf32, #tpu.memory_space<smem>>
    %40 = vector.broadcast %39 : f32 to vector<16x16xf32>
    %41 = arith.mulf %40, %38 : vector<16x16xf32>
    %42 = arith.addf %37, %41 : vector<16x16xf32>
    %43 = vector.extract_strided_slice %24 {offsets = [0, 0], sizes = [16, 16], strides = [1, 1]} : vector<18x16xf32> to vector<16x16xf32>
    %c1_26 = arith.constant 1 : index
    %44 = memref.load %arg3[%c1_26] : memref<108xf32, #tpu.memory_space<smem>>
    %45 = vector.broadcast %44 : f32 to vector<16x16xf32>
    %46 = arith.mulf %45, %43 : vector<16x16xf32>
    %47 = arith.addf %42, %46 : vector<16x16xf32>
    %48 = vector.extract_strided_slice %24 {offsets = [1, 0], sizes = [16, 16], strides = [1, 1]} : vector<18x16xf32> to vector<16x16xf32>
    %c4 = arith.constant 4 : index
    %49 = memref.load %arg3[%c4] : memref<108xf32, #tpu.memory_space<smem>>
    %50 = vector.broadcast %49 : f32 to vector<16x16xf32>
    %51 = arith.mulf %50, %48 : vector<16x16xf32>
    %52 = arith.addf %47, %51 : vector<16x16xf32>
    %53 = vector.extract_strided_slice %24 {offsets = [2, 0], sizes = [16, 16], strides = [1, 1]} : vector<18x16xf32> to vector<16x16xf32>
    %c7 = arith.constant 7 : index
    %54 = memref.load %arg3[%c7] : memref<108xf32, #tpu.memory_space<smem>>
    %55 = vector.broadcast %54 : f32 to vector<16x16xf32>
    %56 = arith.mulf %55, %53 : vector<16x16xf32>
    %57 = arith.addf %52, %56 : vector<16x16xf32>
    %58 = vector.extract_strided_slice %25 {offsets = [0, 0], sizes = [16, 16], strides = [1, 1]} : vector<18x16xf32> to vector<16x16xf32>
    %c2_27 = arith.constant 2 : index
    %59 = memref.load %arg3[%c2_27] : memref<108xf32, #tpu.memory_space<smem>>
    %60 = vector.broadcast %59 : f32 to vector<16x16xf32>
    %61 = arith.mulf %60, %58 : vector<16x16xf32>
    %62 = arith.addf %57, %61 : vector<16x16xf32>
    %63 = vector.extract_strided_slice %25 {offsets = [1, 0], sizes = [16, 16], strides = [1, 1]} : vector<18x16xf32> to vector<16x16xf32>
    %c5 = arith.constant 5 : index
    %64 = memref.load %arg3[%c5] : memref<108xf32, #tpu.memory_space<smem>>
    %65 = vector.broadcast %64 : f32 to vector<16x16xf32>
    %66 = arith.mulf %65, %63 : vector<16x16xf32>
    %67 = arith.addf %62, %66 : vector<16x16xf32>
    %68 = vector.extract_strided_slice %25 {offsets = [2, 0], sizes = [16, 16], strides = [1, 1]} : vector<18x16xf32> to vector<16x16xf32>
    %c8 = arith.constant 8 : index
    %69 = memref.load %arg3[%c8] : memref<108xf32, #tpu.memory_space<smem>>
    %70 = vector.broadcast %69 : f32 to vector<16x16xf32>
    %71 = arith.mulf %70, %68 : vector<16x16xf32>
    %72 = arith.addf %67, %71 : vector<16x16xf32>
    %c0_28 = arith.constant 0 : index
    %c0_29 = arith.constant 0 : index
    %c0_30 = arith.constant 0 : index
    %73 = vector.load %arg8[%c0_28, %c0_29, %c0_30] : memref<3x16x16xf32, #tpu.memory_space<vmem>>, vector<1x16x16xf32>
    %74 = vector.shape_cast %73 : vector<1x16x16xf32> to vector<16x16xf32>
    %75 = vector.shape_cast %72 : vector<16x16xf32> to vector<1x16x16xf32>
    tpu.vector_store %arg8[%c0_28, %c0_29, %c0_30], %75 {strides = array<i32>} : memref<3x16x16xf32, #tpu.memory_space<vmem>>, vector<1x16x16xf32>,
    %c1_31 = arith.constant 1 : index
    %c0_32 = arith.constant 0 : index
    %c0_33 = arith.constant 0 : index
    %76 = vector.load %arg8[%c1_31, %c0_32, %c0_33] : memref<3x16x16xf32, #tpu.memory_space<vmem>>, vector<1x16x16xf32>
    %77 = vector.shape_cast %76 : vector<1x16x16xf32> to vector<16x16xf32>
    %78 = vector.extract_strided_slice %23 {offsets = [0, 0], sizes = [16, 16], strides = [1, 1]} : vector<18x16xf32> to vector<16x16xf32>
    %c36 = arith.constant 36 : index
    %79 = memref.load %arg3[%c36] : memref<108xf32, #tpu.memory_space<smem>>
    %80 = vector.broadcast %79 : f32 to vector<16x16xf32>
    %81 = arith.mulf %80, %78 : vector<16x16xf32>
    %82 = arith.addf %77, %81 : vector<16x16xf32>
    %83 = vector.extract_strided_slice %23 {offsets = [1, 0], sizes = [16, 16], strides = [1, 1]} : vector<18x16xf32> to vector<16x16xf32>
    %c39 = arith.constant 39 : index
    %84 = memref.load %arg3[%c39] : memref<108xf32, #tpu.memory_space<smem>>
    %85 = vector.broadcast %84 : f32 to vector<16x16xf32>
    %86 = arith.mulf %85, %83 : vector<16x16xf32>
    %87 = arith.addf %82, %86 : vector<16x16xf32>
    %88 = vector.extract_strided_slice %23 {offsets = [2, 0], sizes = [16, 16], strides = [1, 1]} : vector<18x16xf32> to vector<16x16xf32>
    %c42 = arith.constant 42 : index
    %89 = memref.load %arg3[%c42] : memref<108xf32, #tpu.memory_space<smem>>
    %90 = vector.broadcast %89 : f32 to vector<16x16xf32>
    %91 = arith.mulf %90, %88 : vector<16x16xf32>
    %92 = arith.addf %87, %91 : vector<16x16xf32>
    %93 = vector.extract_strided_slice %24 {offsets = [0, 0], sizes = [16, 16], strides = [1, 1]} : vector<18x16xf32> to vector<16x16xf32>
    %c37 = arith.constant 37 : index
    %94 = memref.load %arg3[%c37] : memref<108xf32, #tpu.memory_space<smem>>
    %95 = vector.broadcast %94 : f32 to vector<16x16xf32>
    %96 = arith.mulf %95, %93 : vector<16x16xf32>
    %97 = arith.addf %92, %96 : vector<16x16xf32>
    %98 = vector.extract_strided_slice %24 {offsets = [1, 0], sizes = [16, 16], strides = [1, 1]} : vector<18x16xf32> to vector<16x16xf32>
    %c40 = arith.constant 40 : index
    %99 = memref.load %arg3[%c40] : memref<108xf32, #tpu.memory_space<smem>>
    %100 = vector.broadcast %99 : f32 to vector<16x16xf32>
    %101 = arith.mulf %100, %98 : vector<16x16xf32>
    %102 = arith.addf %97, %101 : vector<16x16xf32>
    %103 = vector.extract_strided_slice %24 {offsets = [2, 0], sizes = [16, 16], strides = [1, 1]} : vector<18x16xf32> to vector<16x16xf32>
    %c43 = arith.constant 43 : index
    %104 = memref.load %arg3[%c43] : memref<108xf32, #tpu.memory_space<smem>>
    %105 = vector.broadcast %104 : f32 to vector<16x16xf32>
    %106 = arith.mulf %105, %103 : vector<16x16xf32>
    %107 = arith.addf %102, %106 : vector<16x16xf32>
    %108 = vector.extract_strided_slice %25 {offsets = [0, 0], sizes = [16, 16], strides = [1, 1]} : vector<18x16xf32> to vector<16x16xf32>
    %c38 = arith.constant 38 : index
    %109 = memref.load %arg3[%c38] : memref<108xf32, #tpu.memory_space<smem>>
    %110 = vector.broadcast %109 : f32 to vector<16x16xf32>
    %111 = arith.mulf %110, %108 : vector<16x16xf32>
    %112 = arith.addf %107, %111 : vector<16x16xf32>
    %113 = vector.extract_strided_slice %25 {offsets = [1, 0], sizes = [16, 16], strides = [1, 1]} : vector<18x16xf32> to vector<16x16xf32>
    %c41 = arith.constant 41 : index
    %114 = memref.load %arg3[%c41] : memref<108xf32, #tpu.memory_space<smem>>
    %115 = vector.broadcast %114 : f32 to vector<16x16xf32>
    %116 = arith.mulf %115, %113 : vector<16x16xf32>
    %117 = arith.addf %112, %116 : vector<16x16xf32>
    %118 = vector.extract_strided_slice %25 {offsets = [2, 0], sizes = [16, 16], strides = [1, 1]} : vector<18x16xf32> to vector<16x16xf32>
    %c44 = arith.constant 44 : index
    %119 = memref.load %arg3[%c44] : memref<108xf32, #tpu.memory_space<smem>>
    %120 = vector.broadcast %119 : f32 to vector<16x16xf32>
    %121 = arith.mulf %120, %118 : vector<16x16xf32>
    %122 = arith.addf %117, %121 : vector<16x16xf32>
    %c1_34 = arith.constant 1 : index
    %c0_35 = arith.constant 0 : index
    %c0_36 = arith.constant 0 : index
    %123 = vector.load %arg8[%c1_34, %c0_35, %c0_36] : memref<3x16x16xf32, #tpu.memory_space<vmem>>, vector<1x16x16xf32>
    %124 = vector.shape_cast %123 : vector<1x16x16xf32> to vector<16x16xf32>
    %125 = vector.shape_cast %122 : vector<16x16xf32> to vector<1x16x16xf32>
    tpu.vector_store %arg8[%c1_34, %c0_35, %c0_36], %125 {strides = array<i32>} : memref<3x16x16xf32, #tpu.memory_space<vmem>>, vector<1x16x16xf32>,
    %c2_37 = arith.constant 2 : index
    %c0_38 = arith.constant 0 : index
    %c0_39 = arith.constant 0 : index
    %126 = vector.load %arg8[%c2_37, %c0_38, %c0_39] : memref<3x16x16xf32, #tpu.memory_space<vmem>>, vector<1x16x16xf32>
    %127 = vector.shape_cast %126 : vector<1x16x16xf32> to vector<16x16xf32>
    %128 = vector.extract_strided_slice %23 {offsets = [0, 0], sizes = [16, 16], strides = [1, 1]} : vector<18x16xf32> to vector<16x16xf32>
    %c72 = arith.constant 72 : index
    %129 = memref.load %arg3[%c72] : memref<108xf32, #tpu.memory_space<smem>>
    %130 = vector.broadcast %129 : f32 to vector<16x16xf32>
    %131 = arith.mulf %130, %128 : vector<16x16xf32>
    %132 = arith.addf %127, %131 : vector<16x16xf32>
    %133 = vector.extract_strided_slice %23 {offsets = [1, 0], sizes = [16, 16], strides = [1, 1]} : vector<18x16xf32> to vector<16x16xf32>
    %c75 = arith.constant 75 : index
    %134 = memref.load %arg3[%c75] : memref<108xf32, #tpu.memory_space<smem>>
    %135 = vector.broadcast %134 : f32 to vector<16x16xf32>
    %136 = arith.mulf %135, %133 : vector<16x16xf32>
    %137 = arith.addf %132, %136 : vector<16x16xf32>
    %138 = vector.extract_strided_slice %23 {offsets = [2, 0], sizes = [16, 16], strides = [1, 1]} : vector<18x16xf32> to vector<16x16xf32>
    %c78 = arith.constant 78 : index
    %139 = memref.load %arg3[%c78] : memref<108xf32, #tpu.memory_space<smem>>
    %140 = vector.broadcast %139 : f32 to vector<16x16xf32>
    %141 = arith.mulf %140, %138 : vector<16x16xf32>
    %142 = arith.addf %137, %141 : vector<16x16xf32>
    %143 = vector.extract_strided_slice %24 {offsets = [0, 0], sizes = [16, 16], strides = [1, 1]} : vector<18x16xf32> to vector<16x16xf32>
    %c73 = arith.constant 73 : index
    %144 = memref.load %arg3[%c73] : memref<108xf32, #tpu.memory_space<smem>>
    %145 = vector.broadcast %144 : f32 to vector<16x16xf32>
    %146 = arith.mulf %145, %143 : vector<16x16xf32>
    %147 = arith.addf %142, %146 : vector<16x16xf32>
    %148 = vector.extract_strided_slice %24 {offsets = [1, 0], sizes = [16, 16], strides = [1, 1]} : vector<18x16xf32> to vector<16x16xf32>
    %c76 = arith.constant 76 : index
    %149 = memref.load %arg3[%c76] : memref<108xf32, #tpu.memory_space<smem>>
    %150 = vector.broadcast %149 : f32 to vector<16x16xf32>
    %151 = arith.mulf %150, %148 : vector<16x16xf32>
    %152 = arith.addf %147, %151 : vector<16x16xf32>
    %153 = vector.extract_strided_slice %24 {offsets = [2, 0], sizes = [16, 16], strides = [1, 1]} : vector<18x16xf32> to vector<16x16xf32>
    %c79 = arith.constant 79 : index
    %154 = memref.load %arg3[%c79] : memref<108xf32, #tpu.memory_space<smem>>
    %155 = vector.broadcast %154 : f32 to vector<16x16xf32>
    %156 = arith.mulf %155, %153 : vector<16x16xf32>
    %157 = arith.addf %152, %156 : vector<16x16xf32>
    %158 = vector.extract_strided_slice %25 {offsets = [0, 0], sizes = [16, 16], strides = [1, 1]} : vector<18x16xf32> to vector<16x16xf32>
    %c74 = arith.constant 74 : index
    %159 = memref.load %arg3[%c74] : memref<108xf32, #tpu.memory_space<smem>>
    %160 = vector.broadcast %159 : f32 to vector<16x16xf32>
    %161 = arith.mulf %160, %158 : vector<16x16xf32>
    %162 = arith.addf %157, %161 : vector<16x16xf32>
    %163 = vector.extract_strided_slice %25 {offsets = [1, 0], sizes = [16, 16], strides = [1, 1]} : vector<18x16xf32> to vector<16x16xf32>
    %c77 = arith.constant 77 : index
    %164 = memref.load %arg3[%c77] : memref<108xf32, #tpu.memory_space<smem>>
    %165 = vector.broadcast %164 : f32 to vector<16x16xf32>
    %166 = arith.mulf %165, %163 : vector<16x16xf32>
    %167 = arith.addf %162, %166 : vector<16x16xf32>
    %168 = vector.extract_strided_slice %25 {offsets = [2, 0], sizes = [16, 16], strides = [1, 1]} : vector<18x16xf32> to vector<16x16xf32>
    %c80 = arith.constant 80 : index
    %169 = memref.load %arg3[%c80] : memref<108xf32, #tpu.memory_space<smem>>
    %170 = vector.broadcast %169 : f32 to vector<16x16xf32>
    %171 = arith.mulf %170, %168 : vector<16x16xf32>
    %172 = arith.addf %167, %171 : vector<16x16xf32>
    %c2_40 = arith.constant 2 : index
    %c0_41 = arith.constant 0 : index
    %c0_42 = arith.constant 0 : index
    %173 = vector.load %arg8[%c2_40, %c0_41, %c0_42] : memref<3x16x16xf32, #tpu.memory_space<vmem>>, vector<1x16x16xf32>
    %174 = vector.shape_cast %173 : vector<1x16x16xf32> to vector<16x16xf32>
    %175 = vector.shape_cast %172 : vector<16x16xf32> to vector<1x16x16xf32>
    tpu.vector_store %arg8[%c2_40, %c0_41, %c0_42], %175 {strides = array<i32>} : memref<3x16x16xf32, #tpu.memory_space<vmem>>, vector<1x16x16xf32>,
    %c0_43 = arith.constant 0 : index
    %c1_44 = arith.constant 1 : index
    %c0_45 = arith.constant 0 : index
    %c0_46 = arith.constant 0 : index
    %176 = vector.load %arg2[%c0_43, %c1_44, %c0_45, %c0_46] : memref<1x4x16x16xf32, #tpu.memory_space<vmem>>, vector<1x1x16x16xf32>
    %177 = vector.shape_cast %176 : vector<1x1x16x16xf32> to vector<16x16xf32>
    %178 = vector.extract_strided_slice %177 {offsets = [1, 0], sizes = [1, 16], strides = [1, 1]} : vector<16x16xf32> to vector<1x16xf32>
    %179 = vector.extract_strided_slice %177 {offsets = [14, 0], sizes = [1, 16], strides = [1, 1]} : vector<16x16xf32> to vector<1x16xf32>
    %180 = tpu.concatenate %178, %177, %179 in 0 : vector<1x16xf32>, vector<16x16xf32>, vector<1x16xf32> -> vector<18x16xf32>
    %181 = vector.extract_strided_slice %180 {offsets = [0, 1], sizes = [18, 1], strides = [1, 1]} : vector<18x16xf32> to vector<18x1xf32>
    %182 = vector.extract_strided_slice %180 {offsets = [0, 14], sizes = [18, 1], strides = [1, 1]} : vector<18x16xf32> to vector<18x1xf32>
    %183 = tpu.concatenate %181, %180, %182 in 1 : vector<18x1xf32>, vector<18x16xf32>, vector<18x1xf32> -> vector<18x18xf32>
    %184 = vector.extract_strided_slice %183 {offsets = [0, 0], sizes = [18, 16], strides = [1, 1]} : vector<18x18xf32> to vector<18x16xf32>
    %185 = vector.extract_strided_slice %183 {offsets = [0, 1], sizes = [18, 16], strides = [1, 1]} : vector<18x18xf32> to vector<18x16xf32>
    %186 = vector.extract_strided_slice %183 {offsets = [0, 2], sizes = [18, 16], strides = [1, 1]} : vector<18x18xf32> to vector<18x16xf32>
    %c0_47 = arith.constant 0 : index
    %c0_48 = arith.constant 0 : index
    %c0_49 = arith.constant 0 : index
    %187 = vector.load %arg8[%c0_47, %c0_48, %c0_49] : memref<3x16x16xf32, #tpu.memory_space<vmem>>, vector<1x16x16xf32>
    %188 = vector.shape_cast %187 : vector<1x16x16xf32> to vector<16x16xf32>
    %189 = vector.extract_strided_slice %184 {offsets = [0, 0], sizes = [16, 16], strides = [1, 1]} : vector<18x16xf32> to vector<16x16xf32>
    %c9 = arith.constant 9 : index
    %190 = memref.load %arg3[%c9] : memref<108xf32, #tpu.memory_space<smem>>
    %191 = vector.broadcast %190 : f32 to vector<16x16xf32>
    %192 = arith.mulf %191, %189 : vector<16x16xf32>
    %193 = arith.addf %188, %192 : vector<16x16xf32>
    %194 = vector.extract_strided_slice %184 {offsets = [1, 0], sizes = [16, 16], strides = [1, 1]} : vector<18x16xf32> to vector<16x16xf32>
    %c12 = arith.constant 12 : index
    %195 = memref.load %arg3[%c12] : memref<108xf32, #tpu.memory_space<smem>>
    %196 = vector.broadcast %195 : f32 to vector<16x16xf32>
    %197 = arith.mulf %196, %194 : vector<16x16xf32>
    %198 = arith.addf %193, %197 : vector<16x16xf32>
    %199 = vector.extract_strided_slice %184 {offsets = [2, 0], sizes = [16, 16], strides = [1, 1]} : vector<18x16xf32> to vector<16x16xf32>
    %c15 = arith.constant 15 : index
    %200 = memref.load %arg3[%c15] : memref<108xf32, #tpu.memory_space<smem>>
    %201 = vector.broadcast %200 : f32 to vector<16x16xf32>
    %202 = arith.mulf %201, %199 : vector<16x16xf32>
    %203 = arith.addf %198, %202 : vector<16x16xf32>
    %204 = vector.extract_strided_slice %185 {offsets = [0, 0], sizes = [16, 16], strides = [1, 1]} : vector<18x16xf32> to vector<16x16xf32>
    %c10 = arith.constant 10 : index
    %205 = memref.load %arg3[%c10] : memref<108xf32, #tpu.memory_space<smem>>
    %206 = vector.broadcast %205 : f32 to vector<16x16xf32>
    %207 = arith.mulf %206, %204 : vector<16x16xf32>
    %208 = arith.addf %203, %207 : vector<16x16xf32>
    %209 = vector.extract_strided_slice %185 {offsets = [1, 0], sizes = [16, 16], strides = [1, 1]} : vector<18x16xf32> to vector<16x16xf32>
    %c13 = arith.constant 13 : index
    %210 = memref.load %arg3[%c13] : memref<108xf32, #tpu.memory_space<smem>>
    %211 = vector.broadcast %210 : f32 to vector<16x16xf32>
    %212 = arith.mulf %211, %209 : vector<16x16xf32>
    %213 = arith.addf %208, %212 : vector<16x16xf32>
    %214 = vector.extract_strided_slice %185 {offsets = [2, 0], sizes = [16, 16], strides = [1, 1]} : vector<18x16xf32> to vector<16x16xf32>
    %c16 = arith.constant 16 : index
    %215 = memref.load %arg3[%c16] : memref<108xf32, #tpu.memory_space<smem>>
    %216 = vector.broadcast %215 : f32 to vector<16x16xf32>
    %217 = arith.mulf %216, %214 : vector<16x16xf32>
    %218 = arith.addf %213, %217 : vector<16x16xf32>
    %219 = vector.extract_strided_slice %186 {offsets = [0, 0], sizes = [16, 16], strides = [1, 1]} : vector<18x16xf32> to vector<16x16xf32>
    %c11 = arith.constant 11 : index
    %220 = memref.load %arg3[%c11] : memref<108xf32, #tpu.memory_space<smem>>
    %221 = vector.broadcast %220 : f32 to vector<16x16xf32>
    %222 = arith.mulf %221, %219 : vector<16x16xf32>
    %223 = arith.addf %218, %222 : vector<16x16xf32>
    %224 = vector.extract_strided_slice %186 {offsets = [1, 0], sizes = [16, 16], strides = [1, 1]} : vector<18x16xf32> to vector<16x16xf32>
    %c14 = arith.constant 14 : index
    %225 = memref.load %arg3[%c14] : memref<108xf32, #tpu.memory_space<smem>>
    %226 = vector.broadcast %225 : f32 to vector<16x16xf32>
    %227 = arith.mulf %226, %224 : vector<16x16xf32>
    %228 = arith.addf %223, %227 : vector<16x16xf32>
    %229 = vector.extract_strided_slice %186 {offsets = [2, 0], sizes = [16, 16], strides = [1, 1]} : vector<18x16xf32> to vector<16x16xf32>
    %c17 = arith.constant 17 : index
    %230 = memref.load %arg3[%c17] : memref<108xf32, #tpu.memory_space<smem>>
    %231 = vector.broadcast %230 : f32 to vector<16x16xf32>
    %232 = arith.mulf %231, %229 : vector<16x16xf32>
    %233 = arith.addf %228, %232 : vector<16x16xf32>
    %c0_50 = arith.constant 0 : index
    %c0_51 = arith.constant 0 : index
    %c0_52 = arith.constant 0 : index
    %234 = vector.load %arg8[%c0_50, %c0_51, %c0_52] : memref<3x16x16xf32, #tpu.memory_space<vmem>>, vector<1x16x16xf32>
    %235 = vector.shape_cast %234 : vector<1x16x16xf32> to vector<16x16xf32>
    %236 = vector.shape_cast %233 : vector<16x16xf32> to vector<1x16x16xf32>
    tpu.vector_store %arg8[%c0_50, %c0_51, %c0_52], %236 {strides = array<i32>} : memref<3x16x16xf32, #tpu.memory_space<vmem>>, vector<1x16x16xf32>,
    %c1_53 = arith.constant 1 : index
    %c0_54 = arith.constant 0 : index
    %c0_55 = arith.constant 0 : index
    %237 = vector.load %arg8[%c1_53, %c0_54, %c0_55] : memref<3x16x16xf32, #tpu.memory_space<vmem>>, vector<1x16x16xf32>
    %238 = vector.shape_cast %237 : vector<1x16x16xf32> to vector<16x16xf32>
    %239 = vector.extract_strided_slice %184 {offsets = [0, 0], sizes = [16, 16], strides = [1, 1]} : vector<18x16xf32> to vector<16x16xf32>
    %c45 = arith.constant 45 : index
    %240 = memref.load %arg3[%c45] : memref<108xf32, #tpu.memory_space<smem>>
    %241 = vector.broadcast %240 : f32 to vector<16x16xf32>
    %242 = arith.mulf %241, %239 : vector<16x16xf32>
    %243 = arith.addf %238, %242 : vector<16x16xf32>
    %244 = vector.extract_strided_slice %184 {offsets = [1, 0], sizes = [16, 16], strides = [1, 1]} : vector<18x16xf32> to vector<16x16xf32>
    %c48 = arith.constant 48 : index
    %245 = memref.load %arg3[%c48] : memref<108xf32, #tpu.memory_space<smem>>
    %246 = vector.broadcast %245 : f32 to vector<16x16xf32>
    %247 = arith.mulf %246, %244 : vector<16x16xf32>
    %248 = arith.addf %243, %247 : vector<16x16xf32>
    %249 = vector.extract_strided_slice %184 {offsets = [2, 0], sizes = [16, 16], strides = [1, 1]} : vector<18x16xf32> to vector<16x16xf32>
    %c51 = arith.constant 51 : index
    %250 = memref.load %arg3[%c51] : memref<108xf32, #tpu.memory_space<smem>>
    %251 = vector.broadcast %250 : f32 to vector<16x16xf32>
    %252 = arith.mulf %251, %249 : vector<16x16xf32>
    %253 = arith.addf %248, %252 : vector<16x16xf32>
    %254 = vector.extract_strided_slice %185 {offsets = [0, 0], sizes = [16, 16], strides = [1, 1]} : vector<18x16xf32> to vector<16x16xf32>
    %c46 = arith.constant 46 : index
    %255 = memref.load %arg3[%c46] : memref<108xf32, #tpu.memory_space<smem>>
    %256 = vector.broadcast %255 : f32 to vector<16x16xf32>
    %257 = arith.mulf %256, %254 : vector<16x16xf32>
    %258 = arith.addf %253, %257 : vector<16x16xf32>
    %259 = vector.extract_strided_slice %185 {offsets = [1, 0], sizes = [16, 16], strides = [1, 1]} : vector<18x16xf32> to vector<16x16xf32>
    %c49 = arith.constant 49 : index
    %260 = memref.load %arg3[%c49] : memref<108xf32, #tpu.memory_space<smem>>
    %261 = vector.broadcast %260 : f32 to vector<16x16xf32>
    %262 = arith.mulf %261, %259 : vector<16x16xf32>
    %263 = arith.addf %258, %262 : vector<16x16xf32>
    %264 = vector.extract_strided_slice %185 {offsets = [2, 0], sizes = [16, 16], strides = [1, 1]} : vector<18x16xf32> to vector<16x16xf32>
    %c52 = arith.constant 52 : index
    %265 = memref.load %arg3[%c52] : memref<108xf32, #tpu.memory_space<smem>>
    %266 = vector.broadcast %265 : f32 to vector<16x16xf32>
    %267 = arith.mulf %266, %264 : vector<16x16xf32>
    %268 = arith.addf %263, %267 : vector<16x16xf32>
    %269 = vector.extract_strided_slice %186 {offsets = [0, 0], sizes = [16, 16], strides = [1, 1]} : vector<18x16xf32> to vector<16x16xf32>
    %c47 = arith.constant 47 : index
    %270 = memref.load %arg3[%c47] : memref<108xf32, #tpu.memory_space<smem>>
    %271 = vector.broadcast %270 : f32 to vector<16x16xf32>
    %272 = arith.mulf %271, %269 : vector<16x16xf32>
    %273 = arith.addf %268, %272 : vector<16x16xf32>
    %274 = vector.extract_strided_slice %186 {offsets = [1, 0], sizes = [16, 16], strides = [1, 1]} : vector<18x16xf32> to vector<16x16xf32>
    %c50 = arith.constant 50 : index
    %275 = memref.load %arg3[%c50] : memref<108xf32, #tpu.memory_space<smem>>
    %276 = vector.broadcast %275 : f32 to vector<16x16xf32>
    %277 = arith.mulf %276, %274 : vector<16x16xf32>
    %278 = arith.addf %273, %277 : vector<16x16xf32>
    %279 = vector.extract_strided_slice %186 {offsets = [2, 0], sizes = [16, 16], strides = [1, 1]} : vector<18x16xf32> to vector<16x16xf32>
    %c53 = arith.constant 53 : index
    %280 = memref.load %arg3[%c53] : memref<108xf32, #tpu.memory_space<smem>>
    %281 = vector.broadcast %280 : f32 to vector<16x16xf32>
    %282 = arith.mulf %281, %279 : vector<16x16xf32>
    %283 = arith.addf %278, %282 : vector<16x16xf32>
    %c1_56 = arith.constant 1 : index
    %c0_57 = arith.constant 0 : index
    %c0_58 = arith.constant 0 : index
    %284 = vector.load %arg8[%c1_56, %c0_57, %c0_58] : memref<3x16x16xf32, #tpu.memory_space<vmem>>, vector<1x16x16xf32>
    %285 = vector.shape_cast %284 : vector<1x16x16xf32> to vector<16x16xf32>
    %286 = vector.shape_cast %283 : vector<16x16xf32> to vector<1x16x16xf32>
    tpu.vector_store %arg8[%c1_56, %c0_57, %c0_58], %286 {strides = array<i32>} : memref<3x16x16xf32, #tpu.memory_space<vmem>>, vector<1x16x16xf32>,
    %c2_59 = arith.constant 2 : index
    %c0_60 = arith.constant 0 : index
    %c0_61 = arith.constant 0 : index
    %287 = vector.load %arg8[%c2_59, %c0_60, %c0_61] : memref<3x16x16xf32, #tpu.memory_space<vmem>>, vector<1x16x16xf32>
    %288 = vector.shape_cast %287 : vector<1x16x16xf32> to vector<16x16xf32>
    %289 = vector.extract_strided_slice %184 {offsets = [0, 0], sizes = [16, 16], strides = [1, 1]} : vector<18x16xf32> to vector<16x16xf32>
    %c81 = arith.constant 81 : index
    %290 = memref.load %arg3[%c81] : memref<108xf32, #tpu.memory_space<smem>>
    %291 = vector.broadcast %290 : f32 to vector<16x16xf32>
    %292 = arith.mulf %291, %289 : vector<16x16xf32>
    %293 = arith.addf %288, %292 : vector<16x16xf32>
    %294 = vector.extract_strided_slice %184 {offsets = [1, 0], sizes = [16, 16], strides = [1, 1]} : vector<18x16xf32> to vector<16x16xf32>
    %c84 = arith.constant 84 : index
    %295 = memref.load %arg3[%c84] : memref<108xf32, #tpu.memory_space<smem>>
    %296 = vector.broadcast %295 : f32 to vector<16x16xf32>
    %297 = arith.mulf %296, %294 : vector<16x16xf32>
    %298 = arith.addf %293, %297 : vector<16x16xf32>
    %299 = vector.extract_strided_slice %184 {offsets = [2, 0], sizes = [16, 16], strides = [1, 1]} : vector<18x16xf32> to vector<16x16xf32>
    %c87 = arith.constant 87 : index
    %300 = memref.load %arg3[%c87] : memref<108xf32, #tpu.memory_space<smem>>
    %301 = vector.broadcast %300 : f32 to vector<16x16xf32>
    %302 = arith.mulf %301, %299 : vector<16x16xf32>
    %303 = arith.addf %298, %302 : vector<16x16xf32>
    %304 = vector.extract_strided_slice %185 {offsets = [0, 0], sizes = [16, 16], strides = [1, 1]} : vector<18x16xf32> to vector<16x16xf32>
    %c82 = arith.constant 82 : index
    %305 = memref.load %arg3[%c82] : memref<108xf32, #tpu.memory_space<smem>>
    %306 = vector.broadcast %305 : f32 to vector<16x16xf32>
    %307 = arith.mulf %306, %304 : vector<16x16xf32>
    %308 = arith.addf %303, %307 : vector<16x16xf32>
    %309 = vector.extract_strided_slice %185 {offsets = [1, 0], sizes = [16, 16], strides = [1, 1]} : vector<18x16xf32> to vector<16x16xf32>
    %c85 = arith.constant 85 : index
    %310 = memref.load %arg3[%c85] : memref<108xf32, #tpu.memory_space<smem>>
    %311 = vector.broadcast %310 : f32 to vector<16x16xf32>
    %312 = arith.mulf %311, %309 : vector<16x16xf32>
    %313 = arith.addf %308, %312 : vector<16x16xf32>
    %314 = vector.extract_strided_slice %185 {offsets = [2, 0], sizes = [16, 16], strides = [1, 1]} : vector<18x16xf32> to vector<16x16xf32>
    %c88 = arith.constant 88 : index
    %315 = memref.load %arg3[%c88] : memref<108xf32, #tpu.memory_space<smem>>
    %316 = vector.broadcast %315 : f32 to vector<16x16xf32>
    %317 = arith.mulf %316, %314 : vector<16x16xf32>
    %318 = arith.addf %313, %317 : vector<16x16xf32>
    %319 = vector.extract_strided_slice %186 {offsets = [0, 0], sizes = [16, 16], strides = [1, 1]} : vector<18x16xf32> to vector<16x16xf32>
    %c83 = arith.constant 83 : index
    %320 = memref.load %arg3[%c83] : memref<108xf32, #tpu.memory_space<smem>>
    %321 = vector.broadcast %320 : f32 to vector<16x16xf32>
    %322 = arith.mulf %321, %319 : vector<16x16xf32>
    %323 = arith.addf %318, %322 : vector<16x16xf32>
    %324 = vector.extract_strided_slice %186 {offsets = [1, 0], sizes = [16, 16], strides = [1, 1]} : vector<18x16xf32> to vector<16x16xf32>
    %c86 = arith.constant 86 : index
    %325 = memref.load %arg3[%c86] : memref<108xf32, #tpu.memory_space<smem>>
    %326 = vector.broadcast %325 : f32 to vector<16x16xf32>
    %327 = arith.mulf %326, %324 : vector<16x16xf32>
    %328 = arith.addf %323, %327 : vector<16x16xf32>
    %329 = vector.extract_strided_slice %186 {offsets = [2, 0], sizes = [16, 16], strides = [1, 1]} : vector<18x16xf32> to vector<16x16xf32>
    %c89 = arith.constant 89 : index
    %330 = memref.load %arg3[%c89] : memref<108xf32, #tpu.memory_space<smem>>
    %331 = vector.broadcast %330 : f32 to vector<16x16xf32>
    %332 = arith.mulf %331, %329 : vector<16x16xf32>
    %333 = arith.addf %328, %332 : vector<16x16xf32>
    %c2_62 = arith.constant 2 : index
    %c0_63 = arith.constant 0 : index
    %c0_64 = arith.constant 0 : index
    %334 = vector.load %arg8[%c2_62, %c0_63, %c0_64] : memref<3x16x16xf32, #tpu.memory_space<vmem>>, vector<1x16x16xf32>
    %335 = vector.shape_cast %334 : vector<1x16x16xf32> to vector<16x16xf32>
    %336 = vector.shape_cast %333 : vector<16x16xf32> to vector<1x16x16xf32>
    tpu.vector_store %arg8[%c2_62, %c0_63, %c0_64], %336 {strides = array<i32>} : memref<3x16x16xf32, #tpu.memory_space<vmem>>, vector<1x16x16xf32>,
    %c0_65 = arith.constant 0 : index
    %c2_66 = arith.constant 2 : index
    %c0_67 = arith.constant 0 : index
    %c0_68 = arith.constant 0 : index
    %337 = vector.load %arg2[%c0_65, %c2_66, %c0_67, %c0_68] : memref<1x4x16x16xf32, #tpu.memory_space<vmem>>, vector<1x1x16x16xf32>
    %338 = vector.shape_cast %337 : vector<1x1x16x16xf32> to vector<16x16xf32>
    %339 = vector.extract_strided_slice %338 {offsets = [1, 0], sizes = [1, 16], strides = [1, 1]} : vector<16x16xf32> to vector<1x16xf32>
    %340 = vector.extract_strided_slice %338 {offsets = [14, 0], sizes = [1, 16], strides = [1, 1]} : vector<16x16xf32> to vector<1x16xf32>
    %341 = tpu.concatenate %339, %338, %340 in 0 : vector<1x16xf32>, vector<16x16xf32>, vector<1x16xf32> -> vector<18x16xf32>
    %342 = vector.extract_strided_slice %341 {offsets = [0, 1], sizes = [18, 1], strides = [1, 1]} : vector<18x16xf32> to vector<18x1xf32>
    %343 = vector.extract_strided_slice %341 {offsets = [0, 14], sizes = [18, 1], strides = [1, 1]} : vector<18x16xf32> to vector<18x1xf32>
    %344 = tpu.concatenate %342, %341, %343 in 1 : vector<18x1xf32>, vector<18x16xf32>, vector<18x1xf32> -> vector<18x18xf32>
    %345 = vector.extract_strided_slice %344 {offsets = [0, 0], sizes = [18, 16], strides = [1, 1]} : vector<18x18xf32> to vector<18x16xf32>
    %346 = vector.extract_strided_slice %344 {offsets = [0, 1], sizes = [18, 16], strides = [1, 1]} : vector<18x18xf32> to vector<18x16xf32>
    %347 = vector.extract_strided_slice %344 {offsets = [0, 2], sizes = [18, 16], strides = [1, 1]} : vector<18x18xf32> to vector<18x16xf32>
    %c0_69 = arith.constant 0 : index
    %c0_70 = arith.constant 0 : index
    %c0_71 = arith.constant 0 : index
    %348 = vector.load %arg8[%c0_69, %c0_70, %c0_71] : memref<3x16x16xf32, #tpu.memory_space<vmem>>, vector<1x16x16xf32>
    %349 = vector.shape_cast %348 : vector<1x16x16xf32> to vector<16x16xf32>
    %350 = vector.extract_strided_slice %345 {offsets = [0, 0], sizes = [16, 16], strides = [1, 1]} : vector<18x16xf32> to vector<16x16xf32>
    %c18 = arith.constant 18 : index
    %351 = memref.load %arg3[%c18] : memref<108xf32, #tpu.memory_space<smem>>
    %352 = vector.broadcast %351 : f32 to vector<16x16xf32>
    %353 = arith.mulf %352, %350 : vector<16x16xf32>
    %354 = arith.addf %349, %353 : vector<16x16xf32>
    %355 = vector.extract_strided_slice %345 {offsets = [1, 0], sizes = [16, 16], strides = [1, 1]} : vector<18x16xf32> to vector<16x16xf32>
    %c21 = arith.constant 21 : index
    %356 = memref.load %arg3[%c21] : memref<108xf32, #tpu.memory_space<smem>>
    %357 = vector.broadcast %356 : f32 to vector<16x16xf32>
    %358 = arith.mulf %357, %355 : vector<16x16xf32>
    %359 = arith.addf %354, %358 : vector<16x16xf32>
    %360 = vector.extract_strided_slice %345 {offsets = [2, 0], sizes = [16, 16], strides = [1, 1]} : vector<18x16xf32> to vector<16x16xf32>
    %c24 = arith.constant 24 : index
    %361 = memref.load %arg3[%c24] : memref<108xf32, #tpu.memory_space<smem>>
    %362 = vector.broadcast %361 : f32 to vector<16x16xf32>
    %363 = arith.mulf %362, %360 : vector<16x16xf32>
    %364 = arith.addf %359, %363 : vector<16x16xf32>
    %365 = vector.extract_strided_slice %346 {offsets = [0, 0], sizes = [16, 16], strides = [1, 1]} : vector<18x16xf32> to vector<16x16xf32>
    %c19 = arith.constant 19 : index
    %366 = memref.load %arg3[%c19] : memref<108xf32, #tpu.memory_space<smem>>
    %367 = vector.broadcast %366 : f32 to vector<16x16xf32>
    %368 = arith.mulf %367, %365 : vector<16x16xf32>
    %369 = arith.addf %364, %368 : vector<16x16xf32>
    %370 = vector.extract_strided_slice %346 {offsets = [1, 0], sizes = [16, 16], strides = [1, 1]} : vector<18x16xf32> to vector<16x16xf32>
    %c22 = arith.constant 22 : index
    %371 = memref.load %arg3[%c22] : memref<108xf32, #tpu.memory_space<smem>>
    %372 = vector.broadcast %371 : f32 to vector<16x16xf32>
    %373 = arith.mulf %372, %370 : vector<16x16xf32>
    %374 = arith.addf %369, %373 : vector<16x16xf32>
    %375 = vector.extract_strided_slice %346 {offsets = [2, 0], sizes = [16, 16], strides = [1, 1]} : vector<18x16xf32> to vector<16x16xf32>
    %c25 = arith.constant 25 : index
    %376 = memref.load %arg3[%c25] : memref<108xf32, #tpu.memory_space<smem>>
    %377 = vector.broadcast %376 : f32 to vector<16x16xf32>
    %378 = arith.mulf %377, %375 : vector<16x16xf32>
    %379 = arith.addf %374, %378 : vector<16x16xf32>
    %380 = vector.extract_strided_slice %347 {offsets = [0, 0], sizes = [16, 16], strides = [1, 1]} : vector<18x16xf32> to vector<16x16xf32>
    %c20 = arith.constant 20 : index
    %381 = memref.load %arg3[%c20] : memref<108xf32, #tpu.memory_space<smem>>
    %382 = vector.broadcast %381 : f32 to vector<16x16xf32>
    %383 = arith.mulf %382, %380 : vector<16x16xf32>
    %384 = arith.addf %379, %383 : vector<16x16xf32>
    %385 = vector.extract_strided_slice %347 {offsets = [1, 0], sizes = [16, 16], strides = [1, 1]} : vector<18x16xf32> to vector<16x16xf32>
    %c23 = arith.constant 23 : index
    %386 = memref.load %arg3[%c23] : memref<108xf32, #tpu.memory_space<smem>>
    %387 = vector.broadcast %386 : f32 to vector<16x16xf32>
    %388 = arith.mulf %387, %385 : vector<16x16xf32>
    %389 = arith.addf %384, %388 : vector<16x16xf32>
    %390 = vector.extract_strided_slice %347 {offsets = [2, 0], sizes = [16, 16], strides = [1, 1]} : vector<18x16xf32> to vector<16x16xf32>
    %c26 = arith.constant 26 : index
    %391 = memref.load %arg3[%c26] : memref<108xf32, #tpu.memory_space<smem>>
    %392 = vector.broadcast %391 : f32 to vector<16x16xf32>
    %393 = arith.mulf %392, %390 : vector<16x16xf32>
    %394 = arith.addf %389, %393 : vector<16x16xf32>
    %c0_72 = arith.constant 0 : index
    %c0_73 = arith.constant 0 : index
    %c0_74 = arith.constant 0 : index
    %395 = vector.load %arg8[%c0_72, %c0_73, %c0_74] : memref<3x16x16xf32, #tpu.memory_space<vmem>>, vector<1x16x16xf32>
    %396 = vector.shape_cast %395 : vector<1x16x16xf32> to vector<16x16xf32>
    %397 = vector.shape_cast %394 : vector<16x16xf32> to vector<1x16x16xf32>
    tpu.vector_store %arg8[%c0_72, %c0_73, %c0_74], %397 {strides = array<i32>} : memref<3x16x16xf32, #tpu.memory_space<vmem>>, vector<1x16x16xf32>,
    %c1_75 = arith.constant 1 : index
    %c0_76 = arith.constant 0 : index
    %c0_77 = arith.constant 0 : index
    %398 = vector.load %arg8[%c1_75, %c0_76, %c0_77] : memref<3x16x16xf32, #tpu.memory_space<vmem>>, vector<1x16x16xf32>
    %399 = vector.shape_cast %398 : vector<1x16x16xf32> to vector<16x16xf32>
    %400 = vector.extract_strided_slice %345 {offsets = [0, 0], sizes = [16, 16], strides = [1, 1]} : vector<18x16xf32> to vector<16x16xf32>
    %c54 = arith.constant 54 : index
    %401 = memref.load %arg3[%c54] : memref<108xf32, #tpu.memory_space<smem>>
    %402 = vector.broadcast %401 : f32 to vector<16x16xf32>
    %403 = arith.mulf %402, %400 : vector<16x16xf32>
    %404 = arith.addf %399, %403 : vector<16x16xf32>
    %405 = vector.extract_strided_slice %345 {offsets = [1, 0], sizes = [16, 16], strides = [1, 1]} : vector<18x16xf32> to vector<16x16xf32>
    %c57 = arith.constant 57 : index
    %406 = memref.load %arg3[%c57] : memref<108xf32, #tpu.memory_space<smem>>
    %407 = vector.broadcast %406 : f32 to vector<16x16xf32>
    %408 = arith.mulf %407, %405 : vector<16x16xf32>
    %409 = arith.addf %404, %408 : vector<16x16xf32>
    %410 = vector.extract_strided_slice %345 {offsets = [2, 0], sizes = [16, 16], strides = [1, 1]} : vector<18x16xf32> to vector<16x16xf32>
    %c60 = arith.constant 60 : index
    %411 = memref.load %arg3[%c60] : memref<108xf32, #tpu.memory_space<smem>>
    %412 = vector.broadcast %411 : f32 to vector<16x16xf32>
    %413 = arith.mulf %412, %410 : vector<16x16xf32>
    %414 = arith.addf %409, %413 : vector<16x16xf32>
    %415 = vector.extract_strided_slice %346 {offsets = [0, 0], sizes = [16, 16], strides = [1, 1]} : vector<18x16xf32> to vector<16x16xf32>
    %c55 = arith.constant 55 : index
    %416 = memref.load %arg3[%c55] : memref<108xf32, #tpu.memory_space<smem>>
    %417 = vector.broadcast %416 : f32 to vector<16x16xf32>
    %418 = arith.mulf %417, %415 : vector<16x16xf32>
    %419 = arith.addf %414, %418 : vector<16x16xf32>
    %420 = vector.extract_strided_slice %346 {offsets = [1, 0], sizes = [16, 16], strides = [1, 1]} : vector<18x16xf32> to vector<16x16xf32>
    %c58 = arith.constant 58 : index
    %421 = memref.load %arg3[%c58] : memref<108xf32, #tpu.memory_space<smem>>
    %422 = vector.broadcast %421 : f32 to vector<16x16xf32>
    %423 = arith.mulf %422, %420 : vector<16x16xf32>
    %424 = arith.addf %419, %423 : vector<16x16xf32>
    %425 = vector.extract_strided_slice %346 {offsets = [2, 0], sizes = [16, 16], strides = [1, 1]} : vector<18x16xf32> to vector<16x16xf32>
    %c61 = arith.constant 61 : index
    %426 = memref.load %arg3[%c61] : memref<108xf32, #tpu.memory_space<smem>>
    %427 = vector.broadcast %426 : f32 to vector<16x16xf32>
    %428 = arith.mulf %427, %425 : vector<16x16xf32>
    %429 = arith.addf %424, %428 : vector<16x16xf32>
    %430 = vector.extract_strided_slice %347 {offsets = [0, 0], sizes = [16, 16], strides = [1, 1]} : vector<18x16xf32> to vector<16x16xf32>
    %c56 = arith.constant 56 : index
    %431 = memref.load %arg3[%c56] : memref<108xf32, #tpu.memory_space<smem>>
    %432 = vector.broadcast %431 : f32 to vector<16x16xf32>
    %433 = arith.mulf %432, %430 : vector<16x16xf32>
    %434 = arith.addf %429, %433 : vector<16x16xf32>
    %435 = vector.extract_strided_slice %347 {offsets = [1, 0], sizes = [16, 16], strides = [1, 1]} : vector<18x16xf32> to vector<16x16xf32>
    %c59 = arith.constant 59 : index
    %436 = memref.load %arg3[%c59] : memref<108xf32, #tpu.memory_space<smem>>
    %437 = vector.broadcast %436 : f32 to vector<16x16xf32>
    %438 = arith.mulf %437, %435 : vector<16x16xf32>
    %439 = arith.addf %434, %438 : vector<16x16xf32>
    %440 = vector.extract_strided_slice %347 {offsets = [2, 0], sizes = [16, 16], strides = [1, 1]} : vector<18x16xf32> to vector<16x16xf32>
    %c62 = arith.constant 62 : index
    %441 = memref.load %arg3[%c62] : memref<108xf32, #tpu.memory_space<smem>>
    %442 = vector.broadcast %441 : f32 to vector<16x16xf32>
    %443 = arith.mulf %442, %440 : vector<16x16xf32>
    %444 = arith.addf %439, %443 : vector<16x16xf32>
    %c1_78 = arith.constant 1 : index
    %c0_79 = arith.constant 0 : index
    %c0_80 = arith.constant 0 : index
    %445 = vector.load %arg8[%c1_78, %c0_79, %c0_80] : memref<3x16x16xf32, #tpu.memory_space<vmem>>, vector<1x16x16xf32>
    %446 = vector.shape_cast %445 : vector<1x16x16xf32> to vector<16x16xf32>
    %447 = vector.shape_cast %444 : vector<16x16xf32> to vector<1x16x16xf32>
    tpu.vector_store %arg8[%c1_78, %c0_79, %c0_80], %447 {strides = array<i32>} : memref<3x16x16xf32, #tpu.memory_space<vmem>>, vector<1x16x16xf32>,
    %c2_81 = arith.constant 2 : index
    %c0_82 = arith.constant 0 : index
    %c0_83 = arith.constant 0 : index
    %448 = vector.load %arg8[%c2_81, %c0_82, %c0_83] : memref<3x16x16xf32, #tpu.memory_space<vmem>>, vector<1x16x16xf32>
    %449 = vector.shape_cast %448 : vector<1x16x16xf32> to vector<16x16xf32>
    %450 = vector.extract_strided_slice %345 {offsets = [0, 0], sizes = [16, 16], strides = [1, 1]} : vector<18x16xf32> to vector<16x16xf32>
    %c90 = arith.constant 90 : index
    %451 = memref.load %arg3[%c90] : memref<108xf32, #tpu.memory_space<smem>>
    %452 = vector.broadcast %451 : f32 to vector<16x16xf32>
    %453 = arith.mulf %452, %450 : vector<16x16xf32>
    %454 = arith.addf %449, %453 : vector<16x16xf32>
    %455 = vector.extract_strided_slice %345 {offsets = [1, 0], sizes = [16, 16], strides = [1, 1]} : vector<18x16xf32> to vector<16x16xf32>
    %c93 = arith.constant 93 : index
    %456 = memref.load %arg3[%c93] : memref<108xf32, #tpu.memory_space<smem>>
    %457 = vector.broadcast %456 : f32 to vector<16x16xf32>
    %458 = arith.mulf %457, %455 : vector<16x16xf32>
    %459 = arith.addf %454, %458 : vector<16x16xf32>
    %460 = vector.extract_strided_slice %345 {offsets = [2, 0], sizes = [16, 16], strides = [1, 1]} : vector<18x16xf32> to vector<16x16xf32>
    %c96 = arith.constant 96 : index
    %461 = memref.load %arg3[%c96] : memref<108xf32, #tpu.memory_space<smem>>
    %462 = vector.broadcast %461 : f32 to vector<16x16xf32>
    %463 = arith.mulf %462, %460 : vector<16x16xf32>
    %464 = arith.addf %459, %463 : vector<16x16xf32>
    %465 = vector.extract_strided_slice %346 {offsets = [0, 0], sizes = [16, 16], strides = [1, 1]} : vector<18x16xf32> to vector<16x16xf32>
    %c91 = arith.constant 91 : index
    %466 = memref.load %arg3[%c91] : memref<108xf32, #tpu.memory_space<smem>>
    %467 = vector.broadcast %466 : f32 to vector<16x16xf32>
    %468 = arith.mulf %467, %465 : vector<16x16xf32>
    %469 = arith.addf %464, %468 : vector<16x16xf32>
    %470 = vector.extract_strided_slice %346 {offsets = [1, 0], sizes = [16, 16], strides = [1, 1]} : vector<18x16xf32> to vector<16x16xf32>
    %c94 = arith.constant 94 : index
    %471 = memref.load %arg3[%c94] : memref<108xf32, #tpu.memory_space<smem>>
    %472 = vector.broadcast %471 : f32 to vector<16x16xf32>
    %473 = arith.mulf %472, %470 : vector<16x16xf32>
    %474 = arith.addf %469, %473 : vector<16x16xf32>
    %475 = vector.extract_strided_slice %346 {offsets = [2, 0], sizes = [16, 16], strides = [1, 1]} : vector<18x16xf32> to vector<16x16xf32>
    %c97 = arith.constant 97 : index
    %476 = memref.load %arg3[%c97] : memref<108xf32, #tpu.memory_space<smem>>
    %477 = vector.broadcast %476 : f32 to vector<16x16xf32>
    %478 = arith.mulf %477, %475 : vector<16x16xf32>
    %479 = arith.addf %474, %478 : vector<16x16xf32>
    %480 = vector.extract_strided_slice %347 {offsets = [0, 0], sizes = [16, 16], strides = [1, 1]} : vector<18x16xf32> to vector<16x16xf32>
    %c92 = arith.constant 92 : index
    %481 = memref.load %arg3[%c92] : memref<108xf32, #tpu.memory_space<smem>>
    %482 = vector.broadcast %481 : f32 to vector<16x16xf32>
    %483 = arith.mulf %482, %480 : vector<16x16xf32>
    %484 = arith.addf %479, %483 : vector<16x16xf32>
    %485 = vector.extract_strided_slice %347 {offsets = [1, 0], sizes = [16, 16], strides = [1, 1]} : vector<18x16xf32> to vector<16x16xf32>
    %c95 = arith.constant 95 : index
    %486 = memref.load %arg3[%c95] : memref<108xf32, #tpu.memory_space<smem>>
    %487 = vector.broadcast %486 : f32 to vector<16x16xf32>
    %488 = arith.mulf %487, %485 : vector<16x16xf32>
    %489 = arith.addf %484, %488 : vector<16x16xf32>
    %490 = vector.extract_strided_slice %347 {offsets = [2, 0], sizes = [16, 16], strides = [1, 1]} : vector<18x16xf32> to vector<16x16xf32>
    %c98 = arith.constant 98 : index
    %491 = memref.load %arg3[%c98] : memref<108xf32, #tpu.memory_space<smem>>
    %492 = vector.broadcast %491 : f32 to vector<16x16xf32>
    %493 = arith.mulf %492, %490 : vector<16x16xf32>
    %494 = arith.addf %489, %493 : vector<16x16xf32>
    %c2_84 = arith.constant 2 : index
    %c0_85 = arith.constant 0 : index
    %c0_86 = arith.constant 0 : index
    %495 = vector.load %arg8[%c2_84, %c0_85, %c0_86] : memref<3x16x16xf32, #tpu.memory_space<vmem>>, vector<1x16x16xf32>
    %496 = vector.shape_cast %495 : vector<1x16x16xf32> to vector<16x16xf32>
    %497 = vector.shape_cast %494 : vector<16x16xf32> to vector<1x16x16xf32>
    tpu.vector_store %arg8[%c2_84, %c0_85, %c0_86], %497 {strides = array<i32>} : memref<3x16x16xf32, #tpu.memory_space<vmem>>, vector<1x16x16xf32>,
    %c0_87 = arith.constant 0 : index
    %c3_88 = arith.constant 3 : index
    %c0_89 = arith.constant 0 : index
    %c0_90 = arith.constant 0 : index
    %498 = vector.load %arg2[%c0_87, %c3_88, %c0_89, %c0_90] : memref<1x4x16x16xf32, #tpu.memory_space<vmem>>, vector<1x1x16x16xf32>
    %499 = vector.shape_cast %498 : vector<1x1x16x16xf32> to vector<16x16xf32>
    %500 = vector.extract_strided_slice %499 {offsets = [1, 0], sizes = [1, 16], strides = [1, 1]} : vector<16x16xf32> to vector<1x16xf32>
    %501 = vector.extract_strided_slice %499 {offsets = [14, 0], sizes = [1, 16], strides = [1, 1]} : vector<16x16xf32> to vector<1x16xf32>
    %502 = tpu.concatenate %500, %499, %501 in 0 : vector<1x16xf32>, vector<16x16xf32>, vector<1x16xf32> -> vector<18x16xf32>
    %503 = vector.extract_strided_slice %502 {offsets = [0, 1], sizes = [18, 1], strides = [1, 1]} : vector<18x16xf32> to vector<18x1xf32>
    %504 = vector.extract_strided_slice %502 {offsets = [0, 14], sizes = [18, 1], strides = [1, 1]} : vector<18x16xf32> to vector<18x1xf32>
    %505 = tpu.concatenate %503, %502, %504 in 1 : vector<18x1xf32>, vector<18x16xf32>, vector<18x1xf32> -> vector<18x18xf32>
    %506 = vector.extract_strided_slice %505 {offsets = [0, 0], sizes = [18, 16], strides = [1, 1]} : vector<18x18xf32> to vector<18x16xf32>
    %507 = vector.extract_strided_slice %505 {offsets = [0, 1], sizes = [18, 16], strides = [1, 1]} : vector<18x18xf32> to vector<18x16xf32>
    %508 = vector.extract_strided_slice %505 {offsets = [0, 2], sizes = [18, 16], strides = [1, 1]} : vector<18x18xf32> to vector<18x16xf32>
    %c0_91 = arith.constant 0 : index
    %c0_92 = arith.constant 0 : index
    %c0_93 = arith.constant 0 : index
    %509 = vector.load %arg8[%c0_91, %c0_92, %c0_93] : memref<3x16x16xf32, #tpu.memory_space<vmem>>, vector<1x16x16xf32>
    %510 = vector.shape_cast %509 : vector<1x16x16xf32> to vector<16x16xf32>
    %511 = vector.extract_strided_slice %506 {offsets = [0, 0], sizes = [16, 16], strides = [1, 1]} : vector<18x16xf32> to vector<16x16xf32>
    %c27 = arith.constant 27 : index
    %512 = memref.load %arg3[%c27] : memref<108xf32, #tpu.memory_space<smem>>
    %513 = vector.broadcast %512 : f32 to vector<16x16xf32>
    %514 = arith.mulf %513, %511 : vector<16x16xf32>
    %515 = arith.addf %510, %514 : vector<16x16xf32>
    %516 = vector.extract_strided_slice %506 {offsets = [1, 0], sizes = [16, 16], strides = [1, 1]} : vector<18x16xf32> to vector<16x16xf32>
    %c30 = arith.constant 30 : index
    %517 = memref.load %arg3[%c30] : memref<108xf32, #tpu.memory_space<smem>>
    %518 = vector.broadcast %517 : f32 to vector<16x16xf32>
    %519 = arith.mulf %518, %516 : vector<16x16xf32>
    %520 = arith.addf %515, %519 : vector<16x16xf32>
    %521 = vector.extract_strided_slice %506 {offsets = [2, 0], sizes = [16, 16], strides = [1, 1]} : vector<18x16xf32> to vector<16x16xf32>
    %c33 = arith.constant 33 : index
    %522 = memref.load %arg3[%c33] : memref<108xf32, #tpu.memory_space<smem>>
    %523 = vector.broadcast %522 : f32 to vector<16x16xf32>
    %524 = arith.mulf %523, %521 : vector<16x16xf32>
    %525 = arith.addf %520, %524 : vector<16x16xf32>
    %526 = vector.extract_strided_slice %507 {offsets = [0, 0], sizes = [16, 16], strides = [1, 1]} : vector<18x16xf32> to vector<16x16xf32>
    %c28 = arith.constant 28 : index
    %527 = memref.load %arg3[%c28] : memref<108xf32, #tpu.memory_space<smem>>
    %528 = vector.broadcast %527 : f32 to vector<16x16xf32>
    %529 = arith.mulf %528, %526 : vector<16x16xf32>
    %530 = arith.addf %525, %529 : vector<16x16xf32>
    %531 = vector.extract_strided_slice %507 {offsets = [1, 0], sizes = [16, 16], strides = [1, 1]} : vector<18x16xf32> to vector<16x16xf32>
    %c31 = arith.constant 31 : index
    %532 = memref.load %arg3[%c31] : memref<108xf32, #tpu.memory_space<smem>>
    %533 = vector.broadcast %532 : f32 to vector<16x16xf32>
    %534 = arith.mulf %533, %531 : vector<16x16xf32>
    %535 = arith.addf %530, %534 : vector<16x16xf32>
    %536 = vector.extract_strided_slice %507 {offsets = [2, 0], sizes = [16, 16], strides = [1, 1]} : vector<18x16xf32> to vector<16x16xf32>
    %c34 = arith.constant 34 : index
    %537 = memref.load %arg3[%c34] : memref<108xf32, #tpu.memory_space<smem>>
    %538 = vector.broadcast %537 : f32 to vector<16x16xf32>
    %539 = arith.mulf %538, %536 : vector<16x16xf32>
    %540 = arith.addf %535, %539 : vector<16x16xf32>
    %541 = vector.extract_strided_slice %508 {offsets = [0, 0], sizes = [16, 16], strides = [1, 1]} : vector<18x16xf32> to vector<16x16xf32>
    %c29 = arith.constant 29 : index
    %542 = memref.load %arg3[%c29] : memref<108xf32, #tpu.memory_space<smem>>
    %543 = vector.broadcast %542 : f32 to vector<16x16xf32>
    %544 = arith.mulf %543, %541 : vector<16x16xf32>
    %545 = arith.addf %540, %544 : vector<16x16xf32>
    %546 = vector.extract_strided_slice %508 {offsets = [1, 0], sizes = [16, 16], strides = [1, 1]} : vector<18x16xf32> to vector<16x16xf32>
    %c32 = arith.constant 32 : index
    %547 = memref.load %arg3[%c32] : memref<108xf32, #tpu.memory_space<smem>>
    %548 = vector.broadcast %547 : f32 to vector<16x16xf32>
    %549 = arith.mulf %548, %546 : vector<16x16xf32>
    %550 = arith.addf %545, %549 : vector<16x16xf32>
    %551 = vector.extract_strided_slice %508 {offsets = [2, 0], sizes = [16, 16], strides = [1, 1]} : vector<18x16xf32> to vector<16x16xf32>
    %c35 = arith.constant 35 : index
    %552 = memref.load %arg3[%c35] : memref<108xf32, #tpu.memory_space<smem>>
    %553 = vector.broadcast %552 : f32 to vector<16x16xf32>
    %554 = arith.mulf %553, %551 : vector<16x16xf32>
    %555 = arith.addf %550, %554 : vector<16x16xf32>
    %c0_94 = arith.constant 0 : index
    %c0_95 = arith.constant 0 : index
    %c0_96 = arith.constant 0 : index
    %556 = vector.load %arg8[%c0_94, %c0_95, %c0_96] : memref<3x16x16xf32, #tpu.memory_space<vmem>>, vector<1x16x16xf32>
    %557 = vector.shape_cast %556 : vector<1x16x16xf32> to vector<16x16xf32>
    %558 = vector.shape_cast %555 : vector<16x16xf32> to vector<1x16x16xf32>
    tpu.vector_store %arg8[%c0_94, %c0_95, %c0_96], %558 {strides = array<i32>} : memref<3x16x16xf32, #tpu.memory_space<vmem>>, vector<1x16x16xf32>,
    %c1_97 = arith.constant 1 : index
    %c0_98 = arith.constant 0 : index
    %c0_99 = arith.constant 0 : index
    %559 = vector.load %arg8[%c1_97, %c0_98, %c0_99] : memref<3x16x16xf32, #tpu.memory_space<vmem>>, vector<1x16x16xf32>
    %560 = vector.shape_cast %559 : vector<1x16x16xf32> to vector<16x16xf32>
    %561 = vector.extract_strided_slice %506 {offsets = [0, 0], sizes = [16, 16], strides = [1, 1]} : vector<18x16xf32> to vector<16x16xf32>
    %c63 = arith.constant 63 : index
    %562 = memref.load %arg3[%c63] : memref<108xf32, #tpu.memory_space<smem>>
    %563 = vector.broadcast %562 : f32 to vector<16x16xf32>
    %564 = arith.mulf %563, %561 : vector<16x16xf32>
    %565 = arith.addf %560, %564 : vector<16x16xf32>
    %566 = vector.extract_strided_slice %506 {offsets = [1, 0], sizes = [16, 16], strides = [1, 1]} : vector<18x16xf32> to vector<16x16xf32>
    %c66 = arith.constant 66 : index
    %567 = memref.load %arg3[%c66] : memref<108xf32, #tpu.memory_space<smem>>
    %568 = vector.broadcast %567 : f32 to vector<16x16xf32>
    %569 = arith.mulf %568, %566 : vector<16x16xf32>
    %570 = arith.addf %565, %569 : vector<16x16xf32>
    %571 = vector.extract_strided_slice %506 {offsets = [2, 0], sizes = [16, 16], strides = [1, 1]} : vector<18x16xf32> to vector<16x16xf32>
    %c69 = arith.constant 69 : index
    %572 = memref.load %arg3[%c69] : memref<108xf32, #tpu.memory_space<smem>>
    %573 = vector.broadcast %572 : f32 to vector<16x16xf32>
    %574 = arith.mulf %573, %571 : vector<16x16xf32>
    %575 = arith.addf %570, %574 : vector<16x16xf32>
    %576 = vector.extract_strided_slice %507 {offsets = [0, 0], sizes = [16, 16], strides = [1, 1]} : vector<18x16xf32> to vector<16x16xf32>
    %c64 = arith.constant 64 : index
    %577 = memref.load %arg3[%c64] : memref<108xf32, #tpu.memory_space<smem>>
    %578 = vector.broadcast %577 : f32 to vector<16x16xf32>
    %579 = arith.mulf %578, %576 : vector<16x16xf32>
    %580 = arith.addf %575, %579 : vector<16x16xf32>
    %581 = vector.extract_strided_slice %507 {offsets = [1, 0], sizes = [16, 16], strides = [1, 1]} : vector<18x16xf32> to vector<16x16xf32>
    %c67 = arith.constant 67 : index
    %582 = memref.load %arg3[%c67] : memref<108xf32, #tpu.memory_space<smem>>
    %583 = vector.broadcast %582 : f32 to vector<16x16xf32>
    %584 = arith.mulf %583, %581 : vector<16x16xf32>
    %585 = arith.addf %580, %584 : vector<16x16xf32>
    %586 = vector.extract_strided_slice %507 {offsets = [2, 0], sizes = [16, 16], strides = [1, 1]} : vector<18x16xf32> to vector<16x16xf32>
    %c70 = arith.constant 70 : index
    %587 = memref.load %arg3[%c70] : memref<108xf32, #tpu.memory_space<smem>>
    %588 = vector.broadcast %587 : f32 to vector<16x16xf32>
    %589 = arith.mulf %588, %586 : vector<16x16xf32>
    %590 = arith.addf %585, %589 : vector<16x16xf32>
    %591 = vector.extract_strided_slice %508 {offsets = [0, 0], sizes = [16, 16], strides = [1, 1]} : vector<18x16xf32> to vector<16x16xf32>
    %c65 = arith.constant 65 : index
    %592 = memref.load %arg3[%c65] : memref<108xf32, #tpu.memory_space<smem>>
    %593 = vector.broadcast %592 : f32 to vector<16x16xf32>
    %594 = arith.mulf %593, %591 : vector<16x16xf32>
    %595 = arith.addf %590, %594 : vector<16x16xf32>
    %596 = vector.extract_strided_slice %508 {offsets = [1, 0], sizes = [16, 16], strides = [1, 1]} : vector<18x16xf32> to vector<16x16xf32>
    %c68 = arith.constant 68 : index
    %597 = memref.load %arg3[%c68] : memref<108xf32, #tpu.memory_space<smem>>
    %598 = vector.broadcast %597 : f32 to vector<16x16xf32>
    %599 = arith.mulf %598, %596 : vector<16x16xf32>
    %600 = arith.addf %595, %599 : vector<16x16xf32>
    %601 = vector.extract_strided_slice %508 {offsets = [2, 0], sizes = [16, 16], strides = [1, 1]} : vector<18x16xf32> to vector<16x16xf32>
    %c71 = arith.constant 71 : index
    %602 = memref.load %arg3[%c71] : memref<108xf32, #tpu.memory_space<smem>>
    %603 = vector.broadcast %602 : f32 to vector<16x16xf32>
    %604 = arith.mulf %603, %601 : vector<16x16xf32>
    %605 = arith.addf %600, %604 : vector<16x16xf32>
    %c1_100 = arith.constant 1 : index
    %c0_101 = arith.constant 0 : index
    %c0_102 = arith.constant 0 : index
    %606 = vector.load %arg8[%c1_100, %c0_101, %c0_102] : memref<3x16x16xf32, #tpu.memory_space<vmem>>, vector<1x16x16xf32>
    %607 = vector.shape_cast %606 : vector<1x16x16xf32> to vector<16x16xf32>
    %608 = vector.shape_cast %605 : vector<16x16xf32> to vector<1x16x16xf32>
    tpu.vector_store %arg8[%c1_100, %c0_101, %c0_102], %608 {strides = array<i32>} : memref<3x16x16xf32, #tpu.memory_space<vmem>>, vector<1x16x16xf32>,
    %c2_103 = arith.constant 2 : index
    %c0_104 = arith.constant 0 : index
    %c0_105 = arith.constant 0 : index
    %609 = vector.load %arg8[%c2_103, %c0_104, %c0_105] : memref<3x16x16xf32, #tpu.memory_space<vmem>>, vector<1x16x16xf32>
    %610 = vector.shape_cast %609 : vector<1x16x16xf32> to vector<16x16xf32>
    %611 = vector.extract_strided_slice %506 {offsets = [0, 0], sizes = [16, 16], strides = [1, 1]} : vector<18x16xf32> to vector<16x16xf32>
    %c99 = arith.constant 99 : index
    %612 = memref.load %arg3[%c99] : memref<108xf32, #tpu.memory_space<smem>>
    %613 = vector.broadcast %612 : f32 to vector<16x16xf32>
    %614 = arith.mulf %613, %611 : vector<16x16xf32>
    %615 = arith.addf %610, %614 : vector<16x16xf32>
    %616 = vector.extract_strided_slice %506 {offsets = [1, 0], sizes = [16, 16], strides = [1, 1]} : vector<18x16xf32> to vector<16x16xf32>
    %c102 = arith.constant 102 : index
    %617 = memref.load %arg3[%c102] : memref<108xf32, #tpu.memory_space<smem>>
    %618 = vector.broadcast %617 : f32 to vector<16x16xf32>
    %619 = arith.mulf %618, %616 : vector<16x16xf32>
    %620 = arith.addf %615, %619 : vector<16x16xf32>
    %621 = vector.extract_strided_slice %506 {offsets = [2, 0], sizes = [16, 16], strides = [1, 1]} : vector<18x16xf32> to vector<16x16xf32>
    %c105 = arith.constant 105 : index
    %622 = memref.load %arg3[%c105] : memref<108xf32, #tpu.memory_space<smem>>
    %623 = vector.broadcast %622 : f32 to vector<16x16xf32>
    %624 = arith.mulf %623, %621 : vector<16x16xf32>
    %625 = arith.addf %620, %624 : vector<16x16xf32>
    %626 = vector.extract_strided_slice %507 {offsets = [0, 0], sizes = [16, 16], strides = [1, 1]} : vector<18x16xf32> to vector<16x16xf32>
    %c100 = arith.constant 100 : index
    %627 = memref.load %arg3[%c100] : memref<108xf32, #tpu.memory_space<smem>>
    %628 = vector.broadcast %627 : f32 to vector<16x16xf32>
    %629 = arith.mulf %628, %626 : vector<16x16xf32>
    %630 = arith.addf %625, %629 : vector<16x16xf32>
    %631 = vector.extract_strided_slice %507 {offsets = [1, 0], sizes = [16, 16], strides = [1, 1]} : vector<18x16xf32> to vector<16x16xf32>
    %c103 = arith.constant 103 : index
    %632 = memref.load %arg3[%c103] : memref<108xf32, #tpu.memory_space<smem>>
    %633 = vector.broadcast %632 : f32 to vector<16x16xf32>
    %634 = arith.mulf %633, %631 : vector<16x16xf32>
    %635 = arith.addf %630, %634 : vector<16x16xf32>
    %636 = vector.extract_strided_slice %507 {offsets = [2, 0], sizes = [16, 16], strides = [1, 1]} : vector<18x16xf32> to vector<16x16xf32>
    %c106 = arith.constant 106 : index
    %637 = memref.load %arg3[%c106] : memref<108xf32, #tpu.memory_space<smem>>
    %638 = vector.broadcast %637 : f32 to vector<16x16xf32>
    %639 = arith.mulf %638, %636 : vector<16x16xf32>
    %640 = arith.addf %635, %639 : vector<16x16xf32>
    %641 = vector.extract_strided_slice %508 {offsets = [0, 0], sizes = [16, 16], strides = [1, 1]} : vector<18x16xf32> to vector<16x16xf32>
    %c101 = arith.constant 101 : index
    %642 = memref.load %arg3[%c101] : memref<108xf32, #tpu.memory_space<smem>>
    %643 = vector.broadcast %642 : f32 to vector<16x16xf32>
    %644 = arith.mulf %643, %641 : vector<16x16xf32>
    %645 = arith.addf %640, %644 : vector<16x16xf32>
    %646 = vector.extract_strided_slice %508 {offsets = [1, 0], sizes = [16, 16], strides = [1, 1]} : vector<18x16xf32> to vector<16x16xf32>
    %c104 = arith.constant 104 : index
    %647 = memref.load %arg3[%c104] : memref<108xf32, #tpu.memory_space<smem>>
    %648 = vector.broadcast %647 : f32 to vector<16x16xf32>
    %649 = arith.mulf %648, %646 : vector<16x16xf32>
    %650 = arith.addf %645, %649 : vector<16x16xf32>
    %651 = vector.extract_strided_slice %508 {offsets = [2, 0], sizes = [16, 16], strides = [1, 1]} : vector<18x16xf32> to vector<16x16xf32>
    %c107 = arith.constant 107 : index
    %652 = memref.load %arg3[%c107] : memref<108xf32, #tpu.memory_space<smem>>
    %653 = vector.broadcast %652 : f32 to vector<16x16xf32>
    %654 = arith.mulf %653, %651 : vector<16x16xf32>
    %655 = arith.addf %650, %654 : vector<16x16xf32>
    %c2_106 = arith.constant 2 : index
    %c0_107 = arith.constant 0 : index
    %c0_108 = arith.constant 0 : index
    %656 = vector.load %arg8[%c2_106, %c0_107, %c0_108] : memref<3x16x16xf32, #tpu.memory_space<vmem>>, vector<1x16x16xf32>
    %657 = vector.shape_cast %656 : vector<1x16x16xf32> to vector<16x16xf32>
    %658 = vector.shape_cast %655 : vector<16x16xf32> to vector<1x16x16xf32>
    tpu.vector_store %arg8[%c2_106, %c0_107, %c0_108], %658 {strides = array<i32>} : memref<3x16x16xf32, #tpu.memory_space<vmem>>, vector<1x16x16xf32>,
    %c0_109 = arith.constant 0 : index
    %c0_110 = arith.constant 0 : index
    %c0_111 = arith.constant 0 : index
    %c0_112 = arith.constant 0 : index
    %659 = vector.load %arg2[%c0_109, %c0_110, %c0_111, %c0_112] : memref<1x4x16x16xf32, #tpu.memory_space<vmem>>, vector<1x1x16x16xf32>
    %660 = vector.shape_cast %659 : vector<1x1x16x16xf32> to vector<16x16xf32>
    %c0_113 = arith.constant 0 : index
    %c1_114 = arith.constant 1 : index
    %c0_115 = arith.constant 0 : index
    %c0_116 = arith.constant 0 : index
    %661 = vector.load %arg2[%c0_113, %c1_114, %c0_115, %c0_116] : memref<1x4x16x16xf32, #tpu.memory_space<vmem>>, vector<1x1x16x16xf32>
    %662 = vector.shape_cast %661 : vector<1x1x16x16xf32> to vector<16x16xf32>
    %c0_117 = arith.constant 0 : index
    %c2_118 = arith.constant 2 : index
    %c0_119 = arith.constant 0 : index
    %c0_120 = arith.constant 0 : index
    %663 = vector.load %arg2[%c0_117, %c2_118, %c0_119, %c0_120] : memref<1x4x16x16xf32, #tpu.memory_space<vmem>>, vector<1x1x16x16xf32>
    %664 = vector.shape_cast %663 : vector<1x1x16x16xf32> to vector<16x16xf32>
    %c0_121 = arith.constant 0 : index
    %c3_122 = arith.constant 3 : index
    %c0_123 = arith.constant 0 : index
    %c0_124 = arith.constant 0 : index
    %665 = vector.load %arg2[%c0_121, %c3_122, %c0_123, %c0_124] : memref<1x4x16x16xf32, #tpu.memory_space<vmem>>, vector<1x1x16x16xf32>
    %666 = vector.shape_cast %665 : vector<1x1x16x16xf32> to vector<16x16xf32>
    %c0_125 = arith.constant 0 : index
    %667 = memref.load %arg5[%c0_125] : memref<24xf32, #tpu.memory_space<smem>>
    %668 = vector.broadcast %667 : f32 to vector<16x16xf32>
    %669 = arith.mulf %668, %660 : vector<16x16xf32>
    %c1_126 = arith.constant 1 : index
    %670 = memref.load %arg5[%c1_126] : memref<24xf32, #tpu.memory_space<smem>>
    %671 = vector.broadcast %670 : f32 to vector<16x16xf32>
    %672 = arith.mulf %671, %662 : vector<16x16xf32>
    %673 = arith.addf %669, %672 : vector<16x16xf32>
    %c2_127 = arith.constant 2 : index
    %674 = memref.load %arg5[%c2_127] : memref<24xf32, #tpu.memory_space<smem>>
    %675 = vector.broadcast %674 : f32 to vector<16x16xf32>
    %676 = arith.mulf %675, %664 : vector<16x16xf32>
    %677 = arith.addf %673, %676 : vector<16x16xf32>
    %c3_128 = arith.constant 3 : index
    %678 = memref.load %arg5[%c3_128] : memref<24xf32, #tpu.memory_space<smem>>
    %679 = vector.broadcast %678 : f32 to vector<16x16xf32>
    %680 = arith.mulf %679, %666 : vector<16x16xf32>
    %681 = arith.addf %677, %680 : vector<16x16xf32>
    %c0_129 = arith.constant 0 : index
    %682 = memref.load %arg6[%c0_129] : memref<6xf32, #tpu.memory_space<smem>>
    %683 = vector.broadcast %682 : f32 to vector<16x16xf32>
    %684 = arith.addf %681, %683 : vector<16x16xf32>
    %c0_130 = arith.constant 0 : index
    %c0_131 = arith.constant 0 : index
    %c0_132 = arith.constant 0 : index
    %685 = vector.load %arg9[%c0_130, %c0_131, %c0_132] : memref<6x16x16xf32, #tpu.memory_space<vmem>>, vector<1x16x16xf32>
    %686 = vector.shape_cast %685 : vector<1x16x16xf32> to vector<16x16xf32>
    %687 = vector.shape_cast %684 : vector<16x16xf32> to vector<1x16x16xf32>
    tpu.vector_store %arg9[%c0_130, %c0_131, %c0_132], %687 {strides = array<i32>} : memref<6x16x16xf32, #tpu.memory_space<vmem>>, vector<1x16x16xf32>,
    %c4_133 = arith.constant 4 : index
    %688 = memref.load %arg5[%c4_133] : memref<24xf32, #tpu.memory_space<smem>>
    %689 = vector.broadcast %688 : f32 to vector<16x16xf32>
    %690 = arith.mulf %689, %660 : vector<16x16xf32>
    %c5_134 = arith.constant 5 : index
    %691 = memref.load %arg5[%c5_134] : memref<24xf32, #tpu.memory_space<smem>>
    %692 = vector.broadcast %691 : f32 to vector<16x16xf32>
    %693 = arith.mulf %692, %662 : vector<16x16xf32>
    %694 = arith.addf %690, %693 : vector<16x16xf32>
    %c6_135 = arith.constant 6 : index
    %695 = memref.load %arg5[%c6_135] : memref<24xf32, #tpu.memory_space<smem>>
    %696 = vector.broadcast %695 : f32 to vector<16x16xf32>
    %697 = arith.mulf %696, %664 : vector<16x16xf32>
    %698 = arith.addf %694, %697 : vector<16x16xf32>
    %c7_136 = arith.constant 7 : index
    %699 = memref.load %arg5[%c7_136] : memref<24xf32, #tpu.memory_space<smem>>
    %700 = vector.broadcast %699 : f32 to vector<16x16xf32>
    %701 = arith.mulf %700, %666 : vector<16x16xf32>
    %702 = arith.addf %698, %701 : vector<16x16xf32>
    %c1_137 = arith.constant 1 : index
    %703 = memref.load %arg6[%c1_137] : memref<6xf32, #tpu.memory_space<smem>>
    %704 = vector.broadcast %703 : f32 to vector<16x16xf32>
    %705 = arith.addf %702, %704 : vector<16x16xf32>
    %c1_138 = arith.constant 1 : index
    %c0_139 = arith.constant 0 : index
    %c0_140 = arith.constant 0 : index
    %706 = vector.load %arg9[%c1_138, %c0_139, %c0_140] : memref<6x16x16xf32, #tpu.memory_space<vmem>>, vector<1x16x16xf32>
    %707 = vector.shape_cast %706 : vector<1x16x16xf32> to vector<16x16xf32>
    %708 = vector.shape_cast %705 : vector<16x16xf32> to vector<1x16x16xf32>
    tpu.vector_store %arg9[%c1_138, %c0_139, %c0_140], %708 {strides = array<i32>} : memref<6x16x16xf32, #tpu.memory_space<vmem>>, vector<1x16x16xf32>,
    %c8_141 = arith.constant 8 : index
    %709 = memref.load %arg5[%c8_141] : memref<24xf32, #tpu.memory_space<smem>>
    %710 = vector.broadcast %709 : f32 to vector<16x16xf32>
    %711 = arith.mulf %710, %660 : vector<16x16xf32>
    %c9_142 = arith.constant 9 : index
    %712 = memref.load %arg5[%c9_142] : memref<24xf32, #tpu.memory_space<smem>>
    %713 = vector.broadcast %712 : f32 to vector<16x16xf32>
    %714 = arith.mulf %713, %662 : vector<16x16xf32>
    %715 = arith.addf %711, %714 : vector<16x16xf32>
    %c10_143 = arith.constant 10 : index
    %716 = memref.load %arg5[%c10_143] : memref<24xf32, #tpu.memory_space<smem>>
    %717 = vector.broadcast %716 : f32 to vector<16x16xf32>
    %718 = arith.mulf %717, %664 : vector<16x16xf32>
    %719 = arith.addf %715, %718 : vector<16x16xf32>
    %c11_144 = arith.constant 11 : index
    %720 = memref.load %arg5[%c11_144] : memref<24xf32, #tpu.memory_space<smem>>
    %721 = vector.broadcast %720 : f32 to vector<16x16xf32>
    %722 = arith.mulf %721, %666 : vector<16x16xf32>
    %723 = arith.addf %719, %722 : vector<16x16xf32>
    %c2_145 = arith.constant 2 : index
    %724 = memref.load %arg6[%c2_145] : memref<6xf32, #tpu.memory_space<smem>>
    %725 = vector.broadcast %724 : f32 to vector<16x16xf32>
    %726 = arith.addf %723, %725 : vector<16x16xf32>
    %c2_146 = arith.constant 2 : index
    %c0_147 = arith.constant 0 : index
    %c0_148 = arith.constant 0 : index
    %727 = vector.load %arg9[%c2_146, %c0_147, %c0_148] : memref<6x16x16xf32, #tpu.memory_space<vmem>>, vector<1x16x16xf32>
    %728 = vector.shape_cast %727 : vector<1x16x16xf32> to vector<16x16xf32>
    %729 = vector.shape_cast %726 : vector<16x16xf32> to vector<1x16x16xf32>
    tpu.vector_store %arg9[%c2_146, %c0_147, %c0_148], %729 {strides = array<i32>} : memref<6x16x16xf32, #tpu.memory_space<vmem>>, vector<1x16x16xf32>,
    %c12_149 = arith.constant 12 : index
    %730 = memref.load %arg5[%c12_149] : memref<24xf32, #tpu.memory_space<smem>>
    %731 = vector.broadcast %730 : f32 to vector<16x16xf32>
    %732 = arith.mulf %731, %660 : vector<16x16xf32>
    %c13_150 = arith.constant 13 : index
    %733 = memref.load %arg5[%c13_150] : memref<24xf32, #tpu.memory_space<smem>>
    %734 = vector.broadcast %733 : f32 to vector<16x16xf32>
    %735 = arith.mulf %734, %662 : vector<16x16xf32>
    %736 = arith.addf %732, %735 : vector<16x16xf32>
    %c14_151 = arith.constant 14 : index
    %737 = memref.load %arg5[%c14_151] : memref<24xf32, #tpu.memory_space<smem>>
    %738 = vector.broadcast %737 : f32 to vector<16x16xf32>
    %739 = arith.mulf %738, %664 : vector<16x16xf32>
    %740 = arith.addf %736, %739 : vector<16x16xf32>
    %c15_152 = arith.constant 15 : index
    %741 = memref.load %arg5[%c15_152] : memref<24xf32, #tpu.memory_space<smem>>
    %742 = vector.broadcast %741 : f32 to vector<16x16xf32>
    %743 = arith.mulf %742, %666 : vector<16x16xf32>
    %744 = arith.addf %740, %743 : vector<16x16xf32>
    %c3_153 = arith.constant 3 : index
    %745 = memref.load %arg6[%c3_153] : memref<6xf32, #tpu.memory_space<smem>>
    %746 = vector.broadcast %745 : f32 to vector<16x16xf32>
    %747 = arith.addf %744, %746 : vector<16x16xf32>
    %c3_154 = arith.constant 3 : index
    %c0_155 = arith.constant 0 : index
    %c0_156 = arith.constant 0 : index
    %748 = vector.load %arg9[%c3_154, %c0_155, %c0_156] : memref<6x16x16xf32, #tpu.memory_space<vmem>>, vector<1x16x16xf32>
    %749 = vector.shape_cast %748 : vector<1x16x16xf32> to vector<16x16xf32>
    %750 = vector.shape_cast %747 : vector<16x16xf32> to vector<1x16x16xf32>
    tpu.vector_store %arg9[%c3_154, %c0_155, %c0_156], %750 {strides = array<i32>} : memref<6x16x16xf32, #tpu.memory_space<vmem>>, vector<1x16x16xf32>,
    %c16_157 = arith.constant 16 : index
    %751 = memref.load %arg5[%c16_157] : memref<24xf32, #tpu.memory_space<smem>>
    %752 = vector.broadcast %751 : f32 to vector<16x16xf32>
    %753 = arith.mulf %752, %660 : vector<16x16xf32>
    %c17_158 = arith.constant 17 : index
    %754 = memref.load %arg5[%c17_158] : memref<24xf32, #tpu.memory_space<smem>>
    %755 = vector.broadcast %754 : f32 to vector<16x16xf32>
    %756 = arith.mulf %755, %662 : vector<16x16xf32>
    %757 = arith.addf %753, %756 : vector<16x16xf32>
    %c18_159 = arith.constant 18 : index
    %758 = memref.load %arg5[%c18_159] : memref<24xf32, #tpu.memory_space<smem>>
    %759 = vector.broadcast %758 : f32 to vector<16x16xf32>
    %760 = arith.mulf %759, %664 : vector<16x16xf32>
    %761 = arith.addf %757, %760 : vector<16x16xf32>
    %c19_160 = arith.constant 19 : index
    %762 = memref.load %arg5[%c19_160] : memref<24xf32, #tpu.memory_space<smem>>
    %763 = vector.broadcast %762 : f32 to vector<16x16xf32>
    %764 = arith.mulf %763, %666 : vector<16x16xf32>
    %765 = arith.addf %761, %764 : vector<16x16xf32>
    %c4_161 = arith.constant 4 : index
    %766 = memref.load %arg6[%c4_161] : memref<6xf32, #tpu.memory_space<smem>>
    %767 = vector.broadcast %766 : f32 to vector<16x16xf32>
    %768 = arith.addf %765, %767 : vector<16x16xf32>
    %c4_162 = arith.constant 4 : index
    %c0_163 = arith.constant 0 : index
    %c0_164 = arith.constant 0 : index
    %769 = vector.load %arg9[%c4_162, %c0_163, %c0_164] : memref<6x16x16xf32, #tpu.memory_space<vmem>>, vector<1x16x16xf32>
    %770 = vector.shape_cast %769 : vector<1x16x16xf32> to vector<16x16xf32>
    %771 = vector.shape_cast %768 : vector<16x16xf32> to vector<1x16x16xf32>
    tpu.vector_store %arg9[%c4_162, %c0_163, %c0_164], %771 {strides = array<i32>} : memref<6x16x16xf32, #tpu.memory_space<vmem>>, vector<1x16x16xf32>,
    %c20_165 = arith.constant 20 : index
    %772 = memref.load %arg5[%c20_165] : memref<24xf32, #tpu.memory_space<smem>>
    %773 = vector.broadcast %772 : f32 to vector<16x16xf32>
    %774 = arith.mulf %773, %660 : vector<16x16xf32>
    %c21_166 = arith.constant 21 : index
    %775 = memref.load %arg5[%c21_166] : memref<24xf32, #tpu.memory_space<smem>>
    %776 = vector.broadcast %775 : f32 to vector<16x16xf32>
    %777 = arith.mulf %776, %662 : vector<16x16xf32>
    %778 = arith.addf %774, %777 : vector<16x16xf32>
    %c22_167 = arith.constant 22 : index
    %779 = memref.load %arg5[%c22_167] : memref<24xf32, #tpu.memory_space<smem>>
    %780 = vector.broadcast %779 : f32 to vector<16x16xf32>
    %781 = arith.mulf %780, %664 : vector<16x16xf32>
    %782 = arith.addf %778, %781 : vector<16x16xf32>
    %c23_168 = arith.constant 23 : index
    %783 = memref.load %arg5[%c23_168] : memref<24xf32, #tpu.memory_space<smem>>
    %784 = vector.broadcast %783 : f32 to vector<16x16xf32>
    %785 = arith.mulf %784, %666 : vector<16x16xf32>
    %786 = arith.addf %782, %785 : vector<16x16xf32>
    %c5_169 = arith.constant 5 : index
    %787 = memref.load %arg6[%c5_169] : memref<6xf32, #tpu.memory_space<smem>>
    %788 = vector.broadcast %787 : f32 to vector<16x16xf32>
    %789 = arith.addf %786, %788 : vector<16x16xf32>
    %c5_170 = arith.constant 5 : index
    %c0_171 = arith.constant 0 : index
    %c0_172 = arith.constant 0 : index
    %790 = vector.load %arg9[%c5_170, %c0_171, %c0_172] : memref<6x16x16xf32, #tpu.memory_space<vmem>>, vector<1x16x16xf32>
    %791 = vector.shape_cast %790 : vector<1x16x16xf32> to vector<16x16xf32>
    %792 = vector.shape_cast %789 : vector<16x16xf32> to vector<1x16x16xf32>
    tpu.vector_store %arg9[%c5_170, %c0_171, %c0_172], %792 {strides = array<i32>} : memref<6x16x16xf32, #tpu.memory_space<vmem>>, vector<1x16x16xf32>,
    %c0_173 = arith.constant 0 : index
    %c0_174 = arith.constant 0 : index
    %c0_175 = arith.constant 0 : index
    %793 = vector.load %arg8[%c0_173, %c0_174, %c0_175] : memref<3x16x16xf32, #tpu.memory_space<vmem>>, vector<1x16x16xf32>
    %794 = vector.shape_cast %793 : vector<1x16x16xf32> to vector<16x16xf32>
    %795 = vector.extract_strided_slice %794 {offsets = [1, 0], sizes = [1, 16], strides = [1, 1]} : vector<16x16xf32> to vector<1x16xf32>
    %796 = vector.extract_strided_slice %794 {offsets = [14, 0], sizes = [1, 16], strides = [1, 1]} : vector<16x16xf32> to vector<1x16xf32>
    %797 = tpu.concatenate %795, %794, %796 in 0 : vector<1x16xf32>, vector<16x16xf32>, vector<1x16xf32> -> vector<18x16xf32>
    %798 = vector.extract_strided_slice %797 {offsets = [0, 1], sizes = [18, 1], strides = [1, 1]} : vector<18x16xf32> to vector<18x1xf32>
    %799 = vector.extract_strided_slice %797 {offsets = [0, 14], sizes = [18, 1], strides = [1, 1]} : vector<18x16xf32> to vector<18x1xf32>
    %800 = tpu.concatenate %798, %797, %799 in 1 : vector<18x1xf32>, vector<18x16xf32>, vector<18x1xf32> -> vector<18x18xf32>
    %801 = vector.extract_strided_slice %800 {offsets = [0, 0], sizes = [18, 16], strides = [1, 1]} : vector<18x18xf32> to vector<18x16xf32>
    %802 = vector.extract_strided_slice %800 {offsets = [0, 1], sizes = [18, 16], strides = [1, 1]} : vector<18x18xf32> to vector<18x16xf32>
    %803 = vector.extract_strided_slice %800 {offsets = [0, 2], sizes = [18, 16], strides = [1, 1]} : vector<18x18xf32> to vector<18x16xf32>
    %c0_176 = arith.constant 0 : index
    %c0_177 = arith.constant 0 : index
    %c0_178 = arith.constant 0 : index
    %804 = vector.load %arg9[%c0_176, %c0_177, %c0_178] : memref<6x16x16xf32, #tpu.memory_space<vmem>>, vector<1x16x16xf32>
    %805 = vector.shape_cast %804 : vector<1x16x16xf32> to vector<16x16xf32>
    %806 = vector.extract_strided_slice %801 {offsets = [0, 0], sizes = [16, 16], strides = [1, 1]} : vector<18x16xf32> to vector<16x16xf32>
    %c0_179 = arith.constant 0 : index
    %807 = memref.load %arg4[%c0_179] : memref<162xf32, #tpu.memory_space<smem>>
    %808 = vector.broadcast %807 : f32 to vector<16x16xf32>
    %809 = arith.mulf %808, %806 : vector<16x16xf32>
    %810 = arith.addf %805, %809 : vector<16x16xf32>
    %811 = vector.extract_strided_slice %801 {offsets = [1, 0], sizes = [16, 16], strides = [1, 1]} : vector<18x16xf32> to vector<16x16xf32>
    %c3_180 = arith.constant 3 : index
    %812 = memref.load %arg4[%c3_180] : memref<162xf32, #tpu.memory_space<smem>>
    %813 = vector.broadcast %812 : f32 to vector<16x16xf32>
    %814 = arith.mulf %813, %811 : vector<16x16xf32>
    %815 = arith.addf %810, %814 : vector<16x16xf32>
    %816 = vector.extract_strided_slice %801 {offsets = [2, 0], sizes = [16, 16], strides = [1, 1]} : vector<18x16xf32> to vector<16x16xf32>
    %c6_181 = arith.constant 6 : index
    %817 = memref.load %arg4[%c6_181] : memref<162xf32, #tpu.memory_space<smem>>
    %818 = vector.broadcast %817 : f32 to vector<16x16xf32>
    %819 = arith.mulf %818, %816 : vector<16x16xf32>
    %820 = arith.addf %815, %819 : vector<16x16xf32>
    %821 = vector.extract_strided_slice %802 {offsets = [0, 0], sizes = [16, 16], strides = [1, 1]} : vector<18x16xf32> to vector<16x16xf32>
    %c1_182 = arith.constant 1 : index
    %822 = memref.load %arg4[%c1_182] : memref<162xf32, #tpu.memory_space<smem>>
    %823 = vector.broadcast %822 : f32 to vector<16x16xf32>
    %824 = arith.mulf %823, %821 : vector<16x16xf32>
    %825 = arith.addf %820, %824 : vector<16x16xf32>
    %826 = vector.extract_strided_slice %802 {offsets = [1, 0], sizes = [16, 16], strides = [1, 1]} : vector<18x16xf32> to vector<16x16xf32>
    %c4_183 = arith.constant 4 : index
    %827 = memref.load %arg4[%c4_183] : memref<162xf32, #tpu.memory_space<smem>>
    %828 = vector.broadcast %827 : f32 to vector<16x16xf32>
    %829 = arith.mulf %828, %826 : vector<16x16xf32>
    %830 = arith.addf %825, %829 : vector<16x16xf32>
    %831 = vector.extract_strided_slice %802 {offsets = [2, 0], sizes = [16, 16], strides = [1, 1]} : vector<18x16xf32> to vector<16x16xf32>
    %c7_184 = arith.constant 7 : index
    %832 = memref.load %arg4[%c7_184] : memref<162xf32, #tpu.memory_space<smem>>
    %833 = vector.broadcast %832 : f32 to vector<16x16xf32>
    %834 = arith.mulf %833, %831 : vector<16x16xf32>
    %835 = arith.addf %830, %834 : vector<16x16xf32>
    %836 = vector.extract_strided_slice %803 {offsets = [0, 0], sizes = [16, 16], strides = [1, 1]} : vector<18x16xf32> to vector<16x16xf32>
    %c2_185 = arith.constant 2 : index
    %837 = memref.load %arg4[%c2_185] : memref<162xf32, #tpu.memory_space<smem>>
    %838 = vector.broadcast %837 : f32 to vector<16x16xf32>
    %839 = arith.mulf %838, %836 : vector<16x16xf32>
    %840 = arith.addf %835, %839 : vector<16x16xf32>
    %841 = vector.extract_strided_slice %803 {offsets = [1, 0], sizes = [16, 16], strides = [1, 1]} : vector<18x16xf32> to vector<16x16xf32>
    %c5_186 = arith.constant 5 : index
    %842 = memref.load %arg4[%c5_186] : memref<162xf32, #tpu.memory_space<smem>>
    %843 = vector.broadcast %842 : f32 to vector<16x16xf32>
    %844 = arith.mulf %843, %841 : vector<16x16xf32>
    %845 = arith.addf %840, %844 : vector<16x16xf32>
    %846 = vector.extract_strided_slice %803 {offsets = [2, 0], sizes = [16, 16], strides = [1, 1]} : vector<18x16xf32> to vector<16x16xf32>
    %c8_187 = arith.constant 8 : index
    %847 = memref.load %arg4[%c8_187] : memref<162xf32, #tpu.memory_space<smem>>
    %848 = vector.broadcast %847 : f32 to vector<16x16xf32>
    %849 = arith.mulf %848, %846 : vector<16x16xf32>
    %850 = arith.addf %845, %849 : vector<16x16xf32>
    %c0_188 = arith.constant 0 : index
    %c0_189 = arith.constant 0 : index
    %c0_190 = arith.constant 0 : index
    %851 = vector.load %arg9[%c0_188, %c0_189, %c0_190] : memref<6x16x16xf32, #tpu.memory_space<vmem>>, vector<1x16x16xf32>
    %852 = vector.shape_cast %851 : vector<1x16x16xf32> to vector<16x16xf32>
    %853 = vector.shape_cast %850 : vector<16x16xf32> to vector<1x16x16xf32>
    tpu.vector_store %arg9[%c0_188, %c0_189, %c0_190], %853 {strides = array<i32>} : memref<6x16x16xf32, #tpu.memory_space<vmem>>, vector<1x16x16xf32>,
    %c1_191 = arith.constant 1 : index
    %c0_192 = arith.constant 0 : index
    %c0_193 = arith.constant 0 : index
    %854 = vector.load %arg9[%c1_191, %c0_192, %c0_193] : memref<6x16x16xf32, #tpu.memory_space<vmem>>, vector<1x16x16xf32>
    %855 = vector.shape_cast %854 : vector<1x16x16xf32> to vector<16x16xf32>
    %856 = vector.extract_strided_slice %801 {offsets = [0, 0], sizes = [16, 16], strides = [1, 1]} : vector<18x16xf32> to vector<16x16xf32>
    %c27_194 = arith.constant 27 : index
    %857 = memref.load %arg4[%c27_194] : memref<162xf32, #tpu.memory_space<smem>>
    %858 = vector.broadcast %857 : f32 to vector<16x16xf32>
    %859 = arith.mulf %858, %856 : vector<16x16xf32>
    %860 = arith.addf %855, %859 : vector<16x16xf32>
    %861 = vector.extract_strided_slice %801 {offsets = [1, 0], sizes = [16, 16], strides = [1, 1]} : vector<18x16xf32> to vector<16x16xf32>
    %c30_195 = arith.constant 30 : index
    %862 = memref.load %arg4[%c30_195] : memref<162xf32, #tpu.memory_space<smem>>
    %863 = vector.broadcast %862 : f32 to vector<16x16xf32>
    %864 = arith.mulf %863, %861 : vector<16x16xf32>
    %865 = arith.addf %860, %864 : vector<16x16xf32>
    %866 = vector.extract_strided_slice %801 {offsets = [2, 0], sizes = [16, 16], strides = [1, 1]} : vector<18x16xf32> to vector<16x16xf32>
    %c33_196 = arith.constant 33 : index
    %867 = memref.load %arg4[%c33_196] : memref<162xf32, #tpu.memory_space<smem>>
    %868 = vector.broadcast %867 : f32 to vector<16x16xf32>
    %869 = arith.mulf %868, %866 : vector<16x16xf32>
    %870 = arith.addf %865, %869 : vector<16x16xf32>
    %871 = vector.extract_strided_slice %802 {offsets = [0, 0], sizes = [16, 16], strides = [1, 1]} : vector<18x16xf32> to vector<16x16xf32>
    %c28_197 = arith.constant 28 : index
    %872 = memref.load %arg4[%c28_197] : memref<162xf32, #tpu.memory_space<smem>>
    %873 = vector.broadcast %872 : f32 to vector<16x16xf32>
    %874 = arith.mulf %873, %871 : vector<16x16xf32>
    %875 = arith.addf %870, %874 : vector<16x16xf32>
    %876 = vector.extract_strided_slice %802 {offsets = [1, 0], sizes = [16, 16], strides = [1, 1]} : vector<18x16xf32> to vector<16x16xf32>
    %c31_198 = arith.constant 31 : index
    %877 = memref.load %arg4[%c31_198] : memref<162xf32, #tpu.memory_space<smem>>
    %878 = vector.broadcast %877 : f32 to vector<16x16xf32>
    %879 = arith.mulf %878, %876 : vector<16x16xf32>
    %880 = arith.addf %875, %879 : vector<16x16xf32>
    %881 = vector.extract_strided_slice %802 {offsets = [2, 0], sizes = [16, 16], strides = [1, 1]} : vector<18x16xf32> to vector<16x16xf32>
    %c34_199 = arith.constant 34 : index
    %882 = memref.load %arg4[%c34_199] : memref<162xf32, #tpu.memory_space<smem>>
    %883 = vector.broadcast %882 : f32 to vector<16x16xf32>
    %884 = arith.mulf %883, %881 : vector<16x16xf32>
    %885 = arith.addf %880, %884 : vector<16x16xf32>
    %886 = vector.extract_strided_slice %803 {offsets = [0, 0], sizes = [16, 16], strides = [1, 1]} : vector<18x16xf32> to vector<16x16xf32>
    %c29_200 = arith.constant 29 : index
    %887 = memref.load %arg4[%c29_200] : memref<162xf32, #tpu.memory_space<smem>>
    %888 = vector.broadcast %887 : f32 to vector<16x16xf32>
    %889 = arith.mulf %888, %886 : vector<16x16xf32>
    %890 = arith.addf %885, %889 : vector<16x16xf32>
    %891 = vector.extract_strided_slice %803 {offsets = [1, 0], sizes = [16, 16], strides = [1, 1]} : vector<18x16xf32> to vector<16x16xf32>
    %c32_201 = arith.constant 32 : index
    %892 = memref.load %arg4[%c32_201] : memref<162xf32, #tpu.memory_space<smem>>
    %893 = vector.broadcast %892 : f32 to vector<16x16xf32>
    %894 = arith.mulf %893, %891 : vector<16x16xf32>
    %895 = arith.addf %890, %894 : vector<16x16xf32>
    %896 = vector.extract_strided_slice %803 {offsets = [2, 0], sizes = [16, 16], strides = [1, 1]} : vector<18x16xf32> to vector<16x16xf32>
    %c35_202 = arith.constant 35 : index
    %897 = memref.load %arg4[%c35_202] : memref<162xf32, #tpu.memory_space<smem>>
    %898 = vector.broadcast %897 : f32 to vector<16x16xf32>
    %899 = arith.mulf %898, %896 : vector<16x16xf32>
    %900 = arith.addf %895, %899 : vector<16x16xf32>
    %c1_203 = arith.constant 1 : index
    %c0_204 = arith.constant 0 : index
    %c0_205 = arith.constant 0 : index
    %901 = vector.load %arg9[%c1_203, %c0_204, %c0_205] : memref<6x16x16xf32, #tpu.memory_space<vmem>>, vector<1x16x16xf32>
    %902 = vector.shape_cast %901 : vector<1x16x16xf32> to vector<16x16xf32>
    %903 = vector.shape_cast %900 : vector<16x16xf32> to vector<1x16x16xf32>
    tpu.vector_store %arg9[%c1_203, %c0_204, %c0_205], %903 {strides = array<i32>} : memref<6x16x16xf32, #tpu.memory_space<vmem>>, vector<1x16x16xf32>,
    %c2_206 = arith.constant 2 : index
    %c0_207 = arith.constant 0 : index
    %c0_208 = arith.constant 0 : index
    %904 = vector.load %arg9[%c2_206, %c0_207, %c0_208] : memref<6x16x16xf32, #tpu.memory_space<vmem>>, vector<1x16x16xf32>
    %905 = vector.shape_cast %904 : vector<1x16x16xf32> to vector<16x16xf32>
    %906 = vector.extract_strided_slice %801 {offsets = [0, 0], sizes = [16, 16], strides = [1, 1]} : vector<18x16xf32> to vector<16x16xf32>
    %c54_209 = arith.constant 54 : index
    %907 = memref.load %arg4[%c54_209] : memref<162xf32, #tpu.memory_space<smem>>
    %908 = vector.broadcast %907 : f32 to vector<16x16xf32>
    %909 = arith.mulf %908, %906 : vector<16x16xf32>
    %910 = arith.addf %905, %909 : vector<16x16xf32>
    %911 = vector.extract_strided_slice %801 {offsets = [1, 0], sizes = [16, 16], strides = [1, 1]} : vector<18x16xf32> to vector<16x16xf32>
    %c57_210 = arith.constant 57 : index
    %912 = memref.load %arg4[%c57_210] : memref<162xf32, #tpu.memory_space<smem>>
    %913 = vector.broadcast %912 : f32 to vector<16x16xf32>
    %914 = arith.mulf %913, %911 : vector<16x16xf32>
    %915 = arith.addf %910, %914 : vector<16x16xf32>
    %916 = vector.extract_strided_slice %801 {offsets = [2, 0], sizes = [16, 16], strides = [1, 1]} : vector<18x16xf32> to vector<16x16xf32>
    %c60_211 = arith.constant 60 : index
    %917 = memref.load %arg4[%c60_211] : memref<162xf32, #tpu.memory_space<smem>>
    %918 = vector.broadcast %917 : f32 to vector<16x16xf32>
    %919 = arith.mulf %918, %916 : vector<16x16xf32>
    %920 = arith.addf %915, %919 : vector<16x16xf32>
    %921 = vector.extract_strided_slice %802 {offsets = [0, 0], sizes = [16, 16], strides = [1, 1]} : vector<18x16xf32> to vector<16x16xf32>
    %c55_212 = arith.constant 55 : index
    %922 = memref.load %arg4[%c55_212] : memref<162xf32, #tpu.memory_space<smem>>
    %923 = vector.broadcast %922 : f32 to vector<16x16xf32>
    %924 = arith.mulf %923, %921 : vector<16x16xf32>
    %925 = arith.addf %920, %924 : vector<16x16xf32>
    %926 = vector.extract_strided_slice %802 {offsets = [1, 0], sizes = [16, 16], strides = [1, 1]} : vector<18x16xf32> to vector<16x16xf32>
    %c58_213 = arith.constant 58 : index
    %927 = memref.load %arg4[%c58_213] : memref<162xf32, #tpu.memory_space<smem>>
    %928 = vector.broadcast %927 : f32 to vector<16x16xf32>
    %929 = arith.mulf %928, %926 : vector<16x16xf32>
    %930 = arith.addf %925, %929 : vector<16x16xf32>
    %931 = vector.extract_strided_slice %802 {offsets = [2, 0], sizes = [16, 16], strides = [1, 1]} : vector<18x16xf32> to vector<16x16xf32>
    %c61_214 = arith.constant 61 : index
    %932 = memref.load %arg4[%c61_214] : memref<162xf32, #tpu.memory_space<smem>>
    %933 = vector.broadcast %932 : f32 to vector<16x16xf32>
    %934 = arith.mulf %933, %931 : vector<16x16xf32>
    %935 = arith.addf %930, %934 : vector<16x16xf32>
    %936 = vector.extract_strided_slice %803 {offsets = [0, 0], sizes = [16, 16], strides = [1, 1]} : vector<18x16xf32> to vector<16x16xf32>
    %c56_215 = arith.constant 56 : index
    %937 = memref.load %arg4[%c56_215] : memref<162xf32, #tpu.memory_space<smem>>
    %938 = vector.broadcast %937 : f32 to vector<16x16xf32>
    %939 = arith.mulf %938, %936 : vector<16x16xf32>
    %940 = arith.addf %935, %939 : vector<16x16xf32>
    %941 = vector.extract_strided_slice %803 {offsets = [1, 0], sizes = [16, 16], strides = [1, 1]} : vector<18x16xf32> to vector<16x16xf32>
    %c59_216 = arith.constant 59 : index
    %942 = memref.load %arg4[%c59_216] : memref<162xf32, #tpu.memory_space<smem>>
    %943 = vector.broadcast %942 : f32 to vector<16x16xf32>
    %944 = arith.mulf %943, %941 : vector<16x16xf32>
    %945 = arith.addf %940, %944 : vector<16x16xf32>
    %946 = vector.extract_strided_slice %803 {offsets = [2, 0], sizes = [16, 16], strides = [1, 1]} : vector<18x16xf32> to vector<16x16xf32>
    %c62_217 = arith.constant 62 : index
    %947 = memref.load %arg4[%c62_217] : memref<162xf32, #tpu.memory_space<smem>>
    %948 = vector.broadcast %947 : f32 to vector<16x16xf32>
    %949 = arith.mulf %948, %946 : vector<16x16xf32>
    %950 = arith.addf %945, %949 : vector<16x16xf32>
    %c2_218 = arith.constant 2 : index
    %c0_219 = arith.constant 0 : index
    %c0_220 = arith.constant 0 : index
    %951 = vector.load %arg9[%c2_218, %c0_219, %c0_220] : memref<6x16x16xf32, #tpu.memory_space<vmem>>, vector<1x16x16xf32>
    %952 = vector.shape_cast %951 : vector<1x16x16xf32> to vector<16x16xf32>
    %953 = vector.shape_cast %950 : vector<16x16xf32> to vector<1x16x16xf32>
    tpu.vector_store %arg9[%c2_218, %c0_219, %c0_220], %953 {strides = array<i32>} : memref<6x16x16xf32, #tpu.memory_space<vmem>>, vector<1x16x16xf32>,
    %c3_221 = arith.constant 3 : index
    %c0_222 = arith.constant 0 : index
    %c0_223 = arith.constant 0 : index
    %954 = vector.load %arg9[%c3_221, %c0_222, %c0_223] : memref<6x16x16xf32, #tpu.memory_space<vmem>>, vector<1x16x16xf32>
    %955 = vector.shape_cast %954 : vector<1x16x16xf32> to vector<16x16xf32>
    %956 = vector.extract_strided_slice %801 {offsets = [0, 0], sizes = [16, 16], strides = [1, 1]} : vector<18x16xf32> to vector<16x16xf32>
    %c81_224 = arith.constant 81 : index
    %957 = memref.load %arg4[%c81_224] : memref<162xf32, #tpu.memory_space<smem>>
    %958 = vector.broadcast %957 : f32 to vector<16x16xf32>
    %959 = arith.mulf %958, %956 : vector<16x16xf32>
    %960 = arith.addf %955, %959 : vector<16x16xf32>
    %961 = vector.extract_strided_slice %801 {offsets = [1, 0], sizes = [16, 16], strides = [1, 1]} : vector<18x16xf32> to vector<16x16xf32>
    %c84_225 = arith.constant 84 : index
    %962 = memref.load %arg4[%c84_225] : memref<162xf32, #tpu.memory_space<smem>>
    %963 = vector.broadcast %962 : f32 to vector<16x16xf32>
    %964 = arith.mulf %963, %961 : vector<16x16xf32>
    %965 = arith.addf %960, %964 : vector<16x16xf32>
    %966 = vector.extract_strided_slice %801 {offsets = [2, 0], sizes = [16, 16], strides = [1, 1]} : vector<18x16xf32> to vector<16x16xf32>
    %c87_226 = arith.constant 87 : index
    %967 = memref.load %arg4[%c87_226] : memref<162xf32, #tpu.memory_space<smem>>
    %968 = vector.broadcast %967 : f32 to vector<16x16xf32>
    %969 = arith.mulf %968, %966 : vector<16x16xf32>
    %970 = arith.addf %965, %969 : vector<16x16xf32>
    %971 = vector.extract_strided_slice %802 {offsets = [0, 0], sizes = [16, 16], strides = [1, 1]} : vector<18x16xf32> to vector<16x16xf32>
    %c82_227 = arith.constant 82 : index
    %972 = memref.load %arg4[%c82_227] : memref<162xf32, #tpu.memory_space<smem>>
    %973 = vector.broadcast %972 : f32 to vector<16x16xf32>
    %974 = arith.mulf %973, %971 : vector<16x16xf32>
    %975 = arith.addf %970, %974 : vector<16x16xf32>
    %976 = vector.extract_strided_slice %802 {offsets = [1, 0], sizes = [16, 16], strides = [1, 1]} : vector<18x16xf32> to vector<16x16xf32>
    %c85_228 = arith.constant 85 : index
    %977 = memref.load %arg4[%c85_228] : memref<162xf32, #tpu.memory_space<smem>>
    %978 = vector.broadcast %977 : f32 to vector<16x16xf32>
    %979 = arith.mulf %978, %976 : vector<16x16xf32>
    %980 = arith.addf %975, %979 : vector<16x16xf32>
    %981 = vector.extract_strided_slice %802 {offsets = [2, 0], sizes = [16, 16], strides = [1, 1]} : vector<18x16xf32> to vector<16x16xf32>
    %c88_229 = arith.constant 88 : index
    %982 = memref.load %arg4[%c88_229] : memref<162xf32, #tpu.memory_space<smem>>
    %983 = vector.broadcast %982 : f32 to vector<16x16xf32>
    %984 = arith.mulf %983, %981 : vector<16x16xf32>
    %985 = arith.addf %980, %984 : vector<16x16xf32>
    %986 = vector.extract_strided_slice %803 {offsets = [0, 0], sizes = [16, 16], strides = [1, 1]} : vector<18x16xf32> to vector<16x16xf32>
    %c83_230 = arith.constant 83 : index
    %987 = memref.load %arg4[%c83_230] : memref<162xf32, #tpu.memory_space<smem>>
    %988 = vector.broadcast %987 : f32 to vector<16x16xf32>
    %989 = arith.mulf %988, %986 : vector<16x16xf32>
    %990 = arith.addf %985, %989 : vector<16x16xf32>
    %991 = vector.extract_strided_slice %803 {offsets = [1, 0], sizes = [16, 16], strides = [1, 1]} : vector<18x16xf32> to vector<16x16xf32>
    %c86_231 = arith.constant 86 : index
    %992 = memref.load %arg4[%c86_231] : memref<162xf32, #tpu.memory_space<smem>>
    %993 = vector.broadcast %992 : f32 to vector<16x16xf32>
    %994 = arith.mulf %993, %991 : vector<16x16xf32>
    %995 = arith.addf %990, %994 : vector<16x16xf32>
    %996 = vector.extract_strided_slice %803 {offsets = [2, 0], sizes = [16, 16], strides = [1, 1]} : vector<18x16xf32> to vector<16x16xf32>
    %c89_232 = arith.constant 89 : index
    %997 = memref.load %arg4[%c89_232] : memref<162xf32, #tpu.memory_space<smem>>
    %998 = vector.broadcast %997 : f32 to vector<16x16xf32>
    %999 = arith.mulf %998, %996 : vector<16x16xf32>
    %1000 = arith.addf %995, %999 : vector<16x16xf32>
    %c3_233 = arith.constant 3 : index
    %c0_234 = arith.constant 0 : index
    %c0_235 = arith.constant 0 : index
    %1001 = vector.load %arg9[%c3_233, %c0_234, %c0_235] : memref<6x16x16xf32, #tpu.memory_space<vmem>>, vector<1x16x16xf32>
    %1002 = vector.shape_cast %1001 : vector<1x16x16xf32> to vector<16x16xf32>
    %1003 = vector.shape_cast %1000 : vector<16x16xf32> to vector<1x16x16xf32>
    tpu.vector_store %arg9[%c3_233, %c0_234, %c0_235], %1003 {strides = array<i32>} : memref<6x16x16xf32, #tpu.memory_space<vmem>>, vector<1x16x16xf32>,
    %c4_236 = arith.constant 4 : index
    %c0_237 = arith.constant 0 : index
    %c0_238 = arith.constant 0 : index
    %1004 = vector.load %arg9[%c4_236, %c0_237, %c0_238] : memref<6x16x16xf32, #tpu.memory_space<vmem>>, vector<1x16x16xf32>
    %1005 = vector.shape_cast %1004 : vector<1x16x16xf32> to vector<16x16xf32>
    %1006 = vector.extract_strided_slice %801 {offsets = [0, 0], sizes = [16, 16], strides = [1, 1]} : vector<18x16xf32> to vector<16x16xf32>
    %c108 = arith.constant 108 : index
    %1007 = memref.load %arg4[%c108] : memref<162xf32, #tpu.memory_space<smem>>
    %1008 = vector.broadcast %1007 : f32 to vector<16x16xf32>
    %1009 = arith.mulf %1008, %1006 : vector<16x16xf32>
    %1010 = arith.addf %1005, %1009 : vector<16x16xf32>
    %1011 = vector.extract_strided_slice %801 {offsets = [1, 0], sizes = [16, 16], strides = [1, 1]} : vector<18x16xf32> to vector<16x16xf32>
    %c111 = arith.constant 111 : index
    %1012 = memref.load %arg4[%c111] : memref<162xf32, #tpu.memory_space<smem>>
    %1013 = vector.broadcast %1012 : f32 to vector<16x16xf32>
    %1014 = arith.mulf %1013, %1011 : vector<16x16xf32>
    %1015 = arith.addf %1010, %1014 : vector<16x16xf32>
    %1016 = vector.extract_strided_slice %801 {offsets = [2, 0], sizes = [16, 16], strides = [1, 1]} : vector<18x16xf32> to vector<16x16xf32>
    %c114 = arith.constant 114 : index
    %1017 = memref.load %arg4[%c114] : memref<162xf32, #tpu.memory_space<smem>>
    %1018 = vector.broadcast %1017 : f32 to vector<16x16xf32>
    %1019 = arith.mulf %1018, %1016 : vector<16x16xf32>
    %1020 = arith.addf %1015, %1019 : vector<16x16xf32>
    %1021 = vector.extract_strided_slice %802 {offsets = [0, 0], sizes = [16, 16], strides = [1, 1]} : vector<18x16xf32> to vector<16x16xf32>
    %c109 = arith.constant 109 : index
    %1022 = memref.load %arg4[%c109] : memref<162xf32, #tpu.memory_space<smem>>
    %1023 = vector.broadcast %1022 : f32 to vector<16x16xf32>
    %1024 = arith.mulf %1023, %1021 : vector<16x16xf32>
    %1025 = arith.addf %1020, %1024 : vector<16x16xf32>
    %1026 = vector.extract_strided_slice %802 {offsets = [1, 0], sizes = [16, 16], strides = [1, 1]} : vector<18x16xf32> to vector<16x16xf32>
    %c112 = arith.constant 112 : index
    %1027 = memref.load %arg4[%c112] : memref<162xf32, #tpu.memory_space<smem>>
    %1028 = vector.broadcast %1027 : f32 to vector<16x16xf32>
    %1029 = arith.mulf %1028, %1026 : vector<16x16xf32>
    %1030 = arith.addf %1025, %1029 : vector<16x16xf32>
    %1031 = vector.extract_strided_slice %802 {offsets = [2, 0], sizes = [16, 16], strides = [1, 1]} : vector<18x16xf32> to vector<16x16xf32>
    %c115 = arith.constant 115 : index
    %1032 = memref.load %arg4[%c115] : memref<162xf32, #tpu.memory_space<smem>>
    %1033 = vector.broadcast %1032 : f32 to vector<16x16xf32>
    %1034 = arith.mulf %1033, %1031 : vector<16x16xf32>
    %1035 = arith.addf %1030, %1034 : vector<16x16xf32>
    %1036 = vector.extract_strided_slice %803 {offsets = [0, 0], sizes = [16, 16], strides = [1, 1]} : vector<18x16xf32> to vector<16x16xf32>
    %c110 = arith.constant 110 : index
    %1037 = memref.load %arg4[%c110] : memref<162xf32, #tpu.memory_space<smem>>
    %1038 = vector.broadcast %1037 : f32 to vector<16x16xf32>
    %1039 = arith.mulf %1038, %1036 : vector<16x16xf32>
    %1040 = arith.addf %1035, %1039 : vector<16x16xf32>
    %1041 = vector.extract_strided_slice %803 {offsets = [1, 0], sizes = [16, 16], strides = [1, 1]} : vector<18x16xf32> to vector<16x16xf32>
    %c113 = arith.constant 113 : index
    %1042 = memref.load %arg4[%c113] : memref<162xf32, #tpu.memory_space<smem>>
    %1043 = vector.broadcast %1042 : f32 to vector<16x16xf32>
    %1044 = arith.mulf %1043, %1041 : vector<16x16xf32>
    %1045 = arith.addf %1040, %1044 : vector<16x16xf32>
    %1046 = vector.extract_strided_slice %803 {offsets = [2, 0], sizes = [16, 16], strides = [1, 1]} : vector<18x16xf32> to vector<16x16xf32>
    %c116 = arith.constant 116 : index
    %1047 = memref.load %arg4[%c116] : memref<162xf32, #tpu.memory_space<smem>>
    %1048 = vector.broadcast %1047 : f32 to vector<16x16xf32>
    %1049 = arith.mulf %1048, %1046 : vector<16x16xf32>
    %1050 = arith.addf %1045, %1049 : vector<16x16xf32>
    %c4_239 = arith.constant 4 : index
    %c0_240 = arith.constant 0 : index
    %c0_241 = arith.constant 0 : index
    %1051 = vector.load %arg9[%c4_239, %c0_240, %c0_241] : memref<6x16x16xf32, #tpu.memory_space<vmem>>, vector<1x16x16xf32>
    %1052 = vector.shape_cast %1051 : vector<1x16x16xf32> to vector<16x16xf32>
    %1053 = vector.shape_cast %1050 : vector<16x16xf32> to vector<1x16x16xf32>
    tpu.vector_store %arg9[%c4_239, %c0_240, %c0_241], %1053 {strides = array<i32>} : memref<6x16x16xf32, #tpu.memory_space<vmem>>, vector<1x16x16xf32>,
    %c5_242 = arith.constant 5 : index
    %c0_243 = arith.constant 0 : index
    %c0_244 = arith.constant 0 : index
    %1054 = vector.load %arg9[%c5_242, %c0_243, %c0_244] : memref<6x16x16xf32, #tpu.memory_space<vmem>>, vector<1x16x16xf32>
    %1055 = vector.shape_cast %1054 : vector<1x16x16xf32> to vector<16x16xf32>
    %1056 = vector.extract_strided_slice %801 {offsets = [0, 0], sizes = [16, 16], strides = [1, 1]} : vector<18x16xf32> to vector<16x16xf32>
    %c135 = arith.constant 135 : index
    %1057 = memref.load %arg4[%c135] : memref<162xf32, #tpu.memory_space<smem>>
    %1058 = vector.broadcast %1057 : f32 to vector<16x16xf32>
    %1059 = arith.mulf %1058, %1056 : vector<16x16xf32>
    %1060 = arith.addf %1055, %1059 : vector<16x16xf32>
    %1061 = vector.extract_strided_slice %801 {offsets = [1, 0], sizes = [16, 16], strides = [1, 1]} : vector<18x16xf32> to vector<16x16xf32>
    %c138 = arith.constant 138 : index
    %1062 = memref.load %arg4[%c138] : memref<162xf32, #tpu.memory_space<smem>>
    %1063 = vector.broadcast %1062 : f32 to vector<16x16xf32>
    %1064 = arith.mulf %1063, %1061 : vector<16x16xf32>
    %1065 = arith.addf %1060, %1064 : vector<16x16xf32>
    %1066 = vector.extract_strided_slice %801 {offsets = [2, 0], sizes = [16, 16], strides = [1, 1]} : vector<18x16xf32> to vector<16x16xf32>
    %c141 = arith.constant 141 : index
    %1067 = memref.load %arg4[%c141] : memref<162xf32, #tpu.memory_space<smem>>
    %1068 = vector.broadcast %1067 : f32 to vector<16x16xf32>
    %1069 = arith.mulf %1068, %1066 : vector<16x16xf32>
    %1070 = arith.addf %1065, %1069 : vector<16x16xf32>
    %1071 = vector.extract_strided_slice %802 {offsets = [0, 0], sizes = [16, 16], strides = [1, 1]} : vector<18x16xf32> to vector<16x16xf32>
    %c136 = arith.constant 136 : index
    %1072 = memref.load %arg4[%c136] : memref<162xf32, #tpu.memory_space<smem>>
    %1073 = vector.broadcast %1072 : f32 to vector<16x16xf32>
    %1074 = arith.mulf %1073, %1071 : vector<16x16xf32>
    %1075 = arith.addf %1070, %1074 : vector<16x16xf32>
    %1076 = vector.extract_strided_slice %802 {offsets = [1, 0], sizes = [16, 16], strides = [1, 1]} : vector<18x16xf32> to vector<16x16xf32>
    %c139 = arith.constant 139 : index
    %1077 = memref.load %arg4[%c139] : memref<162xf32, #tpu.memory_space<smem>>
    %1078 = vector.broadcast %1077 : f32 to vector<16x16xf32>
    %1079 = arith.mulf %1078, %1076 : vector<16x16xf32>
    %1080 = arith.addf %1075, %1079 : vector<16x16xf32>
    %1081 = vector.extract_strided_slice %802 {offsets = [2, 0], sizes = [16, 16], strides = [1, 1]} : vector<18x16xf32> to vector<16x16xf32>
    %c142 = arith.constant 142 : index
    %1082 = memref.load %arg4[%c142] : memref<162xf32, #tpu.memory_space<smem>>
    %1083 = vector.broadcast %1082 : f32 to vector<16x16xf32>
    %1084 = arith.mulf %1083, %1081 : vector<16x16xf32>
    %1085 = arith.addf %1080, %1084 : vector<16x16xf32>
    %1086 = vector.extract_strided_slice %803 {offsets = [0, 0], sizes = [16, 16], strides = [1, 1]} : vector<18x16xf32> to vector<16x16xf32>
    %c137 = arith.constant 137 : index
    %1087 = memref.load %arg4[%c137] : memref<162xf32, #tpu.memory_space<smem>>
    %1088 = vector.broadcast %1087 : f32 to vector<16x16xf32>
    %1089 = arith.mulf %1088, %1086 : vector<16x16xf32>
    %1090 = arith.addf %1085, %1089 : vector<16x16xf32>
    %1091 = vector.extract_strided_slice %803 {offsets = [1, 0], sizes = [16, 16], strides = [1, 1]} : vector<18x16xf32> to vector<16x16xf32>
    %c140 = arith.constant 140 : index
    %1092 = memref.load %arg4[%c140] : memref<162xf32, #tpu.memory_space<smem>>
    %1093 = vector.broadcast %1092 : f32 to vector<16x16xf32>
    %1094 = arith.mulf %1093, %1091 : vector<16x16xf32>
    %1095 = arith.addf %1090, %1094 : vector<16x16xf32>
    %1096 = vector.extract_strided_slice %803 {offsets = [2, 0], sizes = [16, 16], strides = [1, 1]} : vector<18x16xf32> to vector<16x16xf32>
    %c143 = arith.constant 143 : index
    %1097 = memref.load %arg4[%c143] : memref<162xf32, #tpu.memory_space<smem>>
    %1098 = vector.broadcast %1097 : f32 to vector<16x16xf32>
    %1099 = arith.mulf %1098, %1096 : vector<16x16xf32>
    %1100 = arith.addf %1095, %1099 : vector<16x16xf32>
    %c5_245 = arith.constant 5 : index
    %c0_246 = arith.constant 0 : index
    %c0_247 = arith.constant 0 : index
    %1101 = vector.load %arg9[%c5_245, %c0_246, %c0_247] : memref<6x16x16xf32, #tpu.memory_space<vmem>>, vector<1x16x16xf32>
    %1102 = vector.shape_cast %1101 : vector<1x16x16xf32> to vector<16x16xf32>
    %1103 = vector.shape_cast %1100 : vector<16x16xf32> to vector<1x16x16xf32>
    tpu.vector_store %arg9[%c5_245, %c0_246, %c0_247], %1103 {strides = array<i32>} : memref<6x16x16xf32, #tpu.memory_space<vmem>>, vector<1x16x16xf32>,
    %c1_248 = arith.constant 1 : index
    %c0_249 = arith.constant 0 : index
    %c0_250 = arith.constant 0 : index
    %1104 = vector.load %arg8[%c1_248, %c0_249, %c0_250] : memref<3x16x16xf32, #tpu.memory_space<vmem>>, vector<1x16x16xf32>
    %1105 = vector.shape_cast %1104 : vector<1x16x16xf32> to vector<16x16xf32>
    %1106 = vector.extract_strided_slice %1105 {offsets = [1, 0], sizes = [1, 16], strides = [1, 1]} : vector<16x16xf32> to vector<1x16xf32>
    %1107 = vector.extract_strided_slice %1105 {offsets = [14, 0], sizes = [1, 16], strides = [1, 1]} : vector<16x16xf32> to vector<1x16xf32>
    %1108 = tpu.concatenate %1106, %1105, %1107 in 0 : vector<1x16xf32>, vector<16x16xf32>, vector<1x16xf32> -> vector<18x16xf32>
    %1109 = vector.extract_strided_slice %1108 {offsets = [0, 1], sizes = [18, 1], strides = [1, 1]} : vector<18x16xf32> to vector<18x1xf32>
    %1110 = vector.extract_strided_slice %1108 {offsets = [0, 14], sizes = [18, 1], strides = [1, 1]} : vector<18x16xf32> to vector<18x1xf32>
    %1111 = tpu.concatenate %1109, %1108, %1110 in 1 : vector<18x1xf32>, vector<18x16xf32>, vector<18x1xf32> -> vector<18x18xf32>
    %1112 = vector.extract_strided_slice %1111 {offsets = [0, 0], sizes = [18, 16], strides = [1, 1]} : vector<18x18xf32> to vector<18x16xf32>
    %1113 = vector.extract_strided_slice %1111 {offsets = [0, 1], sizes = [18, 16], strides = [1, 1]} : vector<18x18xf32> to vector<18x16xf32>
    %1114 = vector.extract_strided_slice %1111 {offsets = [0, 2], sizes = [18, 16], strides = [1, 1]} : vector<18x18xf32> to vector<18x16xf32>
    %c0_251 = arith.constant 0 : index
    %c0_252 = arith.constant 0 : index
    %c0_253 = arith.constant 0 : index
    %1115 = vector.load %arg9[%c0_251, %c0_252, %c0_253] : memref<6x16x16xf32, #tpu.memory_space<vmem>>, vector<1x16x16xf32>
    %1116 = vector.shape_cast %1115 : vector<1x16x16xf32> to vector<16x16xf32>
    %1117 = vector.extract_strided_slice %1112 {offsets = [0, 0], sizes = [16, 16], strides = [1, 1]} : vector<18x16xf32> to vector<16x16xf32>
    %c9_254 = arith.constant 9 : index
    %1118 = memref.load %arg4[%c9_254] : memref<162xf32, #tpu.memory_space<smem>>
    %1119 = vector.broadcast %1118 : f32 to vector<16x16xf32>
    %1120 = arith.mulf %1119, %1117 : vector<16x16xf32>
    %1121 = arith.addf %1116, %1120 : vector<16x16xf32>
    %1122 = vector.extract_strided_slice %1112 {offsets = [1, 0], sizes = [16, 16], strides = [1, 1]} : vector<18x16xf32> to vector<16x16xf32>
    %c12_255 = arith.constant 12 : index
    %1123 = memref.load %arg4[%c12_255] : memref<162xf32, #tpu.memory_space<smem>>
    %1124 = vector.broadcast %1123 : f32 to vector<16x16xf32>
    %1125 = arith.mulf %1124, %1122 : vector<16x16xf32>
    %1126 = arith.addf %1121, %1125 : vector<16x16xf32>
    %1127 = vector.extract_strided_slice %1112 {offsets = [2, 0], sizes = [16, 16], strides = [1, 1]} : vector<18x16xf32> to vector<16x16xf32>
    %c15_256 = arith.constant 15 : index
    %1128 = memref.load %arg4[%c15_256] : memref<162xf32, #tpu.memory_space<smem>>
    %1129 = vector.broadcast %1128 : f32 to vector<16x16xf32>
    %1130 = arith.mulf %1129, %1127 : vector<16x16xf32>
    %1131 = arith.addf %1126, %1130 : vector<16x16xf32>
    %1132 = vector.extract_strided_slice %1113 {offsets = [0, 0], sizes = [16, 16], strides = [1, 1]} : vector<18x16xf32> to vector<16x16xf32>
    %c10_257 = arith.constant 10 : index
    %1133 = memref.load %arg4[%c10_257] : memref<162xf32, #tpu.memory_space<smem>>
    %1134 = vector.broadcast %1133 : f32 to vector<16x16xf32>
    %1135 = arith.mulf %1134, %1132 : vector<16x16xf32>
    %1136 = arith.addf %1131, %1135 : vector<16x16xf32>
    %1137 = vector.extract_strided_slice %1113 {offsets = [1, 0], sizes = [16, 16], strides = [1, 1]} : vector<18x16xf32> to vector<16x16xf32>
    %c13_258 = arith.constant 13 : index
    %1138 = memref.load %arg4[%c13_258] : memref<162xf32, #tpu.memory_space<smem>>
    %1139 = vector.broadcast %1138 : f32 to vector<16x16xf32>
    %1140 = arith.mulf %1139, %1137 : vector<16x16xf32>
    %1141 = arith.addf %1136, %1140 : vector<16x16xf32>
    %1142 = vector.extract_strided_slice %1113 {offsets = [2, 0], sizes = [16, 16], strides = [1, 1]} : vector<18x16xf32> to vector<16x16xf32>
    %c16_259 = arith.constant 16 : index
    %1143 = memref.load %arg4[%c16_259] : memref<162xf32, #tpu.memory_space<smem>>
    %1144 = vector.broadcast %1143 : f32 to vector<16x16xf32>
    %1145 = arith.mulf %1144, %1142 : vector<16x16xf32>
    %1146 = arith.addf %1141, %1145 : vector<16x16xf32>
    %1147 = vector.extract_strided_slice %1114 {offsets = [0, 0], sizes = [16, 16], strides = [1, 1]} : vector<18x16xf32> to vector<16x16xf32>
    %c11_260 = arith.constant 11 : index
    %1148 = memref.load %arg4[%c11_260] : memref<162xf32, #tpu.memory_space<smem>>
    %1149 = vector.broadcast %1148 : f32 to vector<16x16xf32>
    %1150 = arith.mulf %1149, %1147 : vector<16x16xf32>
    %1151 = arith.addf %1146, %1150 : vector<16x16xf32>
    %1152 = vector.extract_strided_slice %1114 {offsets = [1, 0], sizes = [16, 16], strides = [1, 1]} : vector<18x16xf32> to vector<16x16xf32>
    %c14_261 = arith.constant 14 : index
    %1153 = memref.load %arg4[%c14_261] : memref<162xf32, #tpu.memory_space<smem>>
    %1154 = vector.broadcast %1153 : f32 to vector<16x16xf32>
    %1155 = arith.mulf %1154, %1152 : vector<16x16xf32>
    %1156 = arith.addf %1151, %1155 : vector<16x16xf32>
    %1157 = vector.extract_strided_slice %1114 {offsets = [2, 0], sizes = [16, 16], strides = [1, 1]} : vector<18x16xf32> to vector<16x16xf32>
    %c17_262 = arith.constant 17 : index
    %1158 = memref.load %arg4[%c17_262] : memref<162xf32, #tpu.memory_space<smem>>
    %1159 = vector.broadcast %1158 : f32 to vector<16x16xf32>
    %1160 = arith.mulf %1159, %1157 : vector<16x16xf32>
    %1161 = arith.addf %1156, %1160 : vector<16x16xf32>
    %c0_263 = arith.constant 0 : index
    %c0_264 = arith.constant 0 : index
    %c0_265 = arith.constant 0 : index
    %1162 = vector.load %arg9[%c0_263, %c0_264, %c0_265] : memref<6x16x16xf32, #tpu.memory_space<vmem>>, vector<1x16x16xf32>
    %1163 = vector.shape_cast %1162 : vector<1x16x16xf32> to vector<16x16xf32>
    %1164 = vector.shape_cast %1161 : vector<16x16xf32> to vector<1x16x16xf32>
    tpu.vector_store %arg9[%c0_263, %c0_264, %c0_265], %1164 {strides = array<i32>} : memref<6x16x16xf32, #tpu.memory_space<vmem>>, vector<1x16x16xf32>,
    %c1_266 = arith.constant 1 : index
    %c0_267 = arith.constant 0 : index
    %c0_268 = arith.constant 0 : index
    %1165 = vector.load %arg9[%c1_266, %c0_267, %c0_268] : memref<6x16x16xf32, #tpu.memory_space<vmem>>, vector<1x16x16xf32>
    %1166 = vector.shape_cast %1165 : vector<1x16x16xf32> to vector<16x16xf32>
    %1167 = vector.extract_strided_slice %1112 {offsets = [0, 0], sizes = [16, 16], strides = [1, 1]} : vector<18x16xf32> to vector<16x16xf32>
    %c36_269 = arith.constant 36 : index
    %1168 = memref.load %arg4[%c36_269] : memref<162xf32, #tpu.memory_space<smem>>
    %1169 = vector.broadcast %1168 : f32 to vector<16x16xf32>
    %1170 = arith.mulf %1169, %1167 : vector<16x16xf32>
    %1171 = arith.addf %1166, %1170 : vector<16x16xf32>
    %1172 = vector.extract_strided_slice %1112 {offsets = [1, 0], sizes = [16, 16], strides = [1, 1]} : vector<18x16xf32> to vector<16x16xf32>
    %c39_270 = arith.constant 39 : index
    %1173 = memref.load %arg4[%c39_270] : memref<162xf32, #tpu.memory_space<smem>>
    %1174 = vector.broadcast %1173 : f32 to vector<16x16xf32>
    %1175 = arith.mulf %1174, %1172 : vector<16x16xf32>
    %1176 = arith.addf %1171, %1175 : vector<16x16xf32>
    %1177 = vector.extract_strided_slice %1112 {offsets = [2, 0], sizes = [16, 16], strides = [1, 1]} : vector<18x16xf32> to vector<16x16xf32>
    %c42_271 = arith.constant 42 : index
    %1178 = memref.load %arg4[%c42_271] : memref<162xf32, #tpu.memory_space<smem>>
    %1179 = vector.broadcast %1178 : f32 to vector<16x16xf32>
    %1180 = arith.mulf %1179, %1177 : vector<16x16xf32>
    %1181 = arith.addf %1176, %1180 : vector<16x16xf32>
    %1182 = vector.extract_strided_slice %1113 {offsets = [0, 0], sizes = [16, 16], strides = [1, 1]} : vector<18x16xf32> to vector<16x16xf32>
    %c37_272 = arith.constant 37 : index
    %1183 = memref.load %arg4[%c37_272] : memref<162xf32, #tpu.memory_space<smem>>
    %1184 = vector.broadcast %1183 : f32 to vector<16x16xf32>
    %1185 = arith.mulf %1184, %1182 : vector<16x16xf32>
    %1186 = arith.addf %1181, %1185 : vector<16x16xf32>
    %1187 = vector.extract_strided_slice %1113 {offsets = [1, 0], sizes = [16, 16], strides = [1, 1]} : vector<18x16xf32> to vector<16x16xf32>
    %c40_273 = arith.constant 40 : index
    %1188 = memref.load %arg4[%c40_273] : memref<162xf32, #tpu.memory_space<smem>>
    %1189 = vector.broadcast %1188 : f32 to vector<16x16xf32>
    %1190 = arith.mulf %1189, %1187 : vector<16x16xf32>
    %1191 = arith.addf %1186, %1190 : vector<16x16xf32>
    %1192 = vector.extract_strided_slice %1113 {offsets = [2, 0], sizes = [16, 16], strides = [1, 1]} : vector<18x16xf32> to vector<16x16xf32>
    %c43_274 = arith.constant 43 : index
    %1193 = memref.load %arg4[%c43_274] : memref<162xf32, #tpu.memory_space<smem>>
    %1194 = vector.broadcast %1193 : f32 to vector<16x16xf32>
    %1195 = arith.mulf %1194, %1192 : vector<16x16xf32>
    %1196 = arith.addf %1191, %1195 : vector<16x16xf32>
    %1197 = vector.extract_strided_slice %1114 {offsets = [0, 0], sizes = [16, 16], strides = [1, 1]} : vector<18x16xf32> to vector<16x16xf32>
    %c38_275 = arith.constant 38 : index
    %1198 = memref.load %arg4[%c38_275] : memref<162xf32, #tpu.memory_space<smem>>
    %1199 = vector.broadcast %1198 : f32 to vector<16x16xf32>
    %1200 = arith.mulf %1199, %1197 : vector<16x16xf32>
    %1201 = arith.addf %1196, %1200 : vector<16x16xf32>
    %1202 = vector.extract_strided_slice %1114 {offsets = [1, 0], sizes = [16, 16], strides = [1, 1]} : vector<18x16xf32> to vector<16x16xf32>
    %c41_276 = arith.constant 41 : index
    %1203 = memref.load %arg4[%c41_276] : memref<162xf32, #tpu.memory_space<smem>>
    %1204 = vector.broadcast %1203 : f32 to vector<16x16xf32>
    %1205 = arith.mulf %1204, %1202 : vector<16x16xf32>
    %1206 = arith.addf %1201, %1205 : vector<16x16xf32>
    %1207 = vector.extract_strided_slice %1114 {offsets = [2, 0], sizes = [16, 16], strides = [1, 1]} : vector<18x16xf32> to vector<16x16xf32>
    %c44_277 = arith.constant 44 : index
    %1208 = memref.load %arg4[%c44_277] : memref<162xf32, #tpu.memory_space<smem>>
    %1209 = vector.broadcast %1208 : f32 to vector<16x16xf32>
    %1210 = arith.mulf %1209, %1207 : vector<16x16xf32>
    %1211 = arith.addf %1206, %1210 : vector<16x16xf32>
    %c1_278 = arith.constant 1 : index
    %c0_279 = arith.constant 0 : index
    %c0_280 = arith.constant 0 : index
    %1212 = vector.load %arg9[%c1_278, %c0_279, %c0_280] : memref<6x16x16xf32, #tpu.memory_space<vmem>>, vector<1x16x16xf32>
    %1213 = vector.shape_cast %1212 : vector<1x16x16xf32> to vector<16x16xf32>
    %1214 = vector.shape_cast %1211 : vector<16x16xf32> to vector<1x16x16xf32>
    tpu.vector_store %arg9[%c1_278, %c0_279, %c0_280], %1214 {strides = array<i32>} : memref<6x16x16xf32, #tpu.memory_space<vmem>>, vector<1x16x16xf32>,
    %c2_281 = arith.constant 2 : index
    %c0_282 = arith.constant 0 : index
    %c0_283 = arith.constant 0 : index
    %1215 = vector.load %arg9[%c2_281, %c0_282, %c0_283] : memref<6x16x16xf32, #tpu.memory_space<vmem>>, vector<1x16x16xf32>
    %1216 = vector.shape_cast %1215 : vector<1x16x16xf32> to vector<16x16xf32>
    %1217 = vector.extract_strided_slice %1112 {offsets = [0, 0], sizes = [16, 16], strides = [1, 1]} : vector<18x16xf32> to vector<16x16xf32>
    %c63_284 = arith.constant 63 : index
    %1218 = memref.load %arg4[%c63_284] : memref<162xf32, #tpu.memory_space<smem>>
    %1219 = vector.broadcast %1218 : f32 to vector<16x16xf32>
    %1220 = arith.mulf %1219, %1217 : vector<16x16xf32>
    %1221 = arith.addf %1216, %1220 : vector<16x16xf32>
    %1222 = vector.extract_strided_slice %1112 {offsets = [1, 0], sizes = [16, 16], strides = [1, 1]} : vector<18x16xf32> to vector<16x16xf32>
    %c66_285 = arith.constant 66 : index
    %1223 = memref.load %arg4[%c66_285] : memref<162xf32, #tpu.memory_space<smem>>
    %1224 = vector.broadcast %1223 : f32 to vector<16x16xf32>
    %1225 = arith.mulf %1224, %1222 : vector<16x16xf32>
    %1226 = arith.addf %1221, %1225 : vector<16x16xf32>
    %1227 = vector.extract_strided_slice %1112 {offsets = [2, 0], sizes = [16, 16], strides = [1, 1]} : vector<18x16xf32> to vector<16x16xf32>
    %c69_286 = arith.constant 69 : index
    %1228 = memref.load %arg4[%c69_286] : memref<162xf32, #tpu.memory_space<smem>>
    %1229 = vector.broadcast %1228 : f32 to vector<16x16xf32>
    %1230 = arith.mulf %1229, %1227 : vector<16x16xf32>
    %1231 = arith.addf %1226, %1230 : vector<16x16xf32>
    %1232 = vector.extract_strided_slice %1113 {offsets = [0, 0], sizes = [16, 16], strides = [1, 1]} : vector<18x16xf32> to vector<16x16xf32>
    %c64_287 = arith.constant 64 : index
    %1233 = memref.load %arg4[%c64_287] : memref<162xf32, #tpu.memory_space<smem>>
    %1234 = vector.broadcast %1233 : f32 to vector<16x16xf32>
    %1235 = arith.mulf %1234, %1232 : vector<16x16xf32>
    %1236 = arith.addf %1231, %1235 : vector<16x16xf32>
    %1237 = vector.extract_strided_slice %1113 {offsets = [1, 0], sizes = [16, 16], strides = [1, 1]} : vector<18x16xf32> to vector<16x16xf32>
    %c67_288 = arith.constant 67 : index
    %1238 = memref.load %arg4[%c67_288] : memref<162xf32, #tpu.memory_space<smem>>
    %1239 = vector.broadcast %1238 : f32 to vector<16x16xf32>
    %1240 = arith.mulf %1239, %1237 : vector<16x16xf32>
    %1241 = arith.addf %1236, %1240 : vector<16x16xf32>
    %1242 = vector.extract_strided_slice %1113 {offsets = [2, 0], sizes = [16, 16], strides = [1, 1]} : vector<18x16xf32> to vector<16x16xf32>
    %c70_289 = arith.constant 70 : index
    %1243 = memref.load %arg4[%c70_289] : memref<162xf32, #tpu.memory_space<smem>>
    %1244 = vector.broadcast %1243 : f32 to vector<16x16xf32>
    %1245 = arith.mulf %1244, %1242 : vector<16x16xf32>
    %1246 = arith.addf %1241, %1245 : vector<16x16xf32>
    %1247 = vector.extract_strided_slice %1114 {offsets = [0, 0], sizes = [16, 16], strides = [1, 1]} : vector<18x16xf32> to vector<16x16xf32>
    %c65_290 = arith.constant 65 : index
    %1248 = memref.load %arg4[%c65_290] : memref<162xf32, #tpu.memory_space<smem>>
    %1249 = vector.broadcast %1248 : f32 to vector<16x16xf32>
    %1250 = arith.mulf %1249, %1247 : vector<16x16xf32>
    %1251 = arith.addf %1246, %1250 : vector<16x16xf32>
    %1252 = vector.extract_strided_slice %1114 {offsets = [1, 0], sizes = [16, 16], strides = [1, 1]} : vector<18x16xf32> to vector<16x16xf32>
    %c68_291 = arith.constant 68 : index
    %1253 = memref.load %arg4[%c68_291] : memref<162xf32, #tpu.memory_space<smem>>
    %1254 = vector.broadcast %1253 : f32 to vector<16x16xf32>
    %1255 = arith.mulf %1254, %1252 : vector<16x16xf32>
    %1256 = arith.addf %1251, %1255 : vector<16x16xf32>
    %1257 = vector.extract_strided_slice %1114 {offsets = [2, 0], sizes = [16, 16], strides = [1, 1]} : vector<18x16xf32> to vector<16x16xf32>
    %c71_292 = arith.constant 71 : index
    %1258 = memref.load %arg4[%c71_292] : memref<162xf32, #tpu.memory_space<smem>>
    %1259 = vector.broadcast %1258 : f32 to vector<16x16xf32>
    %1260 = arith.mulf %1259, %1257 : vector<16x16xf32>
    %1261 = arith.addf %1256, %1260 : vector<16x16xf32>
    %c2_293 = arith.constant 2 : index
    %c0_294 = arith.constant 0 : index
    %c0_295 = arith.constant 0 : index
    %1262 = vector.load %arg9[%c2_293, %c0_294, %c0_295] : memref<6x16x16xf32, #tpu.memory_space<vmem>>, vector<1x16x16xf32>
    %1263 = vector.shape_cast %1262 : vector<1x16x16xf32> to vector<16x16xf32>
    %1264 = vector.shape_cast %1261 : vector<16x16xf32> to vector<1x16x16xf32>
    tpu.vector_store %arg9[%c2_293, %c0_294, %c0_295], %1264 {strides = array<i32>} : memref<6x16x16xf32, #tpu.memory_space<vmem>>, vector<1x16x16xf32>,
    %c3_296 = arith.constant 3 : index
    %c0_297 = arith.constant 0 : index
    %c0_298 = arith.constant 0 : index
    %1265 = vector.load %arg9[%c3_296, %c0_297, %c0_298] : memref<6x16x16xf32, #tpu.memory_space<vmem>>, vector<1x16x16xf32>
    %1266 = vector.shape_cast %1265 : vector<1x16x16xf32> to vector<16x16xf32>
    %1267 = vector.extract_strided_slice %1112 {offsets = [0, 0], sizes = [16, 16], strides = [1, 1]} : vector<18x16xf32> to vector<16x16xf32>
    %c90_299 = arith.constant 90 : index
    %1268 = memref.load %arg4[%c90_299] : memref<162xf32, #tpu.memory_space<smem>>
    %1269 = vector.broadcast %1268 : f32 to vector<16x16xf32>
    %1270 = arith.mulf %1269, %1267 : vector<16x16xf32>
    %1271 = arith.addf %1266, %1270 : vector<16x16xf32>
    %1272 = vector.extract_strided_slice %1112 {offsets = [1, 0], sizes = [16, 16], strides = [1, 1]} : vector<18x16xf32> to vector<16x16xf32>
    %c93_300 = arith.constant 93 : index
    %1273 = memref.load %arg4[%c93_300] : memref<162xf32, #tpu.memory_space<smem>>
    %1274 = vector.broadcast %1273 : f32 to vector<16x16xf32>
    %1275 = arith.mulf %1274, %1272 : vector<16x16xf32>
    %1276 = arith.addf %1271, %1275 : vector<16x16xf32>
    %1277 = vector.extract_strided_slice %1112 {offsets = [2, 0], sizes = [16, 16], strides = [1, 1]} : vector<18x16xf32> to vector<16x16xf32>
    %c96_301 = arith.constant 96 : index
    %1278 = memref.load %arg4[%c96_301] : memref<162xf32, #tpu.memory_space<smem>>
    %1279 = vector.broadcast %1278 : f32 to vector<16x16xf32>
    %1280 = arith.mulf %1279, %1277 : vector<16x16xf32>
    %1281 = arith.addf %1276, %1280 : vector<16x16xf32>
    %1282 = vector.extract_strided_slice %1113 {offsets = [0, 0], sizes = [16, 16], strides = [1, 1]} : vector<18x16xf32> to vector<16x16xf32>
    %c91_302 = arith.constant 91 : index
    %1283 = memref.load %arg4[%c91_302] : memref<162xf32, #tpu.memory_space<smem>>
    %1284 = vector.broadcast %1283 : f32 to vector<16x16xf32>
    %1285 = arith.mulf %1284, %1282 : vector<16x16xf32>
    %1286 = arith.addf %1281, %1285 : vector<16x16xf32>
    %1287 = vector.extract_strided_slice %1113 {offsets = [1, 0], sizes = [16, 16], strides = [1, 1]} : vector<18x16xf32> to vector<16x16xf32>
    %c94_303 = arith.constant 94 : index
    %1288 = memref.load %arg4[%c94_303] : memref<162xf32, #tpu.memory_space<smem>>
    %1289 = vector.broadcast %1288 : f32 to vector<16x16xf32>
    %1290 = arith.mulf %1289, %1287 : vector<16x16xf32>
    %1291 = arith.addf %1286, %1290 : vector<16x16xf32>
    %1292 = vector.extract_strided_slice %1113 {offsets = [2, 0], sizes = [16, 16], strides = [1, 1]} : vector<18x16xf32> to vector<16x16xf32>
    %c97_304 = arith.constant 97 : index
    %1293 = memref.load %arg4[%c97_304] : memref<162xf32, #tpu.memory_space<smem>>
    %1294 = vector.broadcast %1293 : f32 to vector<16x16xf32>
    %1295 = arith.mulf %1294, %1292 : vector<16x16xf32>
    %1296 = arith.addf %1291, %1295 : vector<16x16xf32>
    %1297 = vector.extract_strided_slice %1114 {offsets = [0, 0], sizes = [16, 16], strides = [1, 1]} : vector<18x16xf32> to vector<16x16xf32>
    %c92_305 = arith.constant 92 : index
    %1298 = memref.load %arg4[%c92_305] : memref<162xf32, #tpu.memory_space<smem>>
    %1299 = vector.broadcast %1298 : f32 to vector<16x16xf32>
    %1300 = arith.mulf %1299, %1297 : vector<16x16xf32>
    %1301 = arith.addf %1296, %1300 : vector<16x16xf32>
    %1302 = vector.extract_strided_slice %1114 {offsets = [1, 0], sizes = [16, 16], strides = [1, 1]} : vector<18x16xf32> to vector<16x16xf32>
    %c95_306 = arith.constant 95 : index
    %1303 = memref.load %arg4[%c95_306] : memref<162xf32, #tpu.memory_space<smem>>
    %1304 = vector.broadcast %1303 : f32 to vector<16x16xf32>
    %1305 = arith.mulf %1304, %1302 : vector<16x16xf32>
    %1306 = arith.addf %1301, %1305 : vector<16x16xf32>
    %1307 = vector.extract_strided_slice %1114 {offsets = [2, 0], sizes = [16, 16], strides = [1, 1]} : vector<18x16xf32> to vector<16x16xf32>
    %c98_307 = arith.constant 98 : index
    %1308 = memref.load %arg4[%c98_307] : memref<162xf32, #tpu.memory_space<smem>>
    %1309 = vector.broadcast %1308 : f32 to vector<16x16xf32>
    %1310 = arith.mulf %1309, %1307 : vector<16x16xf32>
    %1311 = arith.addf %1306, %1310 : vector<16x16xf32>
    %c3_308 = arith.constant 3 : index
    %c0_309 = arith.constant 0 : index
    %c0_310 = arith.constant 0 : index
    %1312 = vector.load %arg9[%c3_308, %c0_309, %c0_310] : memref<6x16x16xf32, #tpu.memory_space<vmem>>, vector<1x16x16xf32>
    %1313 = vector.shape_cast %1312 : vector<1x16x16xf32> to vector<16x16xf32>
    %1314 = vector.shape_cast %1311 : vector<16x16xf32> to vector<1x16x16xf32>
    tpu.vector_store %arg9[%c3_308, %c0_309, %c0_310], %1314 {strides = array<i32>} : memref<6x16x16xf32, #tpu.memory_space<vmem>>, vector<1x16x16xf32>,
    %c4_311 = arith.constant 4 : index
    %c0_312 = arith.constant 0 : index
    %c0_313 = arith.constant 0 : index
    %1315 = vector.load %arg9[%c4_311, %c0_312, %c0_313] : memref<6x16x16xf32, #tpu.memory_space<vmem>>, vector<1x16x16xf32>
    %1316 = vector.shape_cast %1315 : vector<1x16x16xf32> to vector<16x16xf32>
    %1317 = vector.extract_strided_slice %1112 {offsets = [0, 0], sizes = [16, 16], strides = [1, 1]} : vector<18x16xf32> to vector<16x16xf32>
    %c117 = arith.constant 117 : index
    %1318 = memref.load %arg4[%c117] : memref<162xf32, #tpu.memory_space<smem>>
    %1319 = vector.broadcast %1318 : f32 to vector<16x16xf32>
    %1320 = arith.mulf %1319, %1317 : vector<16x16xf32>
    %1321 = arith.addf %1316, %1320 : vector<16x16xf32>
    %1322 = vector.extract_strided_slice %1112 {offsets = [1, 0], sizes = [16, 16], strides = [1, 1]} : vector<18x16xf32> to vector<16x16xf32>
    %c120 = arith.constant 120 : index
    %1323 = memref.load %arg4[%c120] : memref<162xf32, #tpu.memory_space<smem>>
    %1324 = vector.broadcast %1323 : f32 to vector<16x16xf32>
    %1325 = arith.mulf %1324, %1322 : vector<16x16xf32>
    %1326 = arith.addf %1321, %1325 : vector<16x16xf32>
    %1327 = vector.extract_strided_slice %1112 {offsets = [2, 0], sizes = [16, 16], strides = [1, 1]} : vector<18x16xf32> to vector<16x16xf32>
    %c123 = arith.constant 123 : index
    %1328 = memref.load %arg4[%c123] : memref<162xf32, #tpu.memory_space<smem>>
    %1329 = vector.broadcast %1328 : f32 to vector<16x16xf32>
    %1330 = arith.mulf %1329, %1327 : vector<16x16xf32>
    %1331 = arith.addf %1326, %1330 : vector<16x16xf32>
    %1332 = vector.extract_strided_slice %1113 {offsets = [0, 0], sizes = [16, 16], strides = [1, 1]} : vector<18x16xf32> to vector<16x16xf32>
    %c118 = arith.constant 118 : index
    %1333 = memref.load %arg4[%c118] : memref<162xf32, #tpu.memory_space<smem>>
    %1334 = vector.broadcast %1333 : f32 to vector<16x16xf32>
    %1335 = arith.mulf %1334, %1332 : vector<16x16xf32>
    %1336 = arith.addf %1331, %1335 : vector<16x16xf32>
    %1337 = vector.extract_strided_slice %1113 {offsets = [1, 0], sizes = [16, 16], strides = [1, 1]} : vector<18x16xf32> to vector<16x16xf32>
    %c121 = arith.constant 121 : index
    %1338 = memref.load %arg4[%c121] : memref<162xf32, #tpu.memory_space<smem>>
    %1339 = vector.broadcast %1338 : f32 to vector<16x16xf32>
    %1340 = arith.mulf %1339, %1337 : vector<16x16xf32>
    %1341 = arith.addf %1336, %1340 : vector<16x16xf32>
    %1342 = vector.extract_strided_slice %1113 {offsets = [2, 0], sizes = [16, 16], strides = [1, 1]} : vector<18x16xf32> to vector<16x16xf32>
    %c124 = arith.constant 124 : index
    %1343 = memref.load %arg4[%c124] : memref<162xf32, #tpu.memory_space<smem>>
    %1344 = vector.broadcast %1343 : f32 to vector<16x16xf32>
    %1345 = arith.mulf %1344, %1342 : vector<16x16xf32>
    %1346 = arith.addf %1341, %1345 : vector<16x16xf32>
    %1347 = vector.extract_strided_slice %1114 {offsets = [0, 0], sizes = [16, 16], strides = [1, 1]} : vector<18x16xf32> to vector<16x16xf32>
    %c119 = arith.constant 119 : index
    %1348 = memref.load %arg4[%c119] : memref<162xf32, #tpu.memory_space<smem>>
    %1349 = vector.broadcast %1348 : f32 to vector<16x16xf32>
    %1350 = arith.mulf %1349, %1347 : vector<16x16xf32>
    %1351 = arith.addf %1346, %1350 : vector<16x16xf32>
    %1352 = vector.extract_strided_slice %1114 {offsets = [1, 0], sizes = [16, 16], strides = [1, 1]} : vector<18x16xf32> to vector<16x16xf32>
    %c122 = arith.constant 122 : index
    %1353 = memref.load %arg4[%c122] : memref<162xf32, #tpu.memory_space<smem>>
    %1354 = vector.broadcast %1353 : f32 to vector<16x16xf32>
    %1355 = arith.mulf %1354, %1352 : vector<16x16xf32>
    %1356 = arith.addf %1351, %1355 : vector<16x16xf32>
    %1357 = vector.extract_strided_slice %1114 {offsets = [2, 0], sizes = [16, 16], strides = [1, 1]} : vector<18x16xf32> to vector<16x16xf32>
    %c125 = arith.constant 125 : index
    %1358 = memref.load %arg4[%c125] : memref<162xf32, #tpu.memory_space<smem>>
    %1359 = vector.broadcast %1358 : f32 to vector<16x16xf32>
    %1360 = arith.mulf %1359, %1357 : vector<16x16xf32>
    %1361 = arith.addf %1356, %1360 : vector<16x16xf32>
    %c4_314 = arith.constant 4 : index
    %c0_315 = arith.constant 0 : index
    %c0_316 = arith.constant 0 : index
    %1362 = vector.load %arg9[%c4_314, %c0_315, %c0_316] : memref<6x16x16xf32, #tpu.memory_space<vmem>>, vector<1x16x16xf32>
    %1363 = vector.shape_cast %1362 : vector<1x16x16xf32> to vector<16x16xf32>
    %1364 = vector.shape_cast %1361 : vector<16x16xf32> to vector<1x16x16xf32>
    tpu.vector_store %arg9[%c4_314, %c0_315, %c0_316], %1364 {strides = array<i32>} : memref<6x16x16xf32, #tpu.memory_space<vmem>>, vector<1x16x16xf32>,
    %c5_317 = arith.constant 5 : index
    %c0_318 = arith.constant 0 : index
    %c0_319 = arith.constant 0 : index
    %1365 = vector.load %arg9[%c5_317, %c0_318, %c0_319] : memref<6x16x16xf32, #tpu.memory_space<vmem>>, vector<1x16x16xf32>
    %1366 = vector.shape_cast %1365 : vector<1x16x16xf32> to vector<16x16xf32>
    %1367 = vector.extract_strided_slice %1112 {offsets = [0, 0], sizes = [16, 16], strides = [1, 1]} : vector<18x16xf32> to vector<16x16xf32>
    %c144 = arith.constant 144 : index
    %1368 = memref.load %arg4[%c144] : memref<162xf32, #tpu.memory_space<smem>>
    %1369 = vector.broadcast %1368 : f32 to vector<16x16xf32>
    %1370 = arith.mulf %1369, %1367 : vector<16x16xf32>
    %1371 = arith.addf %1366, %1370 : vector<16x16xf32>
    %1372 = vector.extract_strided_slice %1112 {offsets = [1, 0], sizes = [16, 16], strides = [1, 1]} : vector<18x16xf32> to vector<16x16xf32>
    %c147 = arith.constant 147 : index
    %1373 = memref.load %arg4[%c147] : memref<162xf32, #tpu.memory_space<smem>>
    %1374 = vector.broadcast %1373 : f32 to vector<16x16xf32>
    %1375 = arith.mulf %1374, %1372 : vector<16x16xf32>
    %1376 = arith.addf %1371, %1375 : vector<16x16xf32>
    %1377 = vector.extract_strided_slice %1112 {offsets = [2, 0], sizes = [16, 16], strides = [1, 1]} : vector<18x16xf32> to vector<16x16xf32>
    %c150 = arith.constant 150 : index
    %1378 = memref.load %arg4[%c150] : memref<162xf32, #tpu.memory_space<smem>>
    %1379 = vector.broadcast %1378 : f32 to vector<16x16xf32>
    %1380 = arith.mulf %1379, %1377 : vector<16x16xf32>
    %1381 = arith.addf %1376, %1380 : vector<16x16xf32>
    %1382 = vector.extract_strided_slice %1113 {offsets = [0, 0], sizes = [16, 16], strides = [1, 1]} : vector<18x16xf32> to vector<16x16xf32>
    %c145 = arith.constant 145 : index
    %1383 = memref.load %arg4[%c145] : memref<162xf32, #tpu.memory_space<smem>>
    %1384 = vector.broadcast %1383 : f32 to vector<16x16xf32>
    %1385 = arith.mulf %1384, %1382 : vector<16x16xf32>
    %1386 = arith.addf %1381, %1385 : vector<16x16xf32>
    %1387 = vector.extract_strided_slice %1113 {offsets = [1, 0], sizes = [16, 16], strides = [1, 1]} : vector<18x16xf32> to vector<16x16xf32>
    %c148 = arith.constant 148 : index
    %1388 = memref.load %arg4[%c148] : memref<162xf32, #tpu.memory_space<smem>>
    %1389 = vector.broadcast %1388 : f32 to vector<16x16xf32>
    %1390 = arith.mulf %1389, %1387 : vector<16x16xf32>
    %1391 = arith.addf %1386, %1390 : vector<16x16xf32>
    %1392 = vector.extract_strided_slice %1113 {offsets = [2, 0], sizes = [16, 16], strides = [1, 1]} : vector<18x16xf32> to vector<16x16xf32>
    %c151 = arith.constant 151 : index
    %1393 = memref.load %arg4[%c151] : memref<162xf32, #tpu.memory_space<smem>>
    %1394 = vector.broadcast %1393 : f32 to vector<16x16xf32>
    %1395 = arith.mulf %1394, %1392 : vector<16x16xf32>
    %1396 = arith.addf %1391, %1395 : vector<16x16xf32>
    %1397 = vector.extract_strided_slice %1114 {offsets = [0, 0], sizes = [16, 16], strides = [1, 1]} : vector<18x16xf32> to vector<16x16xf32>
    %c146 = arith.constant 146 : index
    %1398 = memref.load %arg4[%c146] : memref<162xf32, #tpu.memory_space<smem>>
    %1399 = vector.broadcast %1398 : f32 to vector<16x16xf32>
    %1400 = arith.mulf %1399, %1397 : vector<16x16xf32>
    %1401 = arith.addf %1396, %1400 : vector<16x16xf32>
    %1402 = vector.extract_strided_slice %1114 {offsets = [1, 0], sizes = [16, 16], strides = [1, 1]} : vector<18x16xf32> to vector<16x16xf32>
    %c149 = arith.constant 149 : index
    %1403 = memref.load %arg4[%c149] : memref<162xf32, #tpu.memory_space<smem>>
    %1404 = vector.broadcast %1403 : f32 to vector<16x16xf32>
    %1405 = arith.mulf %1404, %1402 : vector<16x16xf32>
    %1406 = arith.addf %1401, %1405 : vector<16x16xf32>
    %1407 = vector.extract_strided_slice %1114 {offsets = [2, 0], sizes = [16, 16], strides = [1, 1]} : vector<18x16xf32> to vector<16x16xf32>
    %c152 = arith.constant 152 : index
    %1408 = memref.load %arg4[%c152] : memref<162xf32, #tpu.memory_space<smem>>
    %1409 = vector.broadcast %1408 : f32 to vector<16x16xf32>
    %1410 = arith.mulf %1409, %1407 : vector<16x16xf32>
    %1411 = arith.addf %1406, %1410 : vector<16x16xf32>
    %c5_320 = arith.constant 5 : index
    %c0_321 = arith.constant 0 : index
    %c0_322 = arith.constant 0 : index
    %1412 = vector.load %arg9[%c5_320, %c0_321, %c0_322] : memref<6x16x16xf32, #tpu.memory_space<vmem>>, vector<1x16x16xf32>
    %1413 = vector.shape_cast %1412 : vector<1x16x16xf32> to vector<16x16xf32>
    %1414 = vector.shape_cast %1411 : vector<16x16xf32> to vector<1x16x16xf32>
    tpu.vector_store %arg9[%c5_320, %c0_321, %c0_322], %1414 {strides = array<i32>} : memref<6x16x16xf32, #tpu.memory_space<vmem>>, vector<1x16x16xf32>,
    %c2_323 = arith.constant 2 : index
    %c0_324 = arith.constant 0 : index
    %c0_325 = arith.constant 0 : index
    %1415 = vector.load %arg8[%c2_323, %c0_324, %c0_325] : memref<3x16x16xf32, #tpu.memory_space<vmem>>, vector<1x16x16xf32>
    %1416 = vector.shape_cast %1415 : vector<1x16x16xf32> to vector<16x16xf32>
    %1417 = vector.extract_strided_slice %1416 {offsets = [1, 0], sizes = [1, 16], strides = [1, 1]} : vector<16x16xf32> to vector<1x16xf32>
    %1418 = vector.extract_strided_slice %1416 {offsets = [14, 0], sizes = [1, 16], strides = [1, 1]} : vector<16x16xf32> to vector<1x16xf32>
    %1419 = tpu.concatenate %1417, %1416, %1418 in 0 : vector<1x16xf32>, vector<16x16xf32>, vector<1x16xf32> -> vector<18x16xf32>
    %1420 = vector.extract_strided_slice %1419 {offsets = [0, 1], sizes = [18, 1], strides = [1, 1]} : vector<18x16xf32> to vector<18x1xf32>
    %1421 = vector.extract_strided_slice %1419 {offsets = [0, 14], sizes = [18, 1], strides = [1, 1]} : vector<18x16xf32> to vector<18x1xf32>
    %1422 = tpu.concatenate %1420, %1419, %1421 in 1 : vector<18x1xf32>, vector<18x16xf32>, vector<18x1xf32> -> vector<18x18xf32>
    %1423 = vector.extract_strided_slice %1422 {offsets = [0, 0], sizes = [18, 16], strides = [1, 1]} : vector<18x18xf32> to vector<18x16xf32>
    %1424 = vector.extract_strided_slice %1422 {offsets = [0, 1], sizes = [18, 16], strides = [1, 1]} : vector<18x18xf32> to vector<18x16xf32>
    %1425 = vector.extract_strided_slice %1422 {offsets = [0, 2], sizes = [18, 16], strides = [1, 1]} : vector<18x18xf32> to vector<18x16xf32>
    %c0_326 = arith.constant 0 : index
    %c0_327 = arith.constant 0 : index
    %c0_328 = arith.constant 0 : index
    %1426 = vector.load %arg9[%c0_326, %c0_327, %c0_328] : memref<6x16x16xf32, #tpu.memory_space<vmem>>, vector<1x16x16xf32>
    %1427 = vector.shape_cast %1426 : vector<1x16x16xf32> to vector<16x16xf32>
    %1428 = vector.extract_strided_slice %1423 {offsets = [0, 0], sizes = [16, 16], strides = [1, 1]} : vector<18x16xf32> to vector<16x16xf32>
    %c18_329 = arith.constant 18 : index
    %1429 = memref.load %arg4[%c18_329] : memref<162xf32, #tpu.memory_space<smem>>
    %1430 = vector.broadcast %1429 : f32 to vector<16x16xf32>
    %1431 = arith.mulf %1430, %1428 : vector<16x16xf32>
    %1432 = arith.addf %1427, %1431 : vector<16x16xf32>
    %1433 = vector.extract_strided_slice %1423 {offsets = [1, 0], sizes = [16, 16], strides = [1, 1]} : vector<18x16xf32> to vector<16x16xf32>
    %c21_330 = arith.constant 21 : index
    %1434 = memref.load %arg4[%c21_330] : memref<162xf32, #tpu.memory_space<smem>>
    %1435 = vector.broadcast %1434 : f32 to vector<16x16xf32>
    %1436 = arith.mulf %1435, %1433 : vector<16x16xf32>
    %1437 = arith.addf %1432, %1436 : vector<16x16xf32>
    %1438 = vector.extract_strided_slice %1423 {offsets = [2, 0], sizes = [16, 16], strides = [1, 1]} : vector<18x16xf32> to vector<16x16xf32>
    %c24_331 = arith.constant 24 : index
    %1439 = memref.load %arg4[%c24_331] : memref<162xf32, #tpu.memory_space<smem>>
    %1440 = vector.broadcast %1439 : f32 to vector<16x16xf32>
    %1441 = arith.mulf %1440, %1438 : vector<16x16xf32>
    %1442 = arith.addf %1437, %1441 : vector<16x16xf32>
    %1443 = vector.extract_strided_slice %1424 {offsets = [0, 0], sizes = [16, 16], strides = [1, 1]} : vector<18x16xf32> to vector<16x16xf32>
    %c19_332 = arith.constant 19 : index
    %1444 = memref.load %arg4[%c19_332] : memref<162xf32, #tpu.memory_space<smem>>
    %1445 = vector.broadcast %1444 : f32 to vector<16x16xf32>
    %1446 = arith.mulf %1445, %1443 : vector<16x16xf32>
    %1447 = arith.addf %1442, %1446 : vector<16x16xf32>
    %1448 = vector.extract_strided_slice %1424 {offsets = [1, 0], sizes = [16, 16], strides = [1, 1]} : vector<18x16xf32> to vector<16x16xf32>
    %c22_333 = arith.constant 22 : index
    %1449 = memref.load %arg4[%c22_333] : memref<162xf32, #tpu.memory_space<smem>>
    %1450 = vector.broadcast %1449 : f32 to vector<16x16xf32>
    %1451 = arith.mulf %1450, %1448 : vector<16x16xf32>
    %1452 = arith.addf %1447, %1451 : vector<16x16xf32>
    %1453 = vector.extract_strided_slice %1424 {offsets = [2, 0], sizes = [16, 16], strides = [1, 1]} : vector<18x16xf32> to vector<16x16xf32>
    %c25_334 = arith.constant 25 : index
    %1454 = memref.load %arg4[%c25_334] : memref<162xf32, #tpu.memory_space<smem>>
    %1455 = vector.broadcast %1454 : f32 to vector<16x16xf32>
    %1456 = arith.mulf %1455, %1453 : vector<16x16xf32>
    %1457 = arith.addf %1452, %1456 : vector<16x16xf32>
    %1458 = vector.extract_strided_slice %1425 {offsets = [0, 0], sizes = [16, 16], strides = [1, 1]} : vector<18x16xf32> to vector<16x16xf32>
    %c20_335 = arith.constant 20 : index
    %1459 = memref.load %arg4[%c20_335] : memref<162xf32, #tpu.memory_space<smem>>
    %1460 = vector.broadcast %1459 : f32 to vector<16x16xf32>
    %1461 = arith.mulf %1460, %1458 : vector<16x16xf32>
    %1462 = arith.addf %1457, %1461 : vector<16x16xf32>
    %1463 = vector.extract_strided_slice %1425 {offsets = [1, 0], sizes = [16, 16], strides = [1, 1]} : vector<18x16xf32> to vector<16x16xf32>
    %c23_336 = arith.constant 23 : index
    %1464 = memref.load %arg4[%c23_336] : memref<162xf32, #tpu.memory_space<smem>>
    %1465 = vector.broadcast %1464 : f32 to vector<16x16xf32>
    %1466 = arith.mulf %1465, %1463 : vector<16x16xf32>
    %1467 = arith.addf %1462, %1466 : vector<16x16xf32>
    %1468 = vector.extract_strided_slice %1425 {offsets = [2, 0], sizes = [16, 16], strides = [1, 1]} : vector<18x16xf32> to vector<16x16xf32>
    %c26_337 = arith.constant 26 : index
    %1469 = memref.load %arg4[%c26_337] : memref<162xf32, #tpu.memory_space<smem>>
    %1470 = vector.broadcast %1469 : f32 to vector<16x16xf32>
    %1471 = arith.mulf %1470, %1468 : vector<16x16xf32>
    %1472 = arith.addf %1467, %1471 : vector<16x16xf32>
    %c0_338 = arith.constant 0 : index
    %c0_339 = arith.constant 0 : index
    %c0_340 = arith.constant 0 : index
    %1473 = vector.load %arg9[%c0_338, %c0_339, %c0_340] : memref<6x16x16xf32, #tpu.memory_space<vmem>>, vector<1x16x16xf32>
    %1474 = vector.shape_cast %1473 : vector<1x16x16xf32> to vector<16x16xf32>
    %1475 = vector.shape_cast %1472 : vector<16x16xf32> to vector<1x16x16xf32>
    tpu.vector_store %arg9[%c0_338, %c0_339, %c0_340], %1475 {strides = array<i32>} : memref<6x16x16xf32, #tpu.memory_space<vmem>>, vector<1x16x16xf32>,
    %c1_341 = arith.constant 1 : index
    %c0_342 = arith.constant 0 : index
    %c0_343 = arith.constant 0 : index
    %1476 = vector.load %arg9[%c1_341, %c0_342, %c0_343] : memref<6x16x16xf32, #tpu.memory_space<vmem>>, vector<1x16x16xf32>
    %1477 = vector.shape_cast %1476 : vector<1x16x16xf32> to vector<16x16xf32>
    %1478 = vector.extract_strided_slice %1423 {offsets = [0, 0], sizes = [16, 16], strides = [1, 1]} : vector<18x16xf32> to vector<16x16xf32>
    %c45_344 = arith.constant 45 : index
    %1479 = memref.load %arg4[%c45_344] : memref<162xf32, #tpu.memory_space<smem>>
    %1480 = vector.broadcast %1479 : f32 to vector<16x16xf32>
    %1481 = arith.mulf %1480, %1478 : vector<16x16xf32>
    %1482 = arith.addf %1477, %1481 : vector<16x16xf32>
    %1483 = vector.extract_strided_slice %1423 {offsets = [1, 0], sizes = [16, 16], strides = [1, 1]} : vector<18x16xf32> to vector<16x16xf32>
    %c48_345 = arith.constant 48 : index
    %1484 = memref.load %arg4[%c48_345] : memref<162xf32, #tpu.memory_space<smem>>
    %1485 = vector.broadcast %1484 : f32 to vector<16x16xf32>
    %1486 = arith.mulf %1485, %1483 : vector<16x16xf32>
    %1487 = arith.addf %1482, %1486 : vector<16x16xf32>
    %1488 = vector.extract_strided_slice %1423 {offsets = [2, 0], sizes = [16, 16], strides = [1, 1]} : vector<18x16xf32> to vector<16x16xf32>
    %c51_346 = arith.constant 51 : index
    %1489 = memref.load %arg4[%c51_346] : memref<162xf32, #tpu.memory_space<smem>>
    %1490 = vector.broadcast %1489 : f32 to vector<16x16xf32>
    %1491 = arith.mulf %1490, %1488 : vector<16x16xf32>
    %1492 = arith.addf %1487, %1491 : vector<16x16xf32>
    %1493 = vector.extract_strided_slice %1424 {offsets = [0, 0], sizes = [16, 16], strides = [1, 1]} : vector<18x16xf32> to vector<16x16xf32>
    %c46_347 = arith.constant 46 : index
    %1494 = memref.load %arg4[%c46_347] : memref<162xf32, #tpu.memory_space<smem>>
    %1495 = vector.broadcast %1494 : f32 to vector<16x16xf32>
    %1496 = arith.mulf %1495, %1493 : vector<16x16xf32>
    %1497 = arith.addf %1492, %1496 : vector<16x16xf32>
    %1498 = vector.extract_strided_slice %1424 {offsets = [1, 0], sizes = [16, 16], strides = [1, 1]} : vector<18x16xf32> to vector<16x16xf32>
    %c49_348 = arith.constant 49 : index
    %1499 = memref.load %arg4[%c49_348] : memref<162xf32, #tpu.memory_space<smem>>
    %1500 = vector.broadcast %1499 : f32 to vector<16x16xf32>
    %1501 = arith.mulf %1500, %1498 : vector<16x16xf32>
    %1502 = arith.addf %1497, %1501 : vector<16x16xf32>
    %1503 = vector.extract_strided_slice %1424 {offsets = [2, 0], sizes = [16, 16], strides = [1, 1]} : vector<18x16xf32> to vector<16x16xf32>
    %c52_349 = arith.constant 52 : index
    %1504 = memref.load %arg4[%c52_349] : memref<162xf32, #tpu.memory_space<smem>>
    %1505 = vector.broadcast %1504 : f32 to vector<16x16xf32>
    %1506 = arith.mulf %1505, %1503 : vector<16x16xf32>
    %1507 = arith.addf %1502, %1506 : vector<16x16xf32>
    %1508 = vector.extract_strided_slice %1425 {offsets = [0, 0], sizes = [16, 16], strides = [1, 1]} : vector<18x16xf32> to vector<16x16xf32>
    %c47_350 = arith.constant 47 : index
    %1509 = memref.load %arg4[%c47_350] : memref<162xf32, #tpu.memory_space<smem>>
    %1510 = vector.broadcast %1509 : f32 to vector<16x16xf32>
    %1511 = arith.mulf %1510, %1508 : vector<16x16xf32>
    %1512 = arith.addf %1507, %1511 : vector<16x16xf32>
    %1513 = vector.extract_strided_slice %1425 {offsets = [1, 0], sizes = [16, 16], strides = [1, 1]} : vector<18x16xf32> to vector<16x16xf32>
    %c50_351 = arith.constant 50 : index
    %1514 = memref.load %arg4[%c50_351] : memref<162xf32, #tpu.memory_space<smem>>
    %1515 = vector.broadcast %1514 : f32 to vector<16x16xf32>
    %1516 = arith.mulf %1515, %1513 : vector<16x16xf32>
    %1517 = arith.addf %1512, %1516 : vector<16x16xf32>
    %1518 = vector.extract_strided_slice %1425 {offsets = [2, 0], sizes = [16, 16], strides = [1, 1]} : vector<18x16xf32> to vector<16x16xf32>
    %c53_352 = arith.constant 53 : index
    %1519 = memref.load %arg4[%c53_352] : memref<162xf32, #tpu.memory_space<smem>>
    %1520 = vector.broadcast %1519 : f32 to vector<16x16xf32>
    %1521 = arith.mulf %1520, %1518 : vector<16x16xf32>
    %1522 = arith.addf %1517, %1521 : vector<16x16xf32>
    %c1_353 = arith.constant 1 : index
    %c0_354 = arith.constant 0 : index
    %c0_355 = arith.constant 0 : index
    %1523 = vector.load %arg9[%c1_353, %c0_354, %c0_355] : memref<6x16x16xf32, #tpu.memory_space<vmem>>, vector<1x16x16xf32>
    %1524 = vector.shape_cast %1523 : vector<1x16x16xf32> to vector<16x16xf32>
    %1525 = vector.shape_cast %1522 : vector<16x16xf32> to vector<1x16x16xf32>
    tpu.vector_store %arg9[%c1_353, %c0_354, %c0_355], %1525 {strides = array<i32>} : memref<6x16x16xf32, #tpu.memory_space<vmem>>, vector<1x16x16xf32>,
    %c2_356 = arith.constant 2 : index
    %c0_357 = arith.constant 0 : index
    %c0_358 = arith.constant 0 : index
    %1526 = vector.load %arg9[%c2_356, %c0_357, %c0_358] : memref<6x16x16xf32, #tpu.memory_space<vmem>>, vector<1x16x16xf32>
    %1527 = vector.shape_cast %1526 : vector<1x16x16xf32> to vector<16x16xf32>
    %1528 = vector.extract_strided_slice %1423 {offsets = [0, 0], sizes = [16, 16], strides = [1, 1]} : vector<18x16xf32> to vector<16x16xf32>
    %c72_359 = arith.constant 72 : index
    %1529 = memref.load %arg4[%c72_359] : memref<162xf32, #tpu.memory_space<smem>>
    %1530 = vector.broadcast %1529 : f32 to vector<16x16xf32>
    %1531 = arith.mulf %1530, %1528 : vector<16x16xf32>
    %1532 = arith.addf %1527, %1531 : vector<16x16xf32>
    %1533 = vector.extract_strided_slice %1423 {offsets = [1, 0], sizes = [16, 16], strides = [1, 1]} : vector<18x16xf32> to vector<16x16xf32>
    %c75_360 = arith.constant 75 : index
    %1534 = memref.load %arg4[%c75_360] : memref<162xf32, #tpu.memory_space<smem>>
    %1535 = vector.broadcast %1534 : f32 to vector<16x16xf32>
    %1536 = arith.mulf %1535, %1533 : vector<16x16xf32>
    %1537 = arith.addf %1532, %1536 : vector<16x16xf32>
    %1538 = vector.extract_strided_slice %1423 {offsets = [2, 0], sizes = [16, 16], strides = [1, 1]} : vector<18x16xf32> to vector<16x16xf32>
    %c78_361 = arith.constant 78 : index
    %1539 = memref.load %arg4[%c78_361] : memref<162xf32, #tpu.memory_space<smem>>
    %1540 = vector.broadcast %1539 : f32 to vector<16x16xf32>
    %1541 = arith.mulf %1540, %1538 : vector<16x16xf32>
    %1542 = arith.addf %1537, %1541 : vector<16x16xf32>
    %1543 = vector.extract_strided_slice %1424 {offsets = [0, 0], sizes = [16, 16], strides = [1, 1]} : vector<18x16xf32> to vector<16x16xf32>
    %c73_362 = arith.constant 73 : index
    %1544 = memref.load %arg4[%c73_362] : memref<162xf32, #tpu.memory_space<smem>>
    %1545 = vector.broadcast %1544 : f32 to vector<16x16xf32>
    %1546 = arith.mulf %1545, %1543 : vector<16x16xf32>
    %1547 = arith.addf %1542, %1546 : vector<16x16xf32>
    %1548 = vector.extract_strided_slice %1424 {offsets = [1, 0], sizes = [16, 16], strides = [1, 1]} : vector<18x16xf32> to vector<16x16xf32>
    %c76_363 = arith.constant 76 : index
    %1549 = memref.load %arg4[%c76_363] : memref<162xf32, #tpu.memory_space<smem>>
    %1550 = vector.broadcast %1549 : f32 to vector<16x16xf32>
    %1551 = arith.mulf %1550, %1548 : vector<16x16xf32>
    %1552 = arith.addf %1547, %1551 : vector<16x16xf32>
    %1553 = vector.extract_strided_slice %1424 {offsets = [2, 0], sizes = [16, 16], strides = [1, 1]} : vector<18x16xf32> to vector<16x16xf32>
    %c79_364 = arith.constant 79 : index
    %1554 = memref.load %arg4[%c79_364] : memref<162xf32, #tpu.memory_space<smem>>
    %1555 = vector.broadcast %1554 : f32 to vector<16x16xf32>
    %1556 = arith.mulf %1555, %1553 : vector<16x16xf32>
    %1557 = arith.addf %1552, %1556 : vector<16x16xf32>
    %1558 = vector.extract_strided_slice %1425 {offsets = [0, 0], sizes = [16, 16], strides = [1, 1]} : vector<18x16xf32> to vector<16x16xf32>
    %c74_365 = arith.constant 74 : index
    %1559 = memref.load %arg4[%c74_365] : memref<162xf32, #tpu.memory_space<smem>>
    %1560 = vector.broadcast %1559 : f32 to vector<16x16xf32>
    %1561 = arith.mulf %1560, %1558 : vector<16x16xf32>
    %1562 = arith.addf %1557, %1561 : vector<16x16xf32>
    %1563 = vector.extract_strided_slice %1425 {offsets = [1, 0], sizes = [16, 16], strides = [1, 1]} : vector<18x16xf32> to vector<16x16xf32>
    %c77_366 = arith.constant 77 : index
    %1564 = memref.load %arg4[%c77_366] : memref<162xf32, #tpu.memory_space<smem>>
    %1565 = vector.broadcast %1564 : f32 to vector<16x16xf32>
    %1566 = arith.mulf %1565, %1563 : vector<16x16xf32>
    %1567 = arith.addf %1562, %1566 : vector<16x16xf32>
    %1568 = vector.extract_strided_slice %1425 {offsets = [2, 0], sizes = [16, 16], strides = [1, 1]} : vector<18x16xf32> to vector<16x16xf32>
    %c80_367 = arith.constant 80 : index
    %1569 = memref.load %arg4[%c80_367] : memref<162xf32, #tpu.memory_space<smem>>
    %1570 = vector.broadcast %1569 : f32 to vector<16x16xf32>
    %1571 = arith.mulf %1570, %1568 : vector<16x16xf32>
    %1572 = arith.addf %1567, %1571 : vector<16x16xf32>
    %c2_368 = arith.constant 2 : index
    %c0_369 = arith.constant 0 : index
    %c0_370 = arith.constant 0 : index
    %1573 = vector.load %arg9[%c2_368, %c0_369, %c0_370] : memref<6x16x16xf32, #tpu.memory_space<vmem>>, vector<1x16x16xf32>
    %1574 = vector.shape_cast %1573 : vector<1x16x16xf32> to vector<16x16xf32>
    %1575 = vector.shape_cast %1572 : vector<16x16xf32> to vector<1x16x16xf32>
    tpu.vector_store %arg9[%c2_368, %c0_369, %c0_370], %1575 {strides = array<i32>} : memref<6x16x16xf32, #tpu.memory_space<vmem>>, vector<1x16x16xf32>,
    %c3_371 = arith.constant 3 : index
    %c0_372 = arith.constant 0 : index
    %c0_373 = arith.constant 0 : index
    %1576 = vector.load %arg9[%c3_371, %c0_372, %c0_373] : memref<6x16x16xf32, #tpu.memory_space<vmem>>, vector<1x16x16xf32>
    %1577 = vector.shape_cast %1576 : vector<1x16x16xf32> to vector<16x16xf32>
    %1578 = vector.extract_strided_slice %1423 {offsets = [0, 0], sizes = [16, 16], strides = [1, 1]} : vector<18x16xf32> to vector<16x16xf32>
    %c99_374 = arith.constant 99 : index
    %1579 = memref.load %arg4[%c99_374] : memref<162xf32, #tpu.memory_space<smem>>
    %1580 = vector.broadcast %1579 : f32 to vector<16x16xf32>
    %1581 = arith.mulf %1580, %1578 : vector<16x16xf32>
    %1582 = arith.addf %1577, %1581 : vector<16x16xf32>
    %1583 = vector.extract_strided_slice %1423 {offsets = [1, 0], sizes = [16, 16], strides = [1, 1]} : vector<18x16xf32> to vector<16x16xf32>
    %c102_375 = arith.constant 102 : index
    %1584 = memref.load %arg4[%c102_375] : memref<162xf32, #tpu.memory_space<smem>>
    %1585 = vector.broadcast %1584 : f32 to vector<16x16xf32>
    %1586 = arith.mulf %1585, %1583 : vector<16x16xf32>
    %1587 = arith.addf %1582, %1586 : vector<16x16xf32>
    %1588 = vector.extract_strided_slice %1423 {offsets = [2, 0], sizes = [16, 16], strides = [1, 1]} : vector<18x16xf32> to vector<16x16xf32>
    %c105_376 = arith.constant 105 : index
    %1589 = memref.load %arg4[%c105_376] : memref<162xf32, #tpu.memory_space<smem>>
    %1590 = vector.broadcast %1589 : f32 to vector<16x16xf32>
    %1591 = arith.mulf %1590, %1588 : vector<16x16xf32>
    %1592 = arith.addf %1587, %1591 : vector<16x16xf32>
    %1593 = vector.extract_strided_slice %1424 {offsets = [0, 0], sizes = [16, 16], strides = [1, 1]} : vector<18x16xf32> to vector<16x16xf32>
    %c100_377 = arith.constant 100 : index
    %1594 = memref.load %arg4[%c100_377] : memref<162xf32, #tpu.memory_space<smem>>
    %1595 = vector.broadcast %1594 : f32 to vector<16x16xf32>
    %1596 = arith.mulf %1595, %1593 : vector<16x16xf32>
    %1597 = arith.addf %1592, %1596 : vector<16x16xf32>
    %1598 = vector.extract_strided_slice %1424 {offsets = [1, 0], sizes = [16, 16], strides = [1, 1]} : vector<18x16xf32> to vector<16x16xf32>
    %c103_378 = arith.constant 103 : index
    %1599 = memref.load %arg4[%c103_378] : memref<162xf32, #tpu.memory_space<smem>>
    %1600 = vector.broadcast %1599 : f32 to vector<16x16xf32>
    %1601 = arith.mulf %1600, %1598 : vector<16x16xf32>
    %1602 = arith.addf %1597, %1601 : vector<16x16xf32>
    %1603 = vector.extract_strided_slice %1424 {offsets = [2, 0], sizes = [16, 16], strides = [1, 1]} : vector<18x16xf32> to vector<16x16xf32>
    %c106_379 = arith.constant 106 : index
    %1604 = memref.load %arg4[%c106_379] : memref<162xf32, #tpu.memory_space<smem>>
    %1605 = vector.broadcast %1604 : f32 to vector<16x16xf32>
    %1606 = arith.mulf %1605, %1603 : vector<16x16xf32>
    %1607 = arith.addf %1602, %1606 : vector<16x16xf32>
    %1608 = vector.extract_strided_slice %1425 {offsets = [0, 0], sizes = [16, 16], strides = [1, 1]} : vector<18x16xf32> to vector<16x16xf32>
    %c101_380 = arith.constant 101 : index
    %1609 = memref.load %arg4[%c101_380] : memref<162xf32, #tpu.memory_space<smem>>
    %1610 = vector.broadcast %1609 : f32 to vector<16x16xf32>
    %1611 = arith.mulf %1610, %1608 : vector<16x16xf32>
    %1612 = arith.addf %1607, %1611 : vector<16x16xf32>
    %1613 = vector.extract_strided_slice %1425 {offsets = [1, 0], sizes = [16, 16], strides = [1, 1]} : vector<18x16xf32> to vector<16x16xf32>
    %c104_381 = arith.constant 104 : index
    %1614 = memref.load %arg4[%c104_381] : memref<162xf32, #tpu.memory_space<smem>>
    %1615 = vector.broadcast %1614 : f32 to vector<16x16xf32>
    %1616 = arith.mulf %1615, %1613 : vector<16x16xf32>
    %1617 = arith.addf %1612, %1616 : vector<16x16xf32>
    %1618 = vector.extract_strided_slice %1425 {offsets = [2, 0], sizes = [16, 16], strides = [1, 1]} : vector<18x16xf32> to vector<16x16xf32>
    %c107_382 = arith.constant 107 : index
    %1619 = memref.load %arg4[%c107_382] : memref<162xf32, #tpu.memory_space<smem>>
    %1620 = vector.broadcast %1619 : f32 to vector<16x16xf32>
    %1621 = arith.mulf %1620, %1618 : vector<16x16xf32>
    %1622 = arith.addf %1617, %1621 : vector<16x16xf32>
    %c3_383 = arith.constant 3 : index
    %c0_384 = arith.constant 0 : index
    %c0_385 = arith.constant 0 : index
    %1623 = vector.load %arg9[%c3_383, %c0_384, %c0_385] : memref<6x16x16xf32, #tpu.memory_space<vmem>>, vector<1x16x16xf32>
    %1624 = vector.shape_cast %1623 : vector<1x16x16xf32> to vector<16x16xf32>
    %1625 = vector.shape_cast %1622 : vector<16x16xf32> to vector<1x16x16xf32>
    tpu.vector_store %arg9[%c3_383, %c0_384, %c0_385], %1625 {strides = array<i32>} : memref<6x16x16xf32, #tpu.memory_space<vmem>>, vector<1x16x16xf32>,
    %c4_386 = arith.constant 4 : index
    %c0_387 = arith.constant 0 : index
    %c0_388 = arith.constant 0 : index
    %1626 = vector.load %arg9[%c4_386, %c0_387, %c0_388] : memref<6x16x16xf32, #tpu.memory_space<vmem>>, vector<1x16x16xf32>
    %1627 = vector.shape_cast %1626 : vector<1x16x16xf32> to vector<16x16xf32>
    %1628 = vector.extract_strided_slice %1423 {offsets = [0, 0], sizes = [16, 16], strides = [1, 1]} : vector<18x16xf32> to vector<16x16xf32>
    %c126 = arith.constant 126 : index
    %1629 = memref.load %arg4[%c126] : memref<162xf32, #tpu.memory_space<smem>>
    %1630 = vector.broadcast %1629 : f32 to vector<16x16xf32>
    %1631 = arith.mulf %1630, %1628 : vector<16x16xf32>
    %1632 = arith.addf %1627, %1631 : vector<16x16xf32>
    %1633 = vector.extract_strided_slice %1423 {offsets = [1, 0], sizes = [16, 16], strides = [1, 1]} : vector<18x16xf32> to vector<16x16xf32>
    %c129 = arith.constant 129 : index
    %1634 = memref.load %arg4[%c129] : memref<162xf32, #tpu.memory_space<smem>>
    %1635 = vector.broadcast %1634 : f32 to vector<16x16xf32>
    %1636 = arith.mulf %1635, %1633 : vector<16x16xf32>
    %1637 = arith.addf %1632, %1636 : vector<16x16xf32>
    %1638 = vector.extract_strided_slice %1423 {offsets = [2, 0], sizes = [16, 16], strides = [1, 1]} : vector<18x16xf32> to vector<16x16xf32>
    %c132 = arith.constant 132 : index
    %1639 = memref.load %arg4[%c132] : memref<162xf32, #tpu.memory_space<smem>>
    %1640 = vector.broadcast %1639 : f32 to vector<16x16xf32>
    %1641 = arith.mulf %1640, %1638 : vector<16x16xf32>
    %1642 = arith.addf %1637, %1641 : vector<16x16xf32>
    %1643 = vector.extract_strided_slice %1424 {offsets = [0, 0], sizes = [16, 16], strides = [1, 1]} : vector<18x16xf32> to vector<16x16xf32>
    %c127 = arith.constant 127 : index
    %1644 = memref.load %arg4[%c127] : memref<162xf32, #tpu.memory_space<smem>>
    %1645 = vector.broadcast %1644 : f32 to vector<16x16xf32>
    %1646 = arith.mulf %1645, %1643 : vector<16x16xf32>
    %1647 = arith.addf %1642, %1646 : vector<16x16xf32>
    %1648 = vector.extract_strided_slice %1424 {offsets = [1, 0], sizes = [16, 16], strides = [1, 1]} : vector<18x16xf32> to vector<16x16xf32>
    %c130 = arith.constant 130 : index
    %1649 = memref.load %arg4[%c130] : memref<162xf32, #tpu.memory_space<smem>>
    %1650 = vector.broadcast %1649 : f32 to vector<16x16xf32>
    %1651 = arith.mulf %1650, %1648 : vector<16x16xf32>
    %1652 = arith.addf %1647, %1651 : vector<16x16xf32>
    %1653 = vector.extract_strided_slice %1424 {offsets = [2, 0], sizes = [16, 16], strides = [1, 1]} : vector<18x16xf32> to vector<16x16xf32>
    %c133 = arith.constant 133 : index
    %1654 = memref.load %arg4[%c133] : memref<162xf32, #tpu.memory_space<smem>>
    %1655 = vector.broadcast %1654 : f32 to vector<16x16xf32>
    %1656 = arith.mulf %1655, %1653 : vector<16x16xf32>
    %1657 = arith.addf %1652, %1656 : vector<16x16xf32>
    %1658 = vector.extract_strided_slice %1425 {offsets = [0, 0], sizes = [16, 16], strides = [1, 1]} : vector<18x16xf32> to vector<16x16xf32>
    %c128 = arith.constant 128 : index
    %1659 = memref.load %arg4[%c128] : memref<162xf32, #tpu.memory_space<smem>>
    %1660 = vector.broadcast %1659 : f32 to vector<16x16xf32>
    %1661 = arith.mulf %1660, %1658 : vector<16x16xf32>
    %1662 = arith.addf %1657, %1661 : vector<16x16xf32>
    %1663 = vector.extract_strided_slice %1425 {offsets = [1, 0], sizes = [16, 16], strides = [1, 1]} : vector<18x16xf32> to vector<16x16xf32>
    %c131 = arith.constant 131 : index
    %1664 = memref.load %arg4[%c131] : memref<162xf32, #tpu.memory_space<smem>>
    %1665 = vector.broadcast %1664 : f32 to vector<16x16xf32>
    %1666 = arith.mulf %1665, %1663 : vector<16x16xf32>
    %1667 = arith.addf %1662, %1666 : vector<16x16xf32>
    %1668 = vector.extract_strided_slice %1425 {offsets = [2, 0], sizes = [16, 16], strides = [1, 1]} : vector<18x16xf32> to vector<16x16xf32>
    %c134 = arith.constant 134 : index
    %1669 = memref.load %arg4[%c134] : memref<162xf32, #tpu.memory_space<smem>>
    %1670 = vector.broadcast %1669 : f32 to vector<16x16xf32>
    %1671 = arith.mulf %1670, %1668 : vector<16x16xf32>
    %1672 = arith.addf %1667, %1671 : vector<16x16xf32>
    %c4_389 = arith.constant 4 : index
    %c0_390 = arith.constant 0 : index
    %c0_391 = arith.constant 0 : index
    %1673 = vector.load %arg9[%c4_389, %c0_390, %c0_391] : memref<6x16x16xf32, #tpu.memory_space<vmem>>, vector<1x16x16xf32>
    %1674 = vector.shape_cast %1673 : vector<1x16x16xf32> to vector<16x16xf32>
    %1675 = vector.shape_cast %1672 : vector<16x16xf32> to vector<1x16x16xf32>
    tpu.vector_store %arg9[%c4_389, %c0_390, %c0_391], %1675 {strides = array<i32>} : memref<6x16x16xf32, #tpu.memory_space<vmem>>, vector<1x16x16xf32>,
    %c5_392 = arith.constant 5 : index
    %c0_393 = arith.constant 0 : index
    %c0_394 = arith.constant 0 : index
    %1676 = vector.load %arg9[%c5_392, %c0_393, %c0_394] : memref<6x16x16xf32, #tpu.memory_space<vmem>>, vector<1x16x16xf32>
    %1677 = vector.shape_cast %1676 : vector<1x16x16xf32> to vector<16x16xf32>
    %1678 = vector.extract_strided_slice %1423 {offsets = [0, 0], sizes = [16, 16], strides = [1, 1]} : vector<18x16xf32> to vector<16x16xf32>
    %c153 = arith.constant 153 : index
    %1679 = memref.load %arg4[%c153] : memref<162xf32, #tpu.memory_space<smem>>
    %1680 = vector.broadcast %1679 : f32 to vector<16x16xf32>
    %1681 = arith.mulf %1680, %1678 : vector<16x16xf32>
    %1682 = arith.addf %1677, %1681 : vector<16x16xf32>
    %1683 = vector.extract_strided_slice %1423 {offsets = [1, 0], sizes = [16, 16], strides = [1, 1]} : vector<18x16xf32> to vector<16x16xf32>
    %c156 = arith.constant 156 : index
    %1684 = memref.load %arg4[%c156] : memref<162xf32, #tpu.memory_space<smem>>
    %1685 = vector.broadcast %1684 : f32 to vector<16x16xf32>
    %1686 = arith.mulf %1685, %1683 : vector<16x16xf32>
    %1687 = arith.addf %1682, %1686 : vector<16x16xf32>
    %1688 = vector.extract_strided_slice %1423 {offsets = [2, 0], sizes = [16, 16], strides = [1, 1]} : vector<18x16xf32> to vector<16x16xf32>
    %c159 = arith.constant 159 : index
    %1689 = memref.load %arg4[%c159] : memref<162xf32, #tpu.memory_space<smem>>
    %1690 = vector.broadcast %1689 : f32 to vector<16x16xf32>
    %1691 = arith.mulf %1690, %1688 : vector<16x16xf32>
    %1692 = arith.addf %1687, %1691 : vector<16x16xf32>
    %1693 = vector.extract_strided_slice %1424 {offsets = [0, 0], sizes = [16, 16], strides = [1, 1]} : vector<18x16xf32> to vector<16x16xf32>
    %c154 = arith.constant 154 : index
    %1694 = memref.load %arg4[%c154] : memref<162xf32, #tpu.memory_space<smem>>
    %1695 = vector.broadcast %1694 : f32 to vector<16x16xf32>
    %1696 = arith.mulf %1695, %1693 : vector<16x16xf32>
    %1697 = arith.addf %1692, %1696 : vector<16x16xf32>
    %1698 = vector.extract_strided_slice %1424 {offsets = [1, 0], sizes = [16, 16], strides = [1, 1]} : vector<18x16xf32> to vector<16x16xf32>
    %c157 = arith.constant 157 : index
    %1699 = memref.load %arg4[%c157] : memref<162xf32, #tpu.memory_space<smem>>
    %1700 = vector.broadcast %1699 : f32 to vector<16x16xf32>
    %1701 = arith.mulf %1700, %1698 : vector<16x16xf32>
    %1702 = arith.addf %1697, %1701 : vector<16x16xf32>
    %1703 = vector.extract_strided_slice %1424 {offsets = [2, 0], sizes = [16, 16], strides = [1, 1]} : vector<18x16xf32> to vector<16x16xf32>
    %c160 = arith.constant 160 : index
    %1704 = memref.load %arg4[%c160] : memref<162xf32, #tpu.memory_space<smem>>
    %1705 = vector.broadcast %1704 : f32 to vector<16x16xf32>
    %1706 = arith.mulf %1705, %1703 : vector<16x16xf32>
    %1707 = arith.addf %1702, %1706 : vector<16x16xf32>
    %1708 = vector.extract_strided_slice %1425 {offsets = [0, 0], sizes = [16, 16], strides = [1, 1]} : vector<18x16xf32> to vector<16x16xf32>
    %c155 = arith.constant 155 : index
    %1709 = memref.load %arg4[%c155] : memref<162xf32, #tpu.memory_space<smem>>
    %1710 = vector.broadcast %1709 : f32 to vector<16x16xf32>
    %1711 = arith.mulf %1710, %1708 : vector<16x16xf32>
    %1712 = arith.addf %1707, %1711 : vector<16x16xf32>
    %1713 = vector.extract_strided_slice %1425 {offsets = [1, 0], sizes = [16, 16], strides = [1, 1]} : vector<18x16xf32> to vector<16x16xf32>
    %c158 = arith.constant 158 : index
    %1714 = memref.load %arg4[%c158] : memref<162xf32, #tpu.memory_space<smem>>
    %1715 = vector.broadcast %1714 : f32 to vector<16x16xf32>
    %1716 = arith.mulf %1715, %1713 : vector<16x16xf32>
    %1717 = arith.addf %1712, %1716 : vector<16x16xf32>
    %1718 = vector.extract_strided_slice %1425 {offsets = [2, 0], sizes = [16, 16], strides = [1, 1]} : vector<18x16xf32> to vector<16x16xf32>
    %c161 = arith.constant 161 : index
    %1719 = memref.load %arg4[%c161] : memref<162xf32, #tpu.memory_space<smem>>
    %1720 = vector.broadcast %1719 : f32 to vector<16x16xf32>
    %1721 = arith.mulf %1720, %1718 : vector<16x16xf32>
    %1722 = arith.addf %1717, %1721 : vector<16x16xf32>
    %c5_395 = arith.constant 5 : index
    %c0_396 = arith.constant 0 : index
    %c0_397 = arith.constant 0 : index
    %1723 = vector.load %arg9[%c5_395, %c0_396, %c0_397] : memref<6x16x16xf32, #tpu.memory_space<vmem>>, vector<1x16x16xf32>
    %1724 = vector.shape_cast %1723 : vector<1x16x16xf32> to vector<16x16xf32>
    %1725 = vector.shape_cast %1722 : vector<16x16xf32> to vector<1x16x16xf32>
    tpu.vector_store %arg9[%c5_395, %c0_396, %c0_397], %1725 {strides = array<i32>} : memref<6x16x16xf32, #tpu.memory_space<vmem>>, vector<1x16x16xf32>,
    %c0_398 = arith.constant 0 : index
    %c0_399 = arith.constant 0 : index
    %c0_400 = arith.constant 0 : index
    %1726 = vector.load %arg9[%c0_398, %c0_399, %c0_400] : memref<6x16x16xf32, #tpu.memory_space<vmem>>, vector<1x16x16xf32>
    %1727 = vector.shape_cast %1726 : vector<1x16x16xf32> to vector<16x16xf32>
    %c0_401 = arith.constant 0 : index
    %c0_402 = arith.constant 0 : index
    %c0_403 = arith.constant 0 : index
    %c0_404 = arith.constant 0 : index
    %1728 = vector.load %arg7[%c0_401, %c0_402, %c0_403, %c0_404] : memref<1x6x16x16xf32, #tpu.memory_space<vmem>>, vector<1x1x16x16xf32>
    %1729 = vector.shape_cast %1728 : vector<1x1x16x16xf32> to vector<16x16xf32>
    %1730 = vector.shape_cast %1727 : vector<16x16xf32> to vector<1x1x16x16xf32>
    tpu.vector_store %arg7[%c0_401, %c0_402, %c0_403, %c0_404], %1730 {strides = array<i32>} : memref<1x6x16x16xf32, #tpu.memory_space<vmem>>, vector<1x1x16x16xf32>,
    %c1_405 = arith.constant 1 : index
    %c0_406 = arith.constant 0 : index
    %c0_407 = arith.constant 0 : index
    %1731 = vector.load %arg9[%c1_405, %c0_406, %c0_407] : memref<6x16x16xf32, #tpu.memory_space<vmem>>, vector<1x16x16xf32>
    %1732 = vector.shape_cast %1731 : vector<1x16x16xf32> to vector<16x16xf32>
    %c0_408 = arith.constant 0 : index
    %c1_409 = arith.constant 1 : index
    %c0_410 = arith.constant 0 : index
    %c0_411 = arith.constant 0 : index
    %1733 = vector.load %arg7[%c0_408, %c1_409, %c0_410, %c0_411] : memref<1x6x16x16xf32, #tpu.memory_space<vmem>>, vector<1x1x16x16xf32>
    %1734 = vector.shape_cast %1733 : vector<1x1x16x16xf32> to vector<16x16xf32>
    %1735 = vector.shape_cast %1732 : vector<16x16xf32> to vector<1x1x16x16xf32>
    tpu.vector_store %arg7[%c0_408, %c1_409, %c0_410, %c0_411], %1735 {strides = array<i32>} : memref<1x6x16x16xf32, #tpu.memory_space<vmem>>, vector<1x1x16x16xf32>,
    %c2_412 = arith.constant 2 : index
    %c0_413 = arith.constant 0 : index
    %c0_414 = arith.constant 0 : index
    %1736 = vector.load %arg9[%c2_412, %c0_413, %c0_414] : memref<6x16x16xf32, #tpu.memory_space<vmem>>, vector<1x16x16xf32>
    %1737 = vector.shape_cast %1736 : vector<1x16x16xf32> to vector<16x16xf32>
    %c0_415 = arith.constant 0 : index
    %c2_416 = arith.constant 2 : index
    %c0_417 = arith.constant 0 : index
    %c0_418 = arith.constant 0 : index
    %1738 = vector.load %arg7[%c0_415, %c2_416, %c0_417, %c0_418] : memref<1x6x16x16xf32, #tpu.memory_space<vmem>>, vector<1x1x16x16xf32>
    %1739 = vector.shape_cast %1738 : vector<1x1x16x16xf32> to vector<16x16xf32>
    %1740 = vector.shape_cast %1737 : vector<16x16xf32> to vector<1x1x16x16xf32>
    tpu.vector_store %arg7[%c0_415, %c2_416, %c0_417, %c0_418], %1740 {strides = array<i32>} : memref<1x6x16x16xf32, #tpu.memory_space<vmem>>, vector<1x1x16x16xf32>,
    %c3_419 = arith.constant 3 : index
    %c0_420 = arith.constant 0 : index
    %c0_421 = arith.constant 0 : index
    %1741 = vector.load %arg9[%c3_419, %c0_420, %c0_421] : memref<6x16x16xf32, #tpu.memory_space<vmem>>, vector<1x16x16xf32>
    %1742 = vector.shape_cast %1741 : vector<1x16x16xf32> to vector<16x16xf32>
    %c0_422 = arith.constant 0 : index
    %c3_423 = arith.constant 3 : index
    %c0_424 = arith.constant 0 : index
    %c0_425 = arith.constant 0 : index
    %1743 = vector.load %arg7[%c0_422, %c3_423, %c0_424, %c0_425] : memref<1x6x16x16xf32, #tpu.memory_space<vmem>>, vector<1x1x16x16xf32>
    %1744 = vector.shape_cast %1743 : vector<1x1x16x16xf32> to vector<16x16xf32>
    %1745 = vector.shape_cast %1742 : vector<16x16xf32> to vector<1x1x16x16xf32>
    tpu.vector_store %arg7[%c0_422, %c3_423, %c0_424, %c0_425], %1745 {strides = array<i32>} : memref<1x6x16x16xf32, #tpu.memory_space<vmem>>, vector<1x1x16x16xf32>,
    %c4_426 = arith.constant 4 : index
    %c0_427 = arith.constant 0 : index
    %c0_428 = arith.constant 0 : index
    %1746 = vector.load %arg9[%c4_426, %c0_427, %c0_428] : memref<6x16x16xf32, #tpu.memory_space<vmem>>, vector<1x16x16xf32>
    %1747 = vector.shape_cast %1746 : vector<1x16x16xf32> to vector<16x16xf32>
    %c0_429 = arith.constant 0 : index
    %c4_430 = arith.constant 4 : index
    %c0_431 = arith.constant 0 : index
    %c0_432 = arith.constant 0 : index
    %1748 = vector.load %arg7[%c0_429, %c4_430, %c0_431, %c0_432] : memref<1x6x16x16xf32, #tpu.memory_space<vmem>>, vector<1x1x16x16xf32>
    %1749 = vector.shape_cast %1748 : vector<1x1x16x16xf32> to vector<16x16xf32>
    %1750 = vector.shape_cast %1747 : vector<16x16xf32> to vector<1x1x16x16xf32>
    tpu.vector_store %arg7[%c0_429, %c4_430, %c0_431, %c0_432], %1750 {strides = array<i32>} : memref<1x6x16x16xf32, #tpu.memory_space<vmem>>, vector<1x1x16x16xf32>,
    %c5_433 = arith.constant 5 : index
    %c0_434 = arith.constant 0 : index
    %c0_435 = arith.constant 0 : index
    %1751 = vector.load %arg9[%c5_433, %c0_434, %c0_435] : memref<6x16x16xf32, #tpu.memory_space<vmem>>, vector<1x16x16xf32>
    %1752 = vector.shape_cast %1751 : vector<1x16x16xf32> to vector<16x16xf32>
    %c0_436 = arith.constant 0 : index
    %c5_437 = arith.constant 5 : index
    %c0_438 = arith.constant 0 : index
    %c0_439 = arith.constant 0 : index
    %1753 = vector.load %arg7[%c0_436, %c5_437, %c0_438, %c0_439] : memref<1x6x16x16xf32, #tpu.memory_space<vmem>>, vector<1x1x16x16xf32>
    %1754 = vector.shape_cast %1753 : vector<1x1x16x16xf32> to vector<16x16xf32>
    %1755 = vector.shape_cast %1752 : vector<16x16xf32> to vector<1x1x16x16xf32>
    tpu.vector_store %arg7[%c0_436, %c5_437, %c0_438, %c0_439], %1755 {strides = array<i32>} : memref<1x6x16x16xf32, #tpu.memory_space<vmem>>, vector<1x1x16x16xf32>,
    return
  }
  func.func @transform_0(%arg0: i32) -> (i32, i32, i32, i32) {
    %c0_i32 = arith.constant 0 : i32
    %c0_i32_0 = arith.constant 0 : i32
    %c0_i32_1 = arith.constant 0 : i32
    %c0_i32_2 = arith.constant 0 : i32
    return %arg0, %c0_i32, %c0_i32_0, %c0_i32_1 : i32, i32, i32, i32
  }
  func.func @transform_1(%arg0: i32) -> (i32, i32, i32, i32) {
    %c0_i32 = arith.constant 0 : i32
    %c0_i32_0 = arith.constant 0 : i32
    %c0_i32_1 = arith.constant 0 : i32
    %c0_i32_2 = arith.constant 0 : i32
    return %arg0, %c0_i32, %c0_i32_0, %c0_i32_1 : i32, i32, i32, i32
  }
  func.func @transform_2(%arg0: i32) -> i32 {
    %c0_i32 = arith.constant 0 : i32
    %c0_i32_0 = arith.constant 0 : i32
    return %c0_i32 : i32
  }
  func.func @transform_3(%arg0: i32) -> i32 {
    %c0_i32 = arith.constant 0 : i32
    %c0_i32_0 = arith.constant 0 : i32
    return %c0_i32 : i32
  }
  func.func @transform_4(%arg0: i32) -> i32 {
    %c0_i32 = arith.constant 0 : i32
    %c0_i32_0 = arith.constant 0 : i32
    return %c0_i32 : i32
  }
  func.func @transform_5(%arg0: i32) -> i32 {
    %c0_i32 = arith.constant 0 : i32
    %c0_i32_0 = arith.constant 0 : i32
    return %c0_i32 : i32
  }
  func.func @transform_6(%arg0: i32) -> (i32, i32, i32, i32) {
    %c0_i32 = arith.constant 0 : i32
    %c0_i32_0 = arith.constant 0 : i32
    %c0_i32_1 = arith.constant 0 : i32
    %c0_i32_2 = arith.constant 0 : i32
    return %arg0, %c0_i32, %c0_i32_0, %c0_i32_1 : i32, i32, i32, i32
  }
}

</mosaic_0001>

<bundles_post_ra>
// kernel: neg.1
= control target key start
LH: loop header
LB: loop body
LE: loop exit
PB: predicated region body
PF: predicated region fallthrough
CT: control target
= control target key end

     0   :  { %2 = vsyncpa [#allocation1], 0  ;;  %s120_s6 = smov [#allocation0]   ;;  %s172_s0 = inlined_call_operand.hbm [shape: f32[3,4,3,3], index: 0, kind: input, shape index: {}]   ;;  %s173_s1 = inlined_call_operand.vmem [shape: f32[3,4,3,3], index: 1, kind: output, shape index: {}]  }
   0x1   :  { %s6_s7 = sshll.u32 %s120_s6, 4  ;;  %s96_s10 = scalar_lea.hbm %s172_s0, 576  ;;  %s7_s7 = int_to_ptr.vmem [resolvable:$true] %s6_s7 }
   0x2   :  { %p97_p0 = scmp.ne.s32.totalorder %s172_s0, %s96_s10  ;;  %p100_p1 = scmp.lt.u32.totalorder %s96_s10, %s172_s0 }
   0x4   :  { %p102_p2 = pnand %p100_p1, %p97_p0 }
   0x6   :  { %105 = shalt.err (!%p102_p2)
}
   0x7   :  { %s106_s15 = scalar_lea.vmem %s7_s7, 576  ;;  %p111_p4 = scmp.lt.s32.totalorder %s7_s7, %s7_s7 }
   0x8   :  { %p107_p3 = scmp.ne.s32.totalorder %s7_s7, %s106_s15  ;;  %p112_p5 = scmp.lt.s32.totalorder %s106_s15, %s106_s15 }
   0xa   :  { %p113_p6 = por %p112_p5, %p111_p4 }
   0xc   :  { %p114_p7 = pnand %p113_p6, %p107_p3 }
   0xe   :  { %117 = shalt.err (!%p114_p7)
}
   0xf   :  { %s121_s16 = smov 64   ;;  %s122_s17 = smov 4  }
  0x10   :  { %12 = dma.hbm_to_vmem [thread:$0]  %s172_s0, 576, %s7_s7, [#allocation1], %s121_s16, %s121_s16, %s122_s17  }
  0x11   :  { %118 = dma.done.wait [#allocation1], 576  }
  0x12   :  { %119 = vsyncadd [#allocation1], 4294966720  ;;  %v14_v0 = vld [vmem:[#allocation0] sm:$0xf]  ;;  %v21_v1 = vld [vmem:[#allocation0 + $0xc] sm:$0xf] }
  0x13   :  { %v29_v2 = vld [vmem:[#allocation0 + $0x18] sm:$0xf]  ;;  %v17_v3 = vxor.u32 2147483648, %v14_v0  ;;  %v24_v4 = vxor.u32 2147483648, %v21_v1  ;;  %v37_v6 = vld [vmem:[#allocation0 + $0x4] sm:$0xf] }
  0x14   :  { %v32_v5 = vxor.u32 2147483648, %v29_v2  ;;  %v40_v7 = vxor.u32 2147483648, %v37_v6  ;;  %v45_v8 = vld [vmem:[#allocation0 + $0x10] sm:$0xf]  ;;  %v53_v9 = vld [vmem:[#allocation0 + $0x1c] sm:$0xf] }
  0x15   :  { %19 = vst [vmem:[%s173_s1] sm:$0xf] %v17_v3  ;;  %85 = vst [vmem:[%s173_s1 + $0xc] sm:$0xf] %v24_v4  ;;  %v48_v10 = vxor.u32 2147483648, %v45_v8  ;;  %v56_v11 = vxor.u32 2147483648, %v53_v9 }
  0x16   :  { %86 = vst [vmem:[%s173_s1 + $0x18] sm:$0xf] %v32_v5  ;;  %v61_v12 = vld [vmem:[#allocation0 + $0x8] sm:$0xf]  ;;  %v69_v13 = vld [vmem:[#allocation0 + $0x14] sm:$0xf] }
  0x17   :  { %87 = vst [vmem:[%s173_s1 + $0x4] sm:$0xf] %v40_v7  ;;  %v64_v14 = vxor.u32 2147483648, %v61_v12  ;;  %v72_v15 = vxor.u32 2147483648, %v69_v13  ;;  %v77_v16 = vld [vmem:[#allocation0 + $0x20] sm:$0xf] }
  0x18   :  { %88 = vst [vmem:[%s173_s1 + $0x10] sm:$0xf] %v48_v10  ;;  %89 = vst [vmem:[%s173_s1 + $0x1c] sm:$0xf] %v56_v11  ;;  %v80_v17 = vxor.u32 2147483648, %v77_v16 }
  0x19   :  { %90 = vst [vmem:[%s173_s1 + $0x8] sm:$0xf] %v64_v14  ;;  %91 = vst [vmem:[%s173_s1 + $0x14] sm:$0xf] %v72_v15 }
  0x1a   :  { %92 = vst [vmem:[%s173_s1 + $0x20] sm:$0xf] %v80_v17 }
  0x1b   :  { %84 = vsyncpa [#allocation1], 1 }

// kernel: dict_conv2d_forward.1
= control target key start
LH: loop header
LB: loop body
LE: loop exit
PB: predicated region body
PF: predicated region fallthrough
CT: control target
= control target key end

     0   :  { %s9266_s0 = inlined_call_operand.vmem [shape: f32[2,3,16,16], index: 0, kind: input, shape index: {}]   ;;  %s9267_s1 = inlined_call_operand.vmem [shape: f32[2,4,16,16], index: 1, kind: input, shape index: {}]   ;;  %s9268_s2 = inlined_call_operand.vmem [shape: f32[108], index: 2, kind: input, shape index: {}]   ;;  %s9269_s3 = inlined_call_operand.vmem [shape: f32[162], index: 3, kind: input, shape index: {}]   ;;  %s9270_s4 = inlined_call_operand.vmem [shape: f32[24], index: 4, kind: input, shape index: {}]   ;;  %s9271_s5 = inlined_call_operand.vmem [shape: f32[6], index: 5, kind: input, shape index: {}]   ;;  %s9272_s6 = inlined_call_operand.hbm [shape: f32[2,6,16,16], index: 6, kind: output, shape index: {}]  }
   0x1   :  { %9291 = sst [smem:[#allocation21_spill]] %s9266_s0 }
   0x2   :  { %9292 = sst [smem:[#allocation22_spill]] %s9267_s1 }
   0x3   :  { %9293 = sst [smem:[#allocation23_spill]] %s9268_s2 }
   0x4   :  { %9294 = sst [smem:[#allocation24_spill]] %s9269_s3 }
   0x5   :  { %9295 = sst [smem:[#allocation25_spill]] %s9270_s4 }
   0x6   :  { %9296 = sst [smem:[#allocation26_spill]] %s9271_s5 }
   0x7   :  { %11 = vsyncpa [#allocation6], 0 }
   0x8   :  { %12 = vsyncpa [#allocation8], 0 }
   0x9   :  { %13 = vsyncpa [#allocation11], 0 }
   0xa   :  { %14 = vsyncpa [#allocation5], 0 }
   0xb   :  { %16 = vsyncpa [#allocation5 + $0x1], 0  ;;  %s6328_s21 = smov 0   ;;  %s6330_s22 = smov 0  }
   0xc   :  { %s6332_s23 = smov 0   ;;  %s6334_s24 = smov 0  }
   0xd LB: > { %s6349_s25 = sadd.s32 4294967295, %s6280_s24   ;;  %s5716_s26 = sadd.s32 4294967294, %s6280_s24   ;;  %s6280_s24 = sphi %s6334_s24, %s9340_s24   ;;  %s6276_s23 = sphi %s6332_s23, %s9339_s23   ;;  %s6272_s22 = sphi %s6330_s22, %s9338_s22   ;;  %s6268_s21 = sphi %s6328_s21, %s9337_s21  }
   0xe   : > { %s6353_s27 = sadd.s32 1, %s6280_s24   ;;  %s165_s28 = sadd.s32 1, %s6276_s23 }
   0xf   : > { %s162_s29 = ssub.s32 %s6280_s24, %s6353_s27  ;;  %p175_p0 = scmp.ne.s32.totalorder %s6276_s23, %s6272_s22 }
  0x10   : > { %p163_p1 = scmp.eq.s32.totalorder %s162_s29, 0  ;;  %p176_p2 = scmp.eq.s32.totalorder %s6349_s25, 1 }
  0x11   : > { %p181_p3 = scmp.ne.s32.totalorder %s6272_s22, %s6268_s21  ;;  %p182_p4 = scmp.eq.s32.totalorder %s5716_s26, 1 }
  0x12   : > { %s6364_s30 = scalar_select %p163_p1, %s6276_s23, %s165_s28  }
  0x13   : > { %p6366_p5 = por %p176_p2, %p175_p0  ;;  %p6370_p6 = por %p182_p4, %p181_p3 }
  0x14   : > { %9297 = sst [smem:[#allocation17_spill]] %s6364_s30  ;;  %p5717_p7 = scmp.ge.s32.totalorder %s6280_s24, 1 }
  0x15   : > { %s9298_s7 = scalar_select %p6366_p5, 1, 0 }
  0x16   : > { %s9299_s8 = scalar_select %p6370_p6, 1, 0 }
  0x17   : > { %p189_p8 = scmp.lt.s32.totalorder %s6280_s24, 3  ;;  %p9273_p9 = scmp.eq.s32.totalorder %s6349_s25, 0 }
  0x18   : > { %s9301_s3 = sld [smem:[#allocation24_spill]]  ;;  %s9302_s2 = sld [smem:[#allocation23_spill]] }
  0x19   : > { %p6377_p10 = pnand %p5717_p7, %p189_p8  ;;  %s9304_s4 = sld [smem:[#allocation25_spill]] }
  0x1a   : > { %s9305_s5 = sld [smem:[#allocation26_spill]] }
  0x1b   : > { %s9300_s9 = scalar_select %p6377_p10, 1, 0 }
  0x1c   : > { %p6078_p11 = pneg %p6377_p10 }
  0x1e   : > { %s213_s12 = sshll.u32 %s9301_s3, 4  ;;  %s202_s15 = sshll.u32 %s9302_s2, 4  ;;  %s214_s12 = int_to_ptr.vmem [resolvable:$true] %s213_s12  ;;  %s203_s15 = int_to_ptr.vmem [resolvable:$true] %s202_s15 }
  0x1f   : > { %p6391_p12 = pnand %p9273_p9, %p6078_p11  ;;  %s224_s19 = sshll.u32 %s9304_s4, 4  ;;  %s6398_s19 = int_to_ptr.vmem [resolvable:$true] %s224_s19 }
  0x20   : > { %s235_s28 = sshll.u32 %s9305_s5, 4  ;;  %s6146_s29 = scalar_lea.vmem %s214_s12, 32  ;;  %s236_s28 = int_to_ptr.vmem [resolvable:$true] %s235_s28 }
  0x21   : > { %p6147_p13 = scmp.ne.s32.totalorder %s214_s12, %s6146_s29  ;;  %p6148_p0 = pneg %p6391_p12 }
  0x22   : > { %p6154_p3 = scmp.lt.s32.totalorder %s214_s12, %s214_s12  ;;  %p6155_p4 = scmp.lt.s32.totalorder %s6146_s29, %s6146_s29 }
  0x23   : > { %p6149_p1 = pnand %p6148_p0, %p6147_p13 }
  0x24   : > { %p6156_p7 = por %p6155_p4, %p6154_p3 }
  0x25   : > { %p6150_p2 = pneg %p6149_p1 }
  0x27   : > { %p6157_p8 = pnand %p6156_p7, %p6150_p2 }
  0x29   : > { %6160 = shalt.err (!%p6157_p8)
}
  0x2a   : > { %s6282_s10 = smov [#allocation7]   ;;  %s6161_s11 = scalar_lea.vmem %s203_s15, 16 }
  0x2b   : > { %6084 = dma.vmem_to_smem (!%p6391_p12), %s214_s12, 32, %s6282_s10, [#allocation8]  }
  0x2c   : > { %p6162_p11 = scmp.ne.s32.totalorder %s203_s15, %s6161_s11  ;;  %p6169_p5 = scmp.lt.s32.totalorder %s203_s15, %s203_s15 }
  0x2d   : > { %p6170_p10 = scmp.lt.s32.totalorder %s6161_s11, %s6161_s11 }
  0x2e   : > { %p6164_p9 = pnand %p6162_p11, %p6148_p0 }
  0x2f   : > { %p6171_p13 = por %p6170_p10, %p6169_p5 }
  0x30   : > { %p6165_p6 = pneg %p6164_p9 }
  0x32   : > { %p6172_p1 = pnand %p6171_p13, %p6165_p6 }
  0x34   : > { %6175 = shalt.err (!%p6172_p1)
}
  0x35   : > { %s6283_s13 = smov [#allocation4]   ;;  %s6176_s12 = scalar_lea.vmem %s6398_s19, 16 }
  0x36   : > { %6081 = dma.vmem_to_smem (!%p6391_p12), %s203_s15, 16, %s6283_s13, [#allocation6]  }
  0x37   : > { %p6177_p2 = scmp.ne.s32.totalorder %s6398_s19, %s6176_s12  ;;  %p6184_p9 = scmp.lt.s32.totalorder %s6398_s19, %s6398_s19 }
  0x38   : > { %p6185_p7 = scmp.lt.s32.totalorder %s6176_s12, %s6176_s12 }
  0x39   : > { %p6179_p3 = pnand %p6177_p2, %p6148_p0 }
  0x3a   : > { %p6186_p5 = por %p6185_p7, %p6184_p9 }
  0x3b   : > { %p6180_p4 = pneg %p6179_p3 }
  0x3d   : > { %p6187_p6 = pnand %p6186_p5, %p6180_p4 }
  0x3f   : > { %6190 = shalt.err (!%p6187_p6)
}
  0x40   : > { %s6284_s14 = smov [#allocation9]   ;;  %s6191_s18 = scalar_lea.vmem %s236_s28, 16 }
  0x41   : > { %6087 = dma.vmem_to_smem (!%p6391_p12), %s6398_s19, 16, %s6284_s14, [#allocation8]  }
  0x42   : > { %p6192_p10 = scmp.ne.s32.totalorder %s236_s28, %s6191_s18  ;;  %p6199_p13 = scmp.lt.s32.totalorder %s236_s28, %s236_s28 }
  0x43   : > { %p6200_p1 = scmp.lt.s32.totalorder %s6191_s18, %s6191_s18 }
  0x44   : > { %p6194_p8 = pnand %p6192_p10, %p6148_p0 }
  0x45   : > { %p6201_p2 = por %p6200_p1, %p6199_p13 }
  0x46   : > { %p6195_p11 = pneg %p6194_p8 }
  0x48   : > { %p6202_p3 = pnand %p6201_p2, %p6195_p11 }
  0x4a   : > { %6205 = shalt.err (!%p6202_p3)
}
  0x4b   : > { %s6285_s20 = smov [#allocation10]   ;;  %p9306_p4 = scmp.ne.s32.totalorder %s9300_s9, 0 }
  0x4c   : > { %6090 = dma.vmem_to_smem (!%p6391_p12), %s236_s28, 16, %s6285_s20, [#allocation11]  }
  0x4d   : > { %264 = sbr.rel (%p9306_p4) target bundleno = 1825 (0x721), region = 44 }
  0x54   : > { %p9307_p9 = scmp.eq.s32.totalorder %s6349_s25, 0 }
  0x56   : > { %6251 = dma.done.wait (%p9307_p9), [#allocation6], 16   ;;  %p9308_p7 = pmov %p9307_p9 }
  0x58   : > { %6253 = vsyncadd (%p9308_p7), [#allocation6], 4294967280  ;;  %p9309_p0 = pmov %p9308_p7 }
  0x5a   : > { %6255 = dma.done.wait (%p9309_p0), [#allocation8], 48   ;;  %p9310_p5 = pmov %p9309_p0 }
  0x5b   : > { %p9311_p6 = pmov %p9309_p0 }
  0x5c   : > { %6257 = vsyncadd (%p9310_p5), [#allocation8], 4294967248 }
  0x5d   : > { %6259 = dma.done.wait (%p9311_p6), [#allocation11], 16   ;;  %p9312_p12 = pmov %p9309_p0 }
  0x5f   : > { %6261 = vsyncadd (%p9312_p12), [#allocation11], 4294967280 }
  0x60   : > { %282 = sfence }
  0x61   : > { %p312_p10 = scmp.lt.s32.totalorder %s6349_s25, 1  ;;  %s9313_s1 = sld [smem:[#allocation22_spill]]  ;;  %vm345_vm0 = vcmask 1040384   ;;  %vm324_vm1 = vcmask 130048   ;;  %vm384_vm2 = vcmask 7168   ;;  %vm388_vm3 = vcmask 138240  }
  0x62   : > { %s6286_s29 = smov 127   ;;  %s9287_s10 = smov 1   ;;  %vm408_vm4 = vcmask 1046528   ;;  %vm426_vm5 = vcmask 1045504  }
  0x63   : > { %s6450_s9 = scalar_select %p312_p10, %s6349_s25, 1 }
  0x64   : > { %s9285_s11 = smov 3   ;;  %s9314_s0 = sld [smem:[#allocation21_spill]] }
  0x65   : > { %s6056_s16 = sshll.u32 %s6450_s9, 6  ;;  %s6058_s13 = smul.u32 48, %s6450_s9 }
  0x66   : > { %s5737_s15 = sld [smem:[#allocation4 + $0x1]]  ;;  %s5740_s18 = sld [smem:[#allocation4 + $0x2]] }
  0x67   : > { %s6456_s28 = scalar_lea.vmem %s9313_s1, %s6056_s16  ;;  %s5746_s20 = sld [smem:[#allocation4 + $0x25]] }
  0x68   : > { %v340_v0 = vld [vmem:[%s6456_s28 + $0x8] sm:$0xff]  ;;  %v339_v1 = vld [vmem:[%s6456_s28] sm:$0xff]  ;;  %v5761_v9 = vld [vmem:[%s6456_s28 + $0x10] sm:$0xff]  ;;  %s5749_s9 = sld [smem:[#allocation4 + $0x26]]  ;;  %s5755_s16 = sld [smem:[#allocation4 + $0x49]] }
  0x69   : > { %v347_v2 = vrot.slane %v340_v0, 7  ;;  %v351_v3 = vrot.slane %v340_v0, 5  ;;  %v342_v4 = vrot.slane %v339_v1, 1  ;;  %v346_v5 = vrot.slane %v339_v1, 7  ;;  %v5762_v12 = vld [vmem:[%s6456_s28 + $0x18] sm:$0xff]  ;;  %s9289_s19 = smov 126  }
  0x6a   : > { %v866_v10 = vrot.slane %v5761_v9, 1  ;;  %v869_v11 = vrot.slane %v5761_v9, 7  ;;  %v870_v14 = vrot.slane %v5762_v12, 7  ;;  %v874_v15 = vrot.slane %v5762_v12, 5  ;;  %s316_s17 = scalar_lea.vmem %s9314_s0, %s6058_s13  ;;  %s5758_s26 = sld [smem:[#allocation4 + $0x4a]] }
  0x6b   : > { %v354_v6 = vsel %vm345_vm0, %v347_v2, %v351_v3  ;;  %v353_v7 = vsel %vm345_vm0, %v342_v4, %v346_v5  ;;  %v348_v8 = vsel %vm345_vm0, %v346_v5, %v347_v2  ;;  %v322_v18 = vld [vmem:[%s316_s17] sm:$0xff]  ;;  %v323_v19 = vld [vmem:[%s316_s17 + $0x8] sm:$0xff]  ;;  %v5731_v20 = vld [vmem:[%s316_s17 + $0x10] sm:$0xff]  ;;  %s5766_s13 = sld [smem:[#allocation4 + $0xa]]  ;;  %s5769_s12 = sld [smem:[#allocation4 + $0xb]] }
  0x6c   : > { %361 = vrot.lane.b32.xlu1 %v354_v6, %s6286_s29  ;;  %357 = vrot.lane.b32.xlu0 %v353_v7, %s6286_s29  ;;  %v876_v13 = vsel %vm345_vm0, %v866_v10, %v869_v11  ;;  %v877_v16 = vsel %vm345_vm0, %v870_v14, %v874_v15  ;;  %v871_v17 = vsel %vm345_vm0, %v869_v11, %v870_v14  ;;  %v5732_v21 = vld [vmem:[%s316_s17 + $0x18] sm:$0xff]  ;;  %v5733_v22 = vld [vmem:[%s316_s17 + $0x20] sm:$0xff]  ;;  %s5738_s14 = sld [smem:[#allocation4 + $0x4]]  ;;  %s7095_s0 = sld [smem:[#allocation4 + $0x18]] }
  0x6d   : > { %325 = vst.msk [vmem:[#allocation2] sm:$0xff] %vm324_vm1, %v322_v18  ;;  %326 = vst.msk [vmem:[#allocation2 + $0x8] sm:$0xff] %vm324_vm1, %v323_v19  ;;  %v5734_v23 = vld [vmem:[%s316_s17 + $0x28] sm:$0xff]  ;;  %v437_v30 = vstv %s5737_s15  ;;  %v493_v39 = vstv %s5740_s18  ;;  %v593_v44 = vstv %s5746_s20  ;;  %s5739_s17 = sld [smem:[#allocation4 + $0x7]]  ;;  %s5775_s15 = sld [smem:[#allocation4 + $0x2e]] }
  0x6e   : > { %331 = vst.msk [vmem:[#allocation2 + $0x10] sm:$0xff] %vm324_vm1, %v5731_v20  ;;  %332 = vst.msk [vmem:[#allocation2 + $0x18] sm:$0xff] %vm324_vm1, %v5732_v21  ;;  %v649_v49 = vstv %s5749_s9  ;;  %v749_v54 = vstv %s5755_s16  ;;  %s5741_s18 = sld [smem:[#allocation4 + $0x5]]  ;;  %s5742_s20 = sld [smem:[#allocation4 + $0x8]] }
  0x6f   : > { %337 = vst.msk [vmem:[#allocation2 + $0x20] sm:$0xff] %vm324_vm1, %v5733_v22  ;;  %338 = vst.msk [vmem:[#allocation2 + $0x28] sm:$0xff] %vm324_vm1, %v5734_v23  ;;  %s5747_s9 = sld [smem:[#allocation4 + $0x28]]  ;;  %s5748_s16 = sld [smem:[#allocation4 + $0x2b]] }
  0x70   : > { %366 = vrot.lane.b32.xlu1 %v353_v7, %s9287_s10  ;;  %359 = vrot.lane.b32.xlu0 %v348_v8, %s6286_s29  ;;  %v805_v58 = vstv %s5758_s26  ;;  %s5750_s26 = sld [smem:[#allocation4 + $0x29]]  ;;  %s7097_s1 = sld [smem:[#allocation4 + $0x36]] }
  0x71   : > { %v956_v3 = vstv %s5766_s13  ;;  %s5751_s13 = sld [smem:[#allocation4 + $0x2c]]  ;;  %s7105_s2 = sld [smem:[#allocation4 + $0x39]] }
  0x72   : > { %v451_v9 = vstv %s5738_s14  ;;  %s5757_s14 = sld [smem:[#allocation4 + $0x4f]]  ;;  %s7111_s3 = sld [smem:[#allocation4 + $0x3c]] }
  0x73   : > { %v472_v12 = vstv %s5739_s17  ;;  %s5759_s17 = sld [smem:[#allocation4 + $0x4d]]  ;;  %s7113_s4 = sld [smem:[#allocation4 + $0x5a]] }
  0x74   : > { %370 = vrot.lane.b32.xlu1 %v354_v6, %s9287_s10  ;;  %368 = vrot.lane.b32.xlu0 %v348_v8, %s9287_s10  ;;  %s7470_s5 = sld [smem:[#allocation4 + $0x45]]  ;;  %s7478_s30 = sld [smem:[#allocation4 + $0x63]] }
  0x75   : > { %p9334_p11 = scmp.ne.s32.totalorder %s9298_s7, 0 }
  0x78   : > { %377 = vrot.lane.b32.xlu1 %v348_v8, %s9285_s11  ;;  %375 = vrot.lane.b32.xlu0 %v353_v7, %s9285_s11  ;;  %v1012_v7 = vstv %s5769_s12  ;;  %s5756_s12 = sld [smem:[#allocation4 + $0x4c]] }
  0x7c   : > { %880 = vrot.lane.b32.xlu1 %v876_v13, %s6286_s29  ;;  %379 = vrot.lane.b32.xlu0 %v354_v6, %s9285_s11 }
  0x80   : > { %884 = vrot.lane.b32.xlu1 %v877_v16, %s6286_s29  ;;  %882 = vrot.lane.b32.xlu0 %v871_v17, %s6286_s29 }
  0x84   : > { %891 = vrot.lane.b32.xlu1 %v871_v17, %s9287_s10  ;;  %889 = vrot.lane.b32.xlu0 %v876_v13, %s9287_s10 }
  0x88   : > { %898 = vrot.lane.b32.xlu1 %v876_v13, %s9285_s11  ;;  %893 = vrot.lane.b32.xlu0 %v877_v16, %s9287_s10  ;;  %v1112_v13 = vstv %s5775_s15  ;;  %s5760_s15 = sld [smem:[#allocation4 + $0x50]] }
  0x8c   : > { %902 = vrot.lane.b32.xlu1 %v877_v16, %s9285_s11  ;;  %900 = vrot.lane.b32.xlu0 %v871_v17, %s9285_s11  ;;  %v507_v17 = vstv %s5741_s18  ;;  %s5767_s18 = sld [smem:[#allocation4 + $0xd]] }
  0xde   : > { %v6496_v24 = vpop.permute.xlu1 %361  ;;  %v358_v25 = vpop.permute.xlu0 %357 }
  0xe2   : > { %v367_v26 = vpop.permute.xlu1 %366  ;;  %v360_v27 = vpop.permute.xlu0 %359 }
  0xe3   : > { %v385_v31 = vsel %vm384_vm2, %v358_v25, %v367_v26  ;;  %v528_v26 = vstv %s5742_s20  ;;  %s6617_s20 = sld [smem:[#allocation4 + $0x10]] }
  0xe6   : > { %v6498_v28 = vpop.permute.xlu1 %370  ;;  %v369_v29 = vpop.permute.xlu0 %368 }
  0xe7   : > { %v386_v32 = vsel %vm384_vm2, %v360_v27, %v369_v29  ;;  %v387_v6 = vsel %vm384_vm2, %v6496_v24, %v6498_v28 }
  0xea   : > { %v378_v33 = vpop.permute.xlu1 %377  ;;  %v376_v34 = vpop.permute.xlu0 %375 }
  0xeb   : > { %v6503_v35 = vsel %vm388_vm3, %v386_v32, %v378_v33  ;;  %v6506_v36 = vsel %vm388_vm3, %v385_v31, %v376_v34 }
  0xec   : > { %v439_v37 = vmul.f32 %v437_v30, %v6503_v35  ;;  %v438_v38 = vmul.f32 %v437_v30, %v6506_v36  ;;  %v495_v42 = vmul.f32 %v493_v39, %v6503_v35  ;;  %v494_v43 = vmul.f32 %v493_v39, %v6506_v36 }
  0xed   : > { %v595_v47 = vmul.f32 %v593_v44, %v6503_v35  ;;  %v594_v48 = vmul.f32 %v593_v44, %v6506_v36  ;;  %v651_v52 = vmul.f32 %v649_v49, %v6503_v35  ;;  %v650_v53 = vmul.f32 %v649_v49, %v6506_v36 }
  0xee   : > { %v881_v40 = vpop.permute.xlu1 %880  ;;  %444 = vrot.lane.b32.xlu0 %v439_v37, %s6286_s29  ;;  %442 = vrot.lane.b32.xlu1 %v438_v38, %s6286_s29  ;;  %v380_v41 = vpop.permute.xlu0 %379  ;;  %v751_v56 = vmul.f32 %v749_v54, %v6503_v35  ;;  %v750_v57 = vmul.f32 %v749_v54, %v6506_v36  ;;  %v807_v63 = vmul.f32 %v805_v58, %v6503_v35  ;;  %v607_v37 = vstv %s5747_s9  ;;  %s6619_s9 = sld [smem:[#allocation4 + $0xe]] }
  0xef   : > { %v806_v0 = vmul.f32 %v805_v58, %v6506_v36  ;;  %v6550_v8 = vsel %vm388_vm3, %v387_v6, %v380_v41  ;;  %v453_v14 = vmul.f32 %v451_v9, %v6503_v35  ;;  %v452_v16 = vmul.f32 %v451_v9, %v6506_v36 }
  0xf0   : > { %v454_v15 = vmul.f32 %v451_v9, %v6550_v8  ;;  %v474_v20 = vmul.f32 %v472_v12, %v6503_v35  ;;  %v475_v21 = vmul.f32 %v472_v12, %v6550_v8  ;;  %v473_v25 = vmul.f32 %v472_v12, %v6506_v36 }
  0xf1   : > { %v459_v22 = vrot.slane %v453_v14, 1  ;;  %v458_v24 = vrot.slane %v452_v16, 1  ;;  %v509_v29 = vmul.f32 %v507_v17, %v6503_v35  ;;  %v510_v30 = vmul.f32 %v507_v17, %v6550_v8 }
  0xf2   : > { %v6514_v45 = vpop.permute.xlu1 %884  ;;  %500 = vrot.lane.b32.xlu0 %v495_v42, %s9289_s19  ;;  %498 = vrot.lane.b32.xlu1 %v494_v43, %s9289_s19  ;;  %v883_v46 = vpop.permute.xlu0 %882  ;;  %v461_v23 = vrot.slane %v454_v15, 1  ;;  %v480_v27 = vrot.slane %v474_v20, 2  ;;  %v482_v28 = vrot.slane %v475_v21, 2  ;;  %v479_v33 = vrot.slane %v473_v25, 2 }
  0xf3   : > { %v460_v32 = vsel %vm408_vm4, %v458_v24, %v459_v22  ;;  %v508_v34 = vmul.f32 %v507_v17, %v6506_v36  ;;  %v515_v39 = vrot.slane %v509_v29, 1  ;;  %v530_v41 = vmul.f32 %v528_v26, %v6503_v35 }
  0xf4   : > { %v462_v31 = vsel %vm408_vm4, %v459_v22, %v461_v23  ;;  %v483_v38 = vsel %vm426_vm5, %v480_v27, %v482_v28  ;;  %v481_v42 = vsel %vm426_vm5, %v479_v33, %v480_v27  ;;  %v531_v44 = vmul.f32 %v528_v26, %v6550_v8 }
  0xf5   : > { %v514_v43 = vrot.slane %v508_v34, 1  ;;  %v536_v49 = vrot.slane %v530_v41, 2  ;;  %v763_v14 = vstv %s5756_s12  ;;  %v784_v23 = vstv %s5757_s14  ;;  %s6634_s12 = sld [smem:[#allocation4 + $0x33]]  ;;  %s6675_s14 = sld [smem:[#allocation4 + $0x54]] }
  0xf6   : > { %600 = vrot.lane.b32.xlu0 %v595_v47, %s6286_s29  ;;  %598 = vrot.lane.b32.xlu1 %v594_v48, %s6286_s29  ;;  %v890_v50 = vpop.permute.xlu0 %889  ;;  %v892_v51 = vpop.permute.xlu1 %891  ;;  %v628_v47 = vstv %s5748_s16  ;;  %v766_v27 = vmul.f32 %v763_v14, %v6550_v8  ;;  %s6621_s16 = sld [smem:[#allocation4 + $0xc]]  ;;  %v787_v41 = vmul.f32 %v784_v23, %v6550_v8 }
  0xf7   : > { %v908_v61 = vsel %vm384_vm2, %v883_v46, %v892_v51  ;;  %v907_v62 = vsel %vm384_vm2, %v881_v40, %v890_v50  ;;  %v517_v40 = vrot.slane %v510_v30, 1  ;;  %v529_v46 = vmul.f32 %v528_v26, %v6506_v36 }
  0xf8   : > { %v609_v50 = vmul.f32 %v607_v37, %v6503_v35  ;;  %v610_v51 = vmul.f32 %v607_v37, %v6550_v8  ;;  %v630_v58 = vmul.f32 %v628_v47, %v6503_v35  ;;  %v765_v26 = vmul.f32 %v763_v14, %v6503_v35 }
  0xf9   : > { %v518_v48 = vsel %vm408_vm4, %v515_v39, %v517_v40  ;;  %v535_v54 = vrot.slane %v529_v46, 2  ;;  %v970_v46 = vstv %s5767_s18  ;;  %s6745_s18 = sld [smem:[#allocation4 + $0x31]] }
  0xfa   : > { %656 = vrot.lane.b32.xlu0 %v651_v52, %s9289_s19  ;;  %654 = vrot.lane.b32.xlu1 %v650_v53, %s9289_s19  ;;  %v6526_v55 = vpop.permute.xlu0 %893  ;;  %v899_v59 = vpop.permute.xlu1 %898  ;;  %v516_v52 = vsel %vm408_vm4, %v514_v43, %v515_v39  ;;  %v538_v53 = vrot.slane %v531_v44, 2  ;;  %v771_v34 = vrot.slane %v765_v26, 1  ;;  %v840_v44 = vstv %s5760_s15  ;;  %s6699_s15 = sld [smem:[#allocation4 + $0x11]] }
  0xfb   : > { %v6537_v1 = vsel %vm388_vm3, %v907_v62, %v899_v59  ;;  %v631_v59 = vmul.f32 %v628_v47, %v6550_v8  ;;  %v537_v62 = vsel %vm426_vm5, %v535_v54, %v536_v49 }
  0xfc   : > { %v957_v4 = vmul.f32 %v956_v3, %v6537_v1  ;;  %v1013_v10 = vmul.f32 %v1012_v7, %v6537_v1  ;;  %v1113_v18 = vmul.f32 %v1112_v13, %v6537_v1 }
  0xfe   : > { %756 = vrot.lane.b32.xlu0 %v751_v56, %s6286_s29  ;;  %754 = vrot.lane.b32.xlu1 %v750_v57, %s6286_s29  ;;  %v901_v60 = vpop.permute.xlu0 %900  ;;  %v608_v56 = vmul.f32 %v607_v37, %v6506_v36  ;;  %v615_v57 = vrot.slane %v609_v50, 1  ;;  %v773_v37 = vrot.slane %v766_v27, 1 }
  0xff   : > { %v6540_v2 = vsel %vm388_vm3, %v908_v61, %v901_v60  ;;  %v629_v60 = vmul.f32 %v628_v47, %v6506_v36  ;;  %v539_v61 = vsel %vm426_vm5, %v536_v49, %v538_v53  ;;  %v903_v47 = vpop.permute.xlu1 %902  ;;  %v794_v53 = vrot.slane %v787_v41, 2 }
 0x100   : > { %v958_v5 = vmul.f32 %v956_v3, %v6540_v2  ;;  %v1014_v11 = vmul.f32 %v1012_v7, %v6540_v2  ;;  %v1114_v19 = vmul.f32 %v1112_v13, %v6540_v2  ;;  %v663_v3 = vstv %s5750_s26  ;;  %s6625_s26 = sld [smem:[#allocation4 + $0xf]] }
 0x101   : > { %v635_v6 = vrot.slane %v629_v60, 2  ;;  %v666_v7 = vmul.f32 %v663_v3, %v6550_v8  ;;  %v664_v12 = vmul.f32 %v663_v3, %v6506_v36  ;;  %v684_v13 = vstv %s5751_s13  ;;  %s6632_s13 = sld [smem:[#allocation4 + $0x30]] }
 0x102   : > { %812 = vrot.lane.b32.xlu0 %v807_v63, %s9289_s19  ;;  %810 = vrot.lane.b32.xlu1 %v806_v0, %s9289_s19  ;;  %v617_v63 = vrot.slane %v610_v51, 1  ;;  %v614_v0 = vrot.slane %v608_v56, 1  ;;  %v686_v21 = vmul.f32 %v684_v13, %v6503_v35  ;;  %v685_v22 = vmul.f32 %v684_v13, %v6506_v36 }
 0x103   : > { %v673_v17 = vrot.slane %v666_v7, 1  ;;  %v670_v20 = vrot.slane %v664_v12, 1  ;;  %v843_v56 = vmul.f32 %v840_v44, %v6550_v8  ;;  %v971_v7 = vmul.f32 %v970_v46, %v6537_v1 }
 0x104   : > { %v618_v9 = vsel %vm408_vm4, %v615_v57, %v617_v63  ;;  %v692_v29 = vrot.slane %v686_v21, 2  ;;  %v691_v30 = vrot.slane %v685_v22, 2  ;;  %v6656_v63 = vstv %s6621_s16  ;;  %s5779_s16 = sld [smem:[#allocation4 + $0x32]] }
 0x105   : > { %v6673_v12 = vstv %s6634_s12  ;;  %v977_v22 = vrot.slane %v971_v7, 1  ;;  %s5785_s12 = sld [smem:[#allocation4 + $0x55]] }
 0x106   : > { %961 = vrot.lane.b32.xlu0 %v957_v4, %s6286_s29  ;;  %963 = vrot.lane.b32.xlu1 %v958_v5, %s6286_s29  ;;  %v636_v4 = vrot.slane %v630_v58, 2  ;;  %v638_v5 = vrot.slane %v631_v59, 2  ;;  %v693_v39 = vsel %vm426_vm5, %v691_v30, %v692_v29  ;;  %v991_v58 = vstv %s6617_s20  ;;  %s5777_s20 = sld [smem:[#allocation4 + $0x34]] }
 0x107   : > { %v6649_v59 = vstv %s6619_s9  ;;  %s5778_s9 = sld [smem:[#allocation4 + $0x2f]] }
 0x108   : > { %v639_v15 = vsel %vm426_vm5, %v636_v4, %v638_v5  ;;  %v637_v16 = vsel %vm426_vm5, %v635_v6, %v636_v4  ;;  %v850_v6 = vrot.slane %v843_v56, 2 }
 0x10a   : > { %1017 = vrot.lane.b32.xlu0 %v1013_v10, %s9289_s19  ;;  %1019 = vrot.lane.b32.xlu1 %v1014_v11, %s9289_s19  ;;  %v616_v10 = vsel %vm408_vm4, %v614_v0, %v615_v57  ;;  %v665_v11 = vmul.f32 %v663_v3, %v6503_v35  ;;  %v909_v57 = vsel %vm384_vm2, %v6514_v45, %v6526_v55  ;;  %v6660_v55 = vstv %s6625_s26  ;;  %s5780_s26 = sld [smem:[#allocation4 + $0x35]] }
 0x10b   : > { %v6652_v60 = vsel %vm388_vm3, %v909_v57, %v903_v47  ;;  %v841_v45 = vmul.f32 %v840_v44, %v6506_v36 }
 0x10c   : > { %v1098_v41 = vmul.f32 %v6673_v12, %v6652_v60 }
 0x10e   : > { %1117 = vrot.lane.b32.xlu0 %v1113_v18, %s6286_s29  ;;  %1119 = vrot.lane.b32.xlu1 %v1114_v19, %s6286_s29  ;;  %v687_v18 = vmul.f32 %v684_v13, %v6550_v8  ;;  %v671_v19 = vrot.slane %v665_v11, 1  ;;  %v6670_v11 = vstv %s6632_s13  ;;  %s6818_s13 = sld [smem:[#allocation4 + $0x52]] }
 0x10f   : > { %v6703_v30 = vmul.f32 %v6670_v11, %v6540_v2 }
 0x110   : > { %v674_v24 = vsel %vm408_vm4, %v671_v19, %v673_v17  ;;  %v694_v25 = vrot.slane %v687_v18, 2  ;;  %v672_v28 = vsel %vm408_vm4, %v670_v20, %v671_v19  ;;  %v847_v18 = vrot.slane %v841_v45, 2 }
 0x111   : > { %v6687_v19 = vmul.f32 %v6656_v63, %v6540_v2  ;;  %v6691_v20 = vmul.f32 %v6660_v55, %v6540_v2 }
 0x112   : > { %465 = vrot.lane.b32.xlu0 %v462_v31, %s6286_s29  ;;  %463 = vrot.lane.b32.xlu1 %v460_v32, %s6286_s29  ;;  %v764_v31 = vmul.f32 %v763_v14, %v6506_v36  ;;  %v819_v32 = vstv %s5759_s17  ;;  %v695_v33 = vsel %vm426_vm5, %v692_v29, %v694_v25  ;;  %s6677_s17 = sld [smem:[#allocation4 + $0x57]]  ;;  %v993_v29 = vmul.f32 %v991_v58, %v6540_v2 }
 0x113   : > { %v822_v43 = vmul.f32 %v819_v32, %v6550_v8  ;;  %v821_v50 = vmul.f32 %v819_v32, %v6503_v35  ;;  %v820_v51 = vmul.f32 %v819_v32, %v6506_v36  ;;  %v9281_v27 = vrot.slane %v6687_v19, 1 }
 0x114   : > { %v770_v40 = vrot.slane %v764_v31, 1  ;;  %v1081_v31 = vmul.f32 %v6670_v11, %v6652_v60  ;;  %v6709_v32 = vmul.f32 %v6673_v12, %v6540_v2 }
 0x115   : > { %v827_v0 = vrot.slane %v821_v50, 1  ;;  %v826_v3 = vrot.slane %v820_v51, 1  ;;  %v1105_v51 = vrot.slane %v1098_v41, 2 }
 0x116   : > { %486 = vrot.lane.b32.xlu0 %v483_v38, %s6286_s29  ;;  %484 = vrot.lane.b32.xlu1 %v481_v42, %s6286_s29  ;;  %v786_v38 = vmul.f32 %v784_v23, %v6503_v35  ;;  %v785_v42 = vmul.f32 %v784_v23, %v6506_v36 }
 0x117   : > { %v828_v17 = vsel %vm408_vm4, %v826_v3, %v827_v0 }
 0x118   : > { %v792_v49 = vrot.slane %v786_v38, 2  ;;  %v791_v54 = vrot.slane %v785_v42, 2  ;;  %v9278_v42 = vrot.slane %v6709_v32, 2  ;;  %v6735_v47 = vstv %s6677_s17  ;;  %s6847_s17 = sld [smem:[#allocation4 + $0x53]] }
 0x119   : > { %9315 = vst [vmem:[#allocation18_spill] sm:$0xff] %v6735_v47  ;;  %v6755_v56 = vmul.f32 %v6735_v47, %v6540_v2 }
 0x11a   : > { %521 = vrot.lane.b32.xlu0 %v518_v48, %s9289_s19  ;;  %519 = vrot.lane.b32.xlu1 %v516_v52, %s9289_s19  ;;  %v774_v48 = vsel %vm408_vm4, %v771_v34, %v773_v37  ;;  %v772_v52 = vsel %vm408_vm4, %v770_v40, %v771_v34  ;;  %v795_v4 = vsel %vm426_vm5, %v792_v49, %v794_v53  ;;  %v1088_v40 = vrot.slane %v1081_v31, 1 }
 0x11b   : > { %v793_v5 = vsel %vm426_vm5, %v791_v54, %v792_v49  ;;  %v994_v34 = vmul.f32 %v991_v58, %v6652_v60  ;;  %v999_v49 = vrot.slane %v993_v29, 2  ;;  %9317 = vst [vmem:[#allocation20_spill] sm:$0xff] %v6755_v56 }
 0x11d   : > { %v1001_v57 = vrot.slane %v994_v34, 2 }
 0x11e   : > { %542 = vrot.lane.b32.xlu0 %v539_v61, %s9289_s19  ;;  %540 = vrot.lane.b32.xlu1 %v537_v62, %s9289_s19  ;;  %v829_v61 = vrot.slane %v822_v43, 1  ;;  %v842_v62 = vmul.f32 %v840_v44, %v6503_v35  ;;  %v992_v44 = vmul.f32 %v991_v58, %v6537_v1  ;;  %v1029_v58 = vmul.f32 %v6649_v59, %v6652_v60 }
 0x120   : > { %v830_v13 = vsel %vm408_vm4, %v827_v0, %v829_v61  ;;  %v848_v14 = vrot.slane %v842_v62, 2  ;;  %v6762_v61 = vsel %vm426_vm5, %v9278_v42, %v1105_v51  ;;  %v1254_v62 = vmul.f32 %v6735_v47, %v6652_v60  ;;  %v551_v47 = vld [vmem:[#allocation2 + $0x18] sm:$0xff] }
 0x121   : > { %v998_v0 = vrot.slane %v992_v44, 2 }
 0x122   : > { %621 = vrot.lane.b32.xlu0 %v618_v9, %s6286_s29  ;;  %619 = vrot.lane.b32.xlu1 %v616_v10, %s6286_s29  ;;  %v972_v9 = vmul.f32 %v970_v46, %v6540_v2  ;;  %v973_v10 = vmul.f32 %v970_v46, %v6652_v60  ;;  %v851_v21 = vsel %vm426_vm5, %v848_v14, %v850_v6  ;;  %v6732_v46 = vstv %s6675_s14  ;;  %s5786_s14 = sld [smem:[#allocation4 + $0x58]] }
 0x123   : > { %v6749_v53 = vmul.f32 %v6732_v46, %v6540_v2  ;;  %v1237_v54 = vmul.f32 %v6732_v46, %v6652_v60  ;;  %v1047_v6 = vstv %s6699_s15  ;;  %v1261_v7 = vrot.slane %v1254_v62, 2  ;;  %s5788_s15 = sld [smem:[#allocation4 + $0x56]] }
 0x124   : > { %v978_v25 = vrot.slane %v972_v9, 1  ;;  %v980_v26 = vrot.slane %v973_v10, 1  ;;  %v1000_v9 = vsel %vm426_vm5, %v998_v0, %v999_v49  ;;  %v1049_v10 = vmul.f32 %v1047_v6, %v6540_v2 }
 0x125   : > { %9316 = vst [vmem:[#allocation19_spill] sm:$0xff] %v6749_v53  ;;  %v9277_v3 = vrot.slane %v6749_v53, 1  ;;  %v1244_v45 = vrot.slane %v1237_v54, 1 }
 0x126   : > { %642 = vrot.lane.b32.xlu0 %v639_v15, %s6286_s29  ;;  %640 = vrot.lane.b32.xlu1 %v637_v16, %s6286_s29  ;;  %v925_v15 = vmul.f32 %v6656_v63, %v6652_v60  ;;  %v942_v16 = vmul.f32 %v6660_v55, %v6652_v60  ;;  %v979_v43 = vsel %vm408_vm4, %v977_v22, %v978_v25  ;;  %v1055_v22 = vrot.slane %v1049_v10, 2 }
 0x128   : > { %v932_v23 = vrot.slane %v925_v15, 1  ;;  %v1002_v15 = vsel %vm426_vm5, %v999_v49, %v1001_v57 }
 0x12a   : > { %677 = vrot.lane.b32.xlu0 %v674_v24, %s9289_s19  ;;  %675 = vrot.lane.b32.xlu1 %v672_v28, %s9289_s19  ;;  %v949_v24 = vrot.slane %v942_v16, 2  ;;  %v9280_v28 = vrot.slane %v6691_v20, 2  ;;  %v6716_v37 = vsel %vm408_vm4, %v9281_v27, %v932_v23 }
 0x12c   : > { %v6721_v38 = vsel %vm426_vm5, %v9280_v28, %v949_v24  ;;  %v1126_v24 = vstv %s6745_s18  ;;  %s5735_s18 = sld [smem:[#allocation4 + $0x3]] }
 0x12d   : > { %v1128_v29 = vmul.f32 %v1126_v24, %v6540_v2  ;;  %v1129_v31 = vmul.f32 %v1126_v24, %v6652_v60  ;;  %v1127_v34 = vmul.f32 %v1126_v24, %v6537_v1 }
 0x12e   : > { %698 = vrot.lane.b32.xlu0 %v695_v33, %s9289_s19  ;;  %696 = vrot.lane.b32.xlu1 %v693_v39, %s9289_s19  ;;  %v849_v33 = vsel %vm426_vm5, %v847_v18, %v848_v14  ;;  %v9279_v39 = vrot.slane %v6703_v30, 1  ;;  %v6779_v14 = vsel %vm408_vm4, %v9277_v3, %v1244_v45  ;;  %v1048_v18 = vmul.f32 %v1047_v6, %v6537_v1 }
 0x12f   : > { %v1134_v44 = vrot.slane %v1128_v29, 1 }
 0x130   : > { %v6741_v50 = vsel %vm408_vm4, %v9279_v39, %v1088_v40 }
 0x132   : > { %777 = vrot.lane.b32.xlu0 %v774_v48, %s6286_s29  ;;  %775 = vrot.lane.b32.xlu1 %v772_v52, %s6286_s29  ;;  %v981_v48 = vsel %vm408_vm4, %v978_v25, %v980_v26  ;;  %v1028_v52 = vmul.f32 %v6649_v59, %v6540_v2 }
 0x134   : > { %v1034_v16 = vrot.slane %v1028_v52, 1  ;;  %v1133_v52 = vrot.slane %v1127_v34, 1 }
 0x136   : > { %798 = vrot.lane.b32.xlu0 %v795_v4, %s6286_s29  ;;  %796 = vrot.lane.b32.xlu1 %v793_v5, %s6286_s29  ;;  %v9276_v4 = vrot.slane %v6755_v56, 2  ;;  %v1027_v5 = vmul.f32 %v6649_v59, %v6537_v1  ;;  %v1135_v57 = vsel %vm408_vm4, %v1133_v52, %v1134_v44 }
 0x138   : > { %v6785_v59 = vsel %vm426_vm5, %v9276_v4, %v1261_v7  ;;  %v392_v4 = vld [vmem:[#allocation2] sm:$0xff] }
 0x13a   : > { %833 = vrot.lane.b32.xlu0 %v830_v13, %s9289_s19  ;;  %831 = vrot.lane.b32.xlu1 %v828_v17, %s9289_s19  ;;  %v1050_v13 = vmul.f32 %v1047_v6, %v6652_v60  ;;  %v1036_v17 = vrot.slane %v1029_v58, 1  ;;  %v1182_v6 = vstv %s5779_s16  ;;  %s5736_s16 = sld [smem:[#allocation4 + $0x6]] }
 0x13b   : > { %v1184_v10 = vmul.f32 %v1182_v6, %v6540_v2 }
 0x13c   : > { %v1057_v23 = vrot.slane %v1050_v13, 2  ;;  %v1037_v26 = vsel %vm408_vm4, %v1034_v16, %v1036_v17  ;;  %v1185_v13 = vmul.f32 %v1182_v6, %v6652_v60 }
 0x13e   : > { %854 = vrot.lane.b32.xlu0 %v851_v21, %s9289_s19  ;;  %852 = vrot.lane.b32.xlu1 %v849_v33, %s9289_s19  ;;  %v1033_v21 = vrot.slane %v1027_v5, 1  ;;  %v1054_v33 = vrot.slane %v1048_v18, 2  ;;  %v1058_v41 = vsel %vm426_vm5, %v1055_v22, %v1057_v23  ;;  %v1168_v5 = vstv %s5778_s9  ;;  %s6862_s9 = sld [smem:[#allocation4]] }
 0x13f   : > { %v1170_v17 = vmul.f32 %v1168_v5, %v6540_v2  ;;  %v1203_v18 = vstv %s5780_s26  ;;  %s5744_s26 = sld [smem:[#allocation4 + $0x27]] }
 0x140   : > { %v1035_v25 = vsel %vm408_vm4, %v1033_v21, %v1034_v16  ;;  %v1056_v40 = vsel %vm426_vm5, %v1054_v33, %v1055_v22  ;;  %v1169_v16 = vmul.f32 %v1168_v5, %v6537_v1  ;;  %v1190_v21 = vrot.slane %v1184_v10, 1 }
 0x141   : > { %v1192_v22 = vrot.slane %v1185_v13, 1  ;;  %v1205_v23 = vmul.f32 %v1203_v18, %v6540_v2  ;;  %v1206_v24 = vmul.f32 %v1203_v18, %v6652_v60  ;;  %v1303_v5 = vstv %s5786_s14  ;;  %s5753_s14 = sld [smem:[#allocation4 + $0x4b]] }
 0x142   : > { %982 = vrot.lane.b32.xlu0 %v979_v43, %s6286_s29  ;;  %984 = vrot.lane.b32.xlu1 %v981_v48, %s6286_s29  ;;  %v1147_v43 = vstv %s5777_s20  ;;  %v1136_v48 = vrot.slane %v1129_v31, 1  ;;  %v1306_v10 = vmul.f32 %v1303_v5, %v6652_v60  ;;  %s5789_s20 = sld [smem:[#allocation4 + $0x59]] }
 0x143   : > { %v1149_v49 = vmul.f32 %v1147_v43, %v6540_v2  ;;  %v1150_v51 = vmul.f32 %v1147_v43, %v6652_v60  ;;  %v1148_v54 = vmul.f32 %v1147_v43, %v6537_v1  ;;  %v1193_v31 = vsel %vm408_vm4, %v1190_v21, %v1192_v22 }
 0x144   : > { %v1137_v58 = vsel %vm408_vm4, %v1134_v44, %v1136_v48  ;;  %v1211_v33 = vrot.slane %v1205_v23, 2  ;;  %v1213_v34 = vrot.slane %v1206_v24, 2  ;;  %v1268_v44 = vstv %s6818_s13  ;;  %s6918_s13 = sld [smem:[#allocation4 + $0x24]] }
 0x145   : > { %v1155_v62 = vrot.slane %v1149_v49, 2  ;;  %v1157_v0 = vrot.slane %v1150_v51, 2  ;;  %v1154_v45 = vrot.slane %v1148_v54, 2  ;;  %v1282_v48 = vstv %s5785_s12  ;;  %s5745_s12 = sld [smem:[#allocation4 + $0x2a]] }
 0x146   : > { %1003 = vrot.lane.b32.xlu0 %v1000_v9, %s6286_s29  ;;  %1005 = vrot.lane.b32.xlu1 %v1002_v15, %s6286_s29  ;;  %v1183_v15 = vmul.f32 %v1182_v6, %v6537_v1  ;;  %v1214_v51 = vsel %vm426_vm5, %v1211_v33, %v1213_v34  ;;  %v1284_v52 = vmul.f32 %v1282_v48, %v6540_v2  ;;  %v1313_v23 = vrot.slane %v1306_v10, 2 }
 0x147   : > { %v1156_v7 = vsel %vm426_vm5, %v1154_v45, %v1155_v62  ;;  %v1158_v9 = vsel %vm426_vm5, %v1155_v62, %v1157_v0  ;;  %v1285_v54 = vmul.f32 %v1282_v48, %v6652_v60  ;;  %v1269_v0 = vmul.f32 %v1268_v44, %v6537_v1 }
 0x148   : > { %v1270_v45 = vmul.f32 %v1268_v44, %v6540_v2  ;;  %v1290_v6 = vrot.slane %v1284_v52, 1 }
 0x14a   : > { %1038 = vrot.lane.b32.xlu0 %v1035_v25, %s9289_s19  ;;  %1040 = vrot.lane.b32.xlu1 %v1037_v26, %s9289_s19  ;;  %v1189_v25 = vrot.slane %v1183_v15, 1  ;;  %v1204_v26 = vmul.f32 %v1203_v18, %v6537_v1  ;;  %v1304_v15 = vmul.f32 %v1303_v5, %v6537_v1 }
 0x14c   : > { %v1191_v29 = vsel %vm408_vm4, %v1189_v25, %v1190_v21  ;;  %v1310_v24 = vrot.slane %v1304_v15, 2  ;;  %v395_v15 = vstv %s6862_s9  ;;  %s7007_s9 = sld [smem:[#allocation4 + $0x51]] }
 0x14e   : > { %1059 = vrot.lane.b32.xlu0 %v1056_v40, %s9289_s19  ;;  %1061 = vrot.lane.b32.xlu1 %v1058_v41, %s9289_s19  ;;  %v1210_v40 = vrot.slane %v1204_v26, 2 }
 0x150   : > { %v1212_v49 = vsel %vm426_vm5, %v1210_v40, %v1211_v33 }
 0x152   : > { %1138 = vrot.lane.b32.xlu0 %v1135_v57, %s6286_s29  ;;  %1140 = vrot.lane.b32.xlu1 %v1137_v58, %s6286_s29  ;;  %v1283_v57 = vmul.f32 %v1282_v48, %v6537_v1 }
 0x154   : > { %v1289_v13 = vrot.slane %v1283_v57, 1 }
 0x156   : > { %1159 = vrot.lane.b32.xlu0 %v1156_v7, %s6286_s29  ;;  %1161 = vrot.lane.b32.xlu1 %v1158_v9, %s6286_s29  ;;  %v1292_v7 = vrot.slane %v1285_v54, 1  ;;  %v1305_v9 = vmul.f32 %v1303_v5, %v6540_v2  ;;  %v1291_v18 = vsel %vm408_vm4, %v1289_v13, %v1290_v6  ;;  %v5790_v13 = vld [vmem:[%s6456_s28 + $0x20] sm:$0xff] }
 0x158   : > { %v1293_v21 = vsel %vm408_vm4, %v1290_v6, %v1292_v7  ;;  %v1311_v22 = vrot.slane %v1305_v9, 2 }
 0x15a   : > { %1173 = vrot.lane.b32.xlu0 %v1169_v16, %s9289_s19  ;;  %1175 = vrot.lane.b32.xlu1 %v1170_v17, %s9289_s19  ;;  %v1312_v33 = vsel %vm426_vm5, %v1310_v24, %v1311_v22  ;;  %v1314_v34 = vsel %vm426_vm5, %v1311_v22, %v1313_v23 }
 0x15e   : > { %1194 = vrot.lane.b32.xlu0 %v1191_v29, %s9289_s19  ;;  %1196 = vrot.lane.b32.xlu1 %v1193_v31, %s9289_s19  ;;  %v1324_v29 = vstv %s6847_s17  ;;  %v1338_v31 = vstv %s5788_s15  ;;  %s6948_s17 = sld [smem:[#allocation4 + $0x48]]  ;;  %s5754_s15 = sld [smem:[#allocation4 + $0x4e]] }
 0x15f   : > { %v1340_v40 = vmul.f32 %v1338_v31, %v6540_v2  ;;  %v1341_v44 = vmul.f32 %v1338_v31, %v6652_v60  ;;  %v1339_v48 = vmul.f32 %v1338_v31, %v6537_v1  ;;  %v1325_v54 = vmul.f32 %v1324_v29, %v6537_v1 }
 0x160   : > { %v6829_v41 = vpop.permute.xlu1 %442  ;;  %v6831_v43 = vpop.permute.xlu0 %444  ;;  %v1326_v57 = vmul.f32 %v1324_v29, %v6540_v2 }
 0x161   : > { %v1348_v5 = vrot.slane %v1341_v44, 1  ;;  %v1345_v9 = vrot.slane %v1339_v48, 1  ;;  %v1385_v44 = vrot.slane %v5790_v13, 1  ;;  %v396_v48 = vmul.f32 %v395_v15, %v6506_v36 }
 0x162   : > { %1215 = vrot.lane.b32.xlu0 %v1212_v49, %s9289_s19  ;;  %1217 = vrot.lane.b32.xlu1 %v1214_v51, %s9289_s19  ;;  %v401_v49 = vstv %s5735_s18  ;;  %s6957_s18 = sld [smem:[#allocation4 + $0x9]] }
 0x163   : > { %v404_v22 = vmul.f32 %v401_v49, %v6550_v8 }
 0x164   : > { %v6841_v58 = vpop.permute.xlu1 %498  ;;  %v6843_v62 = vpop.permute.xlu0 %500 }
 0x165   : > { %v412_v42 = vrot.slane %v404_v22, 1 }
 0x166   : > { %1273 = vrot.lane.b32.xlu0 %v1269_v0, %s6286_s29  ;;  %1275 = vrot.lane.b32.xlu1 %v1270_v45, %s6286_s29  ;;  %v1359_v0 = vstv %s5789_s20  ;;  %v1346_v45 = vrot.slane %v1340_v40, 1  ;;  %v419_v40 = vstv %s5736_s16  ;;  %s6982_s20 = sld [smem:[#allocation4 + $0x2d]]  ;;  %s5795_s16 = sld [smem:[#allocation4 + $0x13]] }
 0x167   : > { %v1361_v6 = vmul.f32 %v1359_v0, %v6540_v2  ;;  %v1362_v7 = vmul.f32 %v1359_v0, %v6652_v60  ;;  %v1360_v10 = vmul.f32 %v1359_v0, %v6537_v1  ;;  %v5791_v60 = vld [vmem:[%s6456_s28 + $0x28] sm:$0xff] }
 0x168   : > { %v6854_v16 = vpop.permute.xlu1 %598  ;;  %v6856_v17 = vpop.permute.xlu0 %600  ;;  %v1347_v29 = vsel %vm408_vm4, %v1345_v9, %v1346_v45  ;;  %v1349_v31 = vsel %vm408_vm4, %v1346_v45, %v1348_v5  ;;  %v397_v5 = vmul.f32 %v395_v15, %v6503_v35 }
 0x16a   : > { %1294 = vrot.lane.b32.xlu0 %v1291_v18, %s6286_s29  ;;  %1296 = vrot.lane.b32.xlu1 %v1293_v21, %s6286_s29  ;;  %v403_v18 = vmul.f32 %v401_v49, %v6503_v35  ;;  %v402_v21 = vmul.f32 %v401_v49, %v6506_v36  ;;  %v1366_v49 = vrot.slane %v1360_v10, 2  ;;  %v420_v10 = vmul.f32 %v419_v40, %v6506_v36 }
 0x16c   : > { %v6864_v25 = vpop.permute.xlu1 %654  ;;  %v6866_v26 = vpop.permute.xlu0 %656  ;;  %v410_v0 = vrot.slane %v403_v18, 1  ;;  %v409_v3 = vrot.slane %v402_v21, 1  ;;  %v393_v18 = vld [vmem:[#allocation2 + $0x8] sm:$0xff]  ;;  %v398_v21 = vadd.f32 %v396_v48, %v392_v4  ;;  %v427_v28 = vrot.slane %v420_v10, 2 }
 0x16d   : > { %v399_v39 = vadd.f32 %v397_v5, %v393_v18  ;;  %v559_v48 = vstv %s5744_s26  ;;  %v553_v10 = vstv %s6918_s13  ;;  %s5796_s26 = sld [smem:[#allocation4 + $0x16]]  ;;  %s5797_s13 = sld [smem:[#allocation4 + $0x19]] }
 0x16e   : > { %1315 = vrot.lane.b32.xlu0 %v1312_v33, %s6286_s29  ;;  %1317 = vrot.lane.b32.xlu1 %v1314_v34, %s6286_s29  ;;  %v1367_v33 = vrot.slane %v1361_v6, 2  ;;  %v1369_v34 = vrot.slane %v1362_v7, 2 }
 0x170   : > { %v6876_v51 = vpop.permute.xlu1 %754  ;;  %v6878_v52 = vpop.permute.xlu0 %756  ;;  %v1368_v6 = vsel %vm426_vm5, %v1366_v49, %v1367_v33  ;;  %v1370_v7 = vsel %vm426_vm5, %v1367_v33, %v1369_v34  ;;  %v411_v49 = vsel %vm408_vm4, %v409_v3, %v410_v0  ;;  %v413_v33 = vsel %vm408_vm4, %v410_v0, %v412_v42 }
 0x171   : > { %v416_v4 = vadd.f32 %v411_v49, %v398_v21  ;;  %v554_v49 = vmul.f32 %v553_v10, %v6506_v36 }
 0x172   : > { %1329 = vrot.lane.b32.xlu0 %v1325_v54, %s9289_s19  ;;  %1331 = vrot.lane.b32.xlu1 %v1326_v57, %s9289_s19  ;;  %v1388_v54 = vrot.slane %v5790_v13, 7  ;;  %v1389_v57 = vrot.slane %v5791_v60, 7  ;;  %v422_v13 = vmul.f32 %v419_v40, %v6550_v8 }
 0x174   : > { %v6892_v23 = vpop.permute.xlu1 %810  ;;  %v6894_v24 = vpop.permute.xlu0 %812  ;;  %v1395_v22 = vsel %vm345_vm0, %v1385_v44, %v1388_v54  ;;  %v1390_v15 = vsel %vm345_vm0, %v1388_v54, %v1389_v57 }
 0x176   : > { %1350 = vrot.lane.b32.xlu0 %v1347_v29, %s9289_s19  ;;  %1352 = vrot.lane.b32.xlu1 %v1349_v31, %s9289_s19  ;;  %v421_v29 = vmul.f32 %v419_v40, %v6503_v35  ;;  %v1393_v31 = vrot.slane %v5791_v60, 5  ;;  %v417_v60 = vadd.f32 %v413_v33, %v399_v39  ;;  %v560_v39 = vmul.f32 %v559_v48, %v6506_v36 }
 0x177   : > { %v576_v33 = vstv %s5745_s12  ;;  %s7049_s12 = sld [smem:[#allocation4 + $0x14]] }
 0x178   : > { %v6902_v9 = vpop.permute.xlu1 %963  ;;  %v6904_v45 = vpop.permute.xlu0 %961  ;;  %v1396_v42 = vsel %vm345_vm0, %v1389_v57, %v1393_v31  ;;  %v561_v57 = vmul.f32 %v559_v48, %v6503_v35  ;;  %v578_v56 = vmul.f32 %v576_v33, %v6503_v35  ;;  %v579_v53 = vmul.f32 %v576_v33, %v6550_v8 }
 0x17a   : > { %1371 = vrot.lane.b32.xlu0 %v1368_v6, %s9289_s19  ;;  %1373 = vrot.lane.b32.xlu1 %v1370_v7, %s9289_s19  ;;  %v428_v6 = vrot.slane %v421_v29, 2  ;;  %v430_v7 = vrot.slane %v422_v13, 2  ;;  %v562_v13 = vmul.f32 %v559_v48, %v6550_v8  ;;  %s7090_s19 = sld [smem:[#allocation4 + $0x15]] }
 0x17c   : > { %v6920_v34 = vpop.permute.xlu1 %1019  ;;  %v6922_v40 = vpop.permute.xlu0 %1017  ;;  %v429_v54 = vsel %vm426_vm5, %v427_v28, %v428_v6  ;;  %v431_v0 = vsel %vm426_vm5, %v428_v6, %v430_v7 }
 0x17d   : > { %v434_v5 = vadd.f32 %v429_v54, %v416_v4  ;;  %v435_v29 = vadd.f32 %v431_v0, %v417_v60  ;;  %v566_v4 = vrot.slane %v560_v39, 1  ;;  %v567_v60 = vrot.slane %v561_v57, 1  ;;  %v550_v54 = vld [vmem:[#allocation2 + $0x10] sm:$0xff] }
 0x17e   : > { %1399 = vrot.lane.b32.xlu0 %v1395_v22, %s6286_s29  ;;  %1401 = vrot.lane.b32.xlu1 %v1390_v15, %s6286_s29  ;;  %v569_v0 = vrot.slane %v562_v13, 1  ;;  %v556_v39 = vadd.f32 %v554_v49, %v550_v54 }
 0x17f   : > { %v448_v31 = vadd.f32 %v6829_v41, %v434_v5  ;;  %v449_v28 = vadd.f32 %v6831_v43, %v435_v29  ;;  %v555_v41 = vmul.f32 %v553_v10, %v6503_v35  ;;  %v577_v29 = vmul.f32 %v576_v33, %v6506_v36 }
 0x180   : > { %v6927_v3 = vpop.permute.xlu1 %1119  ;;  %v6929_v44 = vpop.permute.xlu0 %1117  ;;  %v570_v13 = vsel %vm408_vm4, %v567_v60, %v569_v0  ;;  %v584_v33 = vrot.slane %v578_v56, 2  ;;  %v709_v0 = vstv %s6948_s17  ;;  %s7053_s17 = sld [smem:[#allocation4 + $0x1a]] }
 0x182   : > { %1403 = vrot.lane.b32.xlu0 %v1396_v42, %s6286_s29  ;;  %1408 = vrot.lane.b32.xlu1 %v1395_v22, %s9287_s10 }
 0x184   : > { %v464_v18 = vpop.permute.xlu1 %463  ;;  %v466_v21 = vpop.permute.xlu0 %465 }
 0x185   : > { %v469_v6 = vadd.f32 %v464_v18, %v448_v31  ;;  %v470_v7 = vadd.f32 %v466_v21, %v449_v28  ;;  %v557_v31 = vadd.f32 %v555_v41, %v551_v47  ;;  %v583_v28 = vrot.slane %v577_v29, 2 }
 0x186   : > { %1410 = vrot.lane.b32.xlu0 %v1390_v15, %s9287_s10  ;;  %1412 = vrot.lane.b32.xlu1 %v1396_v42, %s9287_s10  ;;  %s7088_s10 = sld [smem:[#allocation4 + $0x12]] }
 0x187   : > { %v585_v47 = vsel %vm426_vm5, %v583_v28, %v584_v33 }
 0x188   : > { %v485_v48 = vpop.permute.xlu1 %484  ;;  %v487_v27 = vpop.permute.xlu0 %486 }
 0x189   : > { %v490_v5 = vadd.f32 %v485_v48, %v469_v6  ;;  %v491_v43 = vadd.f32 %v487_v27, %v470_v7  ;;  %v568_v27 = vsel %vm408_vm4, %v566_v4, %v567_v60  ;;  %v586_v6 = vrot.slane %v579_v53, 2 }
 0x18a   : > { %1417 = vrot.lane.b32.xlu0 %v1395_v22, %s9285_s11  ;;  %1419 = vrot.lane.b32.xlu1 %v1390_v15, %s9285_s11  ;;  %v573_v22 = vadd.f32 %v568_v27, %v556_v39  ;;  %v574_v15 = vadd.f32 %v570_v13, %v557_v31  ;;  %v715_v7 = vstv %s5753_s14  ;;  %v732_v27 = vstv %s5754_s15  ;;  %s7051_s14 = sld [smem:[#allocation4 + $0x17]] }
 0x18b   : > { %v504_v57 = vadd.f32 %v6841_v58, %v490_v5  ;;  %v505_v10 = vadd.f32 %v6843_v62, %v491_v43  ;;  %v587_v56 = vsel %vm426_vm5, %v584_v33, %v586_v6  ;;  %v717_v41 = vmul.f32 %v715_v7, %v6503_v35  ;;  %s7057_s15 = sld [smem:[#allocation4 + $0x37]] }
 0x18c   : > { %v520_v18 = vpop.permute.xlu1 %519  ;;  %v522_v21 = vpop.permute.xlu0 %521  ;;  %v590_v53 = vadd.f32 %v585_v47, %v573_v22  ;;  %v591_v48 = vadd.f32 %v587_v56, %v574_v15  ;;  %v718_v5 = vmul.f32 %v715_v7, %v6550_v8  ;;  %v916_v15 = vstv %s6957_s18  ;;  %s7059_s18 = sld [smem:[#allocation4 + $0x3a]] }
 0x18d   : > { %v525_v49 = vadd.f32 %v520_v18, %v504_v57  ;;  %v526_v58 = vadd.f32 %v522_v21, %v505_v10  ;;  %v710_v10 = vmul.f32 %v709_v0, %v6506_v36  ;;  %v723_v18 = vrot.slane %v717_v41, 1  ;;  %v706_v21 = vld [vmem:[#allocation2 + $0x20] sm:$0xff] }
 0x18e   : > { %1421 = vrot.lane.b32.xlu0 %v1396_v42, %s9285_s11  ;;  %v716_v42 = vmul.f32 %v715_v7, %v6506_v36  ;;  %v604_v39 = vadd.f32 %v6854_v16, %v590_v53  ;;  %v605_v57 = vadd.f32 %v6856_v17, %v591_v48  ;;  %v725_v33 = vrot.slane %v718_v5, 1  ;;  %s7083_s11 = sld [smem:[#allocation4 + $0x62]] }
 0x18f   : > { %v918_v16 = vmul.f32 %v916_v15, %v6540_v2  ;;  %v733_v17 = vmul.f32 %v732_v27, %v6506_v36 }
 0x190   : > { %v541_v62 = vpop.permute.xlu1 %540  ;;  %v543_v54 = vpop.permute.xlu0 %542  ;;  %v722_v13 = vrot.slane %v716_v42, 1  ;;  %v726_v42 = vsel %vm408_vm4, %v723_v18, %v725_v33 }
 0x191   : > { %v546_v4 = vadd.f32 %v541_v62, %v525_v49  ;;  %v547_v60 = vadd.f32 %v543_v54, %v526_v58  ;;  %v711_v49 = vmul.f32 %v709_v0, %v6503_v35  ;;  %v734_v62 = vmul.f32 %v732_v27, %v6503_v35 }
 0x192   : > { %v712_v54 = vadd.f32 %v710_v10, %v706_v21  ;;  %v724_v56 = vsel %vm408_vm4, %v722_v13, %v723_v18  ;;  %v739_v35 = vrot.slane %v733_v17, 2 }
 0x193   : > { %548 = vst.msk [vmem:[#allocation2] sm:$0xff] %vm324_vm1, %v546_v4  ;;  %549 = vst.msk [vmem:[#allocation2 + $0x8] sm:$0xff] %vm324_vm1, %v547_v60  ;;  %v735_v4 = vmul.f32 %v732_v27, %v6550_v8  ;;  %v707_v60 = vld [vmem:[#allocation2 + $0x28] sm:$0xff] }
 0x194   : > { %v620_v43 = vpop.permute.xlu1 %619  ;;  %v622_v29 = vpop.permute.xlu0 %621 }
 0x195   : > { %v625_v31 = vadd.f32 %v620_v43, %v604_v39  ;;  %v626_v28 = vadd.f32 %v622_v29, %v605_v57  ;;  %v713_v43 = vadd.f32 %v711_v49, %v707_v60  ;;  %v740_v29 = vrot.slane %v734_v62, 2 }
 0x196   : > { %v729_v39 = vadd.f32 %v724_v56, %v712_v54  ;;  %v742_v8 = vrot.slane %v735_v4, 2  ;;  %v917_v62 = vmul.f32 %v916_v15, %v6537_v1  ;;  %v1072_v60 = vstv %s6982_s20  ;;  %s7067_s20 = sld [smem:[#allocation4 + $0x3d]] }
 0x197   : > { %v730_v57 = vadd.f32 %v726_v42, %v713_v43  ;;  %v9318_v43 = vrot.slane %v6687_v19, 1 }
 0x198   : > { %v641_v6 = vpop.permute.xlu1 %640  ;;  %v643_v22 = vpop.permute.xlu0 %642 }
 0x199   : > { %v646_v58 = vadd.f32 %v641_v6, %v625_v31  ;;  %v647_v7 = vadd.f32 %v643_v22, %v626_v28  ;;  %v741_v31 = vsel %vm426_vm5, %v739_v35, %v740_v29  ;;  %v743_v28 = vsel %vm426_vm5, %v740_v29, %v742_v8 }
 0x19a   : > { %v914_v47 = vld [vmem:[#allocation2 + $0x8] sm:$0xff]  ;;  %v747_v33 = vadd.f32 %v743_v28, %v730_v57 }
 0x19b   : > { %v660_v53 = vadd.f32 %v6864_v25, %v646_v58  ;;  %v661_v48 = vadd.f32 %v6866_v26, %v647_v7  ;;  %v920_v0 = vadd.f32 %v918_v16, %v914_v47  ;;  %v923_v58 = vmul.f32 %v6656_v63, %v6537_v1  ;;  %v913_v7 = vld [vmem:[#allocation2] sm:$0xff] }
 0x19c   : > { %v676_v41 = vpop.permute.xlu1 %675  ;;  %v678_v5 = vpop.permute.xlu0 %677  ;;  %v761_v49 = vadd.f32 %v6878_v52, %v747_v33  ;;  %v1228_v33 = vstv %s7007_s9  ;;  %s7069_s9 = sld [smem:[#allocation4 + $0x38]] }
 0x19d   : > { %v937_v36 = vadd.f32 %v6716_v37, %v920_v0  ;;  %v681_v10 = vadd.f32 %v676_v41, %v660_v53  ;;  %v682_v27 = vadd.f32 %v678_v5, %v661_v48  ;;  %v746_v37 = vadd.f32 %v741_v31, %v729_v39 }
 0x19e   : > { %v919_v53 = vadd.f32 %v917_v62, %v913_v7  ;;  %v1074_v48 = vmul.f32 %v1072_v60, %v6540_v2  ;;  %v929_v0 = vrot.slane %v923_v58, 1 }
 0x19f   : > { %v954_v13 = vadd.f32 %v6721_v38, %v937_v36  ;;  %v760_v38 = vadd.f32 %v6876_v51, %v746_v37  ;;  %v940_v51 = vmul.f32 %v6660_v55, %v6537_v1 }
 0x1a0   : > { %v697_v25 = vpop.permute.xlu1 %696  ;;  %v699_v21 = vpop.permute.xlu0 %698  ;;  %v931_v36 = vsel %vm408_vm4, %v929_v0, %v9318_v43 }
 0x1a1   : > { %v702_v26 = vadd.f32 %v697_v25, %v681_v10  ;;  %v703_v18 = vadd.f32 %v699_v21, %v682_v27  ;;  %v936_v35 = vadd.f32 %v931_v36, %v919_v53  ;;  %v946_v39 = vrot.slane %v940_v51, 2 }
 0x1a3   : > { %704 = vst.msk [vmem:[#allocation2 + $0x10] sm:$0xff] %vm324_vm1, %v702_v26  ;;  %705 = vst.msk [vmem:[#allocation2 + $0x18] sm:$0xff] %vm324_vm1, %v703_v18 }
 0x1a4   : > { %v776_v6 = vpop.permute.xlu1 %775  ;;  %v778_v22 = vpop.permute.xlu0 %777 }
 0x1a5   : > { %v781_v16 = vadd.f32 %v776_v6, %v760_v38  ;;  %v782_v17 = vadd.f32 %v778_v22, %v761_v49  ;;  %v1230_v38 = vmul.f32 %v1228_v33, %v6540_v2 }
 0x1a8   : > { %v797_v54 = vpop.permute.xlu1 %796  ;;  %v799_v4 = vpop.permute.xlu0 %798 }
 0x1a9   : > { %v802_v47 = vadd.f32 %v797_v54, %v781_v16  ;;  %v803_v56 = vadd.f32 %v799_v4, %v782_v17 }
 0x1aa   : > { %v1070_v52 = vld [vmem:[#allocation2 + $0x18] sm:$0xff] }
 0x1ab   : > { %v816_v63 = vadd.f32 %v6892_v23, %v802_v47  ;;  %v817_v42 = vadd.f32 %v6894_v24, %v803_v56  ;;  %v1076_v41 = vadd.f32 %v1074_v48, %v1070_v52  ;;  %v9319_v23 = vrot.slane %v6691_v20, 2 }
 0x1ac   : > { %v832_v5 = vpop.permute.xlu1 %831  ;;  %v834_v15 = vpop.permute.xlu0 %833 }
 0x1ad   : > { %v1093_v29 = vadd.f32 %v6741_v50, %v1076_v41  ;;  %v837_v8 = vadd.f32 %v832_v5, %v816_v63  ;;  %v838_v57 = vadd.f32 %v834_v15, %v817_v42  ;;  %v948_v24 = vsel %vm426_vm5, %v946_v39, %v9319_v23 }
 0x1ae   : > { %v953_v21 = vadd.f32 %v948_v24, %v936_v35  ;;  %v9321_v42 = vrot.slane %v6709_v32, 2 }
 0x1af   : > { %v1110_v55 = vadd.f32 %v6762_v61, %v1093_v29  ;;  %v968_v61 = vadd.f32 %v6902_v9, %v954_v13  ;;  %v1079_v9 = vmul.f32 %v6670_v11, %v6537_v1  ;;  %v1073_v13 = vmul.f32 %v1072_v60, %v6537_v1 }
 0x1b0   : > { %v853_v10 = vpop.permute.xlu1 %852  ;;  %v855_v27 = vpop.permute.xlu0 %854  ;;  %v967_v18 = vadd.f32 %v6904_v45, %v953_v21  ;;  %v1069_v45 = vld [vmem:[#allocation2 + $0x10] sm:$0xff]  ;;  %v9320_v11 = vrot.slane %v6703_v30, 1 }
 0x1b1   : > { %v858_v19 = vadd.f32 %v853_v10, %v837_v8  ;;  %v859_v25 = vadd.f32 %v855_v27, %v838_v57  ;;  %v1075_v56 = vadd.f32 %v1073_v13, %v1069_v45  ;;  %v1085_v48 = vrot.slane %v1079_v9, 1 }
 0x1b2   : > { %v1124_v43 = vadd.f32 %v6927_v3, %v1110_v55  ;;  %v1235_v3 = vmul.f32 %v6732_v46, %v6537_v1  ;;  %v1229_v55 = vmul.f32 %v1228_v33, %v6537_v1 }
 0x1b3   : > { %860 = vst.msk [vmem:[#allocation2 + $0x20] sm:$0xff] %vm324_vm1, %v858_v19  ;;  %861 = vst.msk [vmem:[#allocation2 + $0x28] sm:$0xff] %vm324_vm1, %v859_v25  ;;  %v1087_v52 = vsel %vm408_vm4, %v1085_v48, %v9320_v11 }
 0x1b4   : > { %v985_v50 = vpop.permute.xlu1 %984  ;;  %v983_v26 = vpop.permute.xlu0 %982 }
 0x1b5   : > { %v989_v31 = vadd.f32 %v985_v50, %v968_v61  ;;  %v988_v20 = vadd.f32 %v983_v26, %v967_v18 }
 0x1b8   : > { %v1006_v28 = vpop.permute.xlu1 %1005  ;;  %v1004_v37 = vpop.permute.xlu0 %1003 }
 0x1b9   : > { %v1010_v6 = vadd.f32 %v1006_v28, %v989_v31  ;;  %v1009_v22 = vadd.f32 %v1004_v37, %v988_v20  ;;  %v1241_v20 = vrot.slane %v1235_v3, 1  ;;  %v9322_v28 = vld [vmem:[#allocation18_spill] sm:$0xff] }
 0x1ba   : > { %v1226_v49 = vld [vmem:[#allocation2 + $0x28] sm:$0xff]  ;;  %v1252_v37 = vmul.f32 %v9322_v28, %v6537_v1  ;;  %v1545_v28 = vstv %s7051_s14  ;;  %s7143_s14 = sld [smem:[#allocation4 + $0x60]] }
 0x1bb   : > { %v1024_v58 = vadd.f32 %v6920_v34, %v1010_v6  ;;  %v1023_v7 = vadd.f32 %v6922_v40, %v1009_v22  ;;  %v1232_v16 = vadd.f32 %v1230_v38, %v1226_v49  ;;  %v1096_v40 = vmul.f32 %v6673_v12, %v6537_v1  ;;  %v9323_v6 = vld [vmem:[#allocation19_spill] sm:$0xff] }
 0x1bc   : > { %v1041_v17 = vpop.permute.xlu1 %1040  ;;  %v1039_v62 = vpop.permute.xlu0 %1038  ;;  %v9324_v22 = vrot.slane %v9323_v6, 1  ;;  %v1531_v6 = vstv %s7049_s12  ;;  %s7118_s12 = sld [smem:[#allocation4 + $0x5d]] }
 0x1bd   : > { %v1249_v54 = vadd.f32 %v6779_v14, %v1232_v16  ;;  %v1045_v4 = vadd.f32 %v1041_v17, %v1024_v58  ;;  %v1044_v47 = vadd.f32 %v1039_v62, %v1023_v7  ;;  %v1092_v14 = vadd.f32 %v1087_v52, %v1075_v56  ;;  %v9325_v16 = vld [vmem:[#allocation20_spill] sm:$0xff] }
 0x1be   : > { %v1102_v63 = vrot.slane %v1096_v40, 2  ;;  %v1243_v38 = vsel %vm408_vm4, %v1241_v20, %v9324_v22  ;;  %v1258_v7 = vrot.slane %v1252_v37, 2  ;;  %v9326_v17 = vrot.slane %v9325_v16, 2 }
 0x1bf   : > { %v1266_v2 = vadd.f32 %v6785_v59, %v1249_v54  ;;  %v1566_v22 = vstv %s7053_s17  ;;  %s5825_s17 = sld [smem:[#allocation4 + $0x1f]] }
 0x1c0   : > { %v1062_v53 = vpop.permute.xlu1 %1061  ;;  %v1060_v34 = vpop.permute.xlu0 %1059  ;;  %v1104_v41 = vsel %vm426_vm5, %v1102_v63, %v9321_v42  ;;  %v1260_v62 = vsel %vm426_vm5, %v1258_v7, %v9326_v17  ;;  %v1687_v17 = vstv %s7069_s9  ;;  %s7426_s9 = sld [smem:[#allocation4 + $0x23]] }
 0x1c1   : > { %v1066_v0 = vadd.f32 %v1062_v53, %v1045_v4  ;;  %v1065_v51 = vadd.f32 %v1060_v34, %v1044_v47  ;;  %v1109_v5 = vadd.f32 %v1104_v41, %v1092_v14 }
 0x1c3   : > { %1068 = vst.msk [vmem:[#allocation2 + $0x8] sm:$0xff] %vm324_vm1, %v1066_v0  ;;  %1067 = vst.msk [vmem:[#allocation2] sm:$0xff] %vm324_vm1, %v1065_v51  ;;  %v1123_v30 = vadd.f32 %v6929_v44, %v1109_v5  ;;  %v1225_v44 = vld [vmem:[#allocation2 + $0x20] sm:$0xff] }
 0x1c4   : > { %v1141_v60 = vpop.permute.xlu1 %1140  ;;  %v1139_v59 = vpop.permute.xlu0 %1138  ;;  %v1231_v31 = vadd.f32 %v1229_v55, %v1225_v44 }
 0x1c5   : > { %v1145_v29 = vadd.f32 %v1141_v60, %v1124_v43  ;;  %v1144_v39 = vadd.f32 %v1139_v59, %v1123_v30  ;;  %v1475_v43 = vstv %s5795_s16  ;;  %v1489_v30 = vstv %s5796_s26  ;;  %s7075_s16 = sld [smem:[#allocation4 + $0x3b]]  ;;  %s7077_s26 = sld [smem:[#allocation4 + $0x3e]] }
 0x1c6   : > { %v1248_v58 = vadd.f32 %v1243_v38, %v1231_v31  ;;  %v1631_v38 = vstv %s7057_s15  ;;  %s5826_s15 = sld [smem:[#allocation4 + $0x22]] }
 0x1c8   : > { %v1162_v12 = vpop.permute.xlu1 %1161  ;;  %v1160_v15 = vpop.permute.xlu0 %1159  ;;  %v1265_v45 = vadd.f32 %v1260_v62, %v1248_v58 }
 0x1c9   : > { %v1166_v8 = vadd.f32 %v1162_v12, %v1145_v29  ;;  %v1165_v57 = vadd.f32 %v1160_v15, %v1144_v39 }
 0x1cc   : > { %v1176_v36 = vpop.permute.xlu1 %1175  ;;  %v1174_v35 = vpop.permute.xlu0 %1173 }
 0x1cd   : > { %v1180_v23 = vadd.f32 %v1176_v36, %v1166_v8  ;;  %v1179_v24 = vadd.f32 %v1174_v35, %v1165_v57  ;;  %v1510_v8 = vstv %s5797_s13  ;;  %s7081_s13 = sld [smem:[#allocation4 + $0x5e]] }
 0x1d0   : > { %v1197_v10 = vpop.permute.xlu1 %1196  ;;  %v1195_v27 = vpop.permute.xlu0 %1194 }
 0x1d1   : > { %v1201_v32 = vadd.f32 %v1197_v10, %v1180_v23  ;;  %v1200_v19 = vadd.f32 %v1195_v27, %v1179_v24 }
 0x1d4   : > { %v1218_v25 = vpop.permute.xlu1 %1217  ;;  %v1216_v21 = vpop.permute.xlu0 %1215 }
 0x1d5   : > { %v1222_v50 = vadd.f32 %v1218_v25, %v1201_v32  ;;  %v1221_v26 = vadd.f32 %v1216_v21, %v1200_v19 }
 0x1d7   : > { %1224 = vst.msk [vmem:[#allocation2 + $0x18] sm:$0xff] %vm324_vm1, %v1222_v50  ;;  %1223 = vst.msk [vmem:[#allocation2 + $0x10] sm:$0xff] %vm324_vm1, %v1221_v26 }
 0x1d8   : > { %v1276_v61 = vpop.permute.xlu1 %1275  ;;  %v1274_v18 = vpop.permute.xlu0 %1273 }
 0x1d9   : > { %v1280_v13 = vadd.f32 %v1276_v61, %v1266_v2  ;;  %v1279_v54 = vadd.f32 %v1274_v18, %v1265_v45  ;;  %v7125_v45 = vstv %s7077_s26  ;;  %s7431_s26 = sld [smem:[#allocation4 + $0x43]] }
 0x1dc   : > { %v1297_v49 = vpop.permute.xlu1 %1296  ;;  %v1295_v46 = vpop.permute.xlu0 %1294 }
 0x1dd   : > { %v1301_v1 = vadd.f32 %v1297_v49, %v1280_v13  ;;  %v1300_v56 = vadd.f32 %v1295_v46, %v1279_v54  ;;  %v1645_v49 = vstv %s7059_s18  ;;  %v1666_v46 = vstv %s7067_s20  ;;  %s7419_s18 = sld [smem:[#allocation4 + $0x1d]]  ;;  %s7421_s20 = sld [smem:[#allocation4 + $0x20]] }
 0x1de   : > { %v7129_v13 = vstv %s7081_s13  ;;  %v7132_v54 = vstv %s7083_s11  ;;  %s9329_s11 = smov 3   ;;  %s7433_s13 = sld [smem:[#allocation4 + $0x46]] }
 0x1e0   : > { %v1318_v33 = vpop.permute.xlu1 %1317  ;;  %v1316_v9 = vpop.permute.xlu0 %1315 }
 0x1e1   : > { %v1322_v53 = vadd.f32 %v1318_v33, %v1301_v1  ;;  %v1321_v34 = vadd.f32 %v1316_v9, %v1300_v56  ;;  %v1701_v9 = vstv %s7075_s16  ;;  %v7137_v1 = vstv %s7090_s19  ;;  %s7415_s19 = sld [smem:[#allocation4 + $0x1c]]  ;;  %s7428_s16 = sld [smem:[#allocation4 + $0x40]] }
 0x1e2   : > { %v7140_v56 = vstv %s7095_s0  ;;  %s9327_s0 = smov 126  }
 0x1e4   : > { %v1332_v4 = vpop.permute.xlu1 %1331  ;;  %v1330_v47 = vpop.permute.xlu0 %1329 }
 0x1e5   : > { %v1336_v0 = vadd.f32 %v1332_v4, %v1322_v53  ;;  %v1335_v51 = vadd.f32 %v1330_v47, %v1321_v34  ;;  %v1435_v4 = vstv %s7088_s10  ;;  %v1591_v53 = vstv %s7097_s1  ;;  %s7301_s1 = sld [smem:[#allocation4 + $0x61]]  ;;  %s9328_s10 = smov 1  }
 0x1e8   : > { %v1353_v48 = vpop.permute.xlu1 %1352  ;;  %v1351_v40 = vpop.permute.xlu0 %1350 }
 0x1e9   : > { %v1357_v11 = vadd.f32 %v1353_v48, %v1336_v0  ;;  %v1356_v52 = vadd.f32 %v1351_v40, %v1335_v51 }
 0x1ec   : > { %v1374_v14 = vpop.permute.xlu1 %1373  ;;  %v1372_v60 = vpop.permute.xlu0 %1371 }
 0x1ed   : > { %v1378_v63 = vadd.f32 %v1374_v14, %v1357_v11  ;;  %v1377_v59 = vadd.f32 %v1372_v60, %v1356_v52 }
 0x1ef   : > { %1380 = vst.msk [vmem:[#allocation2 + $0x28] sm:$0xff] %vm324_vm1, %v1378_v63  ;;  %1379 = vst.msk [vmem:[#allocation2 + $0x20] sm:$0xff] %vm324_vm1, %v1377_v59 }
 0x1f0   : > { %v1402_v2 = vpop.permute.xlu1 %1401  ;;  %v1400_v42 = vpop.permute.xlu0 %1399 }
 0x1f4   : > { %v1409_v41 = vpop.permute.xlu1 %1408  ;;  %v1404_v5 = vpop.permute.xlu0 %1403 }
 0x1f5   : > { %v1426_v36 = vsel %vm384_vm2, %v1400_v42, %v1409_v41  ;;  %v7159_v41 = vstv %s7105_s2  ;;  %s7276_s2 = sld [smem:[#allocation4 + $0x5b]] }
 0x1f8   : > { %v1413_v12 = vpop.permute.xlu1 %1412  ;;  %v1411_v15 = vpop.permute.xlu0 %1410 }
 0x1f9   : > { %v1427_v35 = vsel %vm384_vm2, %v1402_v2, %v1411_v15  ;;  %v1428_v21 = vsel %vm384_vm2, %v1404_v5, %v1413_v12  ;;  %v7162_v5 = vstv %s7111_s3  ;;  %v1747_v12 = vstv %s7113_s4  ;;  %s5817_s3 = sld [smem:[#allocation4 + $0x5f]]  ;;  %s5816_s4 = sld [smem:[#allocation4 + $0x5c]] }
 0x1fc   : > { %v1420_v29 = vpop.permute.xlu1 %1419  ;;  %v1418_v39 = vpop.permute.xlu0 %1417 }
 0x1fd   : > { %v7062_v57 = vsel %vm388_vm3, %v1427_v35, %v1420_v29  ;;  %v7065_v10 = vsel %vm388_vm3, %v1426_v36, %v1418_v39  ;;  %v7167_v36 = vstv %s7118_s12  ;;  %s7437_s12 = sld [smem:[#allocation4 + $0x41]] }
 0x1fe   : > { %v1477_v27 = vmul.f32 %v1475_v43, %v7062_v57  ;;  %v1476_v23 = vmul.f32 %v1475_v43, %v7065_v10  ;;  %v1490_v24 = vmul.f32 %v1489_v30, %v7065_v10  ;;  %v1491_v32 = vmul.f32 %v1489_v30, %v7062_v57 }
 0x1ff   : > { %v1511_v19 = vmul.f32 %v1510_v8, %v7065_v10  ;;  %v1512_v25 = vmul.f32 %v1510_v8, %v7062_v57  ;;  %v1546_v16 = vmul.f32 %v1545_v28, %v7065_v10  ;;  %v1547_v33 = vmul.f32 %v1545_v28, %v7062_v57 }
 0x200   : > { %1482 = vrot.lane.b32.xlu0 %v1477_v27, %s6286_s29  ;;  %1480 = vrot.lane.b32.xlu1 %v1476_v23, %s6286_s29  ;;  %v1422_v50 = vpop.permute.xlu0 %1421  ;;  %v1496_v26 = vrot.slane %v1490_v24, 1  ;;  %v1497_v3 = vrot.slane %v1491_v32, 1  ;;  %v1532_v47 = vmul.f32 %v1531_v6, %v7065_v10  ;;  %v1567_v0 = vmul.f32 %v1566_v22, %v7065_v10 }
 0x201   : > { %v7093_v44 = vsel %vm388_vm3, %v1428_v21, %v1422_v50  ;;  %v1517_v31 = vrot.slane %v1511_v19, 2  ;;  %v1518_v20 = vrot.slane %v1512_v25, 2  ;;  %v1552_v48 = vrot.slane %v1546_v16, 1 }
 0x202   : > { %v1498_v55 = vsel %vm408_vm4, %v1496_v26, %v1497_v3  ;;  %v1492_v61 = vmul.f32 %v1489_v30, %v7093_v44  ;;  %v1513_v18 = vmul.f32 %v1510_v8, %v7093_v44  ;;  %v1548_v40 = vmul.f32 %v1545_v28, %v7093_v44 }
 0x203   : > { %v1519_v62 = vsel %vm426_vm5, %v1517_v31, %v1518_v20  ;;  %v1553_v51 = vrot.slane %v1547_v33, 1  ;;  %v1568_v11 = vmul.f32 %v1566_v22, %v7062_v57  ;;  %v1569_v52 = vmul.f32 %v1566_v22, %v7093_v44 }
 0x204   : > { %1501 = vrot.lane.b32.xlu1 %v1498_v55, %s6286_s29  ;;  %v1499_v37 = vrot.slane %v1492_v61, 1  ;;  %v1520_v7 = vrot.slane %v1513_v18, 2  ;;  %v1646_v14 = vmul.f32 %v1645_v49, %v7065_v10  ;;  %v1647_v60 = vmul.f32 %v1645_v49, %v7062_v57 }
 0x205   : > { %v1648_v63 = vmul.f32 %v1645_v49, %v7093_v44  ;;  %v1667_v59 = vmul.f32 %v1666_v46, %v7065_v10  ;;  %v1668_v2 = vmul.f32 %v1666_v46, %v7062_v57  ;;  %v1533_v42 = vmul.f32 %v1531_v6, %v7062_v57 }
 0x206   : > { %v1500_v58 = vsel %vm408_vm4, %v1497_v3, %v1499_v37  ;;  %v1521_v34 = vsel %vm426_vm5, %v1518_v20, %v1520_v7  ;;  %v1555_v15 = vrot.slane %v1548_v40, 1  ;;  %v1573_v43 = vrot.slane %v1567_v0, 2 }
 0x207   : > { %1503 = vrot.lane.b32.xlu0 %v1500_v58, %s6286_s29  ;;  %v1669_v30 = vmul.f32 %v1666_v46, %v7093_v44  ;;  %v1554_v35 = vsel %vm408_vm4, %v1552_v48, %v1553_v51  ;;  %v1574_v29 = vrot.slane %v1568_v11, 2  ;;  %v1576_v39 = vrot.slane %v1569_v52, 2 }
 0x208   : > { %1522 = vrot.lane.b32.xlu1 %v1519_v62, %s6286_s29  ;;  %v1652_v8 = vrot.slane %v1646_v14, 1  ;;  %v1653_v27 = vrot.slane %v1647_v60, 1  ;;  %v1655_v23 = vrot.slane %v1648_v63, 1  ;;  %v1673_v24 = vrot.slane %v1667_v59, 2  ;;  %v1432_v14 = vld [vmem:[#allocation2] sm:$0xff] }
 0x209   : > { %v1674_v32 = vrot.slane %v1668_v2, 2  ;;  %v1632_v19 = vmul.f32 %v1631_v38, %v7065_v10  ;;  %v1702_v25 = vmul.f32 %v1701_v9, %v7065_v10  ;;  %v7175_v21 = vmul.f32 %v1701_v9, %v7062_v57 }
 0x20a   : > { %v7178_v50 = vstv %s7143_s14  ;;  %v1556_v26 = vsel %vm408_vm4, %v1553_v51, %v1555_v15  ;;  %v1633_v3 = vmul.f32 %v1631_v38, %v7062_v57  ;;  %v1676_v55 = vrot.slane %v1669_v30, 2  ;;  %s7439_s14 = sld [smem:[#allocation4 + $0x44]] }
 0x20b   : > { %1524 = vrot.lane.b32.xlu0 %v1521_v34, %s6286_s29  ;;  %v7183_v61 = vmul.f32 %v1701_v9, %v7093_v44  ;;  %v1575_v18 = vsel %vm426_vm5, %v1573_v43, %v1574_v29  ;;  %v1577_v31 = vsel %vm426_vm5, %v1574_v29, %v1576_v39  ;;  %v7191_v20 = vmul.f32 %v1687_v17, %v7065_v10  ;;  %v1433_v39 = vld [vmem:[#allocation2 + $0x8] sm:$0xff] }
 0x20c   : > { %1536 = vrot.lane.b32.xlu1 %v1532_v47, %s9327_s0  ;;  %v7195_v28 = vmul.f32 %v7125_v45, %v7065_v10  ;;  %v1654_v37 = vsel %vm408_vm4, %v1652_v8, %v1653_v27  ;;  %v1656_v6 = vsel %vm408_vm4, %v1653_v27, %v1655_v23  ;;  %v1675_v22 = vsel %vm426_vm5, %v1673_v24, %v1674_v32 }
 0x20d   : > { %v7204_v38 = vmul.f32 %v1687_v17, %v7062_v57  ;;  %v1708_v49 = vrot.slane %v1702_v25, 1  ;;  %v1709_v46 = vrot.slane %v7175_v21, 1  ;;  %v7209_v58 = vmul.f32 %v7125_v45, %v7062_v57 }
 0x20e   : > { %v1879_v7 = vmul.f32 %v7132_v54, %v7065_v10  ;;  %v7214_v16 = vsel %vm426_vm5, %v1674_v32, %v1676_v55  ;;  %v1711_v62 = vrot.slane %v7183_v61, 1  ;;  %v1880_v17 = vmul.f32 %v7132_v54, %v7062_v57 }
 0x20f   : > { %1538 = vrot.lane.b32.xlu0 %v1533_v42, %s9327_s0  ;;  %v1881_v33 = vmul.f32 %v7132_v54, %v7093_v44  ;;  %v1729_v9 = vrot.slane %v7195_v28, 2  ;;  %v7225_v47 = vmul.f32 %v7125_v45, %v7093_v44  ;;  %v1443_v48 = vmul.f32 %v7137_v1, %v7062_v57 }
 0x210   : > { %1557 = vrot.lane.b32.xlu1 %v1554_v35, %s9327_s0  ;;  %v1885_v34 = vrot.slane %v1879_v7, 2  ;;  %v1886_v40 = vrot.slane %v1880_v17, 2  ;;  %v1460_v54 = vmul.f32 %v7140_v56, %v7062_v57  ;;  %v1436_v51 = vmul.f32 %v1435_v4, %v7065_v10  ;;  %v1588_v17 = vld [vmem:[#allocation2 + $0x10] sm:$0xff] }
 0x211   : > { %v1888_v0 = vrot.slane %v1881_v33, 2  ;;  %v7238_v45 = vsel %vm408_vm4, %v1708_v49, %v1709_v46  ;;  %v1730_v11 = vrot.slane %v7209_v58, 2  ;;  %v1449_v52 = vrot.slane %v1443_v48, 1 }
 0x212   : > { %v1442_v60 = vmul.f32 %v7137_v1, %v7065_v10  ;;  %v7244_v63 = vsel %vm426_vm5, %v1885_v34, %v1886_v40  ;;  %v1466_v2 = vrot.slane %v1460_v54, 2  ;;  %v1438_v42 = vadd.f32 %v1436_v51, %v1432_v14  ;;  %v1589_v51 = vld [vmem:[#allocation2 + $0x18] sm:$0xff] }
 0x213   : > { %1559 = vrot.lane.b32.xlu0 %v1556_v26, %s9327_s0  ;;  %v7247_v59 = vsel %vm426_vm5, %v1886_v40, %v1888_v0  ;;  %v1459_v43 = vmul.f32 %v7140_v56, %v7065_v10  ;;  %v1437_v30 = vmul.f32 %v1435_v4, %v7062_v57  ;;  %v1444_v35 = vmul.f32 %v7137_v1, %v7093_v44 }
 0x214   : > { %1578 = vrot.lane.b32.xlu1 %v1575_v18, %s9327_s0  ;;  %v1448_v15 = vrot.slane %v1442_v60, 1  ;;  %v1461_v29 = vmul.f32 %v7140_v56, %v7093_v44  ;;  %v1592_v8 = vmul.f32 %v1591_v53, %v7065_v10  ;;  %v1598_v27 = vmul.f32 %v7159_v41, %v7065_v10 }
 0x215   : > { %v1599_v23 = vmul.f32 %v7159_v41, %v7062_v57  ;;  %v1465_v24 = vrot.slane %v1459_v43, 2  ;;  %v1451_v32 = vrot.slane %v1444_v35, 1  ;;  %v1439_v1 = vadd.f32 %v1437_v30, %v1433_v39 }
 0x216   : > { %v1450_v4 = vsel %vm408_vm4, %v1448_v15, %v1449_v52  ;;  %v1468_v25 = vrot.slane %v1461_v29, 2  ;;  %v1604_v26 = vrot.slane %v1598_v27, 1  ;;  %v1615_v18 = vmul.f32 %v7162_v5, %v7065_v10  ;;  %v1744_v15 = vld [vmem:[#allocation2 + $0x20] sm:$0xff] }
 0x217   : > { %1580 = vrot.lane.b32.xlu0 %v1577_v31, %s9327_s0  ;;  %v1467_v56 = vsel %vm426_vm5, %v1465_v24, %v1466_v2  ;;  %v1452_v55 = vsel %vm408_vm4, %v1449_v52, %v1451_v32  ;;  %v1616_v31 = vmul.f32 %v7162_v5, %v7062_v57  ;;  %v1594_v48 = vadd.f32 %v1592_v8, %v1588_v17 }
 0x218   : > { %1636 = vrot.lane.b32.xlu1 %v1632_v19, %s6286_s29  ;;  %v1455_v19 = vadd.f32 %v1450_v4, %v1438_v42  ;;  %v1469_v49 = vsel %vm426_vm5, %v1466_v2, %v1468_v25  ;;  %v1621_v33 = vrot.slane %v1615_v18, 2  ;;  %v1593_v40 = vmul.f32 %v1591_v53, %v7062_v57 }
 0x219   : > { %v1622_v34 = vrot.slane %v1616_v31, 2  ;;  %v1617_v54 = vmul.f32 %v7162_v5, %v7093_v44  ;;  %v1748_v52 = vmul.f32 %v1747_v12, %v7065_v10  ;;  %v1754_v53 = vmul.f32 %v7167_v36, %v7065_v10 }
 0x21a   : > { %v1595_v2 = vadd.f32 %v1593_v40, %v1589_v51  ;;  %v1755_v42 = vmul.f32 %v7167_v36, %v7062_v57  ;;  %v1772_v35 = vmul.f32 %v7178_v50, %v7062_v57  ;;  %v1749_v24 = vmul.f32 %v1747_v12, %v7062_v57 }
 0x21b   : > { %1638 = vrot.lane.b32.xlu0 %v1633_v3, %s6286_s29  ;;  %v1605_v3 = vrot.slane %v1599_v23, 1  ;;  %v1623_v14 = vsel %vm426_vm5, %v1621_v33, %v1622_v34  ;;  %v1624_v5 = vrot.slane %v1617_v54, 2  ;;  %v1760_v30 = vrot.slane %v1754_v53, 1 }
 0x21c   : > { %1657 = vrot.lane.b32.xlu1 %v1654_v37, %s6286_s29  ;;  %v7278_v37 = vadd.f32 %v1467_v56, %v1455_v19  ;;  %v1761_v8 = vrot.slane %v1755_v42, 1  ;;  %v1778_v4 = vrot.slane %v1772_v35, 2  ;;  %v1756_v32 = vmul.f32 %v7167_v36, %v7093_v44  ;;  %v1745_v36 = vld [vmem:[#allocation2 + $0x28] sm:$0xff] }
 0x21d   : > { %v1606_v7 = vsel %vm408_vm4, %v1604_v26, %v1605_v3  ;;  %v1625_v39 = vsel %vm426_vm5, %v1622_v34, %v1624_v5  ;;  %v1802_v19 = vmul.f32 %v7129_v13, %v7065_v10  ;;  %v1751_v31 = vadd.f32 %v1749_v24, %v1745_v36 }
 0x21e   : > { %v1611_v60 = vadd.f32 %v1606_v7, %v1594_v48  ;;  %v1762_v25 = vsel %vm408_vm4, %v1760_v30, %v1761_v8  ;;  %v1763_v56 = vrot.slane %v1756_v32, 1  ;;  %v1857_v51 = vstv %s5817_s3  ;;  %s7456_s3 = sld [smem:[#allocation4 + $0x1b]] }
 0x21f   : > { %1659 = vrot.lane.b32.xlu0 %v1656_v6, %s6286_s29  ;;  %v1456_v6 = vadd.f32 %v1452_v55, %v1439_v1  ;;  %v1787_v1 = vstv %s7276_s2  ;;  %v1732_v55 = vrot.slane %v7225_v47, 2  ;;  %v1808_v17 = vrot.slane %v1802_v19, 1  ;;  %s7446_s2 = sld [smem:[#allocation4 + $0x47]] }
 0x220   : > { %1678 = vrot.lane.b32.xlu1 %v1675_v22, %s6286_s29  ;;  %v1600_v22 = vmul.f32 %v7159_v41, %v7093_v44  ;;  %v7307_v43 = vadd.f32 %v1623_v14, %v1611_v60  ;;  %v1764_v21 = vsel %vm408_vm4, %v1761_v8, %v1763_v56  ;;  %v1789_v58 = vmul.f32 %v1787_v1, %v7062_v57 }
 0x221   : > { %v7285_v0 = vadd.f32 %v1469_v49, %v1456_v6  ;;  %v1803_v49 = vmul.f32 %v7129_v13, %v7062_v57  ;;  %v1768_v47 = vadd.f32 %v1764_v21, %v1751_v31  ;;  %v1733_v28 = vsel %vm426_vm5, %v1730_v11, %v1732_v55 }
 0x222   : > { %v1607_v41 = vrot.slane %v1600_v22, 1  ;;  %v1804_v6 = vmul.f32 %v7129_v13, %v7093_v44  ;;  %v1858_v53 = vmul.f32 %v1857_v51, %v7065_v10 }
 0x223   : > { %1680 = vrot.lane.b32.xlu0 %v7214_v16, %s6286_s29  ;;  %v1771_v16 = vmul.f32 %v7178_v50, %v7065_v10  ;;  %v1809_v33 = vrot.slane %v1803_v49, 1 }
 0x224   : > { %1692 = vrot.lane.b32.xlu1 %v7191_v20, %s9327_s0  ;;  %v1750_v20 = vadd.f32 %v1748_v52, %v1744_v15  ;;  %v1608_v29 = vsel %vm408_vm4, %v1605_v3, %v1607_v41  ;;  %v1859_v41 = vmul.f32 %v1857_v51, %v7062_v57  ;;  %v1864_v15 = vrot.slane %v1858_v53, 1 }
 0x225   : > { %v1777_v27 = vrot.slane %v1771_v16, 2  ;;  %v1612_v23 = vadd.f32 %v1608_v29, %v1595_v2  ;;  %v1810_v13 = vsel %vm408_vm4, %v1808_v17, %v1809_v33  ;;  %v1843_v2 = vstv %s5816_s4  ;;  %v5819_v29 = vld [vmem:[%s6456_s28 + $0x30] sm:$0xff]  ;;  %s7458_s4 = sld [smem:[#allocation4 + $0x1e]] }
 0x226   : > { %v1767_v3 = vadd.f32 %v1762_v25, %v1750_v20  ;;  %v1844_v42 = vmul.f32 %v1843_v2, %v7065_v10  ;;  %v1860_v16 = vmul.f32 %v1857_v51, %v7093_v44  ;;  %v1865_v30 = vrot.slane %v1859_v41, 1 }
 0x227   : > { %1694 = vrot.lane.b32.xlu0 %v7204_v38, %s9327_s0  ;;  %v1773_v38 = vmul.f32 %v7178_v50, %v7093_v44  ;;  %v7328_v26 = vadd.f32 %v1625_v39, %v1612_v23  ;;  %v1779_v12 = vsel %vm426_vm5, %v1777_v27, %v1778_v4  ;;  %v1731_v50 = vsel %vm426_vm5, %v1729_v9, %v1730_v11  ;;  %v5820_v27 = vld [vmem:[%s6456_s28 + $0x38] sm:$0xff] }
 0x228   : > { %1713 = vrot.lane.b32.xlu1 %v7238_v45, %s9327_s0  ;;  %v1712_v45 = vsel %vm408_vm4, %v1709_v46, %v1711_v62  ;;  %v7345_v61 = vadd.f32 %v1779_v12, %v1767_v3  ;;  %v1822_v46 = vstv %s7301_s1  ;;  %v1788_v9 = vmul.f32 %v1787_v1, %v7065_v10  ;;  %s7448_s1 = sld [smem:[#allocation4 + $0x6b]] }
 0x229   : > { %v1780_v18 = vrot.slane %v1773_v38, 2  ;;  %v1823_v34 = vmul.f32 %v1822_v46, %v7065_v10  ;;  %v1824_v48 = vmul.f32 %v1822_v46, %v7062_v57  ;;  %v1811_v11 = vrot.slane %v1804_v6, 1 }
 0x22a   : > { %v1825_v40 = vmul.f32 %v1822_v46, %v7093_v44  ;;  %v1845_v35 = vmul.f32 %v1843_v2, %v7062_v57  ;;  %v1867_v20 = vrot.slane %v1860_v16, 1  ;;  %v1866_v39 = vsel %vm408_vm4, %v1864_v15, %v1865_v30 }
 0x22b   : > { %1715 = vrot.lane.b32.xlu0 %v1712_v45, %s9327_s0  ;;  %v1781_v62 = vsel %vm426_vm5, %v1778_v4, %v1780_v18  ;;  %v1829_v22 = vrot.slane %v1823_v34, 2  ;;  %v1830_v54 = vrot.slane %v1824_v48, 2  ;;  %v1812_v52 = vsel %vm408_vm4, %v1809_v33, %v1811_v11 }
 0x22c   : > { %1734 = vrot.lane.b32.xlu1 %v1731_v50, %s9327_s0  ;;  %v7357_v7 = vadd.f32 %v1781_v62, %v1768_v47  ;;  %v1832_v14 = vrot.slane %v1825_v40, 2  ;;  %v1904_v8 = vrot.slane %v5819_v29, 1  ;;  %v1907_v10 = vrot.slane %v5819_v29, 7 }
 0x22d   : > { %v1831_v60 = vsel %vm426_vm5, %v1829_v22, %v1830_v54  ;;  %v1868_v44 = vsel %vm408_vm4, %v1865_v30, %v1867_v20  ;;  %v1908_v23 = vrot.slane %v5820_v27, 7  ;;  %v1912_v4 = vrot.slane %v5820_v27, 5 }
 0x22e   : > { %v1833_v5 = vsel %vm426_vm5, %v1830_v54, %v1832_v14  ;;  %v1914_v57 = vsel %vm345_vm0, %v1904_v8, %v1907_v10 }
 0x22f   : > { %1736 = vrot.lane.b32.xlu0 %v1733_v28, %s9327_s0  ;;  %v1909_v24 = vsel %vm345_vm0, %v1907_v10, %v1908_v23  ;;  %v1915_v32 = vsel %vm345_vm0, %v1908_v23, %v1912_v4 }
 0x230   : > { %1792 = vrot.lane.b32.xlu1 %v1788_v9, %s6286_s29 }
 0x233   : > { %1794 = vrot.lane.b32.xlu0 %v1789_v58, %s6286_s29 }
 0x234   : > { %1813 = vrot.lane.b32.xlu1 %v1810_v13, %s6286_s29 }
 0x237   : > { %1815 = vrot.lane.b32.xlu0 %v1812_v52, %s6286_s29 }
 0x238   : > { %1834 = vrot.lane.b32.xlu1 %v1831_v60, %s6286_s29 }
 0x23b   : > { %1836 = vrot.lane.b32.xlu0 %v1833_v5, %s6286_s29 }
 0x23c   : > { %1848 = vrot.lane.b32.xlu1 %v1844_v42, %s9327_s0 }
 0x23f   : > { %1850 = vrot.lane.b32.xlu0 %v1845_v35, %s9327_s0 }
 0x240   : > { %1869 = vrot.lane.b32.xlu1 %v1866_v39, %s9327_s0 }
 0x243   : > { %1871 = vrot.lane.b32.xlu0 %v1868_v44, %s9327_s0 }
 0x244   : > { %1890 = vrot.lane.b32.xlu1 %v7244_v63, %s9327_s0 }
 0x247   : > { %1892 = vrot.lane.b32.xlu0 %v7247_v59, %s9327_s0 }
 0x248   : > { %1918 = vrot.lane.b32.xlu1 %v1914_v57, %s6286_s29 }
 0x24b   : > { %1920 = vrot.lane.b32.xlu0 %v1909_v24, %s6286_s29 }
 0x24c   : > { %1922 = vrot.lane.b32.xlu1 %v1915_v32, %s6286_s29 }
 0x24f   : > { %1927 = vrot.lane.b32.xlu0 %v1914_v57, %s9328_s10 }
 0x250   : > { %1929 = vrot.lane.b32.xlu1 %v1909_v24, %s9328_s10 }
 0x253   : > { %1931 = vrot.lane.b32.xlu0 %v1915_v32, %s9328_s10 }
 0x254   : > { %1936 = vrot.lane.b32.xlu1 %v1914_v57, %s9329_s11 }
 0x257   : > { %1938 = vrot.lane.b32.xlu0 %v1909_v24, %s9329_s11 }
 0x258   : > { %1940 = vrot.lane.b32.xlu1 %v1915_v32, %s9329_s11 }
 0x272   : > { %v1481_v63 = vpop.permute.xlu1 %1480  ;;  %v1483_v59 = vpop.permute.xlu0 %1482 }
 0x273   : > { %v1486_v38 = vadd.f32 %v1481_v63, %v7278_v37  ;;  %v1487_v36 = vadd.f32 %v1483_v59, %v7285_v0 }
 0x276   : > { %v1502_v1 = vpop.permute.xlu1 %1501 }
 0x277   : > { %v1507_v56 = vadd.f32 %v1502_v1, %v1486_v38 }
 0x279   : > { %v1504_v19 = vpop.permute.xlu0 %1503 }
 0x27a   : > { %v1523_v25 = vpop.permute.xlu1 %1522  ;;  %v1508_v18 = vadd.f32 %v1504_v19, %v1487_v36 }
 0x27b   : > { %v1528_v45 = vadd.f32 %v1523_v25, %v1507_v56 }
 0x27d   : > { %v1525_v12 = vpop.permute.xlu0 %1524 }
 0x27e   : > { %v1537_v3 = vpop.permute.xlu1 %1536  ;;  %v1529_v49 = vadd.f32 %v1525_v12, %v1508_v18 }
 0x27f   : > { %v1542_v50 = vadd.f32 %v1537_v3, %v1528_v45 }
 0x281   : > { %v1539_v55 = vpop.permute.xlu0 %1538 }
 0x282   : > { %v1558_v31 = vpop.permute.xlu1 %1557  ;;  %v1543_v62 = vadd.f32 %v1539_v55, %v1529_v49 }
 0x283   : > { %v1563_v21 = vadd.f32 %v1558_v31, %v1542_v50  ;;  %v1994_v50 = vstv %s7415_s19  ;;  %s7462_s19 = sld [smem:[#allocation4 + $0x21]] }
 0x285   : > { %v1560_v46 = vpop.permute.xlu0 %1559 }
 0x286   : > { %v1579_v47 = vpop.permute.xlu1 %1578  ;;  %v1564_v9 = vadd.f32 %v1560_v46, %v1543_v62  ;;  %v2008_v46 = vstv %s5825_s17  ;;  %s7464_s17 = sld [smem:[#allocation4 + $0x3f]] }
 0x287   : > { %v1584_v28 = vadd.f32 %v1579_v47, %v1563_v21 }
 0x289   : > { %1586 = vst.msk [vmem:[#allocation2] sm:$0xff] %vm324_vm1, %v1584_v28  ;;  %v1581_v37 = vpop.permute.xlu0 %1580 }
 0x28a   : > { %v1585_v6 = vadd.f32 %v1581_v37, %v1564_v9  ;;  %v1637_v17 = vpop.permute.xlu1 %1636 }
 0x28b   : > { %v1642_v58 = vadd.f32 %v1637_v17, %v7307_v43 }
 0x28c   : > { %1587 = vst.msk [vmem:[#allocation2 + $0x8] sm:$0xff] %vm324_vm1, %v1585_v6 }
 0x28d   : > { %v1639_v0 = vpop.permute.xlu0 %1638 }
 0x28e   : > { %v1658_v33 = vpop.permute.xlu1 %1657  ;;  %v1643_v22 = vadd.f32 %v1639_v0, %v7328_v26 }
 0x28f   : > { %v1663_v13 = vadd.f32 %v1658_v33, %v1642_v58  ;;  %v2029_v33 = vstv %s5826_s15  ;;  %s7468_s15 = sld [smem:[#allocation4 + $0x42]] }
 0x291   : > { %v1660_v34 = vpop.permute.xlu0 %1659 }
 0x292   : > { %v1679_v48 = vpop.permute.xlu1 %1678  ;;  %v1664_v52 = vadd.f32 %v1660_v34, %v1643_v22 }
 0x293   : > { %v1684_v54 = vadd.f32 %v1679_v48, %v1663_v13 }
 0x295   : > { %v1681_v11 = vpop.permute.xlu0 %1680 }
 0x296   : > { %v1693_v40 = vpop.permute.xlu1 %1692  ;;  %v1685_v2 = vadd.f32 %v1681_v11, %v1664_v52 }
 0x297   : > { %v1698_v60 = vadd.f32 %v1693_v40, %v1684_v54 }
 0x299   : > { %v1695_v51 = vpop.permute.xlu0 %1694 }
 0x29a   : > { %v1714_v14 = vpop.permute.xlu1 %1713  ;;  %v1699_v5 = vadd.f32 %v1695_v51, %v1685_v2  ;;  %v2050_v2 = vstv %s7419_s18  ;;  %s7484_s18 = sld [smem:[#allocation4 + $0x66]] }
 0x29b   : > { %v1719_v53 = vadd.f32 %v1714_v14, %v1698_v60 }
 0x29d   : > { %v1716_v41 = vpop.permute.xlu0 %1715 }
 0x29e   : > { %v1735_v42 = vpop.permute.xlu1 %1734  ;;  %v1720_v15 = vadd.f32 %v1716_v41, %v1699_v5  ;;  %v2064_v5 = vstv %s7421_s20  ;;  %s7494_s20 = sld [smem:[#allocation4 + $0x69]] }
 0x29f   : > { %v1740_v16 = vadd.f32 %v1735_v42, %v1719_v53  ;;  %v2085_v42 = vstv %s7426_s9  ;;  %s7654_s9 = sld [smem:[#allocation4 + $0x64]] }
 0x2a1   : > { %1742 = vst.msk [vmem:[#allocation2 + $0x10] sm:$0xff] %vm324_vm1, %v1740_v16  ;;  %v1737_v43 = vpop.permute.xlu0 %1736 }
 0x2a2   : > { %v1741_v30 = vadd.f32 %v1737_v43, %v1720_v15  ;;  %v1793_v35 = vpop.permute.xlu1 %1792  ;;  %v2150_v15 = vstv %s7428_s16  ;;  %v2164_v43 = vstv %s7431_s26  ;;  %s7671_s16 = sld [smem:[#allocation4 + $0x6a]]  ;;  %s5845_s26 = sld [smem:[#allocation4 + $0x65]] }
 0x2a3   : > { %v1798_v8 = vadd.f32 %v1793_v35, %v7345_v61  ;;  %v2206_v35 = vstv %s7437_s12  ;;  %s5854_s12 = sld [smem:[#allocation9 + $0x1]] }
 0x2a4   : > { %1743 = vst.msk [vmem:[#allocation2 + $0x18] sm:$0xff] %vm324_vm1, %v1741_v30  ;;  %v2185_v30 = vstv %s7433_s13  ;;  %s2427_s13 = sld [smem:[#allocation9]] }
 0x2a5   : > { %v1795_v26 = vpop.permute.xlu0 %1794 }
 0x2a6   : > { %v1814_v20 = vpop.permute.xlu1 %1813  ;;  %v1799_v23 = vadd.f32 %v1795_v26, %v7357_v7  ;;  %v2220_v26 = vstv %s7439_s14  ;;  %s7766_s14 = sld [smem:[#allocation9 + $0x4]] }
 0x2a7   : > { %v1819_v44 = vadd.f32 %v1814_v20, %v1798_v8  ;;  %v7489_v20 = vstv %s7446_s2  ;;  %s7768_s2 = sld [smem:[#allocation9 + $0x5]] }
 0x2a9   : > { %v1816_v29 = vpop.permute.xlu0 %1815 }
 0x2aa   : > { %v1835_v39 = vpop.permute.xlu1 %1834  ;;  %v1820_v24 = vadd.f32 %v1816_v29, %v1799_v23  ;;  %v7492_v29 = vstv %s7448_s1  ;;  %s7770_s1 = sld [smem:[#allocation9 + $0x2]] }
 0x2ab   : > { %v1840_v57 = vadd.f32 %v1835_v39, %v1819_v44 }
 0x2ad   : > { %v1837_v10 = vpop.permute.xlu0 %1836 }
 0x2ae   : > { %v1849_v27 = vpop.permute.xlu1 %1848  ;;  %v1841_v59 = vadd.f32 %v1837_v10, %v1820_v24  ;;  %v1954_v10 = vstv %s7456_s3  ;;  %s7772_s3 = sld [smem:[#allocation9 + $0x6]] }
 0x2af   : > { %v1854_v63 = vadd.f32 %v1849_v27, %v1840_v57  ;;  %v7500_v27 = vstv %s7458_s4  ;;  %v7506_v57 = vstv %s7462_s19  ;;  %s7774_s4 = sld [smem:[#allocation9 + $0x3]]  ;;  %s7776_s19 = sld [smem:[#allocation9 + $0x7]] }
 0x2b1   : > { %v1851_v4 = vpop.permute.xlu0 %1850 }
 0x2b2   : > { %v1870_v32 = vpop.permute.xlu1 %1869  ;;  %v1855_v25 = vadd.f32 %v1851_v4, %v1841_v59  ;;  %v2110_v4 = vstv %s7464_s17  ;;  %v7516_v59 = vstv %s7470_s5  ;;  %s7647_s5 = sld [smem:[#allocation4 + $0x67]]  ;;  %s7794_s17 = sld [smem:[#allocation9 + $0x8]] }
 0x2b3   : > { %v1875_v1 = vadd.f32 %v1870_v32, %v1854_v63  ;;  %v7513_v63 = vstv %s7468_s15  ;;  %s7800_s15 = sld [smem:[#allocation10]] }
 0x2b5   : > { %v1872_v19 = vpop.permute.xlu0 %1871 }
 0x2b6   : > { %v1891_v38 = vpop.permute.xlu1 %1890  ;;  %v1876_v3 = vadd.f32 %v1872_v19, %v1855_v25 }
 0x2b7   : > { %v1896_v12 = vadd.f32 %v1891_v38, %v1875_v1 }
 0x2b9   : > { %1898 = vst.msk [vmem:[#allocation2 + $0x20] sm:$0xff] %vm324_vm1, %v1896_v12  ;;  %v1893_v61 = vpop.permute.xlu0 %1892 }
 0x2ba   : > { %v1897_v56 = vadd.f32 %v1893_v61, %v1876_v3  ;;  %v1919_v36 = vpop.permute.xlu1 %1918 }
 0x2bc   : > { %1899 = vst.msk [vmem:[#allocation2 + $0x28] sm:$0xff] %vm324_vm1, %v1897_v56 }
 0x2bd   : > { %v1921_v7 = vpop.permute.xlu0 %1920 }
 0x2be   : > { %v1923_v45 = vpop.permute.xlu1 %1922 }
 0x2c1   : > { %v1928_v55 = vpop.permute.xlu0 %1927 }
 0x2c2   : > { %v1930_v18 = vpop.permute.xlu1 %1929  ;;  %v1945_v49 = vsel %vm384_vm2, %v1919_v36, %v1928_v55  ;;  %v2266_v55 = vstv %s7478_s30  ;;  %s5846_s30 = sld [smem:[#allocation4 + $0x68]] }
 0x2c3   : > { %v1946_v28 = vsel %vm384_vm2, %v1921_v7, %v1930_v18 }
 0x2c5   : > { %v1932_v31 = vpop.permute.xlu0 %1931 }
 0x2c6   : > { %v1937_v21 = vpop.permute.xlu1 %1936  ;;  %v1947_v6 = vsel %vm384_vm2, %v1923_v45, %v1932_v31 }
 0x2c7   : > { %v7424_v62 = vsel %vm388_vm3, %v1945_v49, %v1937_v21  ;;  %v7532_v49 = vstv %s7484_s18  ;;  %s7804_s18 = sld [smem:[#allocation10 + $0x1]] }
 0x2c8   : > { %v1995_v47 = vmul.f32 %v1994_v50, %v7424_v62  ;;  %v2009_v37 = vmul.f32 %v2008_v46, %v7424_v62  ;;  %v2030_v51 = vmul.f32 %v2029_v33, %v7424_v62  ;;  %v2065_v24 = vmul.f32 %v2064_v5, %v7424_v62 }
 0x2c9   : > { %v1939_v9 = vpop.permute.xlu0 %1938  ;;  %v2051_v1 = vmul.f32 %v2050_v2, %v7424_v62  ;;  %v2086_v19 = vmul.f32 %v2085_v42, %v7424_v62  ;;  %v2165_v7 = vmul.f32 %v2164_v43, %v7424_v62 }
 0x2ca   : > { %v7443_v17 = vsel %vm388_vm3, %v1946_v28, %v1939_v9  ;;  %v1941_v0 = vpop.permute.xlu1 %1940  ;;  %1999 = vrot.lane.b32.xlu0 %v1995_v47, %s6286_s29  ;;  %v2015_v22 = vrot.slane %v2009_v37, 1  ;;  %v2036_v16 = vrot.slane %v2030_v51, 2  ;;  %v2071_v18 = vrot.slane %v2065_v24, 1 }
 0x2cb   : > { %v7451_v34 = vsel %vm388_vm3, %v1947_v6, %v1941_v0  ;;  %v1996_v48 = vmul.f32 %v1994_v50, %v7443_v17  ;;  %v2010_v58 = vmul.f32 %v2008_v46, %v7443_v17  ;;  %v2031_v11 = vmul.f32 %v2029_v33, %v7443_v17 }
 0x2cc   : > { %v2011_v40 = vmul.f32 %v2008_v46, %v7451_v34  ;;  %v2032_v13 = vmul.f32 %v2029_v33, %v7451_v34  ;;  %v2066_v8 = vmul.f32 %v2064_v5, %v7443_v17  ;;  %v2067_v23 = vmul.f32 %v2064_v5, %v7451_v34 }
 0x2cd   : > { %2001 = vrot.lane.b32.xlu1 %v1996_v48, %s6286_s29  ;;  %v2016_v54 = vrot.slane %v2010_v58, 1  ;;  %v2037_v60 = vrot.slane %v2031_v11, 2  ;;  %v2087_v32 = vmul.f32 %v2085_v42, %v7443_v17  ;;  %v2088_v25 = vmul.f32 %v2085_v42, %v7451_v34 }
 0x2ce   : > { %v2018_v52 = vrot.slane %v2011_v40, 1  ;;  %v2039_v41 = vrot.slane %v2032_v13, 2  ;;  %v2166_v38 = vmul.f32 %v2164_v43, %v7443_v17  ;;  %v2052_v12 = vmul.f32 %v2050_v2, %v7443_v17 }
 0x2cf   : > { %v2017_v14 = vsel %vm408_vm4, %v2015_v22, %v2016_v54  ;;  %v2038_v39 = vsel %vm426_vm5, %v2036_v16, %v2037_v60  ;;  %v2072_v3 = vrot.slane %v2066_v8, 1  ;;  %v2167_v61 = vmul.f32 %v2164_v43, %v7451_v34 }
 0x2d0   : > { %2020 = vrot.lane.b32.xlu0 %v2017_v14, %s6286_s29  ;;  %v2019_v53 = vsel %vm408_vm4, %v2016_v54, %v2018_v52  ;;  %v2040_v44 = vsel %vm426_vm5, %v2037_v60, %v2039_v41  ;;  %v2187_v56 = vmul.f32 %v2185_v30, %v7443_v17  ;;  %v2074_v36 = vrot.slane %v2067_v23, 1 }
 0x2d1   : > { %2022 = vrot.lane.b32.xlu1 %v2019_v53, %s6286_s29  ;;  %v2188_v45 = vmul.f32 %v2185_v30, %v7451_v34  ;;  %v2093_v31 = vrot.slane %v2087_v32, 2  ;;  %v2186_v50 = vmul.f32 %v2185_v30, %v7424_v62  ;;  %v2095_v21 = vrot.slane %v2088_v25, 2 }
 0x2d2   : > { %v2151_v46 = vmul.f32 %v2150_v15, %v7424_v62  ;;  %v2172_v47 = vrot.slane %v2166_v38, 1  ;;  %v7536_v28 = vstv %s7494_s20  ;;  %v2073_v9 = vsel %vm408_vm4, %v2071_v18, %v2072_v3  ;;  %s7812_s20 = sld [smem:[#allocation9 + $0x9]] }
 0x2d3   : > { %v2092_v37 = vrot.slane %v2086_v19, 2  ;;  %v2174_v6 = vrot.slane %v2167_v61, 1  ;;  %v2193_v0 = vrot.slane %v2187_v56, 2  ;;  %v2075_v33 = vsel %vm408_vm4, %v2072_v3, %v2074_v36  ;;  %v1951_v61 = vld [vmem:[#allocation2] sm:$0xff] }
 0x2d4   : > { %2041 = vrot.lane.b32.xlu0 %v2038_v39, %s6286_s29  ;;  %v2171_v48 = vrot.slane %v2165_v7, 1  ;;  %v2195_v58 = vrot.slane %v2188_v45, 2  ;;  %v7542_v11 = vmul.f32 %v2220_v26, %v7424_v62  ;;  %v2152_v13 = vmul.f32 %v2150_v15, %v7443_v17 }
 0x2d5   : > { %2043 = vrot.lane.b32.xlu1 %v2040_v44, %s6286_s29  ;;  %v2094_v40 = vsel %vm426_vm5, %v2092_v37, %v2093_v31  ;;  %v2192_v22 = vrot.slane %v2186_v50, 2  ;;  %v7548_v54 = vmul.f32 %v2220_v26, %v7443_v17  ;;  %v2096_v51 = vsel %vm426_vm5, %v2093_v31, %v2095_v21 }
 0x2d6   : > { %v2173_v52 = vsel %vm408_vm4, %v2171_v48, %v2172_v47  ;;  %v7553_v14 = vmul.f32 %v2206_v35, %v7424_v62  ;;  %v7556_v60 = vmul.f32 %v2206_v35, %v7443_v17  ;;  %v2175_v2 = vsel %vm408_vm4, %v2172_v47, %v2174_v6  ;;  %v1952_v47 = vld [vmem:[#allocation2 + $0x8] sm:$0xff] }
 0x2d7   : > { %v2194_v53 = vsel %vm426_vm5, %v2192_v22, %v2193_v0  ;;  %v7561_v41 = vmul.f32 %v2220_v26, %v7451_v34  ;;  %v2398_v5 = vmul.f32 %v7492_v29, %v7424_v62  ;;  %v2196_v42 = vsel %vm426_vm5, %v2193_v0, %v2195_v58 }
 0x2d8   : > { %2055 = vrot.lane.b32.xlu0 %v2051_v1, %s9327_s0  ;;  %v2227_v16 = vrot.slane %v7542_v11, 1  ;;  %v7570_v15 = vmul.f32 %v7489_v20, %v7424_v62  ;;  %v2399_v43 = vmul.f32 %v7492_v29, %v7443_v17  ;;  %v2228_v30 = vrot.slane %v7548_v54, 1 }
 0x2d9   : > { %2057 = vrot.lane.b32.xlu1 %v2052_v12, %s9327_s0  ;;  %v7578_v35 = vmul.f32 %v7489_v20, %v7443_v17  ;;  %v2404_v26 = vrot.slane %v2398_v5, 2  ;;  %v2400_v39 = vmul.f32 %v7492_v29, %v7451_v34  ;;  %v1955_v44 = vmul.f32 %v1954_v10, %v7424_v62 }
 0x2da   : > { %v2405_v8 = vrot.slane %v2399_v43, 2  ;;  %v1961_v23 = vmul.f32 %v7500_v27, %v7424_v62  ;;  %v1962_v24 = vmul.f32 %v7500_v27, %v7443_v17  ;;  %v2230_v32 = vrot.slane %v7561_v41, 1 }
 0x2db   : > { %v7592_v1 = vmul.f32 %v7489_v20, %v7451_v34  ;;  %v2407_v19 = vrot.slane %v2400_v39, 2  ;;  %v1978_v29 = vmul.f32 %v7506_v57, %v7424_v62  ;;  %v1979_v3 = vmul.f32 %v7506_v57, %v7443_v17 }
 0x2dc   : > { %2076 = vrot.lane.b32.xlu0 %v2073_v9, %s9327_s0  ;;  %v7598_v25 = vsel %vm426_vm5, %v2404_v26, %v2405_v8  ;;  %v1967_v38 = vrot.slane %v1961_v23, 1  ;;  %v1968_v12 = vrot.slane %v1962_v24, 1  ;;  %v1957_v36 = vadd.f32 %v1955_v44, %v1951_v61  ;;  %v2108_v24 = vld [vmem:[#allocation2 + $0x18] sm:$0xff] }
 0x2dd   : > { %2078 = vrot.lane.b32.xlu1 %v2075_v33, %s9327_s0  ;;  %v7604_v20 = vsel %vm426_vm5, %v2405_v8, %v2407_v19  ;;  %v1984_v56 = vrot.slane %v1978_v29, 2  ;;  %v1963_v7 = vmul.f32 %v7500_v27, %v7451_v34  ;;  %v1985_v18 = vrot.slane %v1979_v3, 2 }
 0x2de   : > { %v1969_v45 = vsel %vm408_vm4, %v1967_v38, %v1968_v12  ;;  %v1980_v31 = vmul.f32 %v7506_v57, %v7451_v34  ;;  %v1956_v50 = vmul.f32 %v1954_v10, %v7443_v17  ;;  %v2111_v9 = vmul.f32 %v2110_v4, %v7424_v62 }
 0x2df   : > { %v1974_v21 = vadd.f32 %v1969_v45, %v1957_v36  ;;  %v2117_v37 = vmul.f32 %v7513_v63, %v7424_v62  ;;  %v1986_v27 = vsel %vm426_vm5, %v1984_v56, %v1985_v18  ;;  %v2118_v57 = vmul.f32 %v7513_v63, %v7443_v17 }
 0x2e0   : > { %2097 = vrot.lane.b32.xlu0 %v2094_v40, %s9327_s0  ;;  %v1987_v6 = vrot.slane %v1980_v31, 2  ;;  %v1958_v0 = vadd.f32 %v1956_v50, %v1952_v47  ;;  %v2134_v58 = vmul.f32 %v7516_v59, %v7424_v62  ;;  %v2119_v26 = vmul.f32 %v7513_v63, %v7451_v34  ;;  %v2263_v31 = vld [vmem:[#allocation2 + $0x20] sm:$0xff] }
 0x2e1   : > { %2099 = vrot.lane.b32.xlu1 %v2096_v51, %s9327_s0  ;;  %v7624_v10 = vadd.f32 %v1986_v27, %v1974_v21  ;;  %v2123_v48 = vrot.slane %v2117_v37, 1  ;;  %v2124_v22 = vrot.slane %v2118_v57, 1  ;;  %v2135_v51 = vmul.f32 %v7516_v59, %v7443_v17 }
 0x2e2   : > { %v2140_v5 = vrot.slane %v2134_v58, 2  ;;  %v2136_v23 = vmul.f32 %v7516_v59, %v7451_v34  ;;  %v2126_v29 = vrot.slane %v2119_v26, 1  ;;  %v2274_v59 = vmul.f32 %v7532_v49, %v7443_v17 }
 0x2e3   : > { %v2125_v8 = vsel %vm408_vm4, %v2123_v48, %v2124_v22  ;;  %v2141_v44 = vrot.slane %v2135_v51, 2  ;;  %v2290_v61 = vmul.f32 %v7536_v28, %v7424_v62  ;;  %v2291_v56 = vmul.f32 %v7536_v28, %v7443_v17 }
 0x2e4   : > { %2155 = vrot.lane.b32.xlu0 %v2151_v46, %s6286_s29  ;;  %v1970_v46 = vrot.slane %v1963_v7, 1  ;;  %v2127_v3 = vsel %vm408_vm4, %v2124_v22, %v2126_v29  ;;  %v2268_v47 = vmul.f32 %v2266_v55, %v7443_v17  ;;  %v2275_v37 = vmul.f32 %v7532_v49, %v7451_v34 }
 0x2e5   : > { %2157 = vrot.lane.b32.xlu1 %v2152_v13, %s6286_s29  ;;  %v1988_v13 = vsel %vm426_vm5, %v1985_v18, %v1987_v6  ;;  %v2142_v63 = vsel %vm426_vm5, %v2140_v5, %v2141_v44  ;;  %v2280_v18 = vrot.slane %v2274_v59, 1  ;;  %v2296_v50 = vrot.slane %v2290_v61, 2 }
 0x2e6   : > { %v1971_v33 = vsel %vm408_vm4, %v1968_v12, %v1970_v46  ;;  %v2273_v12 = vmul.f32 %v7532_v49, %v7424_v62  ;;  %v2297_v21 = vrot.slane %v2291_v56, 2  ;;  %v2292_v27 = vmul.f32 %v7536_v28, %v7451_v34 }
 0x2e7   : > { %v1975_v40 = vadd.f32 %v1971_v33, %v1958_v0  ;;  %v2231_v49 = vsel %vm408_vm4, %v2228_v30, %v2230_v32  ;;  %v2251_v28 = vrot.slane %v7592_v1, 2  ;;  %v2282_v57 = vrot.slane %v2275_v37, 1  ;;  %v2264_v33 = vld [vmem:[#allocation2 + $0x28] sm:$0xff] }
 0x2e8   : > { %2176 = vrot.lane.b32.xlu0 %v2173_v52, %s6286_s29  ;;  %v2107_v52 = vld [vmem:[#allocation2 + $0x10] sm:$0xff]  ;;  %v2279_v45 = vrot.slane %v2273_v12, 1  ;;  %v2298_v6 = vsel %vm426_vm5, %v2296_v50, %v2297_v21  ;;  %v2299_v11 = vrot.slane %v2292_v27, 2  ;;  %v2270_v48 = vadd.f32 %v2268_v47, %v2264_v33 }
 0x2e9   : > { %2178 = vrot.lane.b32.xlu1 %v2175_v2, %s6286_s29  ;;  %v2113_v43 = vadd.f32 %v2111_v9, %v2107_v52  ;;  %v2112_v2 = vmul.f32 %v2110_v4, %v7443_v17  ;;  %v7638_v39 = vadd.f32 %v1988_v13, %v1975_v40  ;;  %v2267_v4 = vmul.f32 %v2266_v55, %v7424_v62 }
 0x2ea   : > { %v2249_v55 = vrot.slane %v7578_v35, 2  ;;  %v2320_v58 = vstv %s7647_s5  ;;  %v2283_v41 = vsel %vm408_vm4, %v2280_v18, %v2282_v57  ;;  %v2300_v54 = vsel %vm426_vm5, %v2297_v21, %v2299_v11  ;;  %s7814_s5 = sld [smem:[#allocation9 + $0xa]] }
 0x2eb   : > { %v2130_v19 = vadd.f32 %v2125_v8, %v2113_v43  ;;  %v2114_v38 = vadd.f32 %v2112_v2, %v2108_v24  ;;  %v2269_v46 = vadd.f32 %v2267_v4, %v2263_v31  ;;  %v2306_v32 = vstv %s7654_s9  ;;  %s7822_s9 = sld [smem:[#allocation9 + $0xb]] }
 0x2ec   : > { %2197 = vrot.lane.b32.xlu0 %v2194_v53, %s6286_s29  ;;  %v2143_v53 = vrot.slane %v2136_v23, 2  ;;  %v2322_v1 = vmul.f32 %v2320_v58, %v7443_v17  ;;  %v2287_v40 = vadd.f32 %v2283_v41, %v2270_v48  ;;  %v2252_v13 = vsel %vm426_vm5, %v2249_v55, %v2251_v28 }
 0x2ed   : > { %2199 = vrot.lane.b32.xlu1 %v2196_v42, %s6286_s29  ;;  %v7656_v42 = vadd.f32 %v2142_v63, %v2130_v19  ;;  %v2131_v7 = vadd.f32 %v2127_v3, %v2114_v38  ;;  %v2321_v22 = vmul.f32 %v2320_v58, %v7424_v62  ;;  %v2307_v52 = vmul.f32 %v2306_v32, %v7424_v62 }
 0x2ee   : > { %v2144_v36 = vsel %vm426_vm5, %v2141_v44, %v2143_v53  ;;  %v7709_v51 = vadd.f32 %v2300_v54, %v2287_v40  ;;  %v2341_v5 = vstv %s7671_s16  ;;  %v2308_v43 = vmul.f32 %v2306_v32, %v7443_v17  ;;  %s7833_s16 = sld [smem:[#allocation9 + $0xc]] }
 0x2ef   : > { %v7673_v9 = vadd.f32 %v2144_v36, %v2131_v7  ;;  %v2328_v2 = vrot.slane %v2322_v1, 1  ;;  %v2343_v26 = vmul.f32 %v2341_v5, %v7443_v17  ;;  %v2344_v44 = vmul.f32 %v2341_v5, %v7451_v34 }
 0x2f0   : > { %2211 = vrot.lane.b32.xlu0 %v7553_v14, %s9327_s0  ;;  %v2281_v14 = vsel %vm408_vm4, %v2279_v45, %v2280_v18  ;;  %v2327_v23 = vrot.slane %v2321_v22, 1  ;;  %v2342_v24 = vmul.f32 %v2341_v5, %v7424_v62  ;;  %v2376_v53 = vstv %s5846_s30  ;;  %s7835_s30 = sld [smem:[#allocation9 + $0xd]] }
 0x2f1   : > { %2213 = vrot.lane.b32.xlu1 %v7556_v60, %s9327_s0  ;;  %v2229_v60 = vsel %vm408_vm4, %v2227_v16, %v2228_v30  ;;  %v2286_v0 = vadd.f32 %v2281_v14, %v2269_v46  ;;  %v2248_v16 = vrot.slane %v7570_v15, 2  ;;  %v2323_v15 = vmul.f32 %v2320_v58, %v7451_v34 }
 0x2f2   : > { %v2329_v19 = vsel %vm408_vm4, %v2327_v23, %v2328_v2  ;;  %v2349_v29 = vrot.slane %v2343_v26, 2  ;;  %v2351_v4 = vrot.slane %v2344_v44, 2  ;;  %v2348_v63 = vrot.slane %v2342_v24, 2 }
 0x2f3   : > { %v7696_v35 = vadd.f32 %v2298_v6, %v2286_v0  ;;  %v2250_v30 = vsel %vm426_vm5, %v2248_v16, %v2249_v55  ;;  %v2330_v8 = vrot.slane %v2323_v15, 1  ;;  %v2362_v59 = vstv %s5845_s26  ;;  %s7849_s26 = sld [smem:[#allocation9 + $0xe]] }
 0x2f4   : > { %2232 = vrot.lane.b32.xlu0 %v2229_v60, %s9327_s0  ;;  %v2350_v12 = vsel %vm426_vm5, %v2348_v63, %v2349_v29  ;;  %v2378_v3 = vmul.f32 %v2376_v53, %v7443_v17  ;;  %v2352_v61 = vsel %vm426_vm5, %v2349_v29, %v2351_v4  ;;  %v2379_v56 = vmul.f32 %v2376_v53, %v7451_v34 }
 0x2f5   : > { %2234 = vrot.lane.b32.xlu1 %v2231_v49, %s9327_s0  ;;  %v2331_v38 = vsel %vm408_vm4, %v2328_v2, %v2330_v8  ;;  %v2377_v36 = vmul.f32 %v2376_v53, %v7424_v62  ;;  %v2363_v7 = vmul.f32 %v2362_v59, %v7424_v62  ;;  %v2364_v45 = vmul.f32 %v2362_v59, %v7443_v17 }
 0x2f6   : > { %v2384_v18 = vrot.slane %v2378_v3, 1  ;;  %v2386_v31 = vrot.slane %v2379_v56, 1 }
 0x2f7   : > { %v2383_v50 = vrot.slane %v2377_v36, 1 }
 0x2f8   : > { %2253 = vrot.lane.b32.xlu0 %v2250_v30, %s9327_s0  ;;  %v2387_v34 = vsel %vm408_vm4, %v2384_v18, %v2386_v31 }
 0x2f9   : > { %2255 = vrot.lane.b32.xlu1 %v2252_v13, %s9327_s0  ;;  %v2385_v21 = vsel %vm408_vm4, %v2383_v50, %v2384_v18 }
 0x2fc   : > { %2311 = vrot.lane.b32.xlu0 %v2307_v52, %s6286_s29 }
 0x2fd   : > { %2313 = vrot.lane.b32.xlu1 %v2308_v43, %s6286_s29 }
 0x300   : > { %2332 = vrot.lane.b32.xlu0 %v2329_v19, %s6286_s29 }
 0x301   : > { %2334 = vrot.lane.b32.xlu1 %v2331_v38, %s6286_s29 }
 0x304   : > { %2353 = vrot.lane.b32.xlu0 %v2350_v12, %s6286_s29 }
 0x305   : > { %2355 = vrot.lane.b32.xlu1 %v2352_v61, %s6286_s29 }
 0x308   : > { %2367 = vrot.lane.b32.xlu0 %v2363_v7, %s9327_s0 }
 0x309   : > { %2369 = vrot.lane.b32.xlu1 %v2364_v45, %s9327_s0 }
 0x30c   : > { %2388 = vrot.lane.b32.xlu0 %v2385_v21, %s9327_s0 }
 0x30d   : > { %2390 = vrot.lane.b32.xlu1 %v2387_v34, %s9327_s0 }
 0x310   : > { %2409 = vrot.lane.b32.xlu0 %v7598_v25, %s9327_s0 }
 0x311   : > { %2411 = vrot.lane.b32.xlu1 %v7604_v20, %s9327_s0 }
 0x33c   : > { %v2000_v62 = vpop.permute.xlu0 %1999 }
 0x33d   : > { %v2005_v27 = vadd.f32 %v2000_v62, %v7624_v10 }
 0x33f   : > { %v2002_v17 = vpop.permute.xlu1 %2001 }
 0x340   : > { %v2006_v60 = vadd.f32 %v2002_v17, %v7638_v39 }
 0x342   : > { %v2021_v46 = vpop.permute.xlu0 %2020 }
 0x343   : > { %v2023_v47 = vpop.permute.xlu1 %2022  ;;  %v2026_v6 = vadd.f32 %v2021_v46, %v2005_v27 }
 0x344   : > { %v2027_v49 = vadd.f32 %v2023_v47, %v2006_v60 }
 0x346   : > { %v2042_v14 = vpop.permute.xlu0 %2041 }
 0x347   : > { %v2044_v37 = vpop.permute.xlu1 %2043  ;;  %v2047_v28 = vadd.f32 %v2042_v14, %v2026_v6 }
 0x348   : > { %v2048_v57 = vadd.f32 %v2044_v37, %v2027_v49 }
 0x34a   : > { %v2056_v55 = vpop.permute.xlu0 %2055 }
 0x34b   : > { %v2058_v0 = vpop.permute.xlu1 %2057  ;;  %v2061_v11 = vadd.f32 %v2056_v55, %v2047_v28 }
 0x34c   : > { %v2062_v20 = vadd.f32 %v2058_v0, %v2048_v57 }
 0x34e   : > { %v2077_v25 = vpop.permute.xlu0 %2076 }
 0x34f   : > { %v2079_v33 = vpop.permute.xlu1 %2078  ;;  %v2082_v16 = vadd.f32 %v2077_v25, %v2061_v11 }
 0x350   : > { %v2083_v48 = vadd.f32 %v2079_v33, %v2062_v20 }
 0x352   : > { %v2098_v58 = vpop.permute.xlu0 %2097 }
 0x353   : > { %v2103_v41 = vadd.f32 %v2098_v58, %v2082_v16  ;;  %v2100_v54 = vpop.permute.xlu1 %2099  ;;  %v7782_v16 = vld [vmem:[%s6456_s28 + $0x10] sm:$0xff]  ;;  %v2432_v58 = vstv %s5854_s12  ;;  %s7865_s12 = sld [smem:[#allocation10 + $0x3]] }
 0x354   : > { %v2104_v30 = vadd.f32 %v2100_v54, %v2083_v48  ;;  %v2428_v48 = vstv %s2427_s13  ;;  %v2433_v54 = vmul.f32 %v7782_v16, %v2432_v58  ;;  %s7860_s13 = sld [smem:[#allocation9 + $0xf]] }
 0x355   : > { %2105 = vst.msk [vmem:[#allocation2] sm:$0xff] %vm324_vm1, %v2103_v41 }
 0x356   : > { %2106 = vst.msk [vmem:[#allocation2 + $0x8] sm:$0xff] %vm324_vm1, %v2104_v30  ;;  %v2156_v10 = vpop.permute.xlu0 %2155  ;;  %v7787_v30 = vld [vmem:[%s6456_s28 + $0x8] sm:$0xff] }
 0x357   : > { %v2158_v39 = vpop.permute.xlu1 %2157  ;;  %v2161_v44 = vadd.f32 %v2156_v10, %v7656_v42  ;;  %v7790_v10 = vld [vmem:[%s6456_s28 + $0x18] sm:$0xff] }
 0x358   : > { %v2162_v23 = vadd.f32 %v2158_v39, %v7673_v9  ;;  %v2456_v39 = vstv %s7766_s14  ;;  %s7872_s14 = sld [smem:[#allocation9 + $0x10]] }
 0x35a   : > { %v2177_v32 = vpop.permute.xlu0 %2176 }
 0x35b   : > { %v2179_v1 = vpop.permute.xlu1 %2178  ;;  %v2182_v19 = vadd.f32 %v2177_v32, %v2161_v44  ;;  %v2460_v32 = vstv %s7768_s2  ;;  %s7875_s2 = sld [smem:[#allocation9 + $0x11]] }
 0x35c   : > { %v2600_v40 = vld [vmem:[#allocation2] sm:$0xff]  ;;  %v2183_v4 = vadd.f32 %v2179_v1, %v2162_v23 }
 0x35d   : > { %v2603_v13 = vrot.slane %v2600_v40, 1  ;;  %v2606_v15 = vrot.slane %v2600_v40, 7  ;;  %v2601_v22 = vld [vmem:[#allocation2 + $0x8] sm:$0xff]  ;;  %v7797_v1 = vld [vmem:[%s6456_s28 + $0x20] sm:$0xff]  ;;  %v2438_v40 = vstv %s7770_s1  ;;  %s7877_s1 = sld [smem:[#allocation9 + $0x12]] }
 0x35e   : > { %v2198_v52 = vpop.permute.xlu0 %2197  ;;  %v2607_v5 = vrot.slane %v2601_v22, 7  ;;  %v2611_v26 = vrot.slane %v2601_v22, 5 }
 0x35f   : > { %v2200_v43 = vpop.permute.xlu1 %2199  ;;  %v2613_v2 = vsel %vm345_vm0, %v2603_v13, %v2606_v15  ;;  %v2203_v63 = vadd.f32 %v2198_v52, %v2182_v19  ;;  %v2430_v13 = vmul.f32 %v2428_v48, %v7787_v30  ;;  %v2439_v52 = vmul.f32 %v7797_v1, %v2438_v40 }
 0x360   : > { %2617 = vrot.lane.b32.xlu0 %v2613_v2, %s6286_s29  ;;  %v2608_v8 = vsel %vm345_vm0, %v2606_v15, %v2607_v5  ;;  %v2614_v38 = vsel %vm345_vm0, %v2607_v5, %v2611_v26  ;;  %v2204_v53 = vadd.f32 %v2200_v43, %v2183_v4  ;;  %v2434_v15 = vmul.f32 %v7790_v10, %v2432_v58  ;;  %v7808_v5 = vld [vmem:[%s6456_s28 + $0x28] sm:$0xff]  ;;  %v7817_v26 = vld [vmem:[%s6456_s28 + $0x30] sm:$0xff] }
 0x361   : > { %2619 = vrot.lane.b32.xlu1 %v2608_v8, %s6286_s29  ;;  %v2440_v23 = vmul.f32 %v7808_v5, %v2438_v40 }
 0x362   : > { %v2212_v24 = vpop.permute.xlu0 %2211  ;;  %v2436_v44 = vadd.f32 %v2434_v15, %v2430_v13 }
 0x363   : > { %v2214_v29 = vpop.permute.xlu1 %2213  ;;  %v2217_v59 = vadd.f32 %v2212_v24, %v2203_v63  ;;  %v2466_v24 = vstv %s7772_s3  ;;  %s7883_s3 = sld [smem:[#allocation9 + $0x13]] }
 0x364   : > { %2621 = vrot.lane.b32.xlu0 %v2614_v38, %s6286_s29  ;;  %v2218_v42 = vadd.f32 %v2214_v29, %v2204_v53  ;;  %v2467_v63 = vmul.f32 %v7797_v1, %v2466_v24  ;;  %v2442_v53 = vadd.f32 %v2440_v23, %v2436_v44  ;;  %v2530_v44 = vstv %s7860_s13  ;;  %s5911_s13 = sld [smem:[#allocation7 + $0x52]] }
 0x365   : > { %2626 = vrot.lane.b32.xlu1 %v2613_v2, %s9328_s10 }
 0x366   : > { %v2233_v12 = vpop.permute.xlu0 %2232 }
 0x367   : > { %v2235_v3 = vpop.permute.xlu1 %2234  ;;  %v2238_v61 = vadd.f32 %v2233_v12, %v2217_v59  ;;  %v2472_v59 = vstv %s7776_s19  ;;  %s7892_s19 = sld [smem:[#allocation9 + $0x14]] }
 0x368   : > { %2628 = vrot.lane.b32.xlu0 %v2608_v8, %s9328_s10  ;;  %v2239_v9 = vadd.f32 %v2235_v3, %v2218_v42 }
 0x369   : > { %2630 = vrot.lane.b32.xlu1 %v2614_v38, %s9328_s10 }
 0x36a   : > { %v2254_v56 = vpop.permute.xlu0 %2253 }
 0x36b   : > { %v2259_v36 = vadd.f32 %v2254_v56, %v2238_v61  ;;  %v2256_v7 = vpop.permute.xlu1 %2255  ;;  %v2473_v61 = vmul.f32 %v7817_v26, %v2472_v59  ;;  %v2450_v56 = vstv %s7800_s15  ;;  %s7897_s15 = sld [smem:[#allocation9 + $0x16]] }
 0x36c   : > { %v2260_v45 = vadd.f32 %v2256_v7, %v2239_v9  ;;  %2635 = vrot.lane.b32.xlu0 %v2613_v2, %s9329_s11  ;;  %v2461_v2 = vmul.f32 %v7782_v16, %v2460_v32  ;;  %v2458_v9 = vmul.f32 %v2456_v39, %v7787_v30  ;;  %v2478_v7 = vstv %s7804_s18  ;;  %s7900_s18 = sld [smem:[#allocation9 + $0x17]] }
 0x36d   : > { %2261 = vst.msk [vmem:[#allocation2 + $0x10] sm:$0xff] %vm324_vm1, %v2259_v36  ;;  %2637 = vrot.lane.b32.xlu1 %v2608_v8, %s9329_s11  ;;  %v2444_v8 = vstv %s7774_s4  ;;  %s7889_s4 = sld [smem:[#allocation10 + $0x4]] }
 0x36e   : > { %2262 = vst.msk [vmem:[#allocation2 + $0x18] sm:$0xff] %vm324_vm1, %v2260_v45  ;;  %v2312_v18 = vpop.permute.xlu0 %2311  ;;  %v2445_v29 = vmul.f32 %v7817_v26, %v2444_v8  ;;  %v2462_v45 = vmul.f32 %v7790_v10, %v2460_v32 }
 0x36f   : > { %v2314_v31 = vpop.permute.xlu1 %2313  ;;  %v2317_v17 = vadd.f32 %v2312_v18, %v7696_v35 }
 0x370   : > { %2639 = vrot.lane.b32.xlu0 %v2614_v38, %s9329_s11  ;;  %v2318_v46 = vadd.f32 %v2314_v31, %v7709_v51  ;;  %v7779_v51 = vld [vmem:[%s6456_s28] sm:$0xff]  ;;  %v7826_v38 = vld [vmem:[%s6456_s28 + $0x38] sm:$0xff]  ;;  %s7841_s28 = sld [smem:[#allocation10 + $0x2]] }
 0x371   : > { %v2429_v41 = vmul.f32 %v2428_v48, %v7779_v51  ;;  %v2457_v43 = vmul.f32 %v2456_v39, %v7779_v51  ;;  %v2446_v12 = vmul.f32 %v7826_v38, %v2444_v8  ;;  %v2518_v48 = vstv %s7835_s30  ;;  %s5896_s30 = sld [smem:[#allocation7 + $0x1d]] }
 0x372   : > { %v2333_v50 = vpop.permute.xlu0 %2332  ;;  %v2519_v13 = vmul.f32 %v7782_v16, %v2518_v48 }
 0x373   : > { %v2335_v21 = vpop.permute.xlu1 %2334  ;;  %v2338_v14 = vadd.f32 %v2333_v50, %v2317_v17  ;;  %v2435_v22 = vadd.f32 %v2433_v54, %v2429_v41  ;;  %v2463_v4 = vadd.f32 %v2461_v2, %v2457_v43  ;;  %v2448_v36 = vadd.f32 %v2446_v12, %v2442_v53 }
 0x374   : > { %v2339_v27 = vadd.f32 %v2335_v21, %v2318_v46  ;;  %v2468_v50 = vmul.f32 %v7808_v5, %v2466_v24  ;;  %v2485_v17 = vstv %s7794_s17  ;;  %v2531_v24 = vmul.f32 %v7817_v26, %v2530_v44  ;;  %s7895_s17 = sld [smem:[#allocation9 + $0x15]] }
 0x375   : > { %v2441_v19 = vadd.f32 %v2439_v52, %v2435_v22  ;;  %v2469_v42 = vadd.f32 %v2467_v63, %v2463_v4  ;;  %v2452_v21 = vadd.f32 %v2450_v56, %v2448_v36  ;;  %v2524_v22 = vstv %s7849_s26  ;;  %s5905_s26 = sld [smem:[#allocation7 + $0x38]] }
 0x376   : > { %v2354_v34 = vpop.permute.xlu0 %2353  ;;  %v2507_v54 = vstv %s7841_s28  ;;  %v2525_v8 = vmul.f32 %v7797_v1, %v2524_v22  ;;  %v2520_v4 = vmul.f32 %v7790_v10, %v2518_v48  ;;  %v2526_v53 = vmul.f32 %v7808_v5, %v2524_v22  ;;  %s5902_s28 = sld [smem:[#allocation7 + $0x37]] }
 0x377   : > { %v2356_v62 = vpop.permute.xlu1 %2355  ;;  %v2359_v60 = vadd.f32 %v2354_v34, %v2338_v14  ;;  %v2447_v3 = vadd.f32 %v2445_v29, %v2441_v19  ;;  %v2475_v31 = vadd.f32 %v2473_v61, %v2469_v42  ;;  %v2464_v34 = vadd.f32 %v2462_v45, %v2458_v9  ;;  %2454 = vst.msk [vmem:[#allocation3 + $0x8] sm:$0xff] %vm324_vm1, %v2452_v21 }
 0x378   : > { %v2360_v55 = vadd.f32 %v2356_v62, %v2339_v27  ;;  %v2474_v62 = vmul.f32 %v7826_v38, %v2472_v59  ;;  %v2489_v14 = vstv %s7812_s20  ;;  %v2536_v19 = vstv %s7865_s12  ;;  %s7912_s20 = sld [smem:[#allocation10 + $0x5]]  ;;  %s5885_s12 = sld [smem:[#allocation7 + $0x4]] }
 0x379   : > { %v2451_v18 = vadd.f32 %v2450_v56, %v2447_v3  ;;  %v2479_v46 = vadd.f32 %v2478_v7, %v2475_v31  ;;  %v2470_v27 = vadd.f32 %v2468_v50, %v2464_v34  ;;  %v2532_v59 = vmul.f32 %v7826_v38, %v2530_v44 }
 0x37a   : > { %v2368_v47 = vpop.permute.xlu0 %2367  ;;  %v2543_v42 = vstv %s7872_s14  ;;  %v2547_v56 = vstv %s7875_s2  ;;  %v2553_v36 = vstv %s7877_s1  ;;  %v2559_v31 = vstv %s7883_s3  ;;  %s5914_s14 = sld [smem:[#allocation7 + $0x53]]  ;;  %s5886_s2 = sld [smem:[#allocation7 + $0x7]] }
 0x37b   : > { %v2370_v37 = vpop.permute.xlu1 %2369  ;;  %v2373_v0 = vadd.f32 %v2368_v47, %v2359_v60  ;;  %2453 = vst.msk [vmem:[#allocation3] sm:$0xff] %vm324_vm1, %v2451_v18  ;;  %v2486_v47 = vmul.f32 %v2485_v17, %v7779_v51  ;;  %v2490_v60 = vmul.f32 %v7782_v16, %v2489_v14  ;;  %2482 = vst.msk [vmem:[#allocation3 + $0x10] sm:$0xff] %vm324_vm1, %v2479_v46  ;;  %s5888_s1 = sld [smem:[#allocation7 + $0x5]]  ;;  %s5889_s3 = sld [smem:[#allocation7 + $0x8]] }
 0x37c   : > { %v2374_v28 = vadd.f32 %v2370_v37, %v2360_v55  ;;  %v2495_v37 = vstv %s7814_s5  ;;  %v2544_v9 = vmul.f32 %v2543_v42, %v7779_v51  ;;  %v2548_v45 = vmul.f32 %v7782_v16, %v2547_v56  ;;  %s5884_s5 = sld [smem:[#allocation7 + $0x1]] }
 0x37d   : > { %v2496_v55 = vmul.f32 %v7797_v1, %v2495_v37  ;;  %v2554_v18 = vmul.f32 %v7797_v1, %v2553_v36  ;;  %v2560_v34 = vmul.f32 %v7817_v26, %v2559_v31  ;;  %v2549_v46 = vmul.f32 %v7790_v10, %v2547_v56 }
 0x37e   : > { %v2389_v6 = vpop.permute.xlu0 %2388  ;;  %v2550_v21 = vadd.f32 %v2548_v45, %v2544_v9  ;;  %v2905_v9 = vstv %s5896_s30  ;;  %s5913_s30 = sld [smem:[#allocation7 + $0x58]] }
 0x37f   : > { %v2391_v49 = vpop.permute.xlu1 %2390  ;;  %v2394_v57 = vadd.f32 %v2389_v6, %v2373_v0  ;;  %v2501_v6 = vstv %s7822_s9  ;;  %v2487_v0 = vmul.f32 %v2485_v17, %v7787_v30  ;;  %v2545_v17 = vmul.f32 %v2543_v42, %v7787_v30  ;;  %s5887_s9 = sld [smem:[#allocation7 + $0x2]] }
 0x380   : > { %v2395_v25 = vadd.f32 %v2391_v49, %v2374_v28  ;;  %v2491_v49 = vmul.f32 %v7790_v10, %v2489_v14  ;;  %v2476_v28 = vadd.f32 %v2474_v62, %v2470_v27  ;;  %v2565_v62 = vstv %s7889_s4  ;;  %s5894_s4 = sld [smem:[#allocation7 + $0x1f]] }
 0x381   : > { %v2555_v14 = vmul.f32 %v7808_v5, %v2553_v36  ;;  %v2572_v27 = vstv %s7892_s19  ;;  %s5895_s19 = sld [smem:[#allocation7 + $0x22]] }
 0x382   : > { %v2410_v11 = vpop.permute.xlu0 %2409  ;;  %v2480_v58 = vadd.f32 %v2478_v7, %v2476_v28 }
 0x383   : > { %v2415_v33 = vadd.f32 %v2410_v11, %v2394_v57  ;;  %v2412_v20 = vpop.permute.xlu1 %2411  ;;  %v2492_v57 = vadd.f32 %v2490_v60, %v2486_v47  ;;  %v2497_v11 = vmul.f32 %v7808_v5, %v2495_v37  ;;  %v2556_v47 = vadd.f32 %v2554_v18, %v2550_v21 }
 0x384   : > { %v2416_v35 = vadd.f32 %v2412_v20, %v2395_v25  ;;  %v2502_v25 = vmul.f32 %v7817_v26, %v2501_v6  ;;  %v2503_v20 = vmul.f32 %v7826_v38, %v2501_v6  ;;  %2483 = vst.msk [vmem:[#allocation3 + $0x18] sm:$0xff] %vm324_vm1, %v2480_v58  ;;  %v2561_v37 = vmul.f32 %v7826_v38, %v2559_v31 }
 0x385   : > { %2417 = vst.msk [vmem:[#allocation2 + $0x20] sm:$0xff] %vm324_vm1, %v2415_v33  ;;  %v2493_v33 = vadd.f32 %v2491_v49, %v2487_v0  ;;  %v2498_v41 = vadd.f32 %v2496_v55, %v2492_v57  ;;  %v2551_v60 = vadd.f32 %v2549_v46, %v2545_v17  ;;  %v2573_v55 = vmul.f32 %v2572_v27, %v7779_v51 }
 0x386   : > { %2418 = vst.msk [vmem:[#allocation2 + $0x28] sm:$0xff] %vm324_vm1, %v2416_v35  ;;  %v2514_v35 = vstv %s7833_s16  ;;  %v2576_v6 = vstv %s7895_s17  ;;  %v2582_v0 = vstv %s7897_s15  ;;  %v2562_v49 = vadd.f32 %v2560_v34, %v2556_v47  ;;  %s5893_s16 = sld [smem:[#allocation7 + $0x1c]]  ;;  %s5897_s17 = sld [smem:[#allocation7 + $0x20]] }
 0x387   : > { %v2499_v39 = vadd.f32 %v2497_v11, %v2493_v33  ;;  %v2515_v32 = vmul.f32 %v2514_v35, %v7779_v51  ;;  %v2504_v40 = vadd.f32 %v2502_v25, %v2498_v41  ;;  %v2516_v29 = vmul.f32 %v2514_v35, %v7787_v30  ;;  %s5898_s15 = sld [smem:[#allocation7 + $0x23]] }
 0x388   : > { %v2577_v28 = vmul.f32 %v7782_v16, %v2576_v6  ;;  %v2583_v57 = vmul.f32 %v7797_v1, %v2582_v0  ;;  %v2588_v25 = vstv %s7900_s18  ;;  %v2557_v11 = vadd.f32 %v2555_v14, %v2551_v60  ;;  %s5903_s18 = sld [smem:[#allocation7 + $0x3a]] }
 0x389   : > { %v2505_v15 = vadd.f32 %v2503_v20, %v2499_v39  ;;  %v2508_v52 = vadd.f32 %v2507_v54, %v2504_v40  ;;  %v2521_v43 = vadd.f32 %v2519_v13, %v2515_v32  ;;  %v2522_v12 = vadd.f32 %v2520_v4, %v2516_v29 }
 0x38a   : > { %v2566_v33 = vadd.f32 %v2565_v62, %v2562_v49  ;;  %v2579_v20 = vadd.f32 %v2577_v28, %v2573_v55  ;;  %v2589_v35 = vmul.f32 %v7817_v26, %v2588_v25  ;;  %v2563_v48 = vadd.f32 %v2561_v37, %v2557_v11 }
 0x38b   : > { %v2509_v2 = vadd.f32 %v2507_v54, %v2505_v15  ;;  %2511 = vst.msk [vmem:[#allocation3 + $0x20] sm:$0xff] %vm324_vm1, %v2508_v52  ;;  %v2527_v23 = vadd.f32 %v2525_v8, %v2521_v43  ;;  %v2528_v61 = vadd.f32 %v2526_v53, %v2522_v12  ;;  %v2574_v58 = vmul.f32 %v2572_v27, %v7787_v30 }
 0x38c   : > { %v2578_v41 = vmul.f32 %v7790_v10, %v2576_v6  ;;  %v2584_v51 = vmul.f32 %v7808_v5, %v2582_v0  ;;  %2569 = vst.msk [vmem:[#allocation3 + $0x40] sm:$0xff] %vm324_vm1, %v2566_v33  ;;  %v2585_v54 = vadd.f32 %v2583_v57, %v2579_v20  ;;  %v2567_v39 = vadd.f32 %v2565_v62, %v2563_v48 }
 0x38d   : > { %2512 = vst.msk [vmem:[#allocation3 + $0x28] sm:$0xff] %vm324_vm1, %v2509_v2  ;;  %v2533_v63 = vadd.f32 %v2531_v24, %v2527_v23  ;;  %v2534_v7 = vadd.f32 %v2532_v59, %v2528_v61  ;;  %v2594_v16 = vstv %s7912_s20  ;;  %v2590_v1 = vmul.f32 %v7826_v38, %v2588_v25  ;;  %s5904_s20 = sld [smem:[#allocation7 + $0x3d]] }
 0x38e   : > { %v2580_v32 = vadd.f32 %v2578_v41, %v2574_v58  ;;  %v2591_v40 = vadd.f32 %v2589_v35, %v2585_v54  ;;  %2570 = vst.msk [vmem:[#allocation3 + $0x48] sm:$0xff] %vm324_vm1, %v2567_v39  ;;  %v2693_v38 = vstv %s5884_s5  ;;  %v2749_v53 = vstv %s5887_s9  ;;  %s5906_s5 = sld [smem:[#allocation7 + $0x3b]]  ;;  %s5907_s9 = sld [smem:[#allocation7 + $0x3e]] }
 0x38f   : > { %v2537_v3 = vadd.f32 %v2536_v19, %v2533_v63  ;;  %v2538_v50 = vadd.f32 %v2536_v19, %v2534_v7  ;;  %v3005_v7 = vstv %s5902_s28  ;;  %v3061_v31 = vstv %s5905_s26  ;;  %s5915_s28 = sld [smem:[#allocation7 + $0x56]]  ;;  %s5916_s26 = sld [smem:[#allocation7 + $0x59]] }
 0x390   : > { %v2586_v13 = vadd.f32 %v2584_v51, %v2580_v32  ;;  %v2595_v26 = vadd.f32 %v2594_v16, %v2591_v40  ;;  %v3161_v62 = vstv %s5911_s13  ;;  %v2707_v46 = vstv %s5885_s12  ;;  %s5921_s13 = sld [smem:[#allocation7 + $0x70]]  ;;  %s5920_s12 = sld [smem:[#allocation7 + $0x6d]] }
 0x391   : > { %2540 = vst.msk [vmem:[#allocation3 + $0x30] sm:$0xff] %vm324_vm1, %v2537_v3  ;;  %2541 = vst.msk [vmem:[#allocation3 + $0x38] sm:$0xff] %vm324_vm1, %v2538_v50  ;;  %v2849_v3 = vstv %s5893_s16  ;;  %v3217_v27 = vstv %s5914_s14  ;;  %v2728_v0 = vstv %s5886_s2  ;;  %v2763_v57 = vstv %s5888_s1  ;;  %s5912_s16 = sld [smem:[#allocation7 + $0x55]]  ;;  %s5922_s14 = sld [smem:[#allocation7 + $0x73]] }
 0x392   : > { %v2592_v15 = vadd.f32 %v2590_v1, %v2586_v13  ;;  %2598 = vst.msk [vmem:[#allocation3 + $0x50] sm:$0xff] %vm324_vm1, %v2595_v26  ;;  %v2784_v40 = vstv %s5889_s3  ;;  %s5924_s2 = sld [smem:[#allocation7 + $0x71]]  ;;  %s5923_s1 = sld [smem:[#allocation7 + $0x6e]] }
 0x393   : > { %s5925_s3 = sld [smem:[#allocation7 + $0x74]] }
 0x394   : > { %v2596_v30 = vadd.f32 %v2594_v16, %v2592_v15 }
 0x396   : > { %2599 = vst.msk [vmem:[#allocation3 + $0x58] sm:$0xff] %vm324_vm1, %v2596_v30 }
 0x3d2   : > { %v2618_v10 = vpop.permute.xlu0 %2617 }
 0x3d3   : > { %v2620_v5 = vpop.permute.xlu1 %2619 }
 0x3d6   : > { %v2622_v22 = vpop.permute.xlu0 %2621 }
 0x3d7   : > { %v2627_v52 = vpop.permute.xlu1 %2626 }
 0x3d8   : > { %v2644_v8 = vsel %vm384_vm2, %v2618_v10, %v2627_v52 }
 0x3da   : > { %v2629_v43 = vpop.permute.xlu0 %2628 }
 0x3db   : > { %v2631_v2 = vpop.permute.xlu1 %2630  ;;  %v2645_v23 = vsel %vm384_vm2, %v2620_v5, %v2629_v43  ;;  %v2863_v43 = vstv %s5894_s4  ;;  %s5930_s4 = sld [smem:[#allocation7 + $0x8b]] }
 0x3dc   : > { %v2646_v17 = vsel %vm384_vm2, %v2622_v22, %v2631_v2 }
 0x3de   : > { %v2636_v44 = vpop.permute.xlu0 %2635 }
 0x3df   : > { %v7937_v24 = vsel %vm388_vm3, %v2644_v8, %v2636_v44  ;;  %v2638_v19 = vpop.permute.xlu1 %2637 }
 0x3e0   : > { %v7940_v29 = vsel %vm388_vm3, %v2645_v23, %v2638_v19  ;;  %v2694_v4 = vmul.f32 %v2693_v38, %v7937_v24  ;;  %v2750_v12 = vmul.f32 %v2749_v53, %v7937_v24  ;;  %v2850_v42 = vmul.f32 %v2849_v3, %v7937_v24 }
 0x3e1   : > { %v2695_v63 = vmul.f32 %v2693_v38, %v7940_v29  ;;  %v2751_v59 = vmul.f32 %v2749_v53, %v7940_v29  ;;  %v2851_v61 = vmul.f32 %v2849_v3, %v7940_v29  ;;  %v2906_v56 = vmul.f32 %v2905_v9, %v7937_v24 }
 0x3e2   : > { %2698 = vrot.lane.b32.xlu1 %v2694_v4, %s6286_s29  ;;  %v2907_v36 = vmul.f32 %v2905_v9, %v7940_v29  ;;  %v3006_v45 = vmul.f32 %v3005_v7, %v7937_v24  ;;  %v3007_v18 = vmul.f32 %v3005_v7, %v7940_v29  ;;  %v2640_v50 = vpop.permute.xlu0 %2639  ;;  %v3062_v21 = vmul.f32 %v3061_v31, %v7937_v24 }
 0x3e3   : > { %2700 = vrot.lane.b32.xlu0 %v2695_v63, %s6286_s29  ;;  %v3063_v34 = vmul.f32 %v3061_v31, %v7940_v29  ;;  %v7967_v47 = vsel %vm388_vm3, %v2646_v17, %v2640_v50  ;;  %v3162_v14 = vmul.f32 %v3161_v62, %v7937_v24  ;;  %v3163_v37 = vmul.f32 %v3161_v62, %v7940_v29 }
 0x3e4   : > { %v2708_v60 = vmul.f32 %v2707_v46, %v7937_v24  ;;  %v2709_v55 = vmul.f32 %v2707_v46, %v7940_v29  ;;  %v2710_v6 = vmul.f32 %v2707_v46, %v7967_v47  ;;  %v3218_v49 = vmul.f32 %v3217_v27, %v7937_v24 }
 0x3e5   : > { %v3219_v28 = vmul.f32 %v3217_v27, %v7940_v29  ;;  %v2729_v33 = vmul.f32 %v2728_v0, %v7937_v24  ;;  %v2730_v20 = vmul.f32 %v2728_v0, %v7940_v29  ;;  %v2731_v48 = vmul.f32 %v2728_v0, %v7967_v47 }
 0x3e6   : > { %2754 = vrot.lane.b32.xlu1 %v2750_v12, %s9327_s0  ;;  %v2714_v25 = vrot.slane %v2708_v60, 1  ;;  %v2715_v11 = vrot.slane %v2709_v55, 1  ;;  %v2717_v35 = vrot.slane %v2710_v6, 1  ;;  %v2764_v58 = vmul.f32 %v2763_v57, %v7937_v24 }
 0x3e7   : > { %2756 = vrot.lane.b32.xlu0 %v2751_v59, %s9327_s0  ;;  %v2765_v41 = vmul.f32 %v2763_v57, %v7940_v29  ;;  %v2735_v54 = vrot.slane %v2729_v33, 2  ;;  %v2736_v39 = vrot.slane %v2730_v20, 2  ;;  %v2738_v32 = vrot.slane %v2731_v48, 2 }
 0x3e8   : > { %v2716_v51 = vsel %vm408_vm4, %v2714_v25, %v2715_v11  ;;  %v2718_v16 = vsel %vm408_vm4, %v2715_v11, %v2717_v35  ;;  %v2766_v1 = vmul.f32 %v2763_v57, %v7967_v47  ;;  %v2770_v13 = vrot.slane %v2764_v58, 1 }
 0x3e9   : > { %v2771_v26 = vrot.slane %v2765_v41, 1  ;;  %v2737_v15 = vsel %vm426_vm5, %v2735_v54, %v2736_v39  ;;  %v2785_v30 = vmul.f32 %v2784_v40, %v7937_v24  ;;  %v2786_v10 = vmul.f32 %v2784_v40, %v7940_v29 }
 0x3ea   : > { %2854 = vrot.lane.b32.xlu1 %v2850_v42, %s6286_s29  ;;  %v2739_v5 = vsel %vm426_vm5, %v2736_v39, %v2738_v32  ;;  %v2773_v22 = vrot.slane %v2766_v1, 1  ;;  %v2787_v52 = vmul.f32 %v2784_v40, %v7967_v47  ;;  %v2884_v38 = vstv %s5895_s19  ;;  %s5929_s19 = sld [smem:[#allocation7 + $0x88]] }
 0x3eb   : > { %2856 = vrot.lane.b32.xlu0 %v2851_v61, %s6286_s29  ;;  %v2772_v2 = vsel %vm408_vm4, %v2770_v13, %v2771_v26  ;;  %v2791_v8 = vrot.slane %v2785_v30, 2  ;;  %v2792_v44 = vrot.slane %v2786_v10, 2  ;;  %v2864_v23 = vmul.f32 %v2863_v43, %v7937_v24 }
 0x3ec   : > { %v2865_v19 = vmul.f32 %v2863_v43, %v7940_v29  ;;  %v2774_v4 = vsel %vm408_vm4, %v2771_v26, %v2773_v22  ;;  %v2794_v63 = vrot.slane %v2787_v52, 2  ;;  %v2866_v53 = vmul.f32 %v2863_v43, %v7967_v47 }
 0x3ed   : > { %v2885_v12 = vmul.f32 %v2884_v38, %v7937_v24  ;;  %v2793_v59 = vsel %vm426_vm5, %v2791_v8, %v2792_v44  ;;  %v2870_v3 = vrot.slane %v2864_v23, 1  ;;  %v2886_v61 = vmul.f32 %v2884_v38, %v7940_v29 }
 0x3ee   : > { %2910 = vrot.lane.b32.xlu1 %v2906_v56, %s9327_s0  ;;  %v2871_v42 = vrot.slane %v2865_v19, 1  ;;  %v2795_v9 = vsel %vm426_vm5, %v2792_v44, %v2794_v63  ;;  %v2873_v56 = vrot.slane %v2866_v53, 1  ;;  %v2919_v7 = vstv %s5897_s17  ;;  %s5931_s17 = sld [smem:[#allocation7 + $0x8e]] }
 0x3ef   : > { %2912 = vrot.lane.b32.xlu0 %v2907_v36, %s9327_s0  ;;  %v2887_v36 = vmul.f32 %v2884_v38, %v7967_v47  ;;  %v2892_v50 = vrot.slane %v2886_v61, 2  ;;  %v2922_v46 = vmul.f32 %v2919_v7, %v7967_v47  ;;  %v3040_v25 = vstv %s5904_s20  ;;  %s8141_s20 = sld [smem:[#allocation7 + $0x89]] }
 0x3f0   : > { %v2872_v31 = vsel %vm408_vm4, %v2870_v3, %v2871_v42  ;;  %v2874_v62 = vsel %vm408_vm4, %v2871_v42, %v2873_v56  ;;  %v3042_v32 = vmul.f32 %v3040_v25, %v7940_v29  ;;  %v3043_v13 = vmul.f32 %v3040_v25, %v7967_v47 }
 0x3f1   : > { %v2894_v17 = vrot.slane %v2887_v36, 2  ;;  %v2929_v0 = vrot.slane %v2922_v46, 1  ;;  %v3075_v26 = vstv %s5906_s5  ;;  %v3096_v30 = vstv %s5907_s9  ;;  %s5934_s5 = sld [smem:[#allocation7 + $0x8f]]  ;;  %s8145_s9 = sld [smem:[#allocation7]] }
 0x3f2   : > { %3010 = vrot.lane.b32.xlu1 %v3006_v45, %s6286_s29  ;;  %v2891_v45 = vrot.slane %v2885_v12, 2  ;;  %v3076_v22 = vmul.f32 %v3075_v26, %v7937_v24  ;;  %v3077_v52 = vmul.f32 %v3075_v26, %v7940_v29  ;;  %v3078_v38 = vmul.f32 %v3075_v26, %v7967_v47 }
 0x3f3   : > { %3012 = vrot.lane.b32.xlu0 %v3007_v18, %s6286_s29  ;;  %v2940_v18 = vstv %s5898_s15  ;;  %v2895_v6 = vsel %vm426_vm5, %v2892_v50, %v2894_v17  ;;  %v3097_v8 = vmul.f32 %v3096_v30, %v7937_v24  ;;  %v3099_v12 = vmul.f32 %v3096_v30, %v7967_v47  ;;  %s5933_s15 = sld [smem:[#allocation7 + $0x8c]] }
 0x3f4   : > { %v2942_v55 = vmul.f32 %v2940_v18, %v7940_v29  ;;  %v3082_v23 = vrot.slane %v3076_v22, 1  ;;  %v3083_v19 = vrot.slane %v3077_v52, 1  ;;  %v3085_v53 = vrot.slane %v3078_v38, 1 }
 0x3f5   : > { %v3103_v3 = vrot.slane %v3097_v8, 2  ;;  %v3196_v42 = vstv %s5913_s30  ;;  %v3317_v26 = vstv %s5920_s12  ;;  %v3352_v22 = vstv %s5922_s14  ;;  %s8187_s30 = sld [smem:[#allocation7 + $0x1e]]  ;;  %s5901_s14 = sld [smem:[#allocation7 + $0x3c]] }
 0x3f6   : > { %3066 = vrot.lane.b32.xlu1 %v3062_v21, %s9327_s0  ;;  %v2920_v21 = vmul.f32 %v2919_v7, %v7937_v24  ;;  %v2948_v33 = vrot.slane %v2942_v55, 2  ;;  %v3084_v61 = vsel %vm408_vm4, %v3082_v23, %v3083_v19  ;;  %v3318_v52 = vmul.f32 %v3317_v26, %v7937_v24  ;;  %s8243_s12 = sld [smem:[#allocation7 + $0x36]] }
 0x3f7   : > { %3068 = vrot.lane.b32.xlu0 %v3063_v34, %s9327_s0  ;;  %v2921_v34 = vmul.f32 %v2919_v7, %v7940_v29  ;;  %v3086_v7 = vsel %vm408_vm4, %v3083_v19, %v3085_v53  ;;  %v3353_v8 = vmul.f32 %v3352_v22, %v7937_v24  ;;  %v3355_v19 = vmul.f32 %v3352_v22, %v7967_v47 }
 0x3f8   : > { %v2926_v27 = vrot.slane %v2920_v21, 1 }
 0x3f9   : > { %v2927_v60 = vrot.slane %v2921_v34, 1 }
 0x3fa   : > { %3166 = vrot.lane.b32.xlu1 %v3162_v14, %s6286_s29  ;;  %v2941_v14 = vmul.f32 %v2940_v18, %v7937_v24 }
 0x3fb   : > { %3168 = vrot.lane.b32.xlu0 %v3163_v37, %s6286_s29  ;;  %v2893_v37 = vsel %vm426_vm5, %v2891_v45, %v2892_v50  ;;  %v2928_v11 = vsel %vm408_vm4, %v2926_v27, %v2927_v60  ;;  %v2930_v48 = vsel %vm408_vm4, %v2927_v60, %v2929_v0  ;;  %v3106_v45 = vrot.slane %v3099_v12, 2 }
 0x3fc   : > { %v2947_v57 = vrot.slane %v2941_v14, 2  ;;  %v3199_v14 = vmul.f32 %v3196_v42, %v7967_v47  ;;  %v3252_v60 = vstv %s5916_s26  ;;  %s5892_s26 = sld [smem:[#allocation7 + $0x21]] }
 0x3fe   : > { %3222 = vrot.lane.b32.xlu1 %v3218_v49, %s9327_s0  ;;  %v2943_v49 = vmul.f32 %v2940_v18, %v7967_v47  ;;  %v2949_v54 = vsel %vm426_vm5, %v2947_v57, %v2948_v33  ;;  %v3206_v57 = vrot.slane %v3199_v14, 2 }
 0x3ff   : > { %3224 = vrot.lane.b32.xlu0 %v3219_v28, %s9327_s0  ;;  %v3019_v28 = vstv %s5903_s18  ;;  %s5882_s18 = sld [smem:[#allocation7 + $0x3]] }
 0x400   : > { %v3020_v20 = vmul.f32 %v3019_v28, %v7937_v24  ;;  %v3021_v35 = vmul.f32 %v3019_v28, %v7940_v29  ;;  %v2950_v58 = vrot.slane %v2943_v49, 2  ;;  %v3022_v41 = vmul.f32 %v3019_v28, %v7967_v47 }
 0x402   : > { %2719 = vrot.lane.b32.xlu1 %v2716_v51, %s6286_s29  ;;  %v3041_v51 = vmul.f32 %v3040_v25, %v7937_v24  ;;  %v3026_v39 = vrot.slane %v3020_v20, 1  ;;  %v2951_v1 = vsel %vm426_vm5, %v2948_v33, %v2950_v58  ;;  %v3029_v40 = vrot.slane %v3022_v41, 1 }
 0x403   : > { %2721 = vrot.lane.b32.xlu0 %v2718_v16, %s6286_s29  ;;  %v3027_v16 = vrot.slane %v3021_v35, 1 }
 0x405   : > { %v3028_v10 = vsel %vm408_vm4, %v3026_v39, %v3027_v16  ;;  %v3030_v43 = vsel %vm408_vm4, %v3027_v16, %v3029_v40  ;;  %v3331_v40 = vstv %s5921_s13  ;;  %s8231_s13 = sld [smem:[#allocation7 + $0x39]] }
 0x406   : > { %2740 = vrot.lane.b32.xlu1 %v2737_v15, %s6286_s29  ;;  %v3047_v15 = vrot.slane %v3041_v51, 2  ;;  %v3255_v51 = vmul.f32 %v3252_v60, %v7967_v47 }
 0x407   : > { %2742 = vrot.lane.b32.xlu0 %v2739_v5, %s6286_s29  ;;  %v3048_v5 = vrot.slane %v3042_v32, 2 }
 0x409   : > { %v3049_v44 = vsel %vm426_vm5, %v3047_v15, %v3048_v5  ;;  %v3332_v15 = vmul.f32 %v3331_v40, %v7937_v24 }
 0x40a   : > { %2775 = vrot.lane.b32.xlu1 %v2772_v2, %s9327_s0  ;;  %v3050_v2 = vrot.slane %v3043_v13, 2 }
 0x40b   : > { %2777 = vrot.lane.b32.xlu0 %v2774_v4, %s9327_s0  ;;  %v3098_v4 = vmul.f32 %v3096_v30, %v7940_v29  ;;  %v3333_v30 = vmul.f32 %v3331_v40, %v7940_v29 }
 0x40c   : > { %v3051_v63 = vsel %vm426_vm5, %v3048_v5, %v3050_v2  ;;  %v3334_v5 = vmul.f32 %v3331_v40, %v7967_v47  ;;  %v3338_v2 = vrot.slane %v3332_v15, 1 }
 0x40d   : > { %v3339_v38 = vrot.slane %v3333_v30, 1 }
 0x40e   : > { %2796 = vrot.lane.b32.xlu1 %v2793_v59, %s9327_s0  ;;  %v3175_v59 = vstv %s5912_s16  ;;  %v3341_v23 = vrot.slane %v3334_v5, 1  ;;  %s5883_s16 = sld [smem:[#allocation7 + $0x6]] }
 0x40f   : > { %2798 = vrot.lane.b32.xlu0 %v2795_v9, %s9327_s0  ;;  %v3104_v9 = vrot.slane %v3098_v4, 2  ;;  %v3176_v56 = vmul.f32 %v3175_v59, %v7937_v24  ;;  %v3177_v36 = vmul.f32 %v3175_v59, %v7940_v29  ;;  %v3178_v18 = vmul.f32 %v3175_v59, %v7967_v47 }
 0x410   : > { %v3340_v4 = vsel %vm408_vm4, %v3338_v2, %v3339_v38  ;;  %v3342_v12 = vsel %vm408_vm4, %v3339_v38, %v3341_v23  ;;  %v3362_v59 = vrot.slane %v3355_v19, 2 }
 0x411   : > { %v3105_v50 = vsel %vm426_vm5, %v3103_v3, %v3104_v9  ;;  %v3182_v21 = vrot.slane %v3176_v56, 1  ;;  %v3183_v34 = vrot.slane %v3177_v36, 1  ;;  %v3107_v17 = vsel %vm426_vm5, %v3104_v9, %v3106_v45 }
 0x412   : > { %2875 = vrot.lane.b32.xlu1 %v2872_v31, %s6286_s29  ;;  %v3197_v31 = vmul.f32 %v3196_v42, %v7937_v24  ;;  %v3185_v46 = vrot.slane %v3178_v18, 1  ;;  %v3387_v3 = vstv %s5924_s2  ;;  %v3408_v45 = vstv %s5925_s3  ;;  %s5909_s2 = sld [smem:[#allocation7 + $0x54]]  ;;  %s5910_s3 = sld [smem:[#allocation7 + $0x57]] }
 0x413   : > { %2877 = vrot.lane.b32.xlu0 %v2874_v62, %s6286_s29  ;;  %v3198_v62 = vmul.f32 %v3196_v42, %v7940_v29  ;;  %v3184_v55 = vsel %vm408_vm4, %v3182_v21, %v3183_v34  ;;  %v3388_v9 = vmul.f32 %v3387_v3, %v7937_v24  ;;  %v3389_v56 = vmul.f32 %v3387_v3, %v7940_v29 }
 0x414   : > { %v3203_v27 = vrot.slane %v3197_v31, 2  ;;  %v3186_v28 = vsel %vm408_vm4, %v3183_v34, %v3185_v46  ;;  %v3409_v34 = vmul.f32 %v3408_v45, %v7937_v24  ;;  %v3411_v46 = vmul.f32 %v3408_v45, %v7967_v47 }
 0x415   : > { %v3395_v21 = vrot.slane %v3389_v56, 1 }
 0x416   : > { %2896 = vrot.lane.b32.xlu1 %v2893_v37, %s6286_s29  ;;  %v3231_v37 = vstv %s5915_s28  ;;  %s8205_s28 = sld [smem:[#allocation7 + $0x1b]] }
 0x417   : > { %2898 = vrot.lane.b32.xlu0 %v2895_v6, %s6286_s29  ;;  %v3204_v6 = vrot.slane %v3198_v62, 2  ;;  %v3232_v0 = vmul.f32 %v3231_v37, %v7937_v24  ;;  %v3233_v49 = vmul.f32 %v3231_v37, %v7940_v29  ;;  %v3234_v25 = vmul.f32 %v3231_v37, %v7967_v47 }
 0x418   : > { %v3410_v62 = vmul.f32 %v3408_v45, %v7940_v29  ;;  %v3415_v37 = vrot.slane %v3409_v34, 2 }
 0x419   : > { %v3205_v33 = vsel %vm426_vm5, %v3203_v27, %v3204_v6  ;;  %v3238_v20 = vrot.slane %v3232_v0, 1  ;;  %v3239_v35 = vrot.slane %v3233_v49, 1  ;;  %v3207_v58 = vsel %vm426_vm5, %v3204_v6, %v3206_v57 }
 0x41a   : > { %2931 = vrot.lane.b32.xlu1 %v2928_v11, %s9327_s0  ;;  %v3253_v11 = vmul.f32 %v3252_v60, %v7937_v24  ;;  %v3241_v41 = vrot.slane %v3234_v25, 1  ;;  %v3416_v27 = vrot.slane %v3410_v62, 2  ;;  %v3487_v6 = vstv %s5930_s4  ;;  %s5918_s4 = sld [smem:[#allocation7 + $0x6f]] }
 0x41b   : > { %2933 = vrot.lane.b32.xlu0 %v2930_v48, %s9327_s0  ;;  %v3254_v48 = vmul.f32 %v3252_v60, %v7940_v29  ;;  %v3473_v57 = vstv %s5929_s19  ;;  %v3488_v25 = vmul.f32 %v3487_v6, %v7937_v24  ;;  %s8295_s19 = sld [smem:[#allocation7 + $0x6c]] }
 0x41c   : > { %v3259_v39 = vrot.slane %v3253_v11, 2  ;;  %v3242_v32 = vsel %vm408_vm4, %v3239_v35, %v3241_v41  ;;  %v3489_v11 = vmul.f32 %v3487_v6, %v7940_v29  ;;  %v3475_v41 = vmul.f32 %v3473_v57, %v7940_v29 }
 0x41d   : > { %v3260_v16 = vrot.slane %v3254_v48, 2 }
 0x41e   : > { %2952 = vrot.lane.b32.xlu1 %v2949_v54, %s9327_s0  ;;  %v3240_v54 = vsel %vm408_vm4, %v3238_v20, %v3239_v35  ;;  %v3490_v20 = vmul.f32 %v3487_v6, %v7967_v47  ;;  %v3508_v35 = vstv %s5931_s17  ;;  %s5919_s17 = sld [smem:[#allocation7 + $0x72]] }
 0x41f   : > { %2954 = vrot.lane.b32.xlu0 %v2951_v1, %s9327_s0  ;;  %v3262_v1 = vrot.slane %v3255_v51, 2  ;;  %v3261_v13 = vsel %vm426_vm5, %v3259_v39, %v3260_v16  ;;  %v3495_v39 = vrot.slane %v3489_v11, 1  ;;  %v3511_v40 = vmul.f32 %v3508_v35, %v7967_v47 }
 0x422   : > { %3031 = vrot.lane.b32.xlu1 %v3028_v10, %s6286_s29  ;;  %v3263_v10 = vsel %vm426_vm5, %v3260_v16, %v3262_v1  ;;  %v3509_v16 = vmul.f32 %v3508_v35, %v7937_v24  ;;  %v3497_v1 = vrot.slane %v3490_v20, 1 }
 0x423   : > { %3033 = vrot.lane.b32.xlu0 %v3030_v43, %s6286_s29  ;;  %v3319_v43 = vmul.f32 %v3317_v26, %v7940_v29 }
 0x424   : > { %v3515_v30 = vrot.slane %v3509_v16, 2  ;;  %v3498_v5 = vsel %vm408_vm4, %v3495_v39, %v3497_v1 }
 0x426   : > { %3052 = vrot.lane.b32.xlu1 %v3049_v44, %s6286_s29  ;;  %v3354_v44 = vmul.f32 %v3352_v22, %v7940_v29  ;;  %v3518_v22 = vrot.slane %v3511_v40, 2 }
 0x427   : > { %3054 = vrot.lane.b32.xlu0 %v3051_v63, %s6286_s29  ;;  %v3359_v63 = vrot.slane %v3353_v8, 2 }
 0x428   : > { %v3360_v53 = vrot.slane %v3354_v44, 2  ;;  %v3529_v44 = vstv %s8141_s20  ;;  %s5928_s20 = sld [smem:[#allocation7 + $0x8d]] }
 0x429   : > { %v3530_v56 = vmul.f32 %v3529_v44, %v7937_v24 }
 0x42a   : > { %3087 = vrot.lane.b32.xlu1 %v3084_v61, %s9327_s0  ;;  %v3361_v42 = vsel %vm426_vm5, %v3359_v63, %v3360_v53  ;;  %v3373_v61 = vstv %s5923_s1  ;;  %v3363_v36 = vsel %vm426_vm5, %v3360_v53, %v3362_v59  ;;  %v3564_v53 = vstv %s5934_s5  ;;  %s8268_s1 = sld [smem:[#allocation7 + $0x51]]  ;;  %s5938_s5 = sld [smem:[#allocation7 + $0xa]] }
 0x42b   : > { %3089 = vrot.lane.b32.xlu0 %v3086_v7, %s9327_s0  ;;  %v3390_v7 = vmul.f32 %v3387_v3, %v7967_v47  ;;  %v3374_v18 = vmul.f32 %v3373_v61, %v7937_v24  ;;  %v3375_v31 = vmul.f32 %v3373_v61, %v7940_v29  ;;  %v2676_v3 = vstv %s5883_s16  ;;  %s5940_s16 = sld [smem:[#allocation7 + $0x10]] }
 0x42c   : > { %v3567_v34 = vmul.f32 %v3564_v53, %v7967_v47  ;;  %v2677_v11 = vmul.f32 %v2676_v3, %v7937_v24 }
 0x42e   : > { %3108 = vrot.lane.b32.xlu1 %v3105_v50, %s9327_s0  ;;  %v3394_v50 = vrot.slane %v3388_v9, 1 }
 0x42f   : > { %3110 = vrot.lane.b32.xlu0 %v3107_v17, %s9327_s0  ;;  %v3397_v17 = vrot.slane %v3390_v7, 1 }
 0x430   : > { %v3396_v14 = vsel %vm408_vm4, %v3394_v50, %v3395_v21  ;;  %v3566_v50 = vmul.f32 %v3564_v53, %v7940_v29 }
 0x431   : > { %v3398_v60 = vsel %vm408_vm4, %v3395_v21, %v3397_v17  ;;  %v2678_v17 = vmul.f32 %v2676_v3, %v7940_v29 }
 0x432   : > { %3187 = vrot.lane.b32.xlu1 %v3184_v55, %s6286_s29  ;;  %v3418_v55 = vrot.slane %v3411_v46, 2 }
 0x433   : > { %3189 = vrot.lane.b32.xlu0 %v3186_v28, %s6286_s29  ;;  %v3417_v28 = vsel %vm426_vm5, %v3415_v37, %v3416_v27 }
 0x436   : > { %3208 = vrot.lane.b32.xlu1 %v3205_v33, %s6286_s29  ;;  %v3419_v33 = vsel %vm426_vm5, %v3416_v27, %v3418_v55 }
 0x437   : > { %3210 = vrot.lane.b32.xlu0 %v3207_v58, %s6286_s29  ;;  %v3474_v58 = vmul.f32 %v3473_v57, %v7937_v24  ;;  %v3586_v57 = vld [vmem:[#allocation2 + $0x10] sm:$0xff] }
 0x438   : > { %v3592_v1 = vrot.slane %v3586_v57, 7 }
 0x43a   : > { %3243 = vrot.lane.b32.xlu1 %v3240_v54, %s9327_s0  ;;  %v3494_v54 = vrot.slane %v3488_v25, 1  ;;  %v2650_v25 = vld [vmem:[#allocation3] sm:$0xff] }
 0x43b   : > { %3245 = vrot.lane.b32.xlu0 %v3242_v32, %s9327_s0  ;;  %v3510_v32 = vmul.f32 %v3508_v35, %v7940_v29  ;;  %v3574_v35 = vrot.slane %v3567_v34, 2 }
 0x43c   : > { %v3496_v15 = vsel %vm408_vm4, %v3494_v54, %v3495_v39  ;;  %v2679_v54 = vmul.f32 %v2676_v3, %v7967_v47 }
 0x43e   : > { %3264 = vrot.lane.b32.xlu1 %v3261_v13, %s9327_s0 }
 0x43f   : > { %3266 = vrot.lane.b32.xlu0 %v3263_v10, %s9327_s0  ;;  %v3516_v10 = vrot.slane %v3510_v32, 2  ;;  %v3589_v32 = vrot.slane %v3586_v57, 1 }
 0x441   : > { %v3517_v8 = vsel %vm426_vm5, %v3515_v30, %v3516_v10 }
 0x442   : > { %3322 = vrot.lane.b32.xlu1 %v3318_v52, %s6286_s29  ;;  %v3543_v52 = vstv %s5933_s15  ;;  %s5927_s15 = sld [smem:[#allocation7 + $0x8a]] }
 0x443   : > { %3324 = vrot.lane.b32.xlu0 %v3319_v43, %s6286_s29  ;;  %v2659_v43 = vstv %s5882_s18  ;;  %v3544_v23 = vmul.f32 %v3543_v52, %v7937_v24  ;;  %v3545_v19 = vmul.f32 %v3543_v52, %v7940_v29  ;;  %v3546_v63 = vmul.f32 %v3543_v52, %v7967_v47  ;;  %s8314_s18 = sld [smem:[#allocation7 + $0x87]] }
 0x444   : > { %v2661_v59 = vmul.f32 %v2659_v43, %v7940_v29  ;;  %v2662_v61 = vmul.f32 %v2659_v43, %v7967_v47  ;;  %v2683_v52 = vrot.slane %v2677_v11, 2 }
 0x445   : > { %v3550_v45 = vrot.slane %v3544_v23, 1  ;;  %v3553_v21 = vrot.slane %v3546_v63, 1  ;;  %v2686_v23 = vrot.slane %v2679_v54, 2  ;;  %v2815_v63 = vstv %s8187_s30  ;;  %v2807_v54 = vld [vmem:[#allocation3 + $0x18] sm:$0xff]  ;;  %s5942_s30 = sld [smem:[#allocation7 + $0xe]] }
 0x446   : > { %3343 = vrot.lane.b32.xlu1 %v3340_v4, %s6286_s29  ;;  %v3519_v4 = vsel %vm426_vm5, %v3516_v10, %v3518_v22  ;;  %v2667_v62 = vrot.slane %v2661_v59, 1  ;;  %v2669_v27 = vrot.slane %v2662_v61, 1  ;;  %v2684_v22 = vrot.slane %v2678_v17, 2 }
 0x447   : > { %3345 = vrot.lane.b32.xlu0 %v3342_v12, %s6286_s29  ;;  %v2653_v12 = vstv %s8145_s9  ;;  %s5939_s9 = sld [smem:[#allocation7 + $0xd]] }
 0x448   : > { %v2654_v46 = vmul.f32 %v2653_v12, %v7937_v24  ;;  %v2685_v3 = vsel %vm426_vm5, %v2683_v52, %v2684_v22 }
 0x44a   : > { %3364 = vrot.lane.b32.xlu1 %v3361_v42, %s6286_s29  ;;  %v2660_v42 = vmul.f32 %v2659_v43, %v7937_v24  ;;  %v2656_v40 = vadd.f32 %v2654_v46, %v2650_v25  ;;  %v2809_v46 = vstv %s8205_s28  ;;  %s8347_s28 = sld [smem:[#allocation7 + $0xb]] }
 0x44b   : > { %3366 = vrot.lane.b32.xlu0 %v3363_v36, %s6286_s29  ;;  %v3531_v36 = vmul.f32 %v3529_v44, %v7940_v29 }
 0x44e   : > { %3378 = vrot.lane.b32.xlu1 %v3374_v18, %s9327_s0  ;;  %v3551_v18 = vrot.slane %v3545_v19, 1 }
 0x44f   : > { %3380 = vrot.lane.b32.xlu0 %v3375_v31, %s9327_s0  ;;  %v3565_v31 = vmul.f32 %v3564_v53, %v7937_v24 }
 0x450   : > { %v3552_v55 = vsel %vm408_vm4, %v3550_v45, %v3551_v18  ;;  %v3554_v20 = vsel %vm408_vm4, %v3551_v18, %v3553_v21  ;;  %v2816_v45 = vmul.f32 %v2815_v63, %v7937_v24  ;;  %v2817_v18 = vmul.f32 %v2815_v63, %v7940_v29 }
 0x451   : > { %v3571_v6 = vrot.slane %v3565_v31, 2  ;;  %v2818_v21 = vmul.f32 %v2815_v63, %v7967_v47 }
 0x452   : > { %3399 = vrot.lane.b32.xlu1 %v3396_v14, %s9327_s0  ;;  %v2666_v14 = vrot.slane %v2660_v42, 1 }
 0x453   : > { %3401 = vrot.lane.b32.xlu0 %v3398_v60, %s9327_s0  ;;  %v2825_v25 = vrot.slane %v2818_v21, 1 }
 0x454   : > { %v8122_v0 = vpop.permute.xlu1 %2698  ;;  %v2668_v39 = vsel %vm408_vm4, %v2666_v14, %v2667_v62  ;;  %v2832_v14 = vstv %s5892_s26  ;;  %s5943_s26 = sld [smem:[#allocation7 + $0x11]] }
 0x455   : > { %v8124_v49 = vpop.permute.xlu0 %2700  ;;  %v2673_v44 = vadd.f32 %v2668_v39, %v2656_v40  ;;  %v2835_v39 = vmul.f32 %v2832_v14, %v7967_v47 }
 0x456   : > { %3420 = vrot.lane.b32.xlu1 %v3417_v28, %s9327_s0  ;;  %v3572_v28 = vrot.slane %v3566_v50, 2 }
 0x457   : > { %3422 = vrot.lane.b32.xlu0 %v3419_v33, %s9327_s0  ;;  %v2655_v33 = vmul.f32 %v2653_v12, %v7940_v29  ;;  %v3599_v12 = vsel %vm345_vm0, %v3589_v32, %v3592_v1  ;;  %v2690_v61 = vadd.f32 %v2685_v3, %v2673_v44 }
 0x458   : > { %v8133_v48 = vpop.permute.xlu1 %2754  ;;  %v3573_v10 = vsel %vm426_vm5, %v3571_v6, %v3572_v28  ;;  %v2823_v6 = vrot.slane %v2817_v18, 1 }
 0x459   : > { %v8137_v51 = vpop.permute.xlu0 %2756  ;;  %v2704_v50 = vadd.f32 %v8122_v0, %v2690_v61  ;;  %v2810_v0 = vmul.f32 %v2809_v46, %v7937_v24 }
 0x45a   : > { %3478 = vrot.lane.b32.xlu1 %v3474_v58, %s6286_s29  ;;  %v3587_v58 = vld [vmem:[#allocation2 + $0x18] sm:$0xff] }
 0x45b   : > { %3480 = vrot.lane.b32.xlu0 %v3475_v41, %s6286_s29  ;;  %v2651_v41 = vld [vmem:[#allocation3 + $0x8] sm:$0xff]  ;;  %v3597_v59 = vrot.slane %v3587_v58, 5 }
 0x45c   : > { %v8148_v13 = vpop.permute.xlu1 %2854  ;;  %v2657_v43 = vadd.f32 %v2655_v33, %v2651_v41 }
 0x45d   : > { %v8150_v26 = vpop.permute.xlu0 %2856 }
 0x45e   : > { %3499 = vrot.lane.b32.xlu1 %v3496_v15, %s6286_s29  ;;  %v2670_v15 = vsel %vm408_vm4, %v2667_v62, %v2669_v27 }
 0x45f   : > { %3501 = vrot.lane.b32.xlu0 %v3498_v5, %s6286_s29  ;;  %v3593_v5 = vrot.slane %v3587_v58, 7  ;;  %v2674_v19 = vadd.f32 %v2670_v15, %v2657_v43  ;;  %v2811_v58 = vmul.f32 %v2809_v46, %v7940_v29  ;;  %v2965_v46 = vstv %s8243_s12  ;;  %s8372_s12 = sld [smem:[#allocation7 + $0x25]] }
 0x460   : > { %v8156_v2 = vpop.permute.xlu1 %2910 }
 0x461   : > { %v8158_v38 = vpop.permute.xlu0 %2912  ;;  %v3594_v42 = vsel %vm345_vm0, %v3592_v1, %v3593_v5  ;;  %v3600_v62 = vsel %vm345_vm0, %v3593_v5, %v3597_v59  ;;  %v2826_v5 = vsel %vm408_vm4, %v2823_v6, %v2825_v25  ;;  %v2971_v59 = vstv %s8231_s13  ;;  %s5948_s13 = sld [smem:[#allocation7 + $0x28]] }
 0x462   : > { %3520 = vrot.lane.b32.xlu1 %v3517_v8, %s6286_s29  ;;  %v3575_v8 = vsel %vm426_vm5, %v3572_v28, %v3574_v35  ;;  %v2834_v35 = vmul.f32 %v2832_v14, %v7940_v29 }
 0x463   : > { %3522 = vrot.lane.b32.xlu0 %v3519_v4, %s6286_s29 }
 0x464   : > { %v8172_v9 = vpop.permute.xlu1 %3010  ;;  %v2840_v43 = vrot.slane %v2834_v35, 2 }
 0x465   : > { %v8176_v7 = vpop.permute.xlu0 %3012 }
 0x466   : > { %3534 = vrot.lane.b32.xlu1 %v3530_v56, %s9327_s0  ;;  %v2687_v56 = vsel %vm426_vm5, %v2684_v22, %v2686_v23  ;;  %v2842_v23 = vrot.slane %v2835_v39, 2 }
 0x467   : > { %3536 = vrot.lane.b32.xlu0 %v3531_v36, %s9327_s0  ;;  %v2691_v36 = vadd.f32 %v2687_v56, %v2674_v19 }
 0x468   : > { %v8185_v37 = vpop.permute.xlu1 %3066 }
 0x469   : > { %v8189_v60 = vpop.permute.xlu0 %3068  ;;  %v2705_v17 = vadd.f32 %v8124_v49, %v2691_v36  ;;  %v2833_v49 = vmul.f32 %v2832_v14, %v7937_v24  ;;  %v2988_v14 = vstv %s5901_s14  ;;  %s5949_s14 = sld [smem:[#allocation7 + $0x2b]] }
 0x46a   : > { %3555 = vrot.lane.b32.xlu1 %v3552_v55, %s9327_s0  ;;  %v2822_v55 = vrot.slane %v2816_v45, 1 }
 0x46b   : > { %3557 = vrot.lane.b32.xlu0 %v3554_v20, %s9327_s0  ;;  %v2806_v20 = vld [vmem:[#allocation3 + $0x10] sm:$0xff]  ;;  %v2839_v52 = vrot.slane %v2833_v49, 2  ;;  %v2990_v49 = vmul.f32 %v2988_v14, %v7940_v29 }
 0x46c   : > { %v8199_v16 = vpop.permute.xlu1 %3166  ;;  %v2824_v1 = vsel %vm408_vm4, %v2822_v55, %v2823_v6 }
 0x46d   : > { %v8202_v30 = vpop.permute.xlu0 %3168  ;;  %v2841_v56 = vsel %vm426_vm5, %v2839_v52, %v2840_v43 }
 0x46e   : > { %3576 = vrot.lane.b32.xlu1 %v3573_v10, %s9327_s0  ;;  %v2812_v10 = vadd.f32 %v2810_v0, %v2806_v20  ;;  %v2966_v0 = vmul.f32 %v2965_v46, %v7937_v24  ;;  %v2962_v20 = vld [vmem:[#allocation3 + $0x20] sm:$0xff] }
 0x46f   : > { %3578 = vrot.lane.b32.xlu0 %v3575_v8, %s9327_s0  ;;  %v2813_v8 = vadd.f32 %v2811_v58, %v2807_v54  ;;  %v2963_v58 = vld [vmem:[#allocation3 + $0x28] sm:$0xff] }
 0x470   : > { %v8210_v4 = vpop.permute.xlu1 %3222  ;;  %v2829_v44 = vadd.f32 %v2824_v1, %v2812_v10 }
 0x471   : > { %v8213_v53 = vpop.permute.xlu0 %3224  ;;  %v2830_v19 = vadd.f32 %v2826_v5, %v2813_v8 }
 0x472   : > { %3603 = vrot.lane.b32.xlu1 %v3599_v12, %s6286_s29  ;;  %v2846_v45 = vadd.f32 %v2841_v56, %v2829_v44 }
 0x473   : > { %3605 = vrot.lane.b32.xlu0 %v3594_v42, %s6286_s29 }
 0x474   : > { %v2720_v31 = vpop.permute.xlu1 %2719  ;;  %v2860_v21 = vadd.f32 %v8148_v13, %v2846_v45  ;;  %v2989_v13 = vmul.f32 %v2988_v14, %v7937_v24 }
 0x475   : > { %v2722_v34 = vpop.permute.xlu0 %2721  ;;  %v2725_v27 = vadd.f32 %v2720_v31, %v2704_v50  ;;  %v2973_v31 = vmul.f32 %v2971_v59, %v7940_v29 }
 0x476   : > { %3607 = vrot.lane.b32.xlu1 %v3600_v62, %s6286_s29  ;;  %v2726_v28 = vadd.f32 %v2722_v34, %v2705_v17  ;;  %v2974_v34 = vmul.f32 %v2971_v59, %v7967_v47  ;;  %v2995_v5 = vrot.slane %v2989_v13, 2 }
 0x477   : > { %3612 = vrot.lane.b32.xlu0 %v3599_v12, %s9328_s10  ;;  %v2979_v6 = vrot.slane %v2973_v31, 1 }
 0x478   : > { %v2741_v57 = vpop.permute.xlu1 %2740  ;;  %v2981_v25 = vrot.slane %v2974_v34, 1  ;;  %v3144_v34 = vstv %s5910_s3  ;;  %s5952_s3 = sld [smem:[#allocation7 + $0x2c]] }
 0x479   : > { %v2746_v11 = vadd.f32 %v2741_v57, %v2725_v27  ;;  %v2743_v33 = vpop.permute.xlu0 %2742 }
 0x47a   : > { %v2747_v41 = vadd.f32 %v2743_v33, %v2726_v28  ;;  %3614 = vrot.lane.b32.xlu1 %v3594_v42, %s9328_s10 }
 0x47b   : > { %3616 = vrot.lane.b32.xlu0 %v3600_v62, %s9328_s10  ;;  %v2760_v32 = vadd.f32 %v8133_v48, %v2746_v11 }
 0x47c   : > { %v2776_v40 = vpop.permute.xlu1 %2775  ;;  %v2761_v15 = vadd.f32 %v8137_v51, %v2747_v41  ;;  %v2991_v41 = vmul.f32 %v2988_v14, %v7967_v47 }
 0x47d   : > { %v2778_v22 = vpop.permute.xlu0 %2777  ;;  %v2781_v48 = vadd.f32 %v2776_v40, %v2760_v32  ;;  %v2968_v40 = vadd.f32 %v2966_v0, %v2962_v20  ;;  %v3118_v0 = vld [vmem:[#allocation3 + $0x30] sm:$0xff]  ;;  %v3147_v20 = vmul.f32 %v3144_v34, %v7967_v47 }
 0x47e   : > { %3621 = vrot.lane.b32.xlu1 %v3599_v12, %s9329_s11  ;;  %v2782_v51 = vadd.f32 %v2778_v22, %v2761_v15  ;;  %v2843_v12 = vsel %vm426_vm5, %v2840_v43, %v2842_v23  ;;  %v2982_v15 = vsel %vm408_vm4, %v2979_v6, %v2981_v25  ;;  %v2996_v22 = vrot.slane %v2990_v49, 2 }
 0x47f   : > { %3623 = vrot.lane.b32.xlu0 %v3594_v42, %s9329_s11  ;;  %v2847_v18 = vadd.f32 %v2843_v12, %v2830_v19  ;;  %v2972_v42 = vmul.f32 %v2971_v59, %v7937_v24  ;;  %v2998_v8 = vrot.slane %v2991_v41, 2  ;;  %v3127_v19 = vstv %s5909_s2  ;;  %s5951_s2 = sld [smem:[#allocation7 + $0x29]] }
 0x480   : > { %v2797_v63 = vpop.permute.xlu1 %2796  ;;  %v3129_v45 = vmul.f32 %v3127_v19, %v7940_v29  ;;  %v3146_v25 = vmul.f32 %v3144_v34, %v7940_v29 }
 0x481   : > { %v2802_v3 = vadd.f32 %v2797_v63, %v2781_v48  ;;  %v2799_v61 = vpop.permute.xlu0 %2798  ;;  %v2978_v55 = vrot.slane %v2972_v42, 1  ;;  %v2997_v63 = vsel %vm426_vm5, %v2995_v5, %v2996_v22  ;;  %v3130_v42 = vmul.f32 %v3127_v19, %v7967_v47 }
 0x482   : > { %v2803_v36 = vadd.f32 %v2799_v61, %v2782_v51  ;;  %3625 = vrot.lane.b32.xlu1 %v3600_v62, %s9329_s11  ;;  %v2861_v62 = vadd.f32 %v8150_v26, %v2847_v18  ;;  %v2967_v26 = vmul.f32 %v2965_v46, %v7940_v29  ;;  %v2999_v61 = vsel %vm426_vm5, %v2996_v22, %v2998_v8 }
 0x483   : > { %2804 = vst.msk [vmem:[#allocation3] sm:$0xff] %vm324_vm1, %v2802_v3  ;;  %v2980_v39 = vsel %vm408_vm4, %v2978_v55, %v2979_v6  ;;  %v3135_v46 = vrot.slane %v3129_v45, 1  ;;  %v3137_v6 = vrot.slane %v3130_v42, 1 }
 0x484   : > { %2805 = vst.msk [vmem:[#allocation3 + $0x8] sm:$0xff] %vm324_vm1, %v2803_v36  ;;  %v2876_v50 = vpop.permute.xlu1 %2875  ;;  %v2969_v52 = vadd.f32 %v2967_v26, %v2963_v58  ;;  %v2985_v43 = vadd.f32 %v2980_v39, %v2968_v40  ;;  %v3128_v36 = vmul.f32 %v3127_v19, %v7937_v24 }
 0x485   : > { %v2878_v17 = vpop.permute.xlu0 %2877  ;;  %v2881_v27 = vadd.f32 %v2876_v50, %v2860_v21  ;;  %v3121_v21 = vstv %s8268_s1  ;;  %v3138_v41 = vsel %vm408_vm4, %v3135_v46, %v3137_v6  ;;  %s8393_s1 = sld [smem:[#allocation7 + $0x26]] }
 0x486   : > { %v2882_v28 = vadd.f32 %v2878_v17, %v2861_v62  ;;  %v2986_v23 = vadd.f32 %v2982_v15, %v2969_v52  ;;  %v3002_v3 = vadd.f32 %v2997_v63, %v2985_v43  ;;  %v3134_v62 = vrot.slane %v3128_v36, 1 }
 0x487   : > { %v3122_v55 = vmul.f32 %v3121_v21, %v7937_v24  ;;  %v3154_v15 = vrot.slane %v3147_v20, 2 }
 0x488   : > { %v2897_v57 = vpop.permute.xlu1 %2896  ;;  %v3003_v56 = vadd.f32 %v2999_v61, %v2986_v23  ;;  %v3016_v18 = vadd.f32 %v8172_v9, %v3002_v3  ;;  %v3145_v9 = vmul.f32 %v3144_v34, %v7937_v24  ;;  %v3136_v49 = vsel %vm408_vm4, %v3134_v62, %v3135_v46 }
 0x489   : > { %v2902_v11 = vadd.f32 %v2897_v57, %v2881_v27  ;;  %v2899_v33 = vpop.permute.xlu0 %2898  ;;  %v3124_v58 = vadd.f32 %v3122_v55, %v3118_v0  ;;  %v3277_v62 = vstv %s8295_s19  ;;  %s8414_s19 = sld [smem:[#allocation7 + $0x40]] }
 0x48a   : > { %v2903_v35 = vadd.f32 %v2899_v33, %v2882_v28  ;;  %v3017_v50 = vadd.f32 %v8176_v7, %v3003_v56  ;;  %v3119_v33 = vld [vmem:[#allocation3 + $0x38] sm:$0xff]  ;;  %v3151_v39 = vrot.slane %v3145_v9, 2 }
 0x48b   : > { %v2916_v54 = vadd.f32 %v8156_v2, %v2902_v11  ;;  %v3123_v11 = vmul.f32 %v3121_v21, %v7940_v29  ;;  %v3141_v40 = vadd.f32 %v3136_v49, %v3124_v58 }
 0x48c   : > { %v2932_v32 = vpop.permute.xlu1 %2931  ;;  %v2917_v1 = vadd.f32 %v8158_v38, %v2903_v35 }
 0x48d   : > { %v2934_v10 = vpop.permute.xlu0 %2933  ;;  %v2937_v44 = vadd.f32 %v2932_v32, %v2916_v54  ;;  %v3152_v32 = vrot.slane %v3146_v25, 2 }
 0x48e   : > { %v2938_v2 = vadd.f32 %v2934_v10, %v2917_v1  ;;  %v3125_v1 = vadd.f32 %v3123_v11, %v3119_v33  ;;  %v3279_v11 = vmul.f32 %v3277_v62, %v7940_v29 }
 0x48f   : > { %v3153_v8 = vsel %vm426_vm5, %v3151_v39, %v3152_v32 }
 0x490   : > { %v2953_v48 = vpop.permute.xlu1 %2952  ;;  %v3142_v5 = vadd.f32 %v3138_v41, %v3125_v1  ;;  %v3158_v23 = vadd.f32 %v3153_v8, %v3141_v40 }
 0x491   : > { %v2958_v51 = vadd.f32 %v2953_v48, %v2937_v44  ;;  %v2955_v38 = vpop.permute.xlu0 %2954 }
 0x492   : > { %v2959_v59 = vadd.f32 %v2955_v38, %v2938_v2  ;;  %v3172_v19 = vadd.f32 %v8199_v16, %v3158_v23 }
 0x493   : > { %2960 = vst.msk [vmem:[#allocation3 + $0x10] sm:$0xff] %vm324_vm1, %v2958_v51 }
 0x494   : > { %2961 = vst.msk [vmem:[#allocation3 + $0x18] sm:$0xff] %vm324_vm1, %v2959_v59  ;;  %v3032_v12 = vpop.permute.xlu1 %3031 }
 0x495   : > { %v3034_v31 = vpop.permute.xlu0 %3033  ;;  %v3037_v17 = vadd.f32 %v3032_v12, %v3016_v18  ;;  %v3283_v12 = vstv %s5918_s4  ;;  %s5957_s4 = sld [smem:[#allocation7 + $0x43]] }
 0x496   : > { %v3038_v14 = vadd.f32 %v3034_v31, %v3017_v50  ;;  %v3284_v31 = vmul.f32 %v3283_v12, %v7937_v24  ;;  %v3286_v21 = vmul.f32 %v3283_v12, %v7967_v47 }
 0x498   : > { %v3053_v27 = vpop.permute.xlu1 %3052 }
 0x499   : > { %v3058_v28 = vadd.f32 %v3053_v27, %v3037_v17  ;;  %v3055_v57 = vpop.permute.xlu0 %3054  ;;  %v3300_v27 = vstv %s5919_s17  ;;  %s5958_s17 = sld [smem:[#allocation7 + $0x46]] }
 0x49a   : > { %v3059_v7 = vadd.f32 %v3055_v57, %v3038_v14  ;;  %v3274_v57 = vld [vmem:[#allocation3 + $0x40] sm:$0xff]  ;;  %v3301_v0 = vmul.f32 %v3300_v27, %v7937_v24  ;;  %v3302_v9 = vmul.f32 %v3300_v27, %v7940_v29  ;;  %v3303_v33 = vmul.f32 %v3300_v27, %v7967_v47 }
 0x49b   : > { %v3072_v13 = vadd.f32 %v8185_v37, %v3058_v28  ;;  %v3293_v28 = vrot.slane %v3286_v21, 1 }
 0x49c   : > { %v3088_v26 = vpop.permute.xlu1 %3087  ;;  %v3073_v35 = vadd.f32 %v8189_v60, %v3059_v7  ;;  %v3155_v60 = vsel %vm426_vm5, %v3152_v32, %v3154_v15  ;;  %v3275_v7 = vld [vmem:[#allocation3 + $0x48] sm:$0xff]  ;;  %v3308_v58 = vrot.slane %v3302_v9, 2  ;;  %v3310_v32 = vrot.slane %v3303_v33, 2 }
 0x49d   : > { %v3090_v54 = vpop.permute.xlu0 %3089  ;;  %v3093_v10 = vadd.f32 %v3088_v26, %v3072_v13  ;;  %v3159_v2 = vadd.f32 %v3155_v60, %v3142_v5  ;;  %v3281_v41 = vadd.f32 %v3279_v11, %v3275_v7 }
 0x49e   : > { %v3094_v22 = vadd.f32 %v3090_v54, %v3073_v35  ;;  %v3307_v35 = vrot.slane %v3301_v0, 2 }
 0x49f   : > { %v3173_v38 = vadd.f32 %v8202_v30, %v3159_v2  ;;  %v3285_v30 = vmul.f32 %v3283_v12, %v7940_v29 }
 0x4a0   : > { %v3109_v52 = vpop.permute.xlu1 %3108  ;;  %v3309_v15 = vsel %vm426_vm5, %v3307_v35, %v3308_v58 }
 0x4a1   : > { %v3114_v43 = vadd.f32 %v3109_v52, %v3093_v10  ;;  %v3111_v37 = vpop.permute.xlu0 %3110  ;;  %v3291_v6 = vrot.slane %v3285_v30, 1  ;;  %v3456_v30 = vstv %s5928_s20  ;;  %s5961_s20 = sld [smem:[#allocation7 + $0x47]] }
 0x4a2   : > { %v3115_v44 = vadd.f32 %v3111_v37, %v3094_v22  ;;  %v3311_v22 = vsel %vm426_vm5, %v3308_v58, %v3310_v32  ;;  %v3458_v27 = vmul.f32 %v3456_v30, %v7940_v29 }
 0x4a3   : > { %3116 = vst.msk [vmem:[#allocation3 + $0x20] sm:$0xff] %vm324_vm1, %v3114_v43  ;;  %v3294_v26 = vsel %vm408_vm4, %v3291_v6, %v3293_v28 }
 0x4a4   : > { %3117 = vst.msk [vmem:[#allocation3 + $0x28] sm:$0xff] %vm324_vm1, %v3115_v44  ;;  %v3188_v48 = vpop.permute.xlu1 %3187  ;;  %v3298_v40 = vadd.f32 %v3294_v26, %v3281_v41  ;;  %v3464_v11 = vrot.slane %v3458_v27, 2 }
 0x4a5   : > { %v3190_v51 = vpop.permute.xlu0 %3189  ;;  %v3193_v63 = vadd.f32 %v3188_v48, %v3172_v19  ;;  %v3439_v19 = vstv %s5927_s15  ;;  %s5960_s15 = sld [smem:[#allocation7 + $0x44]] }
 0x4a6   : > { %v3194_v59 = vadd.f32 %v3190_v51, %v3173_v38  ;;  %v3315_v43 = vadd.f32 %v3311_v22, %v3298_v40 }
 0x4a8   : > { %v3209_v3 = vpop.permute.xlu1 %3208 }
 0x4a9   : > { %v3214_v61 = vadd.f32 %v3209_v3, %v3193_v63  ;;  %v3211_v56 = vpop.permute.xlu0 %3210 }
 0x4aa   : > { %v3215_v36 = vadd.f32 %v3211_v56, %v3194_v59  ;;  %v3441_v56 = vmul.f32 %v3439_v19, %v7940_v29 }
 0x4ab   : > { %v3228_v45 = vadd.f32 %v8210_v4, %v3214_v61  ;;  %v3290_v4 = vrot.slane %v3284_v31, 1  ;;  %v3440_v61 = vmul.f32 %v3439_v19, %v7937_v24 }
 0x4ac   : > { %v3244_v18 = vpop.permute.xlu1 %3243  ;;  %v3229_v42 = vadd.f32 %v8213_v53, %v3215_v36  ;;  %v3278_v53 = vmul.f32 %v3277_v62, %v7937_v24 }
 0x4ad   : > { %v3246_v16 = vpop.permute.xlu0 %3245  ;;  %v3249_v50 = vadd.f32 %v3244_v18, %v3228_v45  ;;  %v3292_v13 = vsel %vm408_vm4, %v3290_v4, %v3291_v6  ;;  %v3442_v45 = vmul.f32 %v3439_v19, %v7967_v47  ;;  %v3446_v21 = vrot.slane %v3440_v61, 1  ;;  %v3431_v6 = vld [vmem:[#allocation3 + $0x58] sm:$0xff] }
 0x4ae   : > { %v3250_v34 = vadd.f32 %v3246_v16, %v3229_v42  ;;  %v3280_v49 = vadd.f32 %v3278_v53, %v3274_v57  ;;  %v3433_v42 = vstv %s8314_s18  ;;  %v3459_v53 = vmul.f32 %v3456_v30, %v7967_v47  ;;  %s8435_s18 = sld [smem:[#allocation7 + $0x41]] }
 0x4af   : > { %v3449_v62 = vrot.slane %v3442_v45, 1  ;;  %v3435_v4 = vmul.f32 %v3433_v42, %v7940_v29  ;;  %v3679_v61 = vstv %s5938_s5  ;;  %s5966_s5 = sld [smem:[#allocation7 + $0x5e]] }
 0x4b0   : > { %v3265_v17 = vpop.permute.xlu1 %3264  ;;  %v3297_v39 = vadd.f32 %v3292_v13, %v3280_v49 }
 0x4b1   : > { %v3270_v46 = vadd.f32 %v3265_v17, %v3249_v50  ;;  %v3267_v14 = vpop.permute.xlu0 %3266  ;;  %v3434_v17 = vmul.f32 %v3433_v42, %v7937_v24  ;;  %v3437_v7 = vadd.f32 %v3435_v4, %v3431_v6 }
 0x4b2   : > { %v3271_v55 = vadd.f32 %v3267_v14, %v3250_v34  ;;  %v3314_v5 = vadd.f32 %v3309_v15, %v3297_v39  ;;  %v3447_v34 = vrot.slane %v3441_v56, 1  ;;  %v3457_v14 = vmul.f32 %v3456_v30, %v7937_v24 }
 0x4b3   : > { %3272 = vst.msk [vmem:[#allocation3 + $0x30] sm:$0xff] %vm324_vm1, %v3270_v46  ;;  %v3430_v46 = vld [vmem:[#allocation3 + $0x50] sm:$0xff]  ;;  %v3466_v24 = vrot.slane %v3459_v53, 2  ;;  %v3693_v56 = vstv %s5939_s9  ;;  %s8456_s9 = sld [smem:[#allocation7 + $0x5b]] }
 0x4b4   : > { %3273 = vst.msk [vmem:[#allocation3 + $0x38] sm:$0xff] %vm324_vm1, %v3271_v55  ;;  %v3323_v25 = vpop.permute.xlu1 %3322  ;;  %v3448_v57 = vsel %vm408_vm4, %v3446_v21, %v3447_v34  ;;  %v3436_v0 = vadd.f32 %v3434_v17, %v3430_v46  ;;  %v3450_v9 = vsel %vm408_vm4, %v3447_v34, %v3449_v62 }
 0x4b5   : > { %v3325_v20 = vpop.permute.xlu0 %3324  ;;  %v3328_v37 = vadd.f32 %v3323_v25, %v3314_v5  ;;  %v3463_v25 = vrot.slane %v3457_v14, 2  ;;  %v3454_v49 = vadd.f32 %v3450_v9, %v3437_v7  ;;  %v3467_v47 = vsel %vm426_vm5, %v3464_v11, %v3466_v24 }
 0x4b6   : > { %v3329_v8 = vadd.f32 %v3325_v20, %v3315_v43  ;;  %v3453_v20 = vadd.f32 %v3448_v57, %v3436_v0 }
 0x4b7   : > { %v3465_v26 = vsel %vm426_vm5, %v3463_v25, %v3464_v11  ;;  %v3471_v41 = vadd.f32 %v3467_v47, %v3454_v49  ;;  %v3749_v25 = vstv %s5942_s30  ;;  %v3770_v49 = vstv %s5943_s26  ;;  %s5969_s30 = sld [smem:[#allocation7 + $0x5f]]  ;;  %s5970_s26 = sld [smem:[#allocation7 + $0x62]] }
 0x4b8   : > { %v3344_v54 = vpop.permute.xlu1 %3343  ;;  %v3470_v35 = vadd.f32 %v3465_v26, %v3453_v20  ;;  %v3735_v20 = vstv %s8347_s28  ;;  %s8477_s28 = sld [smem:[#allocation7 + $0x5c]] }
 0x4b9   : > { %v3346_v1 = vpop.permute.xlu0 %3345  ;;  %v3349_v23 = vadd.f32 %v3344_v54, %v3328_v37 }
 0x4ba   : > { %v3350_v2 = vadd.f32 %v3346_v1, %v3329_v8 }
 0x4bc   : > { %v3365_v10 = vpop.permute.xlu1 %3364 }
 0x4bd   : > { %v3367_v52 = vpop.permute.xlu0 %3366  ;;  %v3370_v48 = vadd.f32 %v3365_v10, %v3349_v23 }
 0x4be   : > { %v3371_v51 = vadd.f32 %v3367_v52, %v3350_v2 }
 0x4c0   : > { %v3379_v44 = vpop.permute.xlu1 %3378 }
 0x4c1   : > { %v3381_v60 = vpop.permute.xlu0 %3380  ;;  %v3384_v63 = vadd.f32 %v3379_v44, %v3370_v48 }
 0x4c2   : > { %v3385_v3 = vadd.f32 %v3381_v60, %v3371_v51 }
 0x4c4   : > { %v3400_v38 = vpop.permute.xlu1 %3399 }
 0x4c5   : > { %v3402_v59 = vpop.permute.xlu0 %3401  ;;  %v3405_v36 = vadd.f32 %v3400_v38, %v3384_v63 }
 0x4c6   : > { %v3406_v12 = vadd.f32 %v3402_v59, %v3385_v3 }
 0x4c8   : > { %v3421_v18 = vpop.permute.xlu1 %3420 }
 0x4c9   : > { %v3426_v16 = vadd.f32 %v3421_v18, %v3405_v36  ;;  %v3423_v31 = vpop.permute.xlu0 %3422 }
 0x4ca   : > { %v3427_v50 = vadd.f32 %v3423_v31, %v3406_v12  ;;  %v3714_v12 = vstv %s5940_s16  ;;  %s5967_s16 = sld [smem:[#allocation7 + $0x61]] }
 0x4cb   : > { %3428 = vst.msk [vmem:[#allocation3 + $0x40] sm:$0xff] %vm324_vm1, %v3426_v16 }
 0x4cc   : > { %3429 = vst.msk [vmem:[#allocation3 + $0x48] sm:$0xff] %vm324_vm1, %v3427_v50  ;;  %v3479_v55 = vpop.permute.xlu1 %3478 }
 0x4cd   : > { %v3481_v28 = vpop.permute.xlu0 %3480  ;;  %v3484_v54 = vadd.f32 %v3479_v55, %v3470_v35 }
 0x4ce   : > { %v3485_v39 = vadd.f32 %v3481_v28, %v3471_v41 }
 0x4d0   : > { %v3500_v33 = vpop.permute.xlu1 %3499 }
 0x4d1   : > { %v3502_v13 = vpop.permute.xlu0 %3501  ;;  %v3505_v1 = vadd.f32 %v3500_v33, %v3484_v54 }
 0x4d2   : > { %v3506_v15 = vadd.f32 %v3502_v13, %v3485_v39 }
 0x4d4   : > { %v3521_v29 = vpop.permute.xlu1 %3520 }
 0x4d5   : > { %v3523_v58 = vpop.permute.xlu0 %3522  ;;  %v3526_v10 = vadd.f32 %v3521_v29, %v3505_v1 }
 0x4d6   : > { %v3527_v5 = vadd.f32 %v3523_v58, %v3506_v15 }
 0x4d8   : > { %v3535_v32 = vpop.permute.xlu1 %3534 }
 0x4d9   : > { %v3537_v40 = vpop.permute.xlu0 %3536  ;;  %v3540_v52 = vadd.f32 %v3535_v32, %v3526_v10 }
 0x4da   : > { %v3541_v37 = vadd.f32 %v3537_v40, %v3527_v5  ;;  %v3849_v5 = vstv %s5948_s13  ;;  %s5975_s13 = sld [smem:[#allocation7 + $0x79]] }
 0x4dc   : > { %v3556_v22 = vpop.permute.xlu1 %3555 }
 0x4dd   : > { %v3558_v43 = vpop.permute.xlu0 %3557  ;;  %v3561_v8 = vadd.f32 %v3556_v22, %v3540_v52 }
 0x4de   : > { %v3562_v44 = vadd.f32 %v3558_v43, %v3541_v37  ;;  %v3835_v37 = vstv %s8372_s12  ;;  %s8498_s12 = sld [smem:[#allocation7 + $0x76]] }
 0x4e0   : > { %v3577_v23 = vpop.permute.xlu1 %3576 }
 0x4e1   : > { %v3582_v60 = vadd.f32 %v3577_v23, %v3561_v8  ;;  %v3579_v2 = vpop.permute.xlu0 %3578  ;;  %v3870_v23 = vstv %s5949_s14  ;;  %s5976_s14 = sld [smem:[#allocation7 + $0x7c]] }
 0x4e2   : > { %v3583_v48 = vadd.f32 %v3579_v2, %v3562_v44 }
 0x4e3   : > { %3584 = vst.msk [vmem:[#allocation3 + $0x50] sm:$0xff] %vm324_vm1, %v3582_v60 }
 0x4e4   : > { %3585 = vst.msk [vmem:[#allocation3 + $0x58] sm:$0xff] %vm324_vm1, %v3583_v48  ;;  %v3604_v19 = vpop.permute.xlu1 %3603 }
 0x4e5   : > { %v3606_v51 = vpop.permute.xlu0 %3605 }
 0x4e8   : > { %v3608_v38 = vpop.permute.xlu1 %3607 }
 0x4e9   : > { %v3613_v63 = vpop.permute.xlu0 %3612 }
 0x4ea   : > { %v3630_v36 = vsel %vm384_vm2, %v3604_v19, %v3613_v63 }
 0x4ec   : > { %v3615_v59 = vpop.permute.xlu1 %3614 }
 0x4ed   : > { %v3617_v3 = vpop.permute.xlu0 %3616  ;;  %v3631_v18 = vsel %vm384_vm2, %v3606_v51, %v3615_v59 }
 0x4ee   : > { %v3632_v46 = vsel %vm384_vm2, %v3608_v38, %v3617_v3 }
 0x4f0   : > { %v3622_v45 = vpop.permute.xlu1 %3621 }
 0x4f1   : > { %v8336_v42 = vsel %vm388_vm3, %v3630_v36, %v3622_v45  ;;  %v3624_v16 = vpop.permute.xlu0 %3623 }
 0x4f2   : > { %v8339_v31 = vsel %vm388_vm3, %v3631_v18, %v3624_v16  ;;  %v3680_v30 = vmul.f32 %v3679_v61, %v8336_v42  ;;  %v3694_v50 = vmul.f32 %v3693_v56, %v8336_v42  ;;  %v3715_v17 = vmul.f32 %v3714_v12, %v8336_v42 }
 0x4f3   : > { %v3681_v21 = vmul.f32 %v3679_v61, %v8339_v31  ;;  %v3695_v34 = vmul.f32 %v3693_v56, %v8339_v31  ;;  %v3716_v62 = vmul.f32 %v3714_v12, %v8339_v31  ;;  %v3750_v24 = vmul.f32 %v3749_v25, %v8336_v42 }
 0x4f4   : > { %v3626_v14 = vpop.permute.xlu1 %3625  ;;  %3684 = vrot.lane.b32.xlu0 %v3680_v30, %s6286_s29  ;;  %v3700_v27 = vrot.slane %v3694_v50, 1  ;;  %v3721_v57 = vrot.slane %v3715_v17, 2  ;;  %v3751_v13 = vmul.f32 %v3749_v25, %v8339_v31  ;;  %v3736_v29 = vmul.f32 %v3735_v20, %v8336_v42 }
 0x4f5   : > { %v8352_v55 = vsel %vm388_vm3, %v3632_v46, %v3626_v14  ;;  %3686 = vrot.lane.b32.xlu1 %v3681_v21, %s6286_s29  ;;  %v3701_v4 = vrot.slane %v3695_v34, 1  ;;  %v3722_v0 = vrot.slane %v3716_v62, 2  ;;  %v3756_v47 = vrot.slane %v3750_v24, 1 }
 0x4f6   : > { %v3696_v6 = vmul.f32 %v3693_v56, %v8352_v55  ;;  %v3717_v53 = vmul.f32 %v3714_v12, %v8352_v55  ;;  %v3752_v35 = vmul.f32 %v3749_v25, %v8352_v55  ;;  %v3757_v58 = vrot.slane %v3751_v13, 1 }
 0x4f7   : > { %v3702_v28 = vsel %vm408_vm4, %v3700_v27, %v3701_v4  ;;  %v3723_v33 = vsel %vm426_vm5, %v3721_v57, %v3722_v0  ;;  %v3771_v41 = vmul.f32 %v3770_v49, %v8336_v42  ;;  %v3772_v54 = vmul.f32 %v3770_v49, %v8339_v31 }
 0x4f8   : > { %3705 = vrot.lane.b32.xlu0 %v3702_v28, %s6286_s29  ;;  %v3703_v9 = vrot.slane %v3696_v6, 1  ;;  %v3724_v7 = vrot.slane %v3717_v53, 2  ;;  %v3737_v39 = vmul.f32 %v3735_v20, %v8339_v31  ;;  %v3759_v32 = vrot.slane %v3752_v35, 1 }
 0x4f9   : > { %v3773_v1 = vmul.f32 %v3770_v49, %v8352_v55  ;;  %v3758_v40 = vsel %vm408_vm4, %v3756_v47, %v3757_v58  ;;  %v3777_v15 = vrot.slane %v3771_v41, 2  ;;  %v3778_v10 = vrot.slane %v3772_v54, 2 }
 0x4fa   : > { %v3704_v11 = vsel %vm408_vm4, %v3701_v4, %v3703_v9  ;;  %v3725_v26 = vsel %vm426_vm5, %v3722_v0, %v3724_v7  ;;  %v3760_v22 = vsel %vm408_vm4, %v3757_v58, %v3759_v32  ;;  %v3850_v8 = vmul.f32 %v3849_v5, %v8336_v42 }
 0x4fb   : > { %3707 = vrot.lane.b32.xlu1 %v3704_v11, %s6286_s29  ;;  %v3780_v52 = vrot.slane %v3773_v1, 2  ;;  %v3779_v43 = vsel %vm426_vm5, %v3777_v15, %v3778_v10  ;;  %v3851_v44 = vmul.f32 %v3849_v5, %v8339_v31  ;;  %v3836_v2 = vmul.f32 %v3835_v37, %v8336_v42 }
 0x4fc   : > { %3726 = vrot.lane.b32.xlu0 %v3723_v33, %s6286_s29  ;;  %v3852_v48 = vmul.f32 %v3849_v5, %v8352_v55  ;;  %v3856_v19 = vrot.slane %v3850_v8, 1  ;;  %v3871_v38 = vmul.f32 %v3870_v23, %v8336_v42  ;;  %v3872_v63 = vmul.f32 %v3870_v23, %v8339_v31 }
 0x4fd   : > { %v3781_v60 = vsel %vm426_vm5, %v3778_v10, %v3780_v52  ;;  %v3857_v51 = vrot.slane %v3851_v44, 1  ;;  %v3837_v59 = vmul.f32 %v3835_v37, %v8339_v31  ;;  %v3873_v61 = vmul.f32 %v3870_v23, %v8352_v55 }
 0x4fe   : > { %v3859_v3 = vrot.slane %v3852_v48, 1  ;;  %v3877_v36 = vrot.slane %v3871_v38, 2  ;;  %v3878_v45 = vrot.slane %v3872_v63, 2  ;;  %v3905_v12 = vstv %s5951_s2  ;;  %s5978_s2 = sld [smem:[#allocation7 + $0x7a]] }
 0x4ff   : > { %3728 = vrot.lane.b32.xlu1 %v3725_v26, %s6286_s29  ;;  %v3858_v56 = vsel %vm408_vm4, %v3856_v19, %v3857_v51  ;;  %v3880_v16 = vrot.slane %v3873_v61, 2  ;;  %v3891_v50 = vstv %s8393_s1  ;;  %v3906_v21 = vmul.f32 %v3905_v12, %v8336_v42  ;;  %s5936_s1 = sld [smem:[#allocation7 + $0xc]] }
 0x500   : > { %3740 = vrot.lane.b32.xlu0 %v3736_v29, %s9327_s0  ;;  %v3860_v18 = vsel %vm408_vm4, %v3857_v51, %v3859_v3  ;;  %v3879_v30 = vsel %vm426_vm5, %v3877_v36, %v3878_v45  ;;  %v3907_v34 = vmul.f32 %v3905_v12, %v8339_v31  ;;  %v3926_v17 = vstv %s5952_s3  ;;  %s8519_s3 = sld [smem:[#allocation7 + $0x77]] }
 0x501   : > { %v3881_v62 = vsel %vm426_vm5, %v3878_v45, %v3880_v16  ;;  %v3892_v46 = vmul.f32 %v3891_v50, %v8336_v42  ;;  %v3908_v14 = vmul.f32 %v3905_v12, %v8352_v55  ;;  %v3912_v27 = vrot.slane %v3906_v21, 1 }
 0x502   : > { %v3913_v4 = vrot.slane %v3907_v34, 1  ;;  %v3927_v6 = vmul.f32 %v3926_v17, %v8336_v42  ;;  %v3928_v53 = vmul.f32 %v3926_v17, %v8339_v31  ;;  %v3893_v28 = vmul.f32 %v3891_v50, %v8339_v31 }
 0x503   : > { %3742 = vrot.lane.b32.xlu1 %v3737_v39, %s9327_s0  ;;  %v3915_v57 = vrot.slane %v3908_v14, 1  ;;  %v3929_v0 = vmul.f32 %v3926_v17, %v8352_v55  ;;  %v4005_v7 = vstv %s5957_s4  ;;  %v3991_v13 = vstv %s8414_s19  ;;  %s5979_s4 = sld [smem:[#allocation7 + $0x7d]]  ;;  %s8527_s19 = sld [smem:[#allocation7 + $0x9]] }
 0x504   : > { %3761 = vrot.lane.b32.xlu0 %v3758_v40, %s9327_s0  ;;  %v3914_v9 = vsel %vm408_vm4, %v3912_v27, %v3913_v4  ;;  %v3933_v25 = vrot.slane %v3927_v6, 2  ;;  %v3934_v11 = vrot.slane %v3928_v53, 2  ;;  %v4006_v49 = vmul.f32 %v4005_v7, %v8336_v42 }
 0x505   : > { %v3916_v33 = vsel %vm408_vm4, %v3913_v4, %v3915_v57  ;;  %v3936_v20 = vrot.slane %v3929_v0, 2  ;;  %v4007_v26 = vmul.f32 %v4005_v7, %v8339_v31  ;;  %v4026_v29 = vstv %s5958_s17  ;;  %s5937_s17 = sld [smem:[#allocation7 + $0xf]] }
 0x506   : > { %v3935_v24 = vsel %vm426_vm5, %v3933_v25, %v3934_v11  ;;  %v3992_v47 = vmul.f32 %v3991_v13, %v8336_v42  ;;  %v4008_v58 = vmul.f32 %v4005_v7, %v8352_v55  ;;  %v4012_v41 = vrot.slane %v4006_v49, 1 }
 0x507   : > { %3763 = vrot.lane.b32.xlu1 %v3760_v22, %s9327_s0  ;;  %v3937_v35 = vsel %vm426_vm5, %v3934_v11, %v3936_v20  ;;  %v4013_v54 = vrot.slane %v4007_v26, 1  ;;  %v4027_v39 = vmul.f32 %v4026_v29, %v8336_v42  ;;  %v4028_v32 = vmul.f32 %v4026_v29, %v8339_v31 }
 0x508   : > { %3782 = vrot.lane.b32.xlu0 %v3779_v43, %s9327_s0  ;;  %v3993_v1 = vmul.f32 %v3991_v13, %v8339_v31  ;;  %v4015_v40 = vrot.slane %v4008_v58, 1  ;;  %v4029_v15 = vmul.f32 %v4026_v29, %v8352_v55  ;;  %v4061_v52 = vstv %s5960_s15  ;;  %s5984_s15 = sld [smem:[#allocation7 + $0x94]] }
 0x509   : > { %v4014_v10 = vsel %vm408_vm4, %v4012_v41, %v4013_v54  ;;  %v4033_v5 = vrot.slane %v4027_v39, 2  ;;  %v4034_v22 = vrot.slane %v4028_v32, 2  ;;  %v4047_v44 = vstv %s8435_s18  ;;  %s8537_s18 = sld [smem:[#allocation7 + $0x91]] }
 0x50a   : > { %v4016_v43 = vsel %vm408_vm4, %v4013_v54, %v4015_v40  ;;  %v4036_v37 = vrot.slane %v4029_v15, 2  ;;  %v4062_v23 = vmul.f32 %v4061_v52, %v8336_v42  ;;  %v4048_v19 = vmul.f32 %v4047_v44, %v8336_v42 }
 0x50b   : > { %3784 = vrot.lane.b32.xlu1 %v3781_v60, %s9327_s0  ;;  %v4035_v8 = vsel %vm426_vm5, %v4033_v5, %v4034_v22  ;;  %v4063_v60 = vmul.f32 %v4061_v52, %v8339_v31  ;;  %v4064_v51 = vmul.f32 %v4061_v52, %v8352_v55  ;;  %v4049_v61 = vmul.f32 %v4047_v44, %v8339_v31 }
 0x50c   : > { %3840 = vrot.lane.b32.xlu0 %v3836_v2, %s6286_s29  ;;  %v4082_v2 = vstv %s5961_s20  ;;  %v4037_v48 = vsel %vm426_vm5, %v4034_v22, %v4036_v37  ;;  %v4068_v38 = vrot.slane %v4062_v23, 1  ;;  %v4161_v16 = vstv %s5966_s5  ;;  %s8548_s20 = sld [smem:[#allocation7 + $0x97]]  ;;  %s8562_s5 = sld [smem:[#allocation7 + $0x95]] }
 0x50d   : > { %v4069_v63 = vrot.slane %v4063_v60, 1  ;;  %v4084_v3 = vmul.f32 %v4082_v2, %v8339_v31  ;;  %v4085_v36 = vmul.f32 %v4082_v2, %v8352_v55  ;;  %v4147_v34 = vstv %s8456_s9  ;;  %s8572_s9 = sld [smem:[#allocation7 + $0x92]] }
 0x50e   : > { %v4162_v17 = vmul.f32 %v4161_v16, %v8336_v42  ;;  %v4148_v27 = vmul.f32 %v4147_v34, %v8336_v42  ;;  %v4164_v4 = vmul.f32 %v4161_v16, %v8352_v55  ;;  %v4149_v0 = vmul.f32 %v4147_v34, %v8339_v31 }
 0x50f   : > { %3842 = vrot.lane.b32.xlu1 %v3837_v59, %s6286_s29  ;;  %v4083_v59 = vmul.f32 %v4082_v2, %v8336_v42  ;;  %v4070_v45 = vsel %vm408_vm4, %v4068_v38, %v4069_v63  ;;  %v4092_v50 = vrot.slane %v4085_v36, 2  ;;  %v4217_v20 = vstv %s5969_s30  ;;  %s8586_s30 = sld [smem:[#allocation7 + $0x27]] }
 0x510   : > { %3861 = vrot.lane.b32.xlu0 %v3858_v56, %s6286_s29  ;;  %v4071_v56 = vrot.slane %v4064_v51, 1  ;;  %v4168_v6 = vrot.slane %v4162_v17, 1  ;;  %v4203_v26 = vstv %s8477_s28  ;;  %v4218_v29 = vmul.f32 %v4217_v20, %v8336_v42  ;;  %s8595_s28 = sld [smem:[#allocation7 + $0x24]] }
 0x511   : > { %v4089_v12 = vrot.slane %v4083_v59, 2  ;;  %v4204_v41 = vmul.f32 %v4203_v26, %v8336_v42  ;;  %v4220_v54 = vmul.f32 %v4217_v20, %v8352_v55  ;;  %v4205_v15 = vmul.f32 %v4203_v26, %v8339_v31 }
 0x512   : > { %v4224_v39 = vrot.slane %v4218_v29, 1  ;;  %v4317_v37 = vstv %s5975_s13  ;;  %v4303_v60 = vstv %s8498_s12  ;;  %v3645_v17 = vstv %s5936_s1  ;;  %s5954_s13 = sld [smem:[#allocation7 + $0x42]]  ;;  %s8647_s12 = sld [smem:[#allocation7 + $0x3f]] }
 0x513   : > { %3863 = vrot.lane.b32.xlu1 %v3860_v18, %s6286_s29  ;;  %v4090_v18 = vrot.slane %v4084_v3, 2  ;;  %v4318_v2 = vmul.f32 %v4317_v37, %v8336_v42  ;;  %v4304_v38 = vmul.f32 %v4303_v60, %v8336_v42  ;;  %v4305_v36 = vmul.f32 %v4303_v60, %v8339_v31  ;;  %s5972_s1 = sld [smem:[#allocation7 + $0x78]] }
 0x514   : > { %3882 = vrot.lane.b32.xlu0 %v3879_v30, %s6286_s29  ;;  %v4072_v30 = vsel %vm408_vm4, %v4069_v63, %v4071_v56  ;;  %v4320_v63 = vmul.f32 %v4317_v37, %v8352_v55  ;;  %v3648_v29 = vmul.f32 %v3645_v17, %v8352_v55 }
 0x515   : > { %v4091_v21 = vsel %vm426_vm5, %v4089_v12, %v4090_v18  ;;  %v4093_v14 = vsel %vm426_vm5, %v4090_v18, %v4092_v50  ;;  %v4324_v59 = vrot.slane %v4318_v2, 1  ;;  %v4373_v50 = vstv %s5978_s2  ;;  %s5964_s2 = sld [smem:[#allocation7 + $0x60]] }
 0x516   : > { %v4494_v2 = vstv %s8548_s20  ;;  %s5993_s20 = sld [smem:[#allocation7 + $0x16]] }
 0x517   : > { %3884 = vrot.lane.b32.xlu1 %v3881_v62, %s6286_s29  ;;  %v4163_v62 = vmul.f32 %v4161_v16, %v8339_v31 }
 0x518   : > { %3896 = vrot.lane.b32.xlu0 %v3892_v46, %s9327_s0  ;;  %v4182_v46 = vstv %s5967_s16  ;;  %s8582_s16 = sld [smem:[#allocation7 + $0x98]] }
 0x519   : > { %v4169_v53 = vrot.slane %v4163_v62, 1  ;;  %v4184_v57 = vmul.f32 %v4182_v46, %v8339_v31  ;;  %v4185_v25 = vmul.f32 %v4182_v46, %v8352_v55 }
 0x51b   : > { %3898 = vrot.lane.b32.xlu1 %v3893_v28, %s9327_s0  ;;  %v4183_v28 = vmul.f32 %v4182_v46, %v8336_v42  ;;  %v4170_v11 = vsel %vm408_vm4, %v4168_v6, %v4169_v53  ;;  %v4192_v13 = vrot.slane %v4185_v25, 2  ;;  %v4359_v46 = vstv %s8519_s3  ;;  %s8687_s3 = sld [smem:[#allocation7 + $0x75]] }
 0x51c   : > { %3917 = vrot.lane.b32.xlu0 %v3914_v9, %s9327_s0  ;;  %v4171_v9 = vrot.slane %v4164_v4, 1  ;;  %v4394_v4 = vstv %s5979_s4  ;;  %v3646_v6 = vmul.f32 %v3645_v17, %v8336_v42  ;;  %s5973_s4 = sld [smem:[#allocation7 + $0x7b]] }
 0x51d   : > { %v4189_v7 = vrot.slane %v4183_v28, 2  ;;  %v4360_v28 = vmul.f32 %v4359_v46, %v8336_v42 }
 0x51f   : > { %3919 = vrot.lane.b32.xlu1 %v3916_v33, %s9327_s0  ;;  %v4190_v33 = vrot.slane %v4184_v57, 2  ;;  %v3647_v57 = vmul.f32 %v3645_v17, %v8339_v31 }
 0x520   : > { %3938 = vrot.lane.b32.xlu0 %v3935_v24, %s9327_s0  ;;  %v4172_v24 = vsel %vm408_vm4, %v4169_v53, %v4171_v9 }
 0x521   : > { %v4191_v49 = vsel %vm426_vm5, %v4189_v7, %v4190_v33  ;;  %v4193_v58 = vsel %vm426_vm5, %v4190_v33, %v4192_v13  ;;  %v4396_v7 = vmul.f32 %v4394_v4, %v8339_v31  ;;  %v3639_v33 = vstv %s8527_s19  ;;  %s5981_s19 = sld [smem:[#allocation7 + $0x93]] }
 0x522   : > { %v3662_v13 = vstv %s5937_s17  ;;  %v3641_v60 = vmul.f32 %v3639_v33, %v8339_v31  ;;  %s8704_s17 = sld [smem:[#allocation7 + $0x90]] }
 0x523   : > { %3940 = vrot.lane.b32.xlu1 %v3937_v35, %s9327_s0  ;;  %v4219_v35 = vmul.f32 %v4217_v20, %v8339_v31  ;;  %v4361_v20 = vmul.f32 %v4359_v46, %v8339_v31 }
 0x524   : > { %3996 = vrot.lane.b32.xlu0 %v3992_v47, %s6286_s29  ;;  %v4238_v47 = vstv %s5970_s26  ;;  %s8597_s26 = sld [smem:[#allocation7 + $0x2a]] }
 0x525   : > { %v4225_v32 = vrot.slane %v4219_v35, 1  ;;  %v4240_v40 = vmul.f32 %v4238_v47, %v8339_v31  ;;  %v4241_v5 = vmul.f32 %v4238_v47, %v8352_v55  ;;  %v4397_v35 = vmul.f32 %v4394_v4, %v8352_v55 }
 0x527   : > { %3998 = vrot.lane.b32.xlu1 %v3993_v1, %s6286_s29  ;;  %v4239_v1 = vmul.f32 %v4238_v47, %v8336_v42  ;;  %v4226_v22 = vsel %vm408_vm4, %v4224_v39, %v4225_v32  ;;  %v4248_v44 = vrot.slane %v4241_v5, 2  ;;  %v4473_v39 = vstv %s5984_s15  ;;  %s5982_s15 = sld [smem:[#allocation7 + $0x96]] }
 0x528   : > { %4017 = vrot.lane.b32.xlu0 %v4014_v10, %s6286_s29  ;;  %v4227_v10 = vrot.slane %v4220_v54, 1  ;;  %v4402_v54 = vrot.slane %v4396_v7, 2 }
 0x529   : > { %v4245_v52 = vrot.slane %v4239_v1, 2  ;;  %v3664_v1 = vmul.f32 %v3662_v13, %v8339_v31 }
 0x52b   : > { %4019 = vrot.lane.b32.xlu1 %v4016_v43, %s6286_s29  ;;  %v4246_v43 = vrot.slane %v4240_v40, 2  ;;  %v4459_v40 = vstv %s8537_s18  ;;  %s5992_s18 = sld [smem:[#allocation7 + $0x13]] }
 0x52c   : > { %4038 = vrot.lane.b32.xlu0 %v4035_v8, %s6286_s29  ;;  %v4228_v8 = vsel %vm408_vm4, %v4225_v32, %v4227_v10  ;;  %v3663_v32 = vmul.f32 %v3662_v13, %v8336_v42  ;;  %v4461_v17 = vmul.f32 %v4459_v40, %v8339_v31 }
 0x52d   : > { %v4247_v23 = vsel %vm426_vm5, %v4245_v52, %v4246_v43  ;;  %v4249_v51 = vsel %vm426_vm5, %v4246_v43, %v4248_v44  ;;  %v3655_v52 = vrot.slane %v3648_v29, 1  ;;  %v4404_v43 = vrot.slane %v4397_v35, 2 }
 0x52e   : > { %v4474_v44 = vmul.f32 %v4473_v39, %v8336_v42 }
 0x52f   : > { %4040 = vrot.lane.b32.xlu1 %v4037_v48, %s6286_s29  ;;  %v4319_v48 = vmul.f32 %v4317_v37, %v8339_v31 }
 0x530   : > { %4052 = vrot.lane.b32.xlu0 %v4048_v19, %s9327_s0  ;;  %v4338_v19 = vstv %s5976_s14  ;;  %s5955_s14 = sld [smem:[#allocation7 + $0x45]] }
 0x531   : > { %v4325_v3 = vrot.slane %v4319_v48, 1  ;;  %v4340_v56 = vmul.f32 %v4338_v19, %v8339_v31  ;;  %v4341_v12 = vmul.f32 %v4338_v19, %v8352_v55 }
 0x533   : > { %4054 = vrot.lane.b32.xlu1 %v4049_v61, %s9327_s0  ;;  %v4339_v61 = vmul.f32 %v4338_v19, %v8336_v42  ;;  %v4326_v18 = vsel %vm408_vm4, %v4324_v59, %v4325_v3  ;;  %v4348_v34 = vrot.slane %v4341_v12, 2  ;;  %v3669_v19 = vrot.slane %v3663_v32, 2 }
 0x534   : > { %4073 = vrot.lane.b32.xlu0 %v4070_v45, %s9327_s0  ;;  %v4327_v45 = vrot.slane %v4320_v63, 1  ;;  %v4480_v12 = vrot.slane %v4474_v44, 1 }
 0x535   : > { %v4345_v16 = vrot.slane %v4339_v61, 2  ;;  %v4405_v61 = vsel %vm426_vm5, %v4402_v54, %v4404_v43 }
 0x537   : > { %4075 = vrot.lane.b32.xlu1 %v4072_v30, %s9327_s0  ;;  %v4346_v30 = vrot.slane %v4340_v56, 2  ;;  %v4460_v56 = vmul.f32 %v4459_v40, %v8336_v42 }
 0x538   : > { %4094 = vrot.lane.b32.xlu0 %v4091_v21, %s9327_s0  ;;  %v4328_v21 = vsel %vm408_vm4, %v4325_v3, %v4327_v45  ;;  %v3637_v45 = vld [vmem:[#allocation3 + $0x8] sm:$0xff] }
 0x539   : > { %v4347_v62 = vsel %vm426_vm5, %v4345_v16, %v4346_v30  ;;  %v4349_v53 = vsel %vm426_vm5, %v4346_v30, %v4348_v34  ;;  %v4495_v16 = vmul.f32 %v4494_v2, %v8336_v42  ;;  %v4496_v30 = vmul.f32 %v4494_v2, %v8339_v31 }
 0x53b   : > { %4096 = vrot.lane.b32.xlu1 %v4093_v14, %s9327_s0  ;;  %v4374_v14 = vmul.f32 %v4373_v50, %v8336_v42 }
 0x53c   : > { %4152 = vrot.lane.b32.xlu0 %v4148_v27, %s6286_s29  ;;  %v4375_v27 = vmul.f32 %v4373_v50, %v8339_v31 }
 0x53d   : > { %v4380_v9 = vrot.slane %v4374_v14, 1 }
 0x53e   : > { %v4381_v25 = vrot.slane %v4375_v27, 1 }
 0x53f   : > { %4154 = vrot.lane.b32.xlu1 %v4149_v0, %s6286_s29  ;;  %v4376_v0 = vmul.f32 %v4373_v50, %v8352_v55  ;;  %v3643_v50 = vadd.f32 %v3641_v60, %v3637_v45 }
 0x540   : > { %4173 = vrot.lane.b32.xlu0 %v4170_v11, %s6286_s29  ;;  %v4395_v11 = vmul.f32 %v4394_v4, %v8336_v42  ;;  %v4382_v47 = vsel %vm408_vm4, %v4380_v9, %v4381_v25 }
 0x541   : > { %v4383_v26 = vrot.slane %v4376_v0, 1  ;;  %v4502_v0 = vrot.slane %v4496_v30, 2 }
 0x543   : > { %4175 = vrot.lane.b32.xlu1 %v4172_v24, %s6286_s29  ;;  %v3652_v24 = vrot.slane %v3646_v6, 1  ;;  %v4529_v6 = vstv %s8562_s5  ;;  %s5994_s5 = sld [smem:[#allocation7 + $0x19]] }
 0x544   : > { %4194 = vrot.lane.b32.xlu0 %v4191_v49, %s6286_s29  ;;  %v3653_v49 = vrot.slane %v3647_v57, 1  ;;  %v4501_v57 = vrot.slane %v4495_v16, 2 }
 0x546   : > { %v3654_v10 = vsel %vm408_vm4, %v3652_v24, %v3653_v49  ;;  %v3656_v59 = vsel %vm408_vm4, %v3653_v49, %v3655_v52  ;;  %v4530_v49 = vmul.f32 %v4529_v6, %v8336_v42  ;;  %v4503_v35 = vsel %vm426_vm5, %v4501_v57, %v4502_v0 }
 0x547   : > { %4196 = vrot.lane.b32.xlu1 %v4193_v58, %s6286_s29  ;;  %v3640_v58 = vmul.f32 %v3639_v33, %v8336_v42  ;;  %v3660_v14 = vadd.f32 %v3656_v59, %v3643_v50  ;;  %v4515_v33 = vstv %s8572_s9  ;;  %v4572_v50 = vld [vmem:[#allocation2 + $0x20] sm:$0xff]  ;;  %s5996_s9 = sld [smem:[#allocation7 + $0x17]] }
 0x548   : > { %4208 = vrot.lane.b32.xlu0 %v4204_v41, %s9327_s0  ;;  %v4401_v41 = vrot.slane %v4395_v11, 2  ;;  %v4516_v32 = vmul.f32 %v4515_v33, %v8336_v42  ;;  %v4578_v57 = vrot.slane %v4572_v50, 7 }
 0x54b   : > { %4210 = vrot.lane.b32.xlu1 %v4205_v15, %s9327_s0  ;;  %v3636_v15 = vld [vmem:[#allocation3] sm:$0xff] }
 0x54c   : > { %4229 = vrot.lane.b32.xlu0 %v4226_v22, %s9327_s0  ;;  %v4384_v22 = vsel %vm408_vm4, %v4381_v25, %v4383_v26  ;;  %v3642_v37 = vadd.f32 %v3640_v58, %v3636_v15  ;;  %v4531_v26 = vmul.f32 %v4529_v6, %v8339_v31  ;;  %v4550_v58 = vstv %s8582_s16  ;;  %s5995_s16 = sld [smem:[#allocation7 + $0x14]] }
 0x54d   : > { %v4551_v43 = vmul.f32 %v4550_v58, %v8336_v42 }
 0x54e   : > { %v3659_v48 = vadd.f32 %v3654_v10, %v3642_v37  ;;  %v4536_v10 = vrot.slane %v4530_v49, 1  ;;  %v4552_v37 = vmul.f32 %v4550_v58, %v8339_v31 }
 0x54f   : > { %4231 = vrot.lane.b32.xlu1 %v4228_v8, %s9327_s0  ;;  %v4403_v8 = vsel %vm426_vm5, %v4401_v41, %v4402_v54 }
 0x550   : > { %4250 = vrot.lane.b32.xlu0 %v4247_v23, %s9327_s0  ;;  %v4475_v23 = vmul.f32 %v4473_v39, %v8339_v31  ;;  %v4558_v45 = vrot.slane %v4552_v37, 2 }
 0x553   : > { %4252 = vrot.lane.b32.xlu1 %v4249_v51, %s9327_s0  ;;  %v3670_v51 = vrot.slane %v3664_v1, 2  ;;  %v3801_v1 = vstv %s8586_s30  ;;  %s5997_s30 = sld [smem:[#allocation7 + $0x1a]] }
 0x554   : > { %4308 = vrot.lane.b32.xlu0 %v4304_v38, %s6286_s29  ;;  %v3665_v38 = vmul.f32 %v3662_v13, %v8352_v55  ;;  %v3802_v44 = vmul.f32 %v3801_v1, %v8336_v42 }
 0x555   : > { %v3671_v46 = vsel %vm426_vm5, %v3669_v19, %v3670_v51  ;;  %v3795_v19 = vstv %s8595_s28  ;;  %s6002_s28 = sld [smem:[#allocation7 + $0x31]] }
 0x556   : > { %v3808_v16 = vrot.slane %v3802_v44, 1 }
 0x557   : > { %4310 = vrot.lane.b32.xlu1 %v4305_v36, %s6286_s29  ;;  %v4476_v36 = vmul.f32 %v4473_v39, %v8352_v55 }
 0x558   : > { %4329 = vrot.lane.b32.xlu0 %v4326_v18, %s6286_s29  ;;  %v4481_v18 = vrot.slane %v4475_v23, 1  ;;  %v3803_v23 = vmul.f32 %v3801_v1, %v8339_v31 }
 0x559   : > { %v4483_v4 = vrot.slane %v4476_v36, 1  ;;  %v4557_v36 = vrot.slane %v4551_v43, 2 }
 0x55a   : > { %v3809_v30 = vrot.slane %v3803_v23, 1 }
 0x55b   : > { %4331 = vrot.lane.b32.xlu1 %v4328_v21, %s6286_s29  ;;  %v3672_v21 = vrot.slane %v3665_v38, 2  ;;  %v4484_v13 = vsel %vm408_vm4, %v4481_v18, %v4483_v4 }
 0x55c   : > { %4350 = vrot.lane.b32.xlu0 %v4347_v62, %s6286_s29  ;;  %v4497_v62 = vmul.f32 %v4494_v2, %v8352_v55 }
 0x55d   : > { %v3673_v25 = vsel %vm426_vm5, %v3670_v51, %v3672_v21  ;;  %v3818_v51 = vstv %s8597_s26  ;;  %s6001_s26 = sld [smem:[#allocation7 + $0x2e]] }
 0x55e   : > { %v4504_v7 = vrot.slane %v4497_v62, 2 }
 0x55f   : > { %4352 = vrot.lane.b32.xlu1 %v4349_v53, %s6286_s29  ;;  %v3676_v53 = vadd.f32 %v3671_v46, %v3659_v48  ;;  %v4517_v48 = vmul.f32 %v4515_v33, %v8339_v31  ;;  %v3820_v46 = vmul.f32 %v3818_v51, %v8339_v31  ;;  %v3821_v33 = vmul.f32 %v3818_v51, %v8352_v55 }
 0x560   : > { %4364 = vrot.lane.b32.xlu0 %v4360_v28, %s9327_s0  ;;  %v4482_v28 = vsel %vm408_vm4, %v4480_v12, %v4481_v18  ;;  %v4505_v39 = vsel %vm426_vm5, %v4502_v0, %v4504_v7  ;;  %v3804_v12 = vmul.f32 %v3801_v1, %v8352_v55  ;;  %v4573_v0 = vld [vmem:[#allocation2 + $0x28] sm:$0xff] }
 0x563   : > { %4366 = vrot.lane.b32.xlu1 %v4361_v20, %s9327_s0  ;;  %v3677_v20 = vadd.f32 %v3673_v25, %v3660_v14  ;;  %v3810_v25 = vsel %vm408_vm4, %v3808_v16, %v3809_v30  ;;  %v3951_v16 = vstv %s8647_s12  ;;  %s6005_s12 = sld [smem:[#allocation7 + $0x32]] }
 0x564   : > { %4385 = vrot.lane.b32.xlu0 %v4382_v47, %s9327_s0 }
 0x566   : > { %v3685_v5 = vpop.permute.xlu0 %3684 }
 0x567   : > { %4387 = vrot.lane.b32.xlu1 %v4384_v22, %s9327_s0  ;;  %v3687_v63 = vpop.permute.xlu1 %3686  ;;  %v3690_v9 = vadd.f32 %v3685_v5, %v3676_v53  ;;  %v4537_v5 = vrot.slane %v4531_v26, 1  ;;  %v4532_v22 = vmul.f32 %v4529_v6, %v8352_v55  ;;  %v4559_v6 = vsel %vm426_vm5, %v4557_v36, %v4558_v45 }
 0x568   : > { %4406 = vrot.lane.b32.xlu0 %v4403_v8, %s9327_s0  ;;  %v3691_v47 = vadd.f32 %v3687_v63, %v3677_v20  ;;  %v3811_v53 = vrot.slane %v3804_v12, 1 }
 0x569   : > { %v4538_v59 = vsel %vm408_vm4, %v4536_v10, %v4537_v5 }
 0x56a   : > { %v3706_v3 = vpop.permute.xlu0 %3705 }
 0x56b   : > { %4408 = vrot.lane.b32.xlu1 %v4405_v61, %s9327_s0  ;;  %v3711_v29 = vadd.f32 %v3706_v3, %v3690_v9  ;;  %v4539_v3 = vrot.slane %v4532_v22, 1  ;;  %v4553_v61 = vmul.f32 %v4550_v58, %v8352_v55  ;;  %v3792_v9 = vld [vmem:[#allocation3 + $0x10] sm:$0xff]  ;;  %v3812_v58 = vsel %vm408_vm4, %v3809_v30, %v3811_v53 }
 0x56c   : > { %4464 = vrot.lane.b32.xlu0 %v4460_v56, %s6286_s29 }
 0x56d   : > { %v3708_v34 = vpop.permute.xlu1 %3707  ;;  %v4560_v4 = vrot.slane %v4553_v61, 2 }
 0x56e   : > { %v3727_v27 = vpop.permute.xlu0 %3726  ;;  %v3712_v40 = vadd.f32 %v3708_v34, %v3691_v47  ;;  %v3796_v34 = vmul.f32 %v3795_v19, %v8336_v42  ;;  %v3793_v47 = vld [vmem:[#allocation3 + $0x18] sm:$0xff] }
 0x56f   : > { %4466 = vrot.lane.b32.xlu1 %v4461_v17, %s6286_s29  ;;  %v3732_v41 = vadd.f32 %v3727_v27, %v3711_v29  ;;  %v3819_v17 = vmul.f32 %v3818_v51, %v8336_v42  ;;  %v4540_v27 = vsel %vm408_vm4, %v4537_v5, %v4539_v3  ;;  %v4561_v26 = vsel %vm426_vm5, %v4558_v45, %v4560_v4 }
 0x570   : > { %4485 = vrot.lane.b32.xlu0 %v4482_v28, %s6286_s29  ;;  %v4575_v28 = vrot.slane %v4572_v50, 1  ;;  %v3798_v7 = vadd.f32 %v3796_v34, %v3792_v9  ;;  %v4579_v29 = vrot.slane %v4573_v0, 7  ;;  %v3957_v51 = vstv %s5954_s13  ;;  %s6003_s13 = sld [smem:[#allocation7 + $0x34]] }
 0x571   : > { %v3729_v11 = vpop.permute.xlu1 %3728  ;;  %v3958_v61 = vmul.f32 %v3957_v51, %v8336_v42  ;;  %v3974_v50 = vstv %s5955_s14  ;;  %v3953_v9 = vmul.f32 %v3951_v16, %v8339_v31  ;;  %s6004_s14 = sld [smem:[#allocation7 + $0x2f]] }
 0x572   : > { %v3741_v24 = vpop.permute.xlu0 %3740  ;;  %v3733_v8 = vadd.f32 %v3729_v11, %v3712_v40  ;;  %v3797_v11 = vmul.f32 %v3795_v19, %v8339_v31  ;;  %v4580_v5 = vsel %vm345_vm0, %v4578_v57, %v4579_v29  ;;  %v3975_v4 = vmul.f32 %v3974_v50, %v8336_v42 }
 0x573   : > { %4487 = vrot.lane.b32.xlu1 %v4484_v13, %s6286_s29  ;;  %v3746_v52 = vadd.f32 %v3741_v24, %v3732_v41  ;;  %v3825_v24 = vrot.slane %v3819_v17, 2  ;;  %v3826_v13 = vrot.slane %v3820_v46, 2  ;;  %v4585_v41 = vsel %vm345_vm0, %v4575_v28, %v4578_v57  ;;  %v3948_v57 = vld [vmem:[#allocation3 + $0x20] sm:$0xff] }
 0x574   : > { %4506 = vrot.lane.b32.xlu0 %v4503_v35, %s6286_s29  ;;  %v3815_v35 = vadd.f32 %v3810_v25, %v3798_v7  ;;  %v3964_v17 = vrot.slane %v3958_v61, 1  ;;  %v4130_v61 = vstv %s5964_s2  ;;  %s6010_s2 = sld [smem:[#allocation7 + $0x49]] }
 0x575   : > { %v3743_v54 = vpop.permute.xlu1 %3742  ;;  %v3827_v40 = vsel %vm426_vm5, %v3825_v24, %v3826_v13 }
 0x576   : > { %v3762_v15 = vpop.permute.xlu0 %3761  ;;  %v3747_v38 = vadd.f32 %v3743_v54, %v3733_v8  ;;  %v4583_v54 = vrot.slane %v4573_v0, 5  ;;  %v3832_v22 = vadd.f32 %v3827_v40, %v3815_v35 }
 0x577   : > { %4508 = vrot.lane.b32.xlu1 %v4505_v39, %s6286_s29  ;;  %v3767_v60 = vadd.f32 %v3762_v15, %v3746_v52  ;;  %v3799_v39 = vadd.f32 %v3797_v11, %v3793_v47  ;;  %v3977_v11 = vmul.f32 %v3974_v50, %v8352_v55 }
 0x578   : > { %4520 = vrot.lane.b32.xlu0 %v4516_v32, %s9327_s0  ;;  %v3828_v32 = vrot.slane %v3821_v33, 2  ;;  %v4586_v52 = vsel %vm345_vm0, %v4579_v29, %v4583_v54  ;;  %v3981_v33 = vrot.slane %v3975_v4, 2  ;;  %v4133_v4 = vmul.f32 %v4130_v61, %v8352_v55 }
 0x579   : > { %v3764_v2 = vpop.permute.xlu1 %3763  ;;  %v3816_v15 = vadd.f32 %v3812_v58, %v3799_v39  ;;  %v3984_v35 = vrot.slane %v3977_v11, 2 }
 0x57a   : > { %v3783_v63 = vpop.permute.xlu0 %3782  ;;  %v3768_v18 = vadd.f32 %v3764_v2, %v3747_v38  ;;  %v3829_v37 = vsel %vm426_vm5, %v3826_v13, %v3828_v32 }
 0x57b   : > { %v3788_v56 = vadd.f32 %v3783_v63, %v3767_v60  ;;  %4522 = vrot.lane.b32.xlu1 %v4517_v48, %s9327_s0  ;;  %v3833_v44 = vadd.f32 %v3829_v37, %v3816_v15 }
 0x57c   : > { %4541 = vrot.lane.b32.xlu0 %v4538_v59, %s9327_s0 }
 0x57d   : > { %3790 = vst.msk [vmem:[#allocation3] sm:$0xff] %vm324_vm1, %v3788_v56  ;;  %v3785_v21 = vpop.permute.xlu1 %3784  ;;  %v3959_v56 = vmul.f32 %v3957_v51, %v8339_v31 }
 0x57e   : > { %v3789_v62 = vadd.f32 %v3785_v21, %v3768_v18  ;;  %v3841_v14 = vpop.permute.xlu0 %3840  ;;  %v3960_v21 = vmul.f32 %v3957_v51, %v8352_v55 }
 0x57f   : > { %4543 = vrot.lane.b32.xlu1 %v4540_v27, %s9327_s0  ;;  %v3846_v43 = vadd.f32 %v3841_v14, %v3832_v22  ;;  %v3952_v14 = vmul.f32 %v3951_v16, %v8336_v42 }
 0x580   : > { %3791 = vst.msk [vmem:[#allocation3 + $0x8] sm:$0xff] %vm324_vm1, %v3789_v62  ;;  %4562 = vrot.lane.b32.xlu0 %v4559_v6, %s9327_s0  ;;  %v3965_v62 = vrot.slane %v3959_v56, 1  ;;  %v3976_v6 = vmul.f32 %v3974_v50, %v8339_v31  ;;  %v3967_v28 = vrot.slane %v3960_v21, 1  ;;  %v4131_v50 = vmul.f32 %v4130_v61, %v8336_v42 }
 0x581   : > { %v3843_v20 = vpop.permute.xlu1 %3842  ;;  %v3954_v25 = vadd.f32 %v3952_v14, %v3948_v57  ;;  %v4132_v21 = vmul.f32 %v4130_v61, %v8339_v31 }
 0x582   : > { %v3862_v49 = vpop.permute.xlu0 %3861  ;;  %v3847_v2 = vadd.f32 %v3843_v20, %v3833_v44  ;;  %v3966_v0 = vsel %vm408_vm4, %v3964_v17, %v3965_v62  ;;  %v3982_v20 = vrot.slane %v3976_v6, 2 }
 0x583   : > { %4564 = vrot.lane.b32.xlu1 %v4561_v26, %s9327_s0  ;;  %v3867_v60 = vadd.f32 %v3862_v49, %v3846_v43  ;;  %v3971_v13 = vadd.f32 %v3966_v0, %v3954_v25  ;;  %v3949_v49 = vld [vmem:[#allocation3 + $0x28] sm:$0xff]  ;;  %v3968_v26 = vsel %vm408_vm4, %v3965_v62, %v3967_v28  ;;  %v4104_v62 = vld [vmem:[#allocation3 + $0x30] sm:$0xff]  ;;  %v4138_v28 = vrot.slane %v4132_v21, 2 }
 0x584   : > { %4589 = vrot.lane.b32.xlu0 %v4585_v41, %s6286_s29  ;;  %v3955_v29 = vadd.f32 %v3953_v9, %v3949_v49  ;;  %v3983_v58 = vsel %vm426_vm5, %v3981_v33, %v3982_v20  ;;  %v4105_v9 = vld [vmem:[#allocation3 + $0x38] sm:$0xff] }
 0x585   : > { %v3864_v1 = vpop.permute.xlu1 %3863  ;;  %v3988_v39 = vadd.f32 %v3983_v58, %v3971_v13 }
 0x586   : > { %v3883_v10 = vpop.permute.xlu0 %3882  ;;  %v3868_v38 = vadd.f32 %v3864_v1, %v3847_v2  ;;  %v3985_v1 = vsel %vm426_vm5, %v3982_v20, %v3984_v35 }
 0x587   : > { %4591 = vrot.lane.b32.xlu1 %v4580_v5, %s6286_s29  ;;  %v3888_v48 = vadd.f32 %v3883_v10, %v3867_v60 }
 0x588   : > { %4593 = vrot.lane.b32.xlu0 %v4586_v52, %s6286_s29 }
 0x589   : > { %v3885_v8 = vpop.permute.xlu1 %3884 }
 0x58a   : > { %v3897_v23 = vpop.permute.xlu0 %3896  ;;  %v3889_v3 = vadd.f32 %v3885_v8, %v3868_v38 }
 0x58b   : > { %4598 = vrot.lane.b32.xlu1 %v4585_v41, %s9328_s10  ;;  %v3902_v59 = vadd.f32 %v3897_v23, %v3888_v48 }
 0x58c   : > { %4600 = vrot.lane.b32.xlu0 %v4580_v5, %s9328_s10 }
 0x58d   : > { %v3899_v19 = vpop.permute.xlu1 %3898 }
 0x58e   : > { %v3918_v63 = vpop.permute.xlu0 %3917  ;;  %v3903_v12 = vadd.f32 %v3899_v19, %v3889_v3 }
 0x58f   : > { %4602 = vrot.lane.b32.xlu1 %v4586_v52, %s9328_s10  ;;  %v3923_v36 = vadd.f32 %v3918_v63, %v3902_v59  ;;  %s5963_s10 = sld [smem:[#allocation7 + $0x5d]] }
 0x590   : > { %4607 = vrot.lane.b32.xlu0 %v4585_v41, %s9329_s11  ;;  %v3972_v41 = vadd.f32 %v3968_v26, %v3955_v29 }
 0x591   : > { %v3920_v45 = vpop.permute.xlu1 %3919 }
 0x592   : > { %v3939_v18 = vpop.permute.xlu0 %3938  ;;  %v3924_v34 = vadd.f32 %v3920_v45, %v3903_v12  ;;  %v3989_v15 = vadd.f32 %v3985_v1, %v3972_v41  ;;  %v4269_v1 = vstv %s5972_s1  ;;  %s6012_s1 = sld [smem:[#allocation7 + $0x4f]] }
 0x593   : > { %v3944_v30 = vadd.f32 %v3939_v18, %v3923_v36  ;;  %4609 = vrot.lane.b32.xlu1 %v4580_v5, %s9329_s11 }
 0x594   : > { %4611 = vrot.lane.b32.xlu0 %v4586_v52, %s9329_s11  ;;  %s8670_s11 = sld [smem:[#allocation7 + $0x5a]] }
 0x595   : > { %3946 = vst.msk [vmem:[#allocation3 + $0x10] sm:$0xff] %vm324_vm1, %v3944_v30  ;;  %v3941_v46 = vpop.permute.xlu1 %3940  ;;  %v4113_v37 = vstv %s5963_s10  ;;  %s6006_s10 = sld [smem:[#allocation7 + $0x35]] }
 0x596   : > { %v3945_v27 = vadd.f32 %v3941_v46, %v3924_v34  ;;  %v3997_v53 = vpop.permute.xlu0 %3996  ;;  %v4114_v2 = vmul.f32 %v4113_v37, %v8336_v42  ;;  %v4115_v48 = vmul.f32 %v4113_v37, %v8339_v31  ;;  %v4116_v56 = vmul.f32 %v4113_v37, %v8352_v55 }
 0x597   : > { %v4002_v32 = vadd.f32 %v3997_v53, %v3988_v39  ;;  %v4137_v53 = vrot.slane %v4131_v50, 2 }
 0x598   : > { %3947 = vst.msk [vmem:[#allocation3 + $0x18] sm:$0xff] %vm324_vm1, %v3945_v27  ;;  %v4120_v45 = vrot.slane %v4114_v2, 1  ;;  %v4121_v12 = vrot.slane %v4115_v48, 1  ;;  %v4123_v17 = vrot.slane %v4116_v56, 1  ;;  %v4286_v2 = vstv %s5973_s4  ;;  %s6013_s4 = sld [smem:[#allocation7 + $0x4a]] }
 0x599   : > { %v3999_v7 = vpop.permute.xlu1 %3998  ;;  %v4139_v20 = vsel %vm426_vm5, %v4137_v53, %v4138_v28  ;;  %v4272_v48 = vmul.f32 %v4269_v1, %v8352_v55  ;;  %v4287_v61 = vmul.f32 %v4286_v2, %v8336_v42  ;;  %v4288_v56 = vmul.f32 %v4286_v2, %v8339_v31 }
 0x59a   : > { %v4018_v24 = vpop.permute.xlu0 %4017  ;;  %v4003_v22 = vadd.f32 %v3999_v7, %v3989_v15  ;;  %v4107_v59 = vstv %s8670_s11  ;;  %v4122_v46 = vsel %vm408_vm4, %v4120_v45, %v4121_v12  ;;  %v4124_v25 = vsel %vm408_vm4, %v4121_v12, %v4123_v17  ;;  %v4260_v12 = vld [vmem:[#allocation3 + $0x40] sm:$0xff]  ;;  %s6011_s11 = sld [smem:[#allocation7 + $0x4c]] }
 0x59b   : > { %v4023_v5 = vadd.f32 %v4018_v24, %v4002_v32  ;;  %v4108_v16 = vmul.f32 %v4107_v59, %v8336_v42  ;;  %v4109_v14 = vmul.f32 %v4107_v59, %v8339_v31  ;;  %v4140_v7 = vrot.slane %v4133_v4, 2 }
 0x59c   : > { %v4279_v45 = vrot.slane %v4272_v48, 1  ;;  %v4289_v50 = vmul.f32 %v4286_v2, %v8352_v55  ;;  %v4294_v17 = vrot.slane %v4288_v56, 2 }
 0x59d   : > { %v4020_v47 = vpop.permute.xlu1 %4019  ;;  %v4110_v27 = vadd.f32 %v4108_v16, %v4104_v62  ;;  %v4111_v11 = vadd.f32 %v4109_v14, %v4105_v9  ;;  %v4141_v29 = vsel %vm426_vm5, %v4138_v28, %v4140_v7  ;;  %v4261_v14 = vld [vmem:[#allocation3 + $0x48] sm:$0xff] }
 0x59e   : > { %v4039_v54 = vpop.permute.xlu0 %4038  ;;  %v4024_v8 = vadd.f32 %v4020_v47, %v4003_v22  ;;  %v4270_v22 = vmul.f32 %v4269_v1, %v8336_v42 }
 0x59f   : > { %v4044_v52 = vadd.f32 %v4039_v54, %v4023_v5  ;;  %v4127_v0 = vadd.f32 %v4122_v46, %v4110_v27  ;;  %v4128_v24 = vadd.f32 %v4124_v25, %v4111_v11 }
 0x5a1   : > { %v4041_v40 = vpop.permute.xlu1 %4040  ;;  %v4144_v49 = vadd.f32 %v4139_v20, %v4127_v0  ;;  %v4145_v47 = vadd.f32 %v4141_v29, %v4128_v24  ;;  %v4425_v29 = vstv %s5981_s19  ;;  %s6019_s19 = sld [smem:[#allocation7 + $0x64]] }
 0x5a2   : > { %v4053_v10 = vpop.permute.xlu0 %4052  ;;  %v4045_v60 = vadd.f32 %v4041_v40, %v4024_v8 }
 0x5a3   : > { %v4058_v23 = vadd.f32 %v4053_v10, %v4044_v52  ;;  %v4271_v52 = vmul.f32 %v4269_v1, %v8339_v31 }
 0x5a5   : > { %v4055_v43 = vpop.permute.xlu1 %4054 }
 0x5a6   : > { %v4074_v44 = vpop.permute.xlu0 %4073  ;;  %v4059_v38 = vadd.f32 %v4055_v43, %v4045_v60 }
 0x5a7   : > { %v4079_v19 = vadd.f32 %v4074_v44, %v4058_v23  ;;  %v4263_v23 = vstv %s8687_s3  ;;  %s6014_s3 = sld [smem:[#allocation7 + $0x4d]] }
 0x5a8   : > { %v4264_v59 = vmul.f32 %v4263_v23, %v8336_v42  ;;  %v4265_v16 = vmul.f32 %v4263_v23, %v8339_v31 }
 0x5a9   : > { %v4076_v51 = vpop.permute.xlu1 %4075 }
 0x5aa   : > { %v4095_v63 = vpop.permute.xlu0 %4094  ;;  %v4080_v36 = vadd.f32 %v4076_v51, %v4059_v38  ;;  %v4276_v51 = vrot.slane %v4270_v22, 1  ;;  %v4277_v38 = vrot.slane %v4271_v52, 1  ;;  %v4267_v4 = vadd.f32 %v4265_v16, %v4261_v14 }
 0x5ab   : > { %v4100_v3 = vadd.f32 %v4095_v63, %v4079_v19  ;;  %v4442_v22 = vstv %s5982_s15  ;;  %v4428_v52 = vmul.f32 %v4425_v29, %v8352_v55  ;;  %s6020_s15 = sld [smem:[#allocation7 + $0x67]] }
 0x5ac   : > { %v4280_v27 = vsel %vm408_vm4, %v4277_v38, %v4279_v45  ;;  %v4443_v2 = vmul.f32 %v4442_v22, %v8336_v42  ;;  %v4444_v48 = vmul.f32 %v4442_v22, %v8339_v31 }
 0x5ad   : > { %4102 = vst.msk [vmem:[#allocation3 + $0x20] sm:$0xff] %vm324_vm1, %v4100_v3  ;;  %v4097_v18 = vpop.permute.xlu1 %4096 }
 0x5ae   : > { %v4101_v30 = vadd.f32 %v4097_v18, %v4080_v36  ;;  %v4153_v34 = vpop.permute.xlu0 %4152  ;;  %v4278_v18 = vsel %vm408_vm4, %v4276_v51, %v4277_v38  ;;  %v4435_v51 = vrot.slane %v4428_v52, 1  ;;  %v4416_v38 = vld [vmem:[#allocation3 + $0x50] sm:$0xff]  ;;  %v4450_v45 = vrot.slane %v4444_v48, 2 }
 0x5af   : > { %v4158_v26 = vadd.f32 %v4153_v34, %v4144_v49  ;;  %v4293_v34 = vrot.slane %v4287_v61, 2  ;;  %v4445_v61 = vmul.f32 %v4442_v22, %v8352_v55 }
 0x5b0   : > { %4103 = vst.msk [vmem:[#allocation3 + $0x28] sm:$0xff] %vm324_vm1, %v4101_v30  ;;  %v4266_v30 = vadd.f32 %v4264_v59, %v4260_v12 }
 0x5b1   : > { %v4155_v6 = vpop.permute.xlu1 %4154  ;;  %v4295_v28 = vsel %vm426_vm5, %v4293_v34, %v4294_v17 }
 0x5b2   : > { %v4174_v57 = vpop.permute.xlu0 %4173  ;;  %v4159_v54 = vadd.f32 %v4155_v6, %v4145_v47  ;;  %v4283_v46 = vadd.f32 %v4278_v18, %v4266_v30  ;;  %v4296_v6 = vrot.slane %v4289_v50, 2  ;;  %v4452_v50 = vrot.slane %v4445_v61, 2 }
 0x5b3   : > { %v4179_v41 = vadd.f32 %v4174_v57, %v4158_v26  ;;  %v4284_v57 = vadd.f32 %v4280_v27, %v4267_v4 }
 0x5b4   : > { %v4300_v9 = vadd.f32 %v4295_v28, %v4283_v46  ;;  %v4297_v11 = vsel %vm426_vm5, %v4294_v17, %v4296_v6  ;;  %v4453_v14 = vsel %vm426_vm5, %v4450_v45, %v4452_v50 }
 0x5b5   : > { %v4176_v33 = vpop.permute.xlu1 %4175 }
 0x5b6   : > { %v4195_v13 = vpop.permute.xlu0 %4194  ;;  %v4180_v40 = vadd.f32 %v4176_v33, %v4159_v54  ;;  %v4301_v33 = vadd.f32 %v4297_v11, %v4284_v57  ;;  %v4426_v54 = vmul.f32 %v4425_v29, %v8336_v42 }
 0x5b7   : > { %v4200_v39 = vadd.f32 %v4195_v13, %v4179_v41 }
 0x5b9   : > { %v4197_v35 = vpop.permute.xlu1 %4196 }
 0x5ba   : > { %v4209_v58 = vpop.permute.xlu0 %4208  ;;  %v4201_v5 = vadd.f32 %v4197_v35, %v4180_v40 }
 0x5bb   : > { %v4214_v10 = vadd.f32 %v4209_v58, %v4200_v39  ;;  %v4427_v39 = vmul.f32 %v4425_v29, %v8339_v31 }
 0x5bd   : > { %v4211_v32 = vpop.permute.xlu1 %4210 }
 0x5be   : > { %v4230_v15 = vpop.permute.xlu0 %4229  ;;  %v4215_v8 = vadd.f32 %v4211_v32, %v4201_v5 }
 0x5bf   : > { %v4235_v43 = vadd.f32 %v4230_v15, %v4214_v10  ;;  %v4419_v10 = vstv %s8704_s17  ;;  %s6028_s17 = sld [smem:[#allocation7 + $0x7f]] }
 0x5c0   : > { %v4420_v23 = vmul.f32 %v4419_v10, %v8336_v42  ;;  %v4421_v59 = vmul.f32 %v4419_v10, %v8339_v31  ;;  %v4417_v42 = vld [vmem:[#allocation3 + $0x58] sm:$0xff] }
 0x5c1   : > { %v4232_v37 = vpop.permute.xlu1 %4231 }
 0x5c2   : > { %v4251_v44 = vpop.permute.xlu0 %4250  ;;  %v4236_v19 = vadd.f32 %v4232_v37, %v4215_v8  ;;  %v4432_v37 = vrot.slane %v4426_v54, 1  ;;  %v4433_v8 = vrot.slane %v4427_v39, 1  ;;  %v4423_v30 = vadd.f32 %v4421_v59, %v4417_v42 }
 0x5c3   : > { %v4256_v60 = vadd.f32 %v4251_v44, %v4235_v43  ;;  %v4735_v42 = vstv %s5996_s9  ;;  %s6021_s9 = sld [smem:[#allocation7 + $0x6a]] }
 0x5c4   : > { %v4436_v16 = vsel %vm408_vm4, %v4433_v8, %v4435_v51 }
 0x5c5   : > { %4258 = vst.msk [vmem:[#allocation3 + $0x30] sm:$0xff] %vm324_vm1, %v4256_v60  ;;  %v4253_v63 = vpop.permute.xlu1 %4252  ;;  %v4440_v17 = vadd.f32 %v4436_v16, %v4423_v30  ;;  %v4721_v30 = vstv %s5995_s16  ;;  %s6030_s16 = sld [smem:[#allocation7 + $0x85]] }
 0x5c6   : > { %v4257_v3 = vadd.f32 %v4253_v63, %v4236_v19  ;;  %v4309_v36 = vpop.permute.xlu0 %4308  ;;  %v4434_v63 = vsel %vm408_vm4, %v4432_v37, %v4433_v8 }
 0x5c7   : > { %v4314_v25 = vadd.f32 %v4309_v36, %v4300_v9  ;;  %v4449_v36 = vrot.slane %v4443_v2, 2  ;;  %v4457_v27 = vadd.f32 %v4453_v14, %v4440_v17 }
 0x5c8   : > { %4259 = vst.msk [vmem:[#allocation3 + $0x38] sm:$0xff] %vm324_vm1, %v4257_v3  ;;  %v4422_v3 = vadd.f32 %v4420_v23, %v4416_v38  ;;  %v4700_v23 = vstv %s5994_s5  ;;  %s6038_s5 = sld [smem:[#allocation7 + $0x9d]] }
 0x5c9   : > { %v4311_v21 = vpop.permute.xlu1 %4310  ;;  %v4451_v34 = vsel %vm426_vm5, %v4449_v36, %v4450_v45 }
 0x5ca   : > { %v4330_v62 = vpop.permute.xlu0 %4329  ;;  %v4315_v13 = vadd.f32 %v4311_v21, %v4301_v33  ;;  %v4439_v18 = vadd.f32 %v4434_v63, %v4422_v3 }
 0x5cb   : > { %v4335_v24 = vadd.f32 %v4330_v62, %v4314_v25 }
 0x5cc   : > { %v4456_v46 = vadd.f32 %v4451_v34, %v4439_v18 }
 0x5cd   : > { %v4332_v53 = vpop.permute.xlu1 %4331 }
 0x5ce   : > { %v4351_v0 = vpop.permute.xlu0 %4350  ;;  %v4336_v35 = vadd.f32 %v4332_v53, %v4315_v13 }
 0x5cf   : > { %v4356_v49 = vadd.f32 %v4351_v0, %v4335_v24 }
 0x5d1   : > { %v4353_v7 = vpop.permute.xlu1 %4352 }
 0x5d2   : > { %v4365_v20 = vpop.permute.xlu0 %4364  ;;  %v4357_v41 = vadd.f32 %v4353_v7, %v4336_v35 }
 0x5d3   : > { %v4370_v58 = vadd.f32 %v4365_v20, %v4356_v49 }
 0x5d5   : > { %v4367_v26 = vpop.permute.xlu1 %4366 }
 0x5d6   : > { %v4386_v47 = vpop.permute.xlu0 %4385  ;;  %v4371_v40 = vadd.f32 %v4367_v26, %v4357_v41 }
 0x5d7   : > { %v4391_v32 = vadd.f32 %v4386_v47, %v4370_v58 }
 0x5d9   : > { %v4388_v1 = vpop.permute.xlu1 %4387 }
 0x5da   : > { %v4407_v15 = vpop.permute.xlu0 %4406  ;;  %v4392_v43 = vadd.f32 %v4388_v1, %v4371_v40 }
 0x5db   : > { %v4412_v5 = vadd.f32 %v4407_v15, %v4391_v32  ;;  %v4665_v32 = vstv %s5992_s18  ;;  %v4679_v15 = vstv %s5993_s20  ;;  %s6037_s18 = sld [smem:[#allocation7 + $0x9a]] }
 0x5dc   : > { %s6029_s20 = sld [smem:[#allocation7 + $0x82]] }
 0x5dd   : > { %4414 = vst.msk [vmem:[#allocation3 + $0x40] sm:$0xff] %vm324_vm1, %v4412_v5  ;;  %v4409_v44 = vpop.permute.xlu1 %4408 }
 0x5de   : > { %v4413_v60 = vadd.f32 %v4409_v44, %v4392_v43  ;;  %v4465_v19 = vpop.permute.xlu0 %4464 }
 0x5df   : > { %v4470_v31 = vadd.f32 %v4465_v19, %v4456_v46  ;;  %v4756_v46 = vstv %s5997_s30  ;;  %s6039_s30 = sld [smem:[#allocation7 + $0xa0]] }
 0x5e0   : > { %4415 = vst.msk [vmem:[#allocation3 + $0x48] sm:$0xff] %vm324_vm1, %v4413_v60 }
 0x5e1   : > { %v4467_v56 = vpop.permute.xlu1 %4466 }
 0x5e2   : > { %v4486_v12 = vpop.permute.xlu0 %4485  ;;  %v4471_v53 = vadd.f32 %v4467_v56, %v4457_v27 }
 0x5e3   : > { %v4491_v6 = vadd.f32 %v4486_v12, %v4470_v31 }
 0x5e5   : > { %v4488_v21 = vpop.permute.xlu1 %4487 }
 0x5e6   : > { %v4507_v62 = vpop.permute.xlu0 %4506  ;;  %v4492_v0 = vadd.f32 %v4488_v21, %v4471_v53 }
 0x5e7   : > { %v4512_v28 = vadd.f32 %v4507_v62, %v4491_v6 }
 0x5e9   : > { %v4509_v55 = vpop.permute.xlu1 %4508 }
 0x5ea   : > { %v4521_v4 = vpop.permute.xlu0 %4520  ;;  %v4513_v11 = vadd.f32 %v4509_v55, %v4492_v0 }
 0x5eb   : > { %v4526_v25 = vadd.f32 %v4521_v4, %v4512_v28 }
 0x5ed   : > { %v4523_v57 = vpop.permute.xlu1 %4522 }
 0x5ee   : > { %v4542_v9 = vpop.permute.xlu0 %4541  ;;  %v4527_v20 = vadd.f32 %v4523_v57, %v4513_v11  ;;  %v4835_v11 = vstv %s6002_s28  ;;  %s6022_s28 = sld [smem:[#allocation7 + $0x65]] }
 0x5ef   : > { %v4547_v7 = vadd.f32 %v4542_v9, %v4526_v25 }
 0x5f1   : > { %v4544_v33 = vpop.permute.xlu1 %4543 }
 0x5f2   : > { %v4563_v24 = vpop.permute.xlu0 %4562  ;;  %v4548_v49 = vadd.f32 %v4544_v33, %v4527_v20  ;;  %v4821_v33 = vstv %s6001_s26  ;;  %s6031_s26 = sld [smem:[#allocation7 + $0x80]] }
 0x5f3   : > { %v4568_v13 = vadd.f32 %v4563_v24, %v4547_v7 }
 0x5f5   : > { %4570 = vst.msk [vmem:[#allocation3 + $0x50] sm:$0xff] %vm324_vm1, %v4568_v13  ;;  %v4565_v26 = vpop.permute.xlu1 %4564 }
 0x5f6   : > { %v4569_v29 = vadd.f32 %v4565_v26, %v4548_v49  ;;  %v4590_v35 = vpop.permute.xlu0 %4589 }
 0x5f8   : > { %4571 = vst.msk [vmem:[#allocation3 + $0x58] sm:$0xff] %vm324_vm1, %v4569_v29  ;;  %v4856_v29 = vstv %s6003_s13  ;;  %s8893_s13 = sld [smem:[#allocation7 + $0x9b]] }
 0x5f9   : > { %v4592_v47 = vpop.permute.xlu1 %4591 }
 0x5fa   : > { %v4594_v58 = vpop.permute.xlu0 %4593 }
 0x5fd   : > { %v4599_v41 = vpop.permute.xlu1 %4598 }
 0x5fe   : > { %v4601_v54 = vpop.permute.xlu0 %4600  ;;  %v4616_v1 = vsel %vm384_vm2, %v4590_v35, %v4599_v41 }
 0x5ff   : > { %v4617_v22 = vsel %vm384_vm2, %v4592_v47, %v4601_v54 }
 0x601   : > { %v4603_v39 = vpop.permute.xlu1 %4602 }
 0x602   : > { %v4608_v40 = vpop.permute.xlu0 %4607  ;;  %v4618_v37 = vsel %vm384_vm2, %v4594_v58, %v4603_v39 }
 0x603   : > { %v8725_v10 = vsel %vm388_vm3, %v4616_v1, %v4608_v40 }
 0x604   : > { %v4666_v5 = vmul.f32 %v4665_v32, %v8725_v10  ;;  %v4680_v43 = vmul.f32 %v4679_v15, %v8725_v10  ;;  %v4701_v3 = vmul.f32 %v4700_v23, %v8725_v10  ;;  %v4736_v17 = vmul.f32 %v4735_v42, %v8725_v10 }
 0x605   : > { %v4610_v52 = vpop.permute.xlu1 %4609  ;;  %v4722_v62 = vmul.f32 %v4721_v30, %v8725_v10  ;;  %v4757_v53 = vmul.f32 %v4756_v46, %v8725_v10  ;;  %v4836_v49 = vmul.f32 %v4835_v11, %v8725_v10  ;;  %v4822_v26 = vmul.f32 %v4821_v33, %v8725_v10 }
 0x606   : > { %v8732_v8 = vsel %vm388_vm3, %v4617_v22, %v4610_v52  ;;  %4670 = vrot.lane.b32.xlu1 %v4666_v5, %s6286_s29  ;;  %v4612_v44 = vpop.permute.xlu0 %4611  ;;  %v4686_v63 = vrot.slane %v4680_v43, 1  ;;  %v4707_v18 = vrot.slane %v4701_v3, 2  ;;  %v4742_v6 = vrot.slane %v4736_v17, 1 }
 0x607   : > { %v8736_v60 = vsel %vm388_vm3, %v4618_v37, %v4612_v44  ;;  %v4667_v2 = vmul.f32 %v4665_v32, %v8732_v8  ;;  %v4681_v48 = vmul.f32 %v4679_v15, %v8732_v8  ;;  %v4702_v19 = vmul.f32 %v4700_v23, %v8732_v8 }
 0x608   : > { %v4682_v51 = vmul.f32 %v4679_v15, %v8736_v60  ;;  %v4703_v38 = vmul.f32 %v4700_v23, %v8736_v60  ;;  %v4737_v50 = vmul.f32 %v4735_v42, %v8732_v8  ;;  %v4738_v34 = vmul.f32 %v4735_v42, %v8736_v60 }
 0x609   : > { %4672 = vrot.lane.b32.xlu0 %v4667_v2, %s6286_s29  ;;  %v4687_v59 = vrot.slane %v4681_v48, 1  ;;  %v4708_v36 = vrot.slane %v4702_v19, 2  ;;  %v4723_v31 = vmul.f32 %v4721_v30, %v8732_v8  ;;  %v4758_v55 = vmul.f32 %v4756_v46, %v8732_v8 }
 0x60a   : > { %v4689_v61 = vrot.slane %v4682_v51, 1  ;;  %v4710_v12 = vrot.slane %v4703_v38, 2  ;;  %v4743_v14 = vrot.slane %v4737_v50, 1  ;;  %v4745_v27 = vrot.slane %v4738_v34, 1 }
 0x60b   : > { %v4688_v56 = vsel %vm408_vm4, %v4686_v63, %v4687_v59  ;;  %v4709_v16 = vsel %vm426_vm5, %v4707_v18, %v4708_v36  ;;  %v4759_v4 = vmul.f32 %v4756_v46, %v8736_v60  ;;  %v4764_v57 = vrot.slane %v4758_v55, 2 }
 0x60c   : > { %4691 = vrot.lane.b32.xlu1 %v4688_v56, %s6286_s29  ;;  %v4690_v45 = vsel %vm408_vm4, %v4687_v59, %v4689_v61  ;;  %v4711_v21 = vsel %vm426_vm5, %v4708_v36, %v4710_v12  ;;  %v4744_v28 = vsel %vm408_vm4, %v4742_v6, %v4743_v14  ;;  %v4746_v0 = vsel %vm408_vm4, %v4743_v14, %v4745_v27 }
 0x60d   : > { %4693 = vrot.lane.b32.xlu0 %v4690_v45, %s6286_s29  ;;  %v4766_v9 = vrot.slane %v4759_v4, 2  ;;  %v4763_v25 = vrot.slane %v4757_v53, 2  ;;  %v4837_v20 = vmul.f32 %v4835_v11, %v8732_v8  ;;  %v4838_v13 = vmul.f32 %v4835_v11, %v8736_v60 }
 0x60e   : > { %v4823_v35 = vmul.f32 %v4821_v33, %v8732_v8  ;;  %v4858_v58 = vmul.f32 %v4856_v29, %v8732_v8  ;;  %v4859_v54 = vmul.f32 %v4856_v29, %v8736_v60  ;;  %v4842_v39 = vrot.slane %v4836_v49, 1 }
 0x60f   : > { %v4765_v7 = vsel %vm426_vm5, %v4763_v25, %v4764_v57  ;;  %v4767_v24 = vsel %vm426_vm5, %v4764_v57, %v4766_v9  ;;  %v4843_v47 = vrot.slane %v4837_v20, 1  ;;  %v4845_v41 = vrot.slane %v4838_v13, 1 }
 0x610   : > { %4712 = vrot.lane.b32.xlu1 %v4709_v16, %s6286_s29  ;;  %v4857_v32 = vmul.f32 %v4856_v29, %v8725_v10  ;;  %v4864_v40 = vrot.slane %v4858_v58, 2  ;;  %v4866_v5 = vrot.slane %v4859_v54, 2  ;;  %v4891_v52 = vstv %s6005_s12  ;;  %s5990_s12 = sld [smem:[#allocation7 + $0x15]] }
 0x611   : > { %4714 = vrot.lane.b32.xlu0 %v4711_v21, %s6286_s29  ;;  %v4844_v1 = vsel %vm408_vm4, %v4842_v39, %v4843_v47  ;;  %v4846_v15 = vsel %vm408_vm4, %v4843_v47, %v4845_v41  ;;  %v4877_v37 = vstv %s6004_s14  ;;  %v4893_v44 = vmul.f32 %v4891_v52, %v8732_v8  ;;  %s6023_s14 = sld [smem:[#allocation7 + $0x68]] }
 0x612   : > { %v4863_v22 = vrot.slane %v4857_v32, 2  ;;  %v4867_v23 = vsel %vm426_vm5, %v4864_v40, %v4866_v5  ;;  %v4894_v2 = vmul.f32 %v4891_v52, %v8736_v60  ;;  %v4892_v48 = vmul.f32 %v4891_v52, %v8725_v10 }
 0x613   : > { %v4878_v19 = vmul.f32 %v4877_v37, %v8725_v10  ;;  %v4912_v51 = vstv %s6006_s10  ;;  %v4879_v38 = vmul.f32 %v4877_v37, %v8732_v8  ;;  %v4899_v63 = vrot.slane %v4893_v44, 1  ;;  %s8900_s10 = sld [smem:[#allocation7 + $0x12]] }
 0x614   : > { %4726 = vrot.lane.b32.xlu1 %v4722_v62, %s9327_s0  ;;  %v4865_v43 = vsel %vm426_vm5, %v4863_v22, %v4864_v40  ;;  %v4914_v59 = vmul.f32 %v4912_v51, %v8732_v8  ;;  %v4901_v3 = vrot.slane %v4894_v2, 1  ;;  %v4915_v61 = vmul.f32 %v4912_v51, %v8736_v60 }
 0x615   : > { %4728 = vrot.lane.b32.xlu0 %v4723_v31, %s9327_s0  ;;  %v4898_v56 = vrot.slane %v4892_v48, 1  ;;  %v4913_v36 = vmul.f32 %v4912_v51, %v8725_v10  ;;  %v4991_v30 = vstv %s6011_s11  ;;  %v4977_v21 = vstv %s6010_s2  ;;  %s5991_s11 = sld [smem:[#allocation7 + $0x18]]  ;;  %s6032_s2 = sld [smem:[#allocation7 + $0x83]] }
 0x616   : > { %v4920_v12 = vrot.slane %v4914_v59, 2  ;;  %v4902_v18 = vsel %vm408_vm4, %v4899_v63, %v4901_v3  ;;  %v4922_v42 = vrot.slane %v4915_v61, 2  ;;  %v4993_v34 = vmul.f32 %v4991_v30, %v8732_v8 }
 0x617   : > { %v4900_v45 = vsel %vm408_vm4, %v4898_v56, %v4899_v63  ;;  %v4919_v16 = vrot.slane %v4913_v36, 2  ;;  %v4994_v62 = vmul.f32 %v4991_v30, %v8736_v60  ;;  %v4992_v46 = vmul.f32 %v4991_v30, %v8725_v10 }
 0x618   : > { %4747 = vrot.lane.b32.xlu1 %v4744_v28, %s9327_s0  ;;  %v4923_v17 = vsel %vm426_vm5, %v4920_v12, %v4922_v42  ;;  %v4978_v31 = vmul.f32 %v4977_v21, %v8725_v10  ;;  %v5012_v14 = vstv %s6012_s1  ;;  %v4979_v55 = vmul.f32 %v4977_v21, %v8732_v8  ;;  %s8923_s1 = sld [smem:[#allocation7 + $0x50]] }
 0x619   : > { %4749 = vrot.lane.b32.xlu0 %v4746_v0, %s9327_s0  ;;  %v4921_v50 = vsel %vm426_vm5, %v4919_v16, %v4920_v12  ;;  %v4999_v27 = vrot.slane %v4993_v34, 1  ;;  %v5014_v4 = vmul.f32 %v5012_v14, %v8732_v8  ;;  %v5001_v6 = vrot.slane %v4994_v62, 1 }
 0x61a   : > { %v5015_v53 = vmul.f32 %v5012_v14, %v8736_v60  ;;  %v4998_v28 = vrot.slane %v4992_v46, 1  ;;  %v5013_v57 = vmul.f32 %v5012_v14, %v8725_v10  ;;  %v8821_v33 = vstv %s6014_s3  ;;  %s8937_s3 = sld [smem:[#allocation7 + $0x6b]] }
 0x61b   : > { %v5020_v9 = vrot.slane %v5014_v4, 2  ;;  %v5002_v25 = vsel %vm408_vm4, %v4999_v27, %v5001_v6  ;;  %v8826_v13 = vmul.f32 %v8821_v33, %v8732_v8  ;;  %v5133_v58 = vstv %s6019_s19  ;;  %s8966_s19 = sld [smem:[#allocation7 + $0x30]] }
 0x61c   : > { %4768 = vrot.lane.b32.xlu1 %v4765_v7, %s9327_s0  ;;  %v5000_v0 = vsel %vm408_vm4, %v4998_v28, %v4999_v27  ;;  %v5022_v11 = vrot.slane %v5015_v53, 2  ;;  %v5019_v7 = vrot.slane %v5013_v57, 2  ;;  %v5134_v39 = vmul.f32 %v5133_v58, %v8725_v10 }
 0x61d   : > { %4770 = vrot.lane.b32.xlu0 %v4767_v24, %s9327_s0  ;;  %v5033_v24 = vstv %s6013_s4  ;;  %v5055_v47 = vrot.slane %v8826_v13, 1  ;;  %v5289_v32 = vstv %s6028_s17  ;;  %v5445_v5 = vstv %s6037_s18  ;;  %s8954_s4 = sld [smem:[#allocation7 + $0x86]]  ;;  %s8968_s17 = sld [smem:[#allocation7 + $0xa1]] }
 0x61e   : > { %v5021_v20 = vsel %vm426_vm5, %v5019_v7, %v5020_v9  ;;  %v5023_v49 = vsel %vm426_vm5, %v5020_v9, %v5022_v11  ;;  %v5034_v29 = vmul.f32 %v5033_v24, %v8725_v10  ;;  %v5290_v40 = vmul.f32 %v5289_v32, %v8725_v10  ;;  %s8987_s18 = sld [smem:[#allocation7 + $0x33]] }
 0x61f   : > { %v5291_v52 = vmul.f32 %v5289_v32, %v8732_v8  ;;  %v5446_v37 = vmul.f32 %v5445_v5, %v8725_v10  ;;  %v5459_v3 = vstv %s6038_s5  ;;  %v5168_v30 = vstv %s6021_s9  ;;  %s6008_s9 = sld [smem:[#allocation7 + $0x4b]] }
 0x620   : > { %4826 = vrot.lane.b32.xlu1 %v4822_v26, %s6286_s29  ;;  %v5048_v26 = vmul.f32 %v8821_v33, %v8725_v10  ;;  %v5461_v36 = vmul.f32 %v5459_v3, %v8732_v8  ;;  %v5460_v12 = vmul.f32 %v5459_v3, %v8725_v10  ;;  %v5462_v16 = vmul.f32 %v5459_v3, %v8736_v60 }
 0x621   : > { %4828 = vrot.lane.b32.xlu0 %v4823_v35, %s6286_s29  ;;  %v5035_v35 = vmul.f32 %v5033_v24, %v8732_v8  ;;  %v5170_v34 = vmul.f32 %v5168_v30, %v8732_v8  ;;  %v5169_v62 = vmul.f32 %v5168_v30, %v8725_v10  ;;  %v5171_v14 = vmul.f32 %v5168_v30, %v8736_v60 }
 0x622   : > { %v5054_v41 = vrot.slane %v5048_v26, 1  ;;  %v5467_v21 = vrot.slane %v5461_v36, 1  ;;  %v4648_v36 = vstv %s5991_s11  ;;  %s9103_s11 = sld [smem:[#allocation7 + $0x99]] }
 0x623   : > { %v5176_v4 = vrot.slane %v5170_v34, 2  ;;  %v5175_v53 = vrot.slane %v5169_v62, 2  ;;  %v4651_v13 = vmul.f32 %v4648_v36, %v8736_v60 }
 0x624   : > { %4847 = vrot.lane.b32.xlu1 %v4844_v1, %s6286_s29  ;;  %v5056_v54 = vsel %vm408_vm4, %v5054_v41, %v5055_v47  ;;  %v5135_v1 = vmul.f32 %v5133_v58, %v8732_v8 }
 0x625   : > { %4849 = vrot.lane.b32.xlu0 %v4846_v15, %s6286_s29  ;;  %v5147_v15 = vstv %s6020_s15  ;;  %v5177_v11 = vsel %vm426_vm5, %v5175_v53, %v5176_v4  ;;  %s8978_s15 = sld [smem:[#allocation7 + $0x2d]] }
 0x626   : > { %v5149_v22 = vmul.f32 %v5147_v15, %v8732_v8  ;;  %v5150_v44 = vmul.f32 %v5147_v15, %v8736_v60 }
 0x628   : > { %4868 = vrot.lane.b32.xlu1 %v4865_v43, %s6286_s29  ;;  %v5148_v43 = vmul.f32 %v5147_v15, %v8725_v10  ;;  %v5155_v2 = vrot.slane %v5149_v22, 1  ;;  %v5157_v63 = vrot.slane %v5150_v44, 1  ;;  %v5345_v22 = vstv %s6031_s26  ;;  %s9088_s26 = sld [smem:[#allocation7 + $0x63]] }
 0x629   : > { %4870 = vrot.lane.b32.xlu0 %v4867_v23, %s6286_s29  ;;  %v5303_v23 = vstv %s6029_s20  ;;  %v5050_v44 = vmul.f32 %v8821_v33, %v8736_v60  ;;  %v4625_v33 = vstv %s8900_s10  ;;  %s309_s20 = sand.u32 1, %s6272_s22   ;;  %s6027_s10 = sld [smem:[#allocation7 + $0x84]] }
 0x62a   : > { %v5305_v48 = vmul.f32 %v5303_v23, %v8732_v8  ;;  %v5154_v51 = vrot.slane %v5148_v43, 1  ;;  %v5306_v59 = vmul.f32 %v5303_v23, %v8736_v60  ;;  %v5346_v43 = vmul.f32 %v5345_v22, %v8725_v10  ;;  %s6057_s5 = smul.u32 96, %s309_s20 }
 0x62c   : > { %4882 = vrot.lane.b32.xlu1 %v4878_v19, %s9327_s0  ;;  %v5447_v19 = vmul.f32 %v5445_v5, %v8732_v8  ;;  %v5156_v61 = vsel %vm408_vm4, %v5154_v51, %v5155_v2  ;;  %v5311_v56 = vrot.slane %v5305_v48, 1  ;;  %v5313_v42 = vrot.slane %v5306_v59, 1 }
 0x62d   : > { %4884 = vrot.lane.b32.xlu0 %v4879_v38, %s9327_s0  ;;  %v5304_v38 = vmul.f32 %v5303_v23, %v8725_v10  ;;  %v5347_v23 = vmul.f32 %v5345_v22, %v8732_v8  ;;  %v5203_v48 = vstv %s6023_s14  ;;  %s9099_s14 = sld [smem:[#allocation7 + $0x7e]] }
 0x62e   : > { %v5314_v46 = vsel %vm408_vm4, %v5311_v56, %v5313_v42  ;;  %v5206_v59 = vmul.f32 %v5203_v48, %v8736_v60  ;;  %v8926_v42 = vmul.f32 %v4648_v36, %v8732_v8 }
 0x630   : > { %4903 = vrot.lane.b32.xlu1 %v4900_v45, %s9327_s0  ;;  %v5310_v45 = vrot.slane %v5304_v38, 1  ;;  %v5205_v38 = vmul.f32 %v5203_v48, %v8732_v8  ;;  %v5213_v34 = vrot.slane %v5206_v59, 1 }
 0x631   : > { %4905 = vrot.lane.b32.xlu0 %v4902_v18, %s9327_s0  ;;  %v5158_v18 = vsel %vm408_vm4, %v5155_v2, %v5157_v63  ;;  %v4631_v2 = vstv %s5990_s12  ;;  %v5057_v63 = vrot.slane %v5050_v44, 1  ;;  %s6026_s12 = sld [smem:[#allocation7 + $0x81]] }
 0x632   : > { %v4633_v51 = vmul.f32 %v4631_v2, %v8732_v8  ;;  %v4632_v3 = vmul.f32 %v4631_v2, %v8725_v10 }
 0x634   : > { %4924 = vrot.lane.b32.xlu1 %v4921_v50, %s9327_s0  ;;  %v5312_v50 = vsel %vm408_vm4, %v5310_v45, %v5311_v56  ;;  %v5204_v56 = vmul.f32 %v5203_v48, %v8725_v10  ;;  %v4638_v62 = vrot.slane %v4632_v3, 1 }
 0x635   : > { %4926 = vrot.lane.b32.xlu0 %v4923_v17, %s9327_s0  ;;  %v5466_v17 = vrot.slane %v5460_v12, 1  ;;  %v5359_v12 = vstv %s6032_s2  ;;  %s6035_s2 = sld [smem:[#allocation7 + $0x9c]] }
 0x636   : > { %v5361_v30 = vmul.f32 %v5359_v12, %v8732_v8 }
 0x637   : > { %v5468_v27 = vsel %vm408_vm4, %v5466_v17, %v5467_v21  ;;  %v5362_v17 = vmul.f32 %v5359_v12, %v8736_v60 }
 0x638   : > { %4982 = vrot.lane.b32.xlu1 %v4978_v31, %s6286_s29  ;;  %v5469_v31 = vrot.slane %v5462_v16, 1  ;;  %v5211_v16 = vrot.slane %v5205_v38, 1 }
 0x639   : > { %4984 = vrot.lane.b32.xlu0 %v4979_v55, %s6286_s29  ;;  %v5324_v55 = vstv %s6030_s16  ;;  %s9023_s16 = sld [smem:[#allocation7 + $0x48]] }
 0x63a   : > { %v5326_v6 = vmul.f32 %v5324_v55, %v8732_v8  ;;  %v5325_v28 = vmul.f32 %v5324_v55, %v8725_v10  ;;  %v5470_v57 = vsel %vm408_vm4, %v5467_v21, %v5469_v31  ;;  %v5327_v9 = vmul.f32 %v5324_v55, %v8736_v60 }
 0x63b   : > { %v5058_v21 = vsel %vm408_vm4, %v5055_v47, %v5057_v63  ;;  %v5210_v31 = vrot.slane %v5204_v56, 1 }
 0x63c   : > { %5003 = vrot.lane.b32.xlu1 %v5000_v0, %s6286_s29  ;;  %v5178_v0 = vrot.slane %v5171_v14, 2  ;;  %v5332_v7 = vrot.slane %v5326_v6, 2  ;;  %v5331_v24 = vrot.slane %v5325_v28, 2  ;;  %v5360_v14 = vmul.f32 %v5359_v12, %v8725_v10  ;;  %v4622_v6 = vld [vmem:[#allocation3] sm:$0xff] }
 0x63d   : > { %5005 = vrot.lane.b32.xlu0 %v5002_v25, %s6286_s29  ;;  %v5480_v25 = vstv %s6039_s30  ;;  %s9025_s30 = scalar_lea.vmem [#allocation12], %s6057_s5 }
 0x63e   : > { %v5179_v26 = vsel %vm426_vm5, %v5176_v4, %v5178_v0  ;;  %v5333_v58 = vsel %vm426_vm5, %v5331_v24, %v5332_v7  ;;  %v4627_v4 = vmul.f32 %v4625_v33, %v8732_v8  ;;  %v5367_v0 = vrot.slane %v5361_v30, 1 }
 0x63f   : > { %v4656_v24 = vrot.slane %v8926_v42, 2 }
 0x640   : > { %5024 = vrot.lane.b32.xlu1 %v5021_v20, %s6286_s29  ;;  %v5482_v20 = vmul.f32 %v5480_v25, %v8732_v8 }
 0x641   : > { %5026 = vrot.lane.b32.xlu0 %v5023_v49, %s6286_s29  ;;  %v5481_v49 = vmul.f32 %v5480_v25, %v8725_v10 }
 0x642   : > { %v5488_v41 = vrot.slane %v5482_v20, 2 }
 0x644   : > { %5038 = vrot.lane.b32.xlu1 %v5034_v29, %s9327_s0  ;;  %v5334_v29 = vrot.slane %v5327_v9, 2 }
 0x645   : > { %5040 = vrot.lane.b32.xlu0 %v5035_v35, %s9327_s0  ;;  %v5483_v35 = vmul.f32 %v5480_v25, %v8736_v60 }
 0x647   : > { %v5490_v32 = vrot.slane %v5483_v35, 2 }
 0x648   : > { %5059 = vrot.lane.b32.xlu1 %v5056_v54, %s9327_s0  ;;  %v5487_v54 = vrot.slane %v5481_v49, 2  ;;  %v4623_v49 = vld [vmem:[#allocation3 + $0x8] sm:$0xff] }
 0x649   : > { %5138 = vrot.lane.b32.xlu0 %v5134_v39, %s6286_s29  ;;  %v5335_v39 = vsel %vm426_vm5, %v5332_v7, %v5334_v29  ;;  %v5491_v15 = vsel %vm426_vm5, %v5488_v41, %v5490_v32  ;;  %v5369_v7 = vrot.slane %v5362_v17, 1  ;;  %v5366_v29 = vrot.slane %v5360_v14, 1 }
 0x64a   : > { %v5068_v32 = vstv %s8923_s1  ;;  %s6059_s1 = smul.u32 1536, %s6349_s25  ;;  %s9225_s25 = scalar_lea.sflag [#allocation5], %s309_s20 }
 0x64b   : > { %v5070_v22 = vmul.f32 %v5068_v32, %v8732_v8  ;;  %v5071_v44 = vmul.f32 %v5068_v32, %v8736_v60  ;;  %v5069_v48 = vmul.f32 %v5068_v32, %v8725_v10 }
 0x64c   : > { %5140 = vrot.lane.b32.xlu1 %v5135_v1, %s6286_s29  ;;  %v5489_v1 = vsel %vm426_vm5, %v5487_v54, %v5488_v41  ;;  %v4629_v54 = vadd.f32 %v4627_v4, %v4623_v49 }
 0x64d   : > { %5294 = vrot.lane.b32.xlu0 %v5290_v40, %s6286_s29  ;;  %v5189_v40 = vstv %s6022_s28  ;;  %v5078_v12 = vrot.slane %v5071_v44, 2  ;;  %s6017_s28 = sld [smem:[#allocation7 + $0x66]] }
 0x64e   : > { %v5190_v5 = vmul.f32 %v5189_v40, %v8725_v10 }
 0x650   : > { %5296 = vrot.lane.b32.xlu1 %v5291_v52, %s6286_s29  ;;  %v5191_v52 = vmul.f32 %v5189_v40, %v8732_v8 }
 0x651   : > { %5450 = vrot.lane.b32.xlu0 %v5446_v37, %s6286_s29  ;;  %v5501_v37 = vstv %s8893_s13  ;;  %s6018_s13 = sld [smem:[#allocation7 + $0x69]] }
 0x652   : > { %v5503_v45 = vmul.f32 %v5501_v37, %v8732_v8 }
 0x654   : > { %5452 = vrot.lane.b32.xlu1 %v5447_v19, %s6286_s29  ;;  %v5502_v19 = vmul.f32 %v5501_v37, %v8725_v10 }
 0x655   : > { %5159 = vrot.lane.b32.xlu0 %v5156_v61, %s6286_s29  ;;  %v4634_v61 = vmul.f32 %v4631_v2, %v8736_v60 }
 0x658   : > { %5161 = vrot.lane.b32.xlu1 %v5158_v18, %s6286_s29  ;;  %v4639_v18 = vrot.slane %v4633_v51, 1 }
 0x659   : > { %5315 = vrot.lane.b32.xlu0 %v5312_v50, %s6286_s29  ;;  %v4626_v50 = vmul.f32 %v4625_v33, %v8725_v10 }
 0x65a   : > { %v4640_v53 = vsel %vm408_vm4, %v4638_v62, %v4639_v18 }
 0x65b   : > { %v4628_v25 = vadd.f32 %v4626_v50, %v4622_v6 }
 0x65c   : > { %5317 = vrot.lane.b32.xlu1 %v5314_v46, %s6286_s29  ;;  %v4641_v46 = vrot.slane %v4634_v61, 1  ;;  %v5076_v61 = vrot.slane %v5070_v22, 2 }
 0x65d   : > { %5471 = vrot.lane.b32.xlu0 %v5468_v27, %s6286_s29  ;;  %v4649_v27 = vmul.f32 %v4648_v36, %v8725_v10 }
 0x65f   : > { %v4655_v41 = vrot.slane %v4649_v27, 2 }
 0x660   : > { %5473 = vrot.lane.b32.xlu1 %v5470_v57, %s6286_s29  ;;  %v5212_v57 = vsel %vm408_vm4, %v5210_v31, %v5211_v16 }
 0x661   : > { %5180 = vrot.lane.b32.xlu0 %v5177_v11, %s6286_s29  ;;  %v5214_v11 = vsel %vm408_vm4, %v5211_v16, %v5213_v34  ;;  %v5075_v16 = vrot.slane %v5069_v48, 2  ;;  %v5380_v34 = vstv %s8954_s4 }
 0x662   : > { %v5382_v14 = vmul.f32 %v5380_v34, %v8732_v8  ;;  %v5381_v6 = vmul.f32 %v5380_v34, %v8725_v10 }
 0x664   : > { %5182 = vrot.lane.b32.xlu1 %v5179_v26, %s6286_s29  ;;  %v4642_v26 = vsel %vm408_vm4, %v4639_v18, %v4641_v46  ;;  %v5077_v46 = vsel %vm426_vm5, %v5075_v16, %v5076_v61 }
 0x665   : > { %5336 = vrot.lane.b32.xlu0 %v5333_v58, %s6286_s29  ;;  %v4645_v58 = vadd.f32 %v4640_v53, %v4628_v25 }
 0x668   : > { %5338 = vrot.lane.b32.xlu1 %v5335_v39, %s6286_s29 }
 0x669   : > { %5492 = vrot.lane.b32.xlu0 %v5489_v1, %s6286_s29  ;;  %v4658_v1 = vrot.slane %v4651_v13, 2  ;;  %v5383_v13 = vmul.f32 %v5380_v34, %v8736_v60 }
 0x66b   : > { %v4659_v59 = vsel %vm426_vm5, %v4656_v24, %v4658_v1 }
 0x66c   : > { %5494 = vrot.lane.b32.xlu1 %v5491_v15, %s6286_s29  ;;  %s8910_s29 = sld [smem:[#allocation7 + $0x9e]]  ;;  %v5368_v15 = vsel %vm408_vm4, %v5366_v29, %v5367_v0 }
 0x66d   : > { %5194 = vrot.lane.b32.xlu0 %v5190_v5, %s9327_s0 }
 0x670   : > { %5196 = vrot.lane.b32.xlu1 %v5191_v52, %s9327_s0  ;;  %v4646_v52 = vadd.f32 %v4642_v26, %v4629_v54  ;;  %v5390_v26 = vrot.slane %v5383_v13, 2 }
 0x671   : > { %5350 = vrot.lane.b32.xlu0 %v5346_v43, %s9327_s0  ;;  %v5370_v43 = vsel %vm408_vm4, %v5367_v0, %v5369_v7  ;;  %v4787_v0 = vstv %s8966_s19 }
 0x672   : > { %v5515_v47 = vstv %s8910_s29  ;;  %v4663_v36 = vadd.f32 %v4659_v59, %v4646_v52  ;;  %v4789_v29 = vmul.f32 %v4787_v0, %v8732_v8  ;;  %v4790_v54 = vmul.f32 %v4787_v0, %v8736_v60  ;;  %s6036_s29 = sld [smem:[#allocation7 + $0x9f]] }
 0x673   : > { %v5517_v9 = vmul.f32 %v5515_v47, %v8732_v8  ;;  %v5518_v20 = vmul.f32 %v5515_v47, %v8736_v60  ;;  %v5516_v35 = vmul.f32 %v5515_v47, %v8725_v10 }
 0x674   : > { %5352 = vrot.lane.b32.xlu1 %v5347_v23, %s9327_s0  ;;  %v4657_v23 = vsel %vm426_vm5, %v4655_v41, %v4656_v24  ;;  %v5387_v41 = vrot.slane %v5381_v6, 2 }
 0x675   : > { %5506 = vrot.lane.b32.xlu0 %v5502_v19, %s9327_s0  ;;  %v5523_v5 = vrot.slane %v5517_v9, 1  ;;  %v5525_v37 = vrot.slane %v5518_v20, 1  ;;  %v5522_v2 = vrot.slane %v5516_v35, 1  ;;  %v5224_v19 = vstv %s8937_s3  ;;  %s5601_s3 = sshll.u32 %s9025_s30, 4  ;;  %s9217_s3 = int_to_ptr.vmem [resolvable:$true] %s5601_s3 }
 0x676   : > { %v4662_v51 = vadd.f32 %v4657_v23, %v4645_v58  ;;  %v5226_v63 = vmul.f32 %v5224_v19, %v8732_v8  ;;  %v5227_v56 = vmul.f32 %v5224_v19, %v8736_v60  ;;  %v5225_v18 = vmul.f32 %v5224_v19, %v8725_v10 }
 0x677   : > { %v5524_v3 = vsel %vm408_vm4, %v5522_v2, %v5523_v5  ;;  %v5536_v9 = vstv %s8968_s17  ;;  %v5388_v20 = vrot.slane %v5382_v14, 2  ;;  %v4795_v23 = vrot.slane %v4789_v29, 1  ;;  %s9215_s17 = scalar_lea.hbm %s9272_s6, %s6059_s1 }
 0x678   : > { %5508 = vrot.lane.b32.xlu1 %v5503_v45, %s9327_s0  ;;  %v4671_v55 = vpop.permute.xlu1 %4670  ;;  %v5526_v45 = vsel %vm408_vm4, %v5523_v5, %v5525_v37  ;;  %v5234_v31 = vrot.slane %v5227_v56, 2  ;;  %v5231_v4 = vrot.slane %v5225_v18, 2  ;;  %v5538_v24 = vmul.f32 %v5536_v9, %v8732_v8 }
 0x679   : > { %5061 = vrot.lane.b32.xlu0 %v5058_v21, %s9327_s0  ;;  %v4676_v42 = vadd.f32 %v4671_v55, %v4662_v51  ;;  %v5232_v21 = vrot.slane %v5226_v63, 2  ;;  %v5079_v55 = vsel %vm426_vm5, %v5076_v61, %v5078_v12  ;;  %v5539_v35 = vmul.f32 %v5536_v9, %v8736_v60 }
 0x67a   : > { %v5389_v52 = vsel %vm426_vm5, %v5387_v41, %v5388_v20  ;;  %v5391_v44 = vsel %vm426_vm5, %v5388_v20, %v5390_v26  ;;  %v4804_v19 = vstv %s8987_s18  ;;  %v4797_v51 = vrot.slane %v4790_v54, 1  ;;  %s6290_s18 = smov [#allocation12]  }
 0x67b   : > { %v4673_v28 = vpop.permute.xlu0 %4672  ;;  %v5235_v7 = vsel %vm426_vm5, %v5232_v21, %v5234_v31  ;;  %v5546_v2 = vrot.slane %v5539_v35, 2  ;;  %v4806_v59 = vmul.f32 %v4804_v19, %v8732_v8  ;;  %v4807_v61 = vmul.f32 %v4804_v19, %v8736_v60  ;;  %s6210_s5 = sshll.u32 %s6290_s18, 4  ;;  %s6211_s5 = int_to_ptr.vmem [resolvable:$false] %s6210_s5 }
 0x67c   : > { %5215 = vrot.lane.b32.xlu1 %v5212_v57, %s9327_s0  ;;  %v4677_v30 = vadd.f32 %v4673_v28, %v4663_v36  ;;  %v5233_v57 = vsel %vm426_vm5, %v5231_v4, %v5232_v21  ;;  %v4805_v18 = vmul.f32 %v4804_v19, %v8725_v10  ;;  %p6213_p2 = scmp.lt.s32.totalorder %s9217_s3, %s6211_s5 }
 0x67d   : > { %5217 = vrot.lane.b32.xlu0 %v5214_v11, %s9327_s0  ;;  %v4812_v21 = vrot.slane %v4806_v59, 2 }
 0x67e   : > { %v4692_v39 = vpop.permute.xlu1 %4691 }
 0x67f   : > { %v4694_v40 = vpop.permute.xlu0 %4693  ;;  %v4697_v17 = vadd.f32 %v4692_v39, %v4676_v42  ;;  %v5537_v39 = vmul.f32 %v5536_v9, %v8725_v10 }
 0x680   : > { %5371 = vrot.lane.b32.xlu1 %v5368_v15, %s9327_s0  ;;  %v4698_v27 = vadd.f32 %v4694_v40, %v4677_v30  ;;  %v4781_v40 = vstv %s8978_s15  ;;  %v4788_v15 = vmul.f32 %v4787_v0, %v8725_v10  ;;  %v4779_v30 = vld [vmem:[#allocation3 + $0x18] sm:$0xff]  ;;  %s6206_s15 = scalar_lea.vmem %s9217_s3, 1536 }
 0x681   : > { %5373 = vrot.lane.b32.xlu0 %v5370_v43, %s9327_s0  ;;  %v5544_v43 = vrot.slane %v5538_v24, 2  ;;  %v4782_v48 = vmul.f32 %v4781_v40, %v8725_v10  ;;  %v4937_v24 = vstv %s9023_s16  ;;  %p6207_p8 = scmp.ne.s32.totalorder %s9217_s3, %s6206_s15 }
 0x682   : > { %v4713_v38 = vpop.permute.xlu1 %4712  ;;  %v4794_v63 = vrot.slane %v4788_v15, 1  ;;  %v4938_v54 = vmul.f32 %v4937_v24, %v8725_v10 }
 0x683   : > { %v4715_v33 = vpop.permute.xlu0 %4714  ;;  %v4718_v47 = vadd.f32 %v4713_v38, %v4697_v17  ;;  %v5543_v38 = vrot.slane %v5537_v39, 2  ;;  %v5547_v42 = vsel %vm426_vm5, %v5544_v43, %v5546_v2  ;;  %p6208_p13 = pnand %p6207_p8, %p9334_p11 }
 0x684   : > { %5527 = vrot.lane.b32.xlu1 %v5524_v3, %s9327_s0  ;;  %v4719_v53 = vadd.f32 %v4715_v33, %v4698_v27  ;;  %v4783_v3 = vmul.f32 %v4781_v40, %v8732_v8  ;;  %v4796_v12 = vsel %vm408_vm4, %v4794_v63, %v4795_v23  ;;  %v4811_v27 = vrot.slane %v4805_v18, 2 }
 0x685   : > { %5529 = vrot.lane.b32.xlu0 %v5526_v45, %s9327_s0  ;;  %v5545_v36 = vsel %vm426_vm5, %v5543_v38, %v5544_v43  ;;  %v4778_v45 = vld [vmem:[#allocation3 + $0x10] sm:$0xff]  ;;  %v4935_v38 = vld [vmem:[#allocation3 + $0x28] sm:$0xff]  ;;  %p6209_p1 = pneg %p6208_p13 }
 0x686   : > { %v4727_v50 = vpop.permute.xlu1 %4726  ;;  %v4784_v16 = vadd.f32 %v4782_v48, %v4778_v45  ;;  %v4785_v34 = vadd.f32 %v4783_v3, %v4779_v30  ;;  %v4813_v13 = vsel %vm426_vm5, %v4811_v27, %v4812_v21 }
 0x687   : > { %v4729_v62 = vpop.permute.xlu0 %4728  ;;  %v4732_v25 = vadd.f32 %v4727_v50, %v4718_v47  ;;  %v4798_v50 = vsel %vm408_vm4, %v4795_v23, %v4797_v51  ;;  %v4934_v23 = vld [vmem:[#allocation3 + $0x20] sm:$0xff] }
 0x688   : > { %5080 = vrot.lane.b32.xlu1 %v5077_v46, %s9327_s0  ;;  %v4733_v49 = vadd.f32 %v4729_v62, %v4719_v53  ;;  %v4801_v62 = vadd.f32 %v4796_v12, %v4784_v16  ;;  %v4814_v46 = vrot.slane %v4807_v61, 2  ;;  %v4940_v51 = vadd.f32 %v4938_v54, %v4934_v23 }
 0x689   : > { %5082 = vrot.lane.b32.xlu0 %v5079_v55, %s9327_s0  ;;  %v4802_v55 = vadd.f32 %v4798_v50, %v4785_v34 }
 0x68a   : > { %v4748_v28 = vpop.permute.xlu1 %4747  ;;  %v4818_v6 = vadd.f32 %v4813_v13, %v4801_v62  ;;  %v4815_v53 = vsel %vm426_vm5, %v4812_v21, %v4814_v46 }
 0x68b   : > { %v4750_v11 = vpop.permute.xlu0 %4749  ;;  %v4753_v58 = vadd.f32 %v4748_v28, %v4732_v25  ;;  %v4819_v0 = vadd.f32 %v4815_v53, %v4802_v55 }
 0x68c   : > { %5236 = vrot.lane.b32.xlu1 %v5233_v57, %s9327_s0  ;;  %v4754_v32 = vadd.f32 %v4750_v11, %v4733_v49  ;;  %v4943_v57 = vstv %s6008_s9  ;;  %s6212_s9 = scalar_lea.vmem %s6211_s5, 3072 }
 0x68d   : > { %5238 = vrot.lane.b32.xlu0 %v5235_v7, %s9327_s0  ;;  %v4945_v9 = vmul.f32 %v4943_v57, %v8732_v8  ;;  %v4946_v11 = vmul.f32 %v4943_v57, %v8736_v60  ;;  %v4944_v49 = vmul.f32 %v4943_v57, %v8725_v10  ;;  %p6214_p3 = scmp.lt.s32.totalorder %s6212_s9, %s6206_s15 }
 0x68e   : > { %v4769_v1 = vpop.permute.xlu1 %4768 }
 0x68f   : > { %v4774_v5 = vadd.f32 %v4769_v1, %v4753_v58  ;;  %v4771_v22 = vpop.permute.xlu0 %4770  ;;  %v4951_v58 = vrot.slane %v4945_v9, 1  ;;  %v4950_v15 = vrot.slane %v4944_v49, 1  ;;  %p6215_p4 = por %p6214_p3, %p6213_p2 }
 0x690   : > { %v4775_v37 = vadd.f32 %v4771_v22, %v4754_v32  ;;  %5392 = vrot.lane.b32.xlu1 %v5389_v52, %s9327_s0  ;;  %v4953_v32 = vrot.slane %v4946_v11, 1  ;;  %v4939_v22 = vmul.f32 %v4937_v24, %v8732_v8 }
 0x691   : > { %4776 = vst.msk [vmem:[#allocation3] sm:$0xff] %vm324_vm1, %v4774_v5  ;;  %5394 = vrot.lane.b32.xlu0 %v5391_v44, %s9327_s0  ;;  %v4952_v2 = vsel %vm408_vm4, %v4950_v15, %v4951_v58  ;;  %p6216_p9 = pnand %p6215_p4, %p6209_p1 }
 0x692   : > { %4777 = vst.msk [vmem:[#allocation3 + $0x8] sm:$0xff] %vm324_vm1, %v4775_v37  ;;  %v4827_v33 = vpop.permute.xlu1 %4826  ;;  %v4954_v63 = vsel %vm408_vm4, %v4951_v58, %v4953_v32  ;;  %v4941_v61 = vadd.f32 %v4939_v22, %v4935_v38  ;;  %v4957_v45 = vadd.f32 %v4952_v2, %v4940_v51  ;;  %v5093_v2 = vstv %s9088_s26 }
 0x693   : > { %v4829_v56 = vpop.permute.xlu0 %4828  ;;  %v4832_v25 = vadd.f32 %v4827_v33, %v4818_v6  ;;  %v5116_v38 = vstv %s6018_s13 }
 0x694   : > { %5548 = vrot.lane.b32.xlu1 %v5545_v36, %s9327_s0  ;;  %v4833_v7 = vadd.f32 %v4829_v56, %v4819_v0  ;;  %v4958_v16 = vadd.f32 %v4954_v63, %v4941_v61 }
 0x695   : > { %5550 = vrot.lane.b32.xlu0 %v5547_v42, %s9327_s0  ;;  %s6009_s0 = sld [smem:[#allocation7 + $0x4e]] }
 0x696   : > { %v4848_v17 = vpop.permute.xlu1 %4847 }
 0x697   : > { %v4850_v31 = vpop.permute.xlu0 %4849  ;;  %v4853_v26 = vadd.f32 %v4848_v17, %v4832_v25 }
 0x698   : > { %v5558_v14 = vld [vmem:[#allocation3] sm:$0xff]  ;;  %v4854_v35 = vadd.f32 %v4850_v31, %v4833_v7 }
 0x699   : > { %5560 = vst.msk [vmem:[%s9025_s30] sm:$0xff] %vm324_vm1, %v5558_v14  ;;  %v5559_v4 = vld [vmem:[#allocation3 + $0x8] sm:$0xff] }
 0x69a   : > { %5561 = vst.msk [vmem:[%s9025_s30 + $0x8] sm:$0xff] %vm324_vm1, %v5559_v4  ;;  %v4869_v47 = vpop.permute.xlu1 %4868 }
 0x69b   : > { %v4871_v28 = vpop.permute.xlu0 %4870  ;;  %v4874_v41 = vadd.f32 %v4869_v47, %v4853_v26  ;;  %v4960_v39 = vstv %s6009_s0 }
 0x69c   : > { %v4875_v1 = vadd.f32 %v4871_v28, %v4854_v35  ;;  %v4962_v5 = vmul.f32 %v4960_v39, %v8732_v8  ;;  %v4963_v37 = vmul.f32 %v4960_v39, %v8736_v60  ;;  %v4961_v48 = vmul.f32 %v4960_v39, %v8725_v10 }
 0x69e   : > { %v4883_v20 = vpop.permute.xlu1 %4882  ;;  %v4968_v3 = vrot.slane %v4962_v5, 2  ;;  %v4970_v12 = vrot.slane %v4963_v37, 2  ;;  %v4967_v42 = vrot.slane %v4961_v48, 2 }
 0x69f   : > { %v4885_v29 = vpop.permute.xlu0 %4884  ;;  %v4888_v52 = vadd.f32 %v4883_v20, %v4874_v41 }
 0x6a0   : > { %v4889_v44 = vadd.f32 %v4885_v29, %v4875_v1  ;;  %v4969_v30 = vsel %vm426_vm5, %v4967_v42, %v4968_v3  ;;  %v4971_v34 = vsel %vm426_vm5, %v4968_v3, %v4970_v12  ;;  %v5090_v12 = vld [vmem:[#allocation3 + $0x30] sm:$0xff]  ;;  %v5119_v42 = vmul.f32 %v5116_v38, %v8736_v60 }
 0x6a1   : > { %v4974_v21 = vadd.f32 %v4969_v30, %v4957_v45  ;;  %v4975_v62 = vadd.f32 %v4971_v34, %v4958_v16 }
 0x6a2   : > { %v4904_v40 = vpop.permute.xlu1 %4903 }
 0x6a3   : > { %v4906_v43 = vpop.permute.xlu0 %4905  ;;  %v4909_v19 = vadd.f32 %v4904_v40, %v4888_v52 }
 0x6a4   : > { %v4910_v59 = vadd.f32 %v4906_v43, %v4889_v44  ;;  %v5099_v43 = vstv %s6017_s28 }
 0x6a5   : > { %v5101_v44 = vmul.f32 %v5099_v43, %v8732_v8  ;;  %v5100_v48 = vmul.f32 %v5099_v43, %v8725_v10  ;;  %v5102_v3 = vmul.f32 %v5099_v43, %v8736_v60 }
 0x6a6   : > { %v4925_v33 = vpop.permute.xlu1 %4924 }
 0x6a7   : > { %v4930_v56 = vadd.f32 %v4925_v33, %v4909_v19  ;;  %v4927_v36 = vpop.permute.xlu0 %4926  ;;  %v5107_v51 = vrot.slane %v5101_v44, 1  ;;  %v5118_v33 = vmul.f32 %v5116_v38, %v8732_v8  ;;  %v5106_v61 = vrot.slane %v5100_v48, 1 }
 0x6a8   : > { %v4931_v18 = vadd.f32 %v4927_v36, %v4910_v59  ;;  %v5094_v59 = vmul.f32 %v5093_v2, %v8725_v10  ;;  %v5255_v36 = vstv %s6026_s12  ;;  %v5109_v34 = vrot.slane %v5102_v3, 1 }
 0x6a9   : > { %4932 = vst.msk [vmem:[#allocation3 + $0x10] sm:$0xff] %vm324_vm1, %v4930_v56  ;;  %v5117_v56 = vmul.f32 %v5116_v38, %v8725_v10  ;;  %v5257_v16 = vmul.f32 %v5255_v36, %v8732_v8  ;;  %v5091_v38 = vld [vmem:[#allocation3 + $0x38] sm:$0xff] }
 0x6aa   : > { %4933 = vst.msk [vmem:[#allocation3 + $0x18] sm:$0xff] %vm324_vm1, %v4931_v18  ;;  %v4983_v50 = vpop.permute.xlu1 %4982  ;;  %v5108_v18 = vsel %vm408_vm4, %v5106_v61, %v5107_v51  ;;  %v5110_v43 = vsel %vm408_vm4, %v5107_v51, %v5109_v34 }
 0x6ab   : > { %v4985_v17 = vpop.permute.xlu0 %4984  ;;  %v4988_v46 = vadd.f32 %v4983_v50, %v4974_v21  ;;  %v5096_v50 = vadd.f32 %v5094_v59, %v5090_v12  ;;  %v5124_v21 = vrot.slane %v5118_v33, 2 }
 0x6ac   : > { %v4989_v31 = vadd.f32 %v4985_v17, %v4975_v62  ;;  %v5249_v17 = vstv %s9099_s14  ;;  %v5256_v62 = vmul.f32 %v5255_v36, %v8725_v10 }
 0x6ad   : > { %v5250_v44 = vmul.f32 %v5249_v17, %v8725_v10  ;;  %v5251_v12 = vmul.f32 %v5249_v17, %v8732_v8 }
 0x6ae   : > { %v5004_v14 = vpop.permute.xlu1 %5003 }
 0x6af   : > { %v5009_v27 = vadd.f32 %v5004_v14, %v4988_v46  ;;  %v5006_v55 = vpop.permute.xlu0 %5005  ;;  %v5272_v46 = vstv %s6027_s10  ;;  %v5405_v14 = vstv %s9103_s11 }
 0x6b0   : > { %v5562_v4 = vld [vmem:[#allocation3 + $0x10] sm:$0xff]  ;;  %v5010_v13 = vadd.f32 %v5006_v55, %v4989_v31  ;;  %v5258_v31 = vmul.f32 %v5255_v36, %v8736_v60  ;;  %v5123_v55 = vrot.slane %v5117_v56, 2  ;;  %v5274_v48 = vmul.f32 %v5272_v46, %v8732_v8 }
 0x6b1   : > { %6043 = vst.msk [vmem:[%s9025_s30 + $0x10] sm:$0xff] %vm324_vm1, %v5562_v4  ;;  %v5563_v47 = vld [vmem:[#allocation3 + $0x18] sm:$0xff]  ;;  %v5095_v4 = vmul.f32 %v5093_v2, %v8732_v8  ;;  %v5262_v2 = vrot.slane %v5256_v62, 1  ;;  %v5273_v36 = vmul.f32 %v5272_v46, %v8725_v10 }
 0x6b2   : > { %6044 = vst.msk [vmem:[%s9025_s30 + $0x18] sm:$0xff] %vm324_vm1, %v5563_v47  ;;  %v5025_v6 = vpop.permute.xlu1 %5024  ;;  %v5265_v59 = vrot.slane %v5258_v31, 1 }
 0x6b3   : > { %v5030_v53 = vadd.f32 %v5025_v6, %v5009_v27  ;;  %v5027_v28 = vpop.permute.xlu0 %5026  ;;  %v5113_v27 = vadd.f32 %v5108_v18, %v5096_v50  ;;  %v5126_v6 = vrot.slane %v5119_v42, 2  ;;  %v5097_v56 = vadd.f32 %v5095_v4, %v5091_v38  ;;  %v5246_v42 = vld [vmem:[#allocation3 + $0x40] sm:$0xff] }
 0x6b4   : > { %v5031_v57 = vadd.f32 %v5027_v28, %v5010_v13  ;;  %v5411_v13 = vstv %s6035_s2  ;;  %v5275_v50 = vmul.f32 %v5272_v46, %v8736_v60  ;;  %v5406_v4 = vmul.f32 %v5405_v14, %v8725_v10 }
 0x6b5   : > { %v5413_v28 = vmul.f32 %v5411_v13, %v8732_v8  ;;  %v5412_v33 = vmul.f32 %v5411_v13, %v8725_v10  ;;  %v5414_v3 = vmul.f32 %v5411_v13, %v8736_v60  ;;  %v5127_v51 = vsel %vm426_vm5, %v5124_v21, %v5126_v6  ;;  %v5247_v13 = vld [vmem:[#allocation3 + $0x48] sm:$0xff] }
 0x6b6   : > { %v5039_v0 = vpop.permute.xlu1 %5038  ;;  %v5114_v31 = vadd.f32 %v5110_v43, %v5097_v56  ;;  %v5407_v46 = vmul.f32 %v5405_v14, %v8732_v8  ;;  %v5402_v43 = vld [vmem:[#allocation3 + $0x50] sm:$0xff] }
 0x6b7   : > { %v9052_v9 = vadd.f32 %v5039_v0, %v5030_v53  ;;  %v5041_v25 = vpop.permute.xlu0 %5040  ;;  %v5263_v53 = vrot.slane %v5257_v16, 1  ;;  %v5419_v34 = vrot.slane %v5413_v28, 1 }
 0x6b8   : > { %v9054_v11 = vadd.f32 %v5041_v25, %v5031_v57  ;;  %v5428_v57 = vstv %s6036_s29  ;;  %v5125_v25 = vsel %vm426_vm5, %v5123_v55, %v5124_v21  ;;  %v5252_v55 = vadd.f32 %v5250_v44, %v5246_v42 }
 0x6b9   : > { %v5130_v61 = vadd.f32 %v5125_v25, %v5113_v27  ;;  %v5264_v16 = vsel %vm408_vm4, %v5262_v2, %v5263_v53  ;;  %v5280_v27 = vrot.slane %v5274_v48, 2  ;;  %v5266_v17 = vsel %vm408_vm4, %v5263_v53, %v5265_v59 }
 0x6ba   : > { %v9056_v7 = vpop.permute.xlu1 %5059  ;;  %v5418_v25 = vrot.slane %v5412_v33, 1  ;;  %v5430_v38 = vmul.f32 %v5428_v57, %v8732_v8  ;;  %v5421_v21 = vrot.slane %v5414_v3, 1  ;;  %v5269_v6 = vadd.f32 %v5264_v16, %v5252_v55  ;;  %v5403_v8 = vld [vmem:[#allocation3 + $0x58] sm:$0xff] }
 0x6bb   : > { %v9058_v20 = vpop.permute.xlu0 %5138  ;;  %v5253_v2 = vadd.f32 %v5251_v12, %v5247_v13  ;;  %v5429_v48 = vmul.f32 %v5428_v57, %v8725_v10  ;;  %v5431_v56 = vmul.f32 %v5428_v57, %v8736_v60  ;;  %v5131_v59 = vadd.f32 %v5127_v51, %v5114_v31 }
 0x6bc   : > { %v5420_v44 = vsel %vm408_vm4, %v5418_v25, %v5419_v34  ;;  %v5408_v42 = vadd.f32 %v5406_v4, %v5402_v43  ;;  %v5144_v3 = vadd.f32 %v9058_v20, %v5130_v61  ;;  %v5436_v12 = vrot.slane %v5430_v38, 2 }
 0x6bd   : > { %v5270_v33 = vadd.f32 %v5266_v17, %v5253_v2  ;;  %v5422_v14 = vsel %vm408_vm4, %v5419_v34, %v5421_v21  ;;  %v5409_v13 = vadd.f32 %v5407_v46, %v5403_v8  ;;  %v5435_v57 = vrot.slane %v5429_v48, 2 }
 0x6be   : > { %v9060_v24 = vpop.permute.xlu1 %5140  ;;  %v5425_v55 = vadd.f32 %v5420_v44, %v5408_v42  ;;  %v5438_v51 = vrot.slane %v5431_v56, 2  ;;  %v5065_v34 = vadd.f32 %v9056_v7, %v9052_v9 }
 0x6bf   : > { %v9062_v49 = vpop.permute.xlu0 %5294  ;;  %v5145_v16 = vadd.f32 %v9060_v24, %v5131_v59  ;;  %v5426_v61 = vadd.f32 %v5422_v14, %v5409_v13  ;;  %v5437_v17 = vsel %vm426_vm5, %v5435_v57, %v5436_v12 }
 0x6c2   : > { %v9064_v26 = vpop.permute.xlu1 %5296 }
 0x6c3   : > { %v9066_v29 = vpop.permute.xlu0 %5450 }
 0x6c6   : > { %v9068_v35 = vpop.permute.xlu1 %5452 }
 0x6c7   : > { %v9070_v58 = vpop.permute.xlu0 %5159 }
 0x6c8   : > { %v5165_v31 = vadd.f32 %v9070_v58, %v5144_v3 }
 0x6ca   : > { %v9072_v41 = vpop.permute.xlu1 %5161 }
 0x6cb   : > { %v9074_v54 = vpop.permute.xlu0 %5315 }
 0x6ce   : > { %v9076_v39 = vpop.permute.xlu1 %5317 }
 0x6cf   : > { %v9078_v32 = vpop.permute.xlu0 %5471 }
 0x6d2   : > { %v9080_v1 = vpop.permute.xlu1 %5473 }
 0x6d3   : > { %v9082_v40 = vpop.permute.xlu0 %5180 }
 0x6d4   : > { %v5186_v25 = vadd.f32 %v9082_v40, %v5165_v31 }
 0x6d6   : > { %v9084_v15 = vpop.permute.xlu1 %5182 }
 0x6d7   : > { %v9086_v5 = vpop.permute.xlu0 %5336 }
 0x6da   : > { %v9090_v22 = vpop.permute.xlu1 %5338 }
 0x6db   : > { %v9092_v52 = vpop.permute.xlu0 %5492 }
 0x6de   : > { %v9094_v37 = vpop.permute.xlu1 %5494 }
 0x6df   : > { %v9097_v23 = vpop.permute.xlu0 %5194 }
 0x6e0   : > { %v5200_v9 = vadd.f32 %v9097_v23, %v5186_v25 }
 0x6e2   : > { %v9105_v19 = vpop.permute.xlu1 %5196 }
 0x6e3   : > { %v9107_v63 = vpop.permute.xlu0 %5350 }
 0x6e6   : > { %v9113_v45 = vpop.permute.xlu1 %5352 }
 0x6e7   : > { %v9118_v30 = vpop.permute.xlu0 %5506 }
 0x6e8   : > { %9330 = vst [vmem:[#allocation18_spill] sm:$0xff] %v9118_v30  ;;  %v5282_v30 = vrot.slane %v5275_v50, 2 }
 0x6ea   : > { %v9125_v47 = vpop.permute.xlu1 %5508  ;;  %v5283_v60 = vsel %vm426_vm5, %v5280_v27, %v5282_v30 }
 0x6eb   : > { %9331 = vst [vmem:[#allocation19_spill] sm:$0xff] %v9125_v47  ;;  %v9128_v0 = vpop.permute.xlu0 %5061  ;;  %v5279_v47 = vrot.slane %v5273_v36, 2  ;;  %v5287_v20 = vadd.f32 %v5283_v60, %v5270_v33 }
 0x6ec   : > { %v5066_v58 = vadd.f32 %v9128_v0, %v9054_v11 }
 0x6ed   : > { %v5281_v36 = vsel %vm426_vm5, %v5279_v47, %v5280_v27  ;;  %v5166_v47 = vadd.f32 %v9072_v41, %v5145_v16  ;;  %v5301_v30 = vadd.f32 %v9064_v26, %v5287_v20  ;;  %v5442_v27 = vadd.f32 %v5437_v17, %v5425_v55 }
 0x6ee   : > { %v9138_v18 = vpop.permute.xlu1 %5215  ;;  %v5286_v50 = vadd.f32 %v5281_v36, %v5269_v6  ;;  %v5439_v41 = vsel %vm426_vm5, %v5436_v12, %v5438_v51 }
 0x6ef   : > { %v9143_v62 = vpop.permute.xlu0 %5217  ;;  %v5187_v38 = vadd.f32 %v9084_v15, %v5166_v47  ;;  %v5443_v2 = vadd.f32 %v5439_v41, %v5426_v61  ;;  %v5322_v40 = vadd.f32 %v9076_v39, %v5301_v30  ;;  %v5456_v15 = vadd.f32 %v9066_v29, %v5442_v27  ;;  %v9332_v59 = vld [vmem:[#allocation18_spill] sm:$0xff] }
 0x6f0   : > { %v5300_v24 = vadd.f32 %v9062_v49, %v5286_v50  ;;  %v5221_v11 = vadd.f32 %v9138_v18, %v5200_v9 }
 0x6f1   : > { %v5201_v26 = vadd.f32 %v9105_v19, %v5187_v38  ;;  %v5343_v23 = vadd.f32 %v9090_v22, %v5322_v40  ;;  %v5477_v19 = vadd.f32 %v9078_v32, %v5456_v15 }
 0x6f2   : > { %v9149_v28 = vpop.permute.xlu1 %5371  ;;  %v5321_v6 = vadd.f32 %v9074_v54, %v5300_v24  ;;  %v5457_v54 = vadd.f32 %v9068_v35, %v5443_v2 }
 0x6f3   : > { %v5374_v53 = vpop.permute.xlu0 %5373  ;;  %v5222_v0 = vadd.f32 %v9143_v62, %v5201_v26  ;;  %v5357_v18 = vadd.f32 %v9113_v45, %v5343_v23  ;;  %v5498_v35 = vadd.f32 %v9092_v52, %v5477_v19  ;;  %v9333_v45 = vld [vmem:[#allocation19_spill] sm:$0xff] }
 0x6f4   : > { %v5342_v43 = vadd.f32 %v9086_v5, %v5321_v6  ;;  %v5478_v5 = vadd.f32 %v9080_v1, %v5457_v54 }
 0x6f5   : > { %v5378_v32 = vadd.f32 %v5374_v53, %v5357_v18  ;;  %v5512_v33 = vadd.f32 %v9332_v59, %v5498_v35 }
 0x6f6   : > { %v5528_v10 = vpop.permute.xlu1 %5527  ;;  %v5356_v44 = vadd.f32 %v9107_v63, %v5342_v43  ;;  %v5499_v62 = vadd.f32 %v9094_v37, %v5478_v5 }
 0x6f7   : > { %v5530_v4 = vpop.permute.xlu0 %5529 }
 0x6f8   : > { %v5377_v22 = vadd.f32 %v9149_v28, %v5356_v44  ;;  %v5513_v3 = vadd.f32 %v9333_v45, %v5499_v62  ;;  %v5533_v28 = vadd.f32 %v5528_v10, %v5512_v33 }
 0x6fa   : > { %v5081_v21 = vpop.permute.xlu1 %5080  ;;  %v5534_v37 = vadd.f32 %v5530_v4, %v5513_v3 }
 0x6fb   : > { %v5086_v7 = vadd.f32 %v5081_v21, %v5065_v34  ;;  %v5083_v49 = vpop.permute.xlu0 %5082 }
 0x6fc   : > { %v5087_v46 = vadd.f32 %v5083_v49, %v5066_v58 }
 0x6fd   : > { %5088 = vst.msk [vmem:[#allocation3 + $0x20] sm:$0xff] %vm324_vm1, %v5086_v7 }
 0x6fe   : > { %5089 = vst.msk [vmem:[#allocation3 + $0x28] sm:$0xff] %vm324_vm1, %v5087_v46  ;;  %v5237_v39 = vpop.permute.xlu1 %5236 }
 0x6ff   : > { %v5242_v29 = vadd.f32 %v5237_v39, %v5221_v11  ;;  %v5239_v48 = vpop.permute.xlu0 %5238 }
 0x700   : > { %v5243_v56 = vadd.f32 %v5239_v48, %v5222_v0 }
 0x701   : > { %5244 = vst.msk [vmem:[#allocation3 + $0x30] sm:$0xff] %vm324_vm1, %v5242_v29 }
 0x702   : > { %5245 = vst.msk [vmem:[#allocation3 + $0x38] sm:$0xff] %vm324_vm1, %v5243_v56  ;;  %v5393_v63 = vpop.permute.xlu1 %5392 }
 0x703   : > { %v5398_v1 = vadd.f32 %v5393_v63, %v5377_v22  ;;  %v5395_v42 = vpop.permute.xlu0 %5394 }
 0x704   : > { %v5567_v36 = vld [vmem:[#allocation3 + $0x20] sm:$0xff]  ;;  %v5399_v52 = vadd.f32 %v5395_v42, %v5378_v32 }
 0x705   : > { %6045 = vst.msk [vmem:[%s9025_s30 + $0x20] sm:$0xff] %vm324_vm1, %v5567_v36  ;;  %v5568_v12 = vld [vmem:[#allocation3 + $0x28] sm:$0xff]  ;;  %5400 = vst.msk [vmem:[#allocation3 + $0x40] sm:$0xff] %vm324_vm1, %v5398_v1 }
 0x706   : > { %6046 = vst.msk [vmem:[%s9025_s30 + $0x28] sm:$0xff] %vm324_vm1, %v5568_v12  ;;  %5401 = vst.msk [vmem:[#allocation3 + $0x48] sm:$0xff] %vm324_vm1, %v5399_v52  ;;  %v5549_v53 = vpop.permute.xlu1 %5548 }
 0x707   : > { %v5554_v8 = vadd.f32 %v5549_v53, %v5533_v28  ;;  %v5551_v14 = vpop.permute.xlu0 %5550 }
 0x708   : > { %v5572_v16 = vld [vmem:[#allocation3 + $0x30] sm:$0xff]  ;;  %v5555_v50 = vadd.f32 %v5551_v14, %v5534_v37 }
 0x709   : > { %6047 = vst.msk [vmem:[%s9025_s30 + $0x30] sm:$0xff] %vm324_vm1, %v5572_v16  ;;  %v5573_v55 = vld [vmem:[#allocation3 + $0x38] sm:$0xff]  ;;  %5556 = vst.msk [vmem:[#allocation3 + $0x50] sm:$0xff] %vm324_vm1, %v5554_v8 }
 0x70a   : > { %6048 = vst.msk [vmem:[%s9025_s30 + $0x38] sm:$0xff] %vm324_vm1, %v5573_v55  ;;  %5557 = vst.msk [vmem:[#allocation3 + $0x58] sm:$0xff] %vm324_vm1, %v5555_v50 }
 0x70c   : > { %v5577_v13 = vld [vmem:[#allocation3 + $0x40] sm:$0xff] }
 0x70d   : > { %6049 = vst.msk [vmem:[%s9025_s30 + $0x40] sm:$0xff] %vm324_vm1, %v5577_v13  ;;  %v5578_v10 = vld [vmem:[#allocation3 + $0x48] sm:$0xff] }
 0x70e   : > { %6050 = vst.msk [vmem:[%s9025_s30 + $0x48] sm:$0xff] %vm324_vm1, %v5578_v10 }
 0x710   : > { %v5582_v60 = vld [vmem:[#allocation3 + $0x50] sm:$0xff] }
 0x711   : > { %6051 = vst.msk [vmem:[%s9025_s30 + $0x50] sm:$0xff] %vm324_vm1, %v5582_v60  ;;  %v5583_v57 = vld [vmem:[#allocation3 + $0x58] sm:$0xff] }
 0x712   : > { %6052 = vst.msk [vmem:[%s9025_s30 + $0x58] sm:$0xff] %vm324_vm1, %v5583_v57 }
 0x713   : > { %6219 = shalt.err (!%p6216_p9)
}
 0x714   : > { %s6220_s20 = scalar_lea.hbm %s9215_s17, 1536  ;;  %s6224_s0 = scalar_lea.hbm %s9272_s6, 3072 }
 0x715   : > { %p6221_p7 = scmp.ne.s32.totalorder %s9215_s17, %s6220_s20  ;;  %p6225_p6 = scmp.lt.u32.totalorder %s9215_s17, %s9272_s6 }
 0x716   : > { %p6226_p12 = scmp.lt.u32.totalorder %s6224_s0, %s6220_s20  ;;  %p6228_p8 = scmp.lt.u32.totalorder %s6220_s20, %s9215_s17 }
 0x717   : > { %p6222_p0 = pnand %p6221_p7, %p9334_p11 }
 0x718   : > { %p6227_p10 = por %p6226_p12, %p6225_p6 }
 0x719   : > { %p6223_p5 = pneg %p6222_p0 }
 0x71a   : > { %p6229_p13 = por %p6228_p8, %p6227_p10 }
 0x71c   : > { %p6230_p1 = pnand %p6229_p13, %p6223_p5 }
 0x71e   : > { %6233 = shalt.err (!%p6230_p1)
}
 0x71f   : > { %s6291_s13 = smov 128   ;;  %s6292_s12 = smov 8  }
 0x720   : > { %6076 = dma.vmem_to_hbm [thread:$0]  (%p9334_p11), %s9217_s3, 1536, %s9215_s17, %s9225_s25, %s6291_s13, %s6291_s13, %s6292_s12  }
 0x721 PF: > { %p6103_p2 = scmp.ge.s32.totalorder %s6280_s24, 2  ;;  %s5616_s14 = sand.u32 1, %s6268_s21  }
 0x722   : > { %p9335_p3 = scmp.ne.s32.totalorder %s9299_s8, 0  ;;  %s5617_s10 = scalar_lea.sflag [#allocation5], %s5616_s14 }
 0x724   : > { %p6092_p4 = pnand %p6103_p2, %p9335_p3 }
 0x726   : > { %6263 = dma.done.wait (!%p6092_p4), %s5617_s10, 1536  }
 0x727   : > { %6265 = vsyncadd (!%p6092_p4), %s5617_s10, 4294965760  ;;  %s9336_s11 = sld [smem:[#allocation17_spill]]  ;;  %p19_p9 = scmp.ge.s32.totalorder %s6353_s27, 4  }
 0x728   : > { %s9337_s21 = smov %s6272_s22  ;;  %s9338_s22 = smov %s6276_s23 }
 0x729   : > { %s9340_s24 = smov %s6353_s27  ;;  %21 = sbr.rel (!%p19_p9) target bundleno = 13 (0xd), region = 116 }
 0x72d   : > { %s9339_s23 = smov %s9336_s11 }
 0x730   :  { %5622 = vsyncpa [#allocation5], 1 }
 0x731   :  { %5624 = vsyncpa [#allocation5 + $0x1], 1 }
 0x732   :  { %5625 = vsyncpa [#allocation6], 1 }
 0x733   :  { %5627 = vsyncpa [#allocation6 + $0x1], 1 }
 0x734   :  { %5628 = vsyncpa [#allocation8], 1 }
 0x735   :  { %5629 = vsyncpa [#allocation11], 1 }

</bundles_post_ra>
